<compile_context>
chip_gen: v5e
topology: v5e:2x2
jax: 0.10.0
libtpu: 0.0.40
codegen_flags: <defaults>
</compile_context>

<pallas_src>
import jax
import jax.numpy as jnp
from jax.experimental import pallas as pl
from jax.experimental.pallas import tpu as pltpu


def _tnet_kernel(pos_ref,
                 w1_ref, b1_ref, w2_ref, b2_ref, w3_ref, b3_ref,
                 w4_ref, b4_ref, w5_ref, b5_ref, w6_ref, b6_ref,
                 out_ref, gmax_ref):
    k = pl.program_id(1)                      # point-tile index (reduction axis)
    tb, tn, _ = pos_ref.shape
    rows = tb * tn

    # ---- shared per-point MLP over all TB*TN point rows of this step ----
    x = pos_ref[...].reshape(rows, 3)         # (rows, 3) f32

    # Layer 1 (3 -> 64): K=3 is a terrible MXU shape -> 3 broadcast FMAs (VPU).
    w1 = w1_ref[...]                          # (3, 64) f32
    h = (x[:, 0:1] * w1[0:1, :]
         + x[:, 1:2] * w1[1:2, :]
         + x[:, 2:3] * w1[2:3, :]
         + b1_ref[...])
    h = jnp.maximum(h, 0.0)                   # (rows, 64) f32

    # Layer 2 (64 -> 128): bf16 operands, f32 accumulation on the MXU.
    h = jnp.dot(h.astype(jnp.bfloat16), w2_ref[...],
                preferred_element_type=jnp.float32) + b2_ref[...]
    h = jnp.maximum(h, 0.0)                   # (rows, 128) f32

    # Layer 3 (128 -> 1024): bias + ReLU deferred past the max-pool.
    h = jnp.dot(h.astype(jnp.bfloat16), w3_ref[...],
                preferred_element_type=jnp.float32)        # (rows, 1024) raw

    # ---- running per-cloud max over this tile of points ----
    tile_max = jnp.max(h.reshape(tb, tn, h.shape[-1]), axis=1)   # (tb, 1024)

    @pl.when(k == 0)
    def _():
        gmax_ref[...] = jnp.full_like(gmax_ref, -jnp.inf)

    gmax_ref[...] = jnp.maximum(gmax_ref[...], tile_max)

    # ---- FC head, only after the last point tile ----
    @pl.when(k == pl.num_programs(1) - 1)
    def _():
        # Deferred layer-3 epilogue (exact: constant shift + monotone ReLU).
        g = jnp.maximum(gmax_ref[...] + b3_ref[...], 0.0)         # (tb, 1024)
        f = jnp.dot(g.astype(jnp.bfloat16), w4_ref[...],
                    preferred_element_type=jnp.float32) + b4_ref[...]
        f = jnp.maximum(f, 0.0)                                   # (tb, 512)
        f = jnp.dot(f.astype(jnp.bfloat16), w5_ref[...],
                    preferred_element_type=jnp.float32) + b5_ref[...]
        f = jnp.maximum(f, 0.0)                                   # (tb, 256)
        # b6 already carries the flattened 3x3 identity (folded on the host).
        out_ref[...] = (jnp.dot(f.astype(jnp.bfloat16), w6_ref[...],
                                preferred_element_type=jnp.float32)
                        + b6_ref[...])                            # (tb, 9)


def _legal_tiles(dim):
    """Block sizes legal for an f32 second-minor dim: divisors of `dim` that
    are multiples of 8, plus the full dim itself."""
    tiles = {dim}
    for d in range(8, dim + 1, 8):
        if dim % d == 0:
            tiles.add(d)
    return sorted(tiles)


def _pick_tiles(B, N, max_rows):
    """Pick (tb, tn): rows = tb*tn <= max_rows when possible, favouring large
    tiles (amortize ~0.35us per-step pipeline overhead) and >= 2 batch tiles
    (so the 'parallel' batch axis can shard across v7x's two TensorCores)."""
    best_key, best = None, None
    for tb in _legal_tiles(B):
        for tn in _legal_tiles(N):
            rows = tb * tn
            fits = rows <= max_rows
            multi = (B // tb) >= 2
            # Megacore ~doubles throughput, so weight multi-batch-tile configs
            # as if they had 2x the rows; if nothing fits, minimize rows.
            eff = rows * (2 if multi else 1)
            key = (fits, eff if fits else -rows, multi, tn)
            if best_key is None or key > best_key:
                best_key, best = key, (tb, tn)
    return best


def tnet2_forward(pos, params, *, tb=None, tn=None, max_rows=2048):
    """pos: (B, N, 3) float32 -> (B, 3, 3) float32."""
    B, N, C = pos.shape
    assert C == 3
    (w1, b1, w2, b2, w3, b3, w4, b4, w5, b5, w6, b6) = params

    # Host-side prep: fold the T-Net identity into the last bias, and pre-cast
    # the MXU weight operands to bf16 (f32 accumulation happens in-kernel).
    b6 = b6 + jnp.eye(3, dtype=b6.dtype).reshape(1, 9)
    bf = jnp.bfloat16
    params = (w1, b1,
              w2.astype(bf), b2,
              w3.astype(bf), b3,
              w4.astype(bf), b4,
              w5.astype(bf), b5,
              w6.astype(bf), b6)

    auto_tb, auto_tn = _pick_tiles(B, N, max_rows)
    tb = auto_tb if tb is None else tb
    tn = auto_tn if tn is None else tn
    assert B % tb == 0 and N % tn == 0
    assert tb % 8 == 0 or tb == B, "tb must be a multiple of 8 or the full B"
    assert tn % 8 == 0 or tn == N, "tn must be a multiple of 8 or the full N"

    hidden = w3.shape[1]                      # 1024
    out_dim = w6.shape[1]                     # 9

    def run(single_buffer_params):
        def param_spec(arr):
            # Constant block index across the whole grid -> DMA'd once, stays
            # resident in VMEM; single-buffer to free ~1.7 MiB of headroom.
            nd = arr.ndim
            kwargs = {}
            if single_buffer_params:
                kwargs["pipeline_mode"] = pl.Buffered(1)
            return pl.BlockSpec(arr.shape, lambda b, k, _nd=nd: (0,) * _nd,
                                **kwargs)

        grid_spec = pltpu.PrefetchScalarGridSpec(
            num_scalar_prefetch=0,
            grid=(B // tb, N // tn),          # (batch tiles, point tiles)
            in_specs=[pl.BlockSpec((tb, tn, 3), lambda b, k: (b, k, 0))]
            + [param_spec(p) for p in params],
            out_specs=pl.BlockSpec((tb, out_dim), lambda b, k: (b, 0)),
            scratch_shapes=[pltpu.VMEM((tb, hidden), jnp.float32)],
        )
        return pl.pallas_call(
            _tnet_kernel,
            out_shape=jax.ShapeDtypeStruct((B, out_dim), jnp.float32),
            grid_spec=grid_spec,
            compiler_params=pltpu.CompilerParams(
                dimension_semantics=("parallel", "arbitrary"),
                vmem_limit_bytes=48 * 1024 * 1024,
            ),
        )(pos, *params)

    try:
        out9 = run(single_buffer_params=True)
    except Exception:
        # Fallback for jax versions without BlockSpec pipeline_mode support:
        # default double-buffered weights cost ~1.7 MiB extra VMEM, harmless.
        out9 = run(single_buffer_params=False)

    # Lane-dense (B, 9) store in the kernel; the (3, 3) reshape is free in XLA.
    return out9.reshape(B, 3, 3)


def make_params(key):
    """Deterministic synthetic parameters (shapes from the standard T-Net)."""
    dims = [(3, 64), (64, 128), (128, 1024), (1024, 512), (512, 256), (256, 9)]
    params = []
    for cin, cout in dims:
        key, kw = jax.random.split(key)
        scale = 1.0 / jnp.sqrt(jnp.float32(cin))
        w = jax.random.normal(kw, (cin, cout), dtype=jnp.float32) * scale
        b = jnp.zeros((1, cout), dtype=jnp.float32)
        params += [w, b]
    return tuple(params)


def tnet2_reference(pos, params):
    """Plain-JAX f32 reference for a sanity check."""
    (w1, b1, w2, b2, w3, b3, w4, b4, w5, b5, w6, b6) = params
    h = jax.nn.relu(pos @ w1 + b1)
    h = jax.nn.relu(h @ w2 + b2)
    h = jax.nn.relu(h @ w3 + b3)
    g = jnp.max(h, axis=1)                    # (B, 1024)
    f = jax.nn.relu(g @ w4 + b4[0])
    f = jax.nn.relu(f @ w5 + b5[0])
    o = f @ w6 + b6[0] + jnp.eye(3).reshape(9)
    return o.reshape(-1, 3, 3)


if __name__ == "__main__":
    key = jax.random.PRNGKey(0)
    key, kpos = jax.random.split(key)

    B, N = 2, 64                              # small shapes: 2 clouds x 64 pts
    pos = jax.random.normal(kpos, (B, N, 3), dtype=jnp.float32)
    params = make_params(key)

    ref = tnet2_reference(pos, params)

    # Default tiling.
    out = jax.block_until_ready(tnet2_forward(pos, params))
    assert out.shape == (B, 3, 3)
    # bf16 MXU operands (f32 accumulation) -> loosened tolerance vs f32 ref.
    assert jnp.allclose(out, ref, atol=5e-2, rtol=5e-2)

    # Force several point tiles to exercise the running-max accumulator path.
    out2 = jax.block_until_ready(tnet2_forward(pos, params, tb=2, tn=16))
    assert jnp.allclose(out2, ref, atol=5e-2, rtol=5e-2)

    # Several batch tiles (exercises the aligned/megacore-aware tile picker).
    key, kpos2 = jax.random.split(key)
    B2, N2 = 16, 64
    pos2 = jax.random.normal(kpos2, (B2, N2, 3), dtype=jnp.float32)
    ref2 = tnet2_reference(pos2, params)
    out3 = jax.block_until_ready(tnet2_forward(pos2, params))
    assert out3.shape == (B2, 3, 3)
    assert jnp.allclose(out3, ref2, atol=5e-2, rtol=5e-2)

    print("KERNEL_OK")
</pallas_src>

<mosaic_0001>
module attributes {stable_mosaic.version = 11 : i64} {
  func.func @_tnet_kernel(%arg0: i32, %arg1: i32, %arg2: memref<2x64x3xf32, #tpu.memory_space<vmem>>, %arg3: memref<3x64xf32, #tpu.memory_space<vmem>>, %arg4: memref<1x64xf32, #tpu.memory_space<vmem>>, %arg5: memref<64x128xbf16, #tpu.memory_space<vmem>>, %arg6: memref<1x128xf32, #tpu.memory_space<vmem>>, %arg7: memref<128x1024xbf16, #tpu.memory_space<vmem>>, %arg8: memref<1x1024xf32, #tpu.memory_space<vmem>>, %arg9: memref<1024x512xbf16, #tpu.memory_space<vmem>>, %arg10: memref<1x512xf32, #tpu.memory_space<vmem>>, %arg11: memref<512x256xbf16, #tpu.memory_space<vmem>>, %arg12: memref<1x256xf32, #tpu.memory_space<vmem>>, %arg13: memref<256x9xbf16, #tpu.memory_space<vmem>>, %arg14: memref<1x9xf32, #tpu.memory_space<vmem>>, %arg15: memref<2x9xf32, #tpu.memory_space<vmem>>, %arg16: memref<2x1024xf32, #tpu.memory_space<vmem>>) attributes {dimension_semantics = [#tpu.dimension_semantics<parallel>, #tpu.dimension_semantics<arbitrary>], iteration_bounds = array<i64: 1, 1>, scalar_prefetch = 0 : i64, scratch_operands = 1 : i64, tpu.core_type = #tpu.core_type<tc>, window_params = [{transform_indices = @transform_0, window_bounds = array<i64: 2, 64, 3>}, {pipeline_mode = #tpu.pipeline_mode<synchronous>, transform_indices = @transform_1, window_bounds = array<i64: 3, 64>}, {pipeline_mode = #tpu.pipeline_mode<synchronous>, transform_indices = @transform_2, window_bounds = array<i64: 1, 64>}, {pipeline_mode = #tpu.pipeline_mode<synchronous>, transform_indices = @transform_3, window_bounds = array<i64: 64, 128>}, {pipeline_mode = #tpu.pipeline_mode<synchronous>, transform_indices = @transform_4, window_bounds = array<i64: 1, 128>}, {pipeline_mode = #tpu.pipeline_mode<synchronous>, transform_indices = @transform_5, window_bounds = array<i64: 128, 1024>}, {pipeline_mode = #tpu.pipeline_mode<synchronous>, transform_indices = @transform_6, window_bounds = array<i64: 1, 1024>}, {pipeline_mode = #tpu.pipeline_mode<synchronous>, transform_indices = @transform_7, window_bounds = array<i64: 1024, 512>}, {pipeline_mode = #tpu.pipeline_mode<synchronous>, transform_indices = @transform_8, window_bounds = array<i64: 1, 512>}, {pipeline_mode = #tpu.pipeline_mode<synchronous>, transform_indices = @transform_9, window_bounds = array<i64: 512, 256>}, {pipeline_mode = #tpu.pipeline_mode<synchronous>, transform_indices = @transform_10, window_bounds = array<i64: 1, 256>}, {pipeline_mode = #tpu.pipeline_mode<synchronous>, transform_indices = @transform_11, window_bounds = array<i64: 256, 9>}, {pipeline_mode = #tpu.pipeline_mode<synchronous>, transform_indices = @transform_12, window_bounds = array<i64: 1, 9>}, {transform_indices = @transform_13, window_bounds = array<i64: 2, 9>}]} {
    %c0 = arith.constant 0 : index
    %c0_0 = arith.constant 0 : index
    %c0_1 = arith.constant 0 : index
    %0 = vector.load %arg2[%c0, %c0_0, %c0_1] : memref<2x64x3xf32, #tpu.memory_space<vmem>>, vector<2x64x3xf32>
    %1 = vector.shape_cast %0 : vector<2x64x3xf32> to vector<128x3xf32>
    %c0_2 = arith.constant 0 : index
    %c0_3 = arith.constant 0 : index
    %2 = vector.load %arg3[%c0_2, %c0_3] : memref<3x64xf32, #tpu.memory_space<vmem>>, vector<3x64xf32>
    %3 = vector.extract_strided_slice %1 {offsets = [0, 0], sizes = [128, 1], strides = [1, 1]} : vector<128x3xf32> to vector<128x1xf32>
    %4 = vector.extract_strided_slice %2 {offsets = [0, 0], sizes = [1, 64], strides = [1, 1]} : vector<3x64xf32> to vector<1x64xf32>
    %5 = vector.broadcast %3 : vector<128x1xf32> to vector<128x64xf32>
    %6 = vector.broadcast %4 : vector<1x64xf32> to vector<128x64xf32>
    %7 = arith.mulf %5, %6 : vector<128x64xf32>
    %8 = vector.extract_strided_slice %1 {offsets = [0, 1], sizes = [128, 1], strides = [1, 1]} : vector<128x3xf32> to vector<128x1xf32>
    %9 = vector.extract_strided_slice %2 {offsets = [1, 0], sizes = [1, 64], strides = [1, 1]} : vector<3x64xf32> to vector<1x64xf32>
    %10 = vector.broadcast %8 : vector<128x1xf32> to vector<128x64xf32>
    %11 = vector.broadcast %9 : vector<1x64xf32> to vector<128x64xf32>
    %12 = arith.mulf %10, %11 : vector<128x64xf32>
    %13 = arith.addf %7, %12 : vector<128x64xf32>
    %14 = vector.extract_strided_slice %1 {offsets = [0, 2], sizes = [128, 1], strides = [1, 1]} : vector<128x3xf32> to vector<128x1xf32>
    %15 = vector.extract_strided_slice %2 {offsets = [2, 0], sizes = [1, 64], strides = [1, 1]} : vector<3x64xf32> to vector<1x64xf32>
    %16 = vector.broadcast %14 : vector<128x1xf32> to vector<128x64xf32>
    %17 = vector.broadcast %15 : vector<1x64xf32> to vector<128x64xf32>
    %18 = arith.mulf %16, %17 : vector<128x64xf32>
    %19 = arith.addf %13, %18 : vector<128x64xf32>
    %c0_4 = arith.constant 0 : index
    %c0_5 = arith.constant 0 : index
    %20 = vector.load %arg4[%c0_4, %c0_5] : memref<1x64xf32, #tpu.memory_space<vmem>>, vector<1x64xf32>
    %21 = vector.broadcast %20 : vector<1x64xf32> to vector<128x64xf32>
    %22 = arith.addf %19, %21 : vector<128x64xf32>
    %cst = arith.constant 0.000000e+00 : f32
    %23 = vector.broadcast %cst : f32 to vector<128x64xf32>
    %24 = arith.maximumf %22, %23 : vector<128x64xf32>
    %25 = arith.truncf %24 : vector<128x64xf32> to vector<128x64xbf16>
    %c0_6 = arith.constant 0 : index
    %c0_7 = arith.constant 0 : index
    %26 = vector.load %arg5[%c0_6, %c0_7] : memref<64x128xbf16, #tpu.memory_space<vmem>>, vector<64x128xbf16>
    %cst_8 = arith.constant dense<0.000000e+00> : vector<128x128xf32>
    %27 = tpu.matmul %25, %26, %cst_8 {dimension_numbers = #tpu.dot_dimension_numbers<[1], [0], [0], [1], [0, 0, 1, 1], [], []>} : vector<128x64xbf16>, vector<64x128xbf16>, vector<128x128xf32> -> vector<128x128xf32>
    %c0_9 = arith.constant 0 : index
    %c0_10 = arith.constant 0 : index
    %28 = vector.load %arg6[%c0_9, %c0_10] : memref<1x128xf32, #tpu.memory_space<vmem>>, vector<1x128xf32>
    %29 = vector.broadcast %28 : vector<1x128xf32> to vector<128x128xf32>
    %30 = arith.addf %27, %29 : vector<128x128xf32>
    %cst_11 = arith.constant 0.000000e+00 : f32
    %31 = vector.broadcast %cst_11 : f32 to vector<128x128xf32>
    %32 = arith.maximumf %30, %31 : vector<128x128xf32>
    %33 = arith.truncf %32 : vector<128x128xf32> to vector<128x128xbf16>
    %c0_12 = arith.constant 0 : index
    %c0_13 = arith.constant 0 : index
    %34 = vector.load %arg7[%c0_12, %c0_13] : memref<128x1024xbf16, #tpu.memory_space<vmem>>, vector<128x1024xbf16>
    %cst_14 = arith.constant dense<0.000000e+00> : vector<128x1024xf32>
    %35 = tpu.matmul %33, %34, %cst_14 {dimension_numbers = #tpu.dot_dimension_numbers<[1], [0], [0], [1], [0, 0, 1, 1], [], []>} : vector<128x128xbf16>, vector<128x1024xbf16>, vector<128x1024xf32> -> vector<128x1024xf32>
    %36 = vector.shape_cast %35 : vector<128x1024xf32> to vector<2x64x1024xf32>
    %cst_15 = arith.constant dense<0xFF800000> : vector<2x1024xf32>
    %37 = vector.multi_reduction <maximumf>, %36, %cst_15 [1] : vector<2x64x1024xf32> to vector<2x1024xf32>
    %c0_i32 = arith.constant 0 : i32
    %38 = arith.cmpi eq, %arg1, %c0_i32 : i32
    %39 = arith.extui %38 : i1 to i32
    %c0_i32_16 = arith.constant 0 : i32
    %40 = arith.cmpi ne, %39, %c0_i32_16 : i32
    scf.if %40 {
      %cst_23 = arith.constant 0xFF800000 : f32
      %47 = vector.broadcast %cst_23 : f32 to vector<2x1024xf32>
      %c0_24 = arith.constant 0 : index
      %c0_25 = arith.constant 0 : index
      %48 = vector.load %arg16[%c0_24, %c0_25] : memref<2x1024xf32, #tpu.memory_space<vmem>>, vector<2x1024xf32>
      tpu.vector_store %arg16[%c0_24, %c0_25], %47 {strides = array<i32>} : memref<2x1024xf32, #tpu.memory_space<vmem>>, vector<2x1024xf32>,
    } else {
    }
    %c0_17 = arith.constant 0 : index
    %c0_18 = arith.constant 0 : index
    %41 = vector.load %arg16[%c0_17, %c0_18] : memref<2x1024xf32, #tpu.memory_space<vmem>>, vector<2x1024xf32>
    %42 = arith.maximumf %41, %37 : vector<2x1024xf32>
    %c0_19 = arith.constant 0 : index
    %c0_20 = arith.constant 0 : index
    %43 = vector.load %arg16[%c0_19, %c0_20] : memref<2x1024xf32, #tpu.memory_space<vmem>>, vector<2x1024xf32>
    tpu.vector_store %arg16[%c0_19, %c0_20], %42 {strides = array<i32>} : memref<2x1024xf32, #tpu.memory_space<vmem>>, vector<2x1024xf32>,
    %c0_i32_21 = arith.constant 0 : i32
    %44 = arith.cmpi eq, %arg1, %c0_i32_21 : i32
    %45 = arith.extui %44 : i1 to i32
    %c0_i32_22 = arith.constant 0 : i32
    %46 = arith.cmpi ne, %45, %c0_i32_22 : i32
    scf.if %46 {
      %c0_23 = arith.constant 0 : index
      %c0_24 = arith.constant 0 : index
      %47 = vector.load %arg16[%c0_23, %c0_24] : memref<2x1024xf32, #tpu.memory_space<vmem>>, vector<2x1024xf32>
      %c0_25 = arith.constant 0 : index
      %c0_26 = arith.constant 0 : index
      %48 = vector.load %arg8[%c0_25, %c0_26] : memref<1x1024xf32, #tpu.memory_space<vmem>>, vector<1x1024xf32>
      %49 = vector.broadcast %48 : vector<1x1024xf32> to vector<2x1024xf32>
      %50 = arith.addf %47, %49 : vector<2x1024xf32>
      %cst_27 = arith.constant 0.000000e+00 : f32
      %51 = vector.broadcast %cst_27 : f32 to vector<2x1024xf32>
      %52 = arith.maximumf %50, %51 : vector<2x1024xf32>
      %53 = arith.truncf %52 : vector<2x1024xf32> to vector<2x1024xbf16>
      %c0_28 = arith.constant 0 : index
      %c0_29 = arith.constant 0 : index
      %54 = vector.load %arg9[%c0_28, %c0_29] : memref<1024x512xbf16, #tpu.memory_space<vmem>>, vector<1024x512xbf16>
      %cst_30 = arith.constant dense<0.000000e+00> : vector<2x512xf32>
      %55 = tpu.matmul %53, %54, %cst_30 {dimension_numbers = #tpu.dot_dimension_numbers<[1], [0], [0], [1], [0, 0, 1, 1], [], []>} : vector<2x1024xbf16>, vector<1024x512xbf16>, vector<2x512xf32> -> vector<2x512xf32>
      %c0_31 = arith.constant 0 : index
      %c0_32 = arith.constant 0 : index
      %56 = vector.load %arg10[%c0_31, %c0_32] : memref<1x512xf32, #tpu.memory_space<vmem>>, vector<1x512xf32>
      %57 = vector.broadcast %56 : vector<1x512xf32> to vector<2x512xf32>
      %58 = arith.addf %55, %57 : vector<2x512xf32>
      %cst_33 = arith.constant 0.000000e+00 : f32
      %59 = vector.broadcast %cst_33 : f32 to vector<2x512xf32>
      %60 = arith.maximumf %58, %59 : vector<2x512xf32>
      %61 = arith.truncf %60 : vector<2x512xf32> to vector<2x512xbf16>
      %c0_34 = arith.constant 0 : index
      %c0_35 = arith.constant 0 : index
      %62 = vector.load %arg11[%c0_34, %c0_35] : memref<512x256xbf16, #tpu.memory_space<vmem>>, vector<512x256xbf16>
      %cst_36 = arith.constant dense<0.000000e+00> : vector<2x256xf32>
      %63 = tpu.matmul %61, %62, %cst_36 {dimension_numbers = #tpu.dot_dimension_numbers<[1], [0], [0], [1], [0, 0, 1, 1], [], []>} : vector<2x512xbf16>, vector<512x256xbf16>, vector<2x256xf32> -> vector<2x256xf32>
      %c0_37 = arith.constant 0 : index
      %c0_38 = arith.constant 0 : index
      %64 = vector.load %arg12[%c0_37, %c0_38] : memref<1x256xf32, #tpu.memory_space<vmem>>, vector<1x256xf32>
      %65 = vector.broadcast %64 : vector<1x256xf32> to vector<2x256xf32>
      %66 = arith.addf %63, %65 : vector<2x256xf32>
      %cst_39 = arith.constant 0.000000e+00 : f32
      %67 = vector.broadcast %cst_39 : f32 to vector<2x256xf32>
      %68 = arith.maximumf %66, %67 : vector<2x256xf32>
      %69 = arith.truncf %68 : vector<2x256xf32> to vector<2x256xbf16>
      %c0_40 = arith.constant 0 : index
      %c0_41 = arith.constant 0 : index
      %70 = vector.load %arg13[%c0_40, %c0_41] : memref<256x9xbf16, #tpu.memory_space<vmem>>, vector<256x9xbf16>
      %cst_42 = arith.constant dense<0.000000e+00> : vector<2x9xf32>
      %71 = tpu.matmul %69, %70, %cst_42 {dimension_numbers = #tpu.dot_dimension_numbers<[1], [0], [0], [1], [0, 0, 1, 1], [], []>} : vector<2x256xbf16>, vector<256x9xbf16>, vector<2x9xf32> -> vector<2x9xf32>
      %c0_43 = arith.constant 0 : index
      %c0_44 = arith.constant 0 : index
      %72 = vector.load %arg14[%c0_43, %c0_44] : memref<1x9xf32, #tpu.memory_space<vmem>>, vector<1x9xf32>
      %73 = vector.broadcast %72 : vector<1x9xf32> to vector<2x9xf32>
      %74 = arith.addf %71, %73 : vector<2x9xf32>
      %c0_45 = arith.constant 0 : index
      %c0_46 = arith.constant 0 : index
      %75 = vector.load %arg15[%c0_45, %c0_46] : memref<2x9xf32, #tpu.memory_space<vmem>>, vector<2x9xf32>
      tpu.vector_store %arg15[%c0_45, %c0_46], %74 {strides = array<i32>} : memref<2x9xf32, #tpu.memory_space<vmem>>, vector<2x9xf32>,
    } else {
    }
    return
  }
  func.func @transform_0(%arg0: i32, %arg1: i32) -> (i32, i32, i32) {
    %c0_i32 = arith.constant 0 : i32
    %c0_i32_0 = arith.constant 0 : i32
    return %arg0, %arg1, %c0_i32 : i32, i32, i32
  }
  func.func @transform_1(%arg0: i32, %arg1: i32) -> (i32, i32) {
    %c0_i32 = arith.constant 0 : i32
    %c0_i32_0 = arith.constant 0 : i32
    %c0_i32_1 = arith.constant 0 : i32
    return %c0_i32, %c0_i32_0 : i32, i32
  }
  func.func @transform_2(%arg0: i32, %arg1: i32) -> (i32, i32) {
    %c0_i32 = arith.constant 0 : i32
    %c0_i32_0 = arith.constant 0 : i32
    %c0_i32_1 = arith.constant 0 : i32
    return %c0_i32, %c0_i32_0 : i32, i32
  }
  func.func @transform_3(%arg0: i32, %arg1: i32) -> (i32, i32) {
    %c0_i32 = arith.constant 0 : i32
    %c0_i32_0 = arith.constant 0 : i32
    %c0_i32_1 = arith.constant 0 : i32
    return %c0_i32, %c0_i32_0 : i32, i32
  }
  func.func @transform_4(%arg0: i32, %arg1: i32) -> (i32, i32) {
    %c0_i32 = arith.constant 0 : i32
    %c0_i32_0 = arith.constant 0 : i32
    %c0_i32_1 = arith.constant 0 : i32
    return %c0_i32, %c0_i32_0 : i32, i32
  }
  func.func @transform_5(%arg0: i32, %arg1: i32) -> (i32, i32) {
    %c0_i32 = arith.constant 0 : i32
    %c0_i32_0 = arith.constant 0 : i32
    %c0_i32_1 = arith.constant 0 : i32
    return %c0_i32, %c0_i32_0 : i32, i32
  }
  func.func @transform_6(%arg0: i32, %arg1: i32) -> (i32, i32) {
    %c0_i32 = arith.constant 0 : i32
    %c0_i32_0 = arith.constant 0 : i32
    %c0_i32_1 = arith.constant 0 : i32
    return %c0_i32, %c0_i32_0 : i32, i32
  }
  func.func @transform_7(%arg0: i32, %arg1: i32) -> (i32, i32) {
    %c0_i32 = arith.constant 0 : i32
    %c0_i32_0 = arith.constant 0 : i32
    %c0_i32_1 = arith.constant 0 : i32
    return %c0_i32, %c0_i32_0 : i32, i32
  }
  func.func @transform_8(%arg0: i32, %arg1: i32) -> (i32, i32) {
    %c0_i32 = arith.constant 0 : i32
    %c0_i32_0 = arith.constant 0 : i32
    %c0_i32_1 = arith.constant 0 : i32
    return %c0_i32, %c0_i32_0 : i32, i32
  }
  func.func @transform_9(%arg0: i32, %arg1: i32) -> (i32, i32) {
    %c0_i32 = arith.constant 0 : i32
    %c0_i32_0 = arith.constant 0 : i32
    %c0_i32_1 = arith.constant 0 : i32
    return %c0_i32, %c0_i32_0 : i32, i32
  }
  func.func @transform_10(%arg0: i32, %arg1: i32) -> (i32, i32) {
    %c0_i32 = arith.constant 0 : i32
    %c0_i32_0 = arith.constant 0 : i32
    %c0_i32_1 = arith.constant 0 : i32
    return %c0_i32, %c0_i32_0 : i32, i32
  }
  func.func @transform_11(%arg0: i32, %arg1: i32) -> (i32, i32) {
    %c0_i32 = arith.constant 0 : i32
    %c0_i32_0 = arith.constant 0 : i32
    %c0_i32_1 = arith.constant 0 : i32
    return %c0_i32, %c0_i32_0 : i32, i32
  }
  func.func @transform_12(%arg0: i32, %arg1: i32) -> (i32, i32) {
    %c0_i32 = arith.constant 0 : i32
    %c0_i32_0 = arith.constant 0 : i32
    %c0_i32_1 = arith.constant 0 : i32
    return %c0_i32, %c0_i32_0 : i32, i32
  }
  func.func @transform_13(%arg0: i32, %arg1: i32) -> (i32, i32) {
    %c0_i32 = arith.constant 0 : i32
    %c0_i32_0 = arith.constant 0 : i32
    return %arg0, %c0_i32 : i32, i32
  }
}

module attributes {stable_mosaic.version = 11 : i64} {
  func.func @_tnet_kernel(%arg0: i32, %arg1: i32, %arg2: memref<2x64x3xf32, #tpu.memory_space<vmem>>, %arg3: memref<3x64xf32, #tpu.memory_space<vmem>>, %arg4: memref<1x64xf32, #tpu.memory_space<vmem>>, %arg5: memref<64x128xbf16, #tpu.memory_space<vmem>>, %arg6: memref<1x128xf32, #tpu.memory_space<vmem>>, %arg7: memref<128x1024xbf16, #tpu.memory_space<vmem>>, %arg8: memref<1x1024xf32, #tpu.memory_space<vmem>>, %arg9: memref<1024x512xbf16, #tpu.memory_space<vmem>>, %arg10: memref<1x512xf32, #tpu.memory_space<vmem>>, %arg11: memref<512x256xbf16, #tpu.memory_space<vmem>>, %arg12: memref<1x256xf32, #tpu.memory_space<vmem>>, %arg13: memref<256x9xbf16, #tpu.memory_space<vmem>>, %arg14: memref<1x9xf32, #tpu.memory_space<vmem>>, %arg15: memref<2x9xf32, #tpu.memory_space<vmem>>, %arg16: memref<2x1024xf32, #tpu.memory_space<vmem>>) attributes {dimension_semantics = [#tpu.dimension_semantics<parallel>, #tpu.dimension_semantics<arbitrary>], iteration_bounds = array<i64: 1, 1>, scalar_prefetch = 0 : i64, scratch_operands = 1 : i64, tpu.core_type = #tpu.core_type<tc>, window_params = [{transform_indices = @transform_0, window_bounds = array<i64: 2, 64, 3>}, {pipeline_mode = #tpu.pipeline_mode<synchronous>, transform_indices = @transform_1, window_bounds = array<i64: 3, 64>}, {pipeline_mode = #tpu.pipeline_mode<synchronous>, transform_indices = @transform_2, window_bounds = array<i64: 1, 64>}, {pipeline_mode = #tpu.pipeline_mode<synchronous>, transform_indices = @transform_3, window_bounds = array<i64: 64, 128>}, {pipeline_mode = #tpu.pipeline_mode<synchronous>, transform_indices = @transform_4, window_bounds = array<i64: 1, 128>}, {pipeline_mode = #tpu.pipeline_mode<synchronous>, transform_indices = @transform_5, window_bounds = array<i64: 128, 1024>}, {pipeline_mode = #tpu.pipeline_mode<synchronous>, transform_indices = @transform_6, window_bounds = array<i64: 1, 1024>}, {pipeline_mode = #tpu.pipeline_mode<synchronous>, transform_indices = @transform_7, window_bounds = array<i64: 1024, 512>}, {pipeline_mode = #tpu.pipeline_mode<synchronous>, transform_indices = @transform_8, window_bounds = array<i64: 1, 512>}, {pipeline_mode = #tpu.pipeline_mode<synchronous>, transform_indices = @transform_9, window_bounds = array<i64: 512, 256>}, {pipeline_mode = #tpu.pipeline_mode<synchronous>, transform_indices = @transform_10, window_bounds = array<i64: 1, 256>}, {pipeline_mode = #tpu.pipeline_mode<synchronous>, transform_indices = @transform_11, window_bounds = array<i64: 256, 9>}, {pipeline_mode = #tpu.pipeline_mode<synchronous>, transform_indices = @transform_12, window_bounds = array<i64: 1, 9>}, {transform_indices = @transform_13, window_bounds = array<i64: 2, 9>}]} {
    %c0 = arith.constant 0 : index
    %c0_0 = arith.constant 0 : index
    %c0_1 = arith.constant 0 : index
    %0 = vector.load %arg2[%c0, %c0_0, %c0_1] : memref<2x64x3xf32, #tpu.memory_space<vmem>>, vector<2x64x3xf32>
    %1 = vector.shape_cast %0 : vector<2x64x3xf32> to vector<128x3xf32>
    %c0_2 = arith.constant 0 : index
    %c0_3 = arith.constant 0 : index
    %2 = vector.load %arg3[%c0_2, %c0_3] : memref<3x64xf32, #tpu.memory_space<vmem>>, vector<3x64xf32>
    %3 = vector.extract_strided_slice %1 {offsets = [0, 0], sizes = [128, 1], strides = [1, 1]} : vector<128x3xf32> to vector<128x1xf32>
    %4 = vector.extract_strided_slice %2 {offsets = [0, 0], sizes = [1, 64], strides = [1, 1]} : vector<3x64xf32> to vector<1x64xf32>
    %5 = vector.broadcast %3 : vector<128x1xf32> to vector<128x64xf32>
    %6 = vector.broadcast %4 : vector<1x64xf32> to vector<128x64xf32>
    %7 = arith.mulf %5, %6 : vector<128x64xf32>
    %8 = vector.extract_strided_slice %1 {offsets = [0, 1], sizes = [128, 1], strides = [1, 1]} : vector<128x3xf32> to vector<128x1xf32>
    %9 = vector.extract_strided_slice %2 {offsets = [1, 0], sizes = [1, 64], strides = [1, 1]} : vector<3x64xf32> to vector<1x64xf32>
    %10 = vector.broadcast %8 : vector<128x1xf32> to vector<128x64xf32>
    %11 = vector.broadcast %9 : vector<1x64xf32> to vector<128x64xf32>
    %12 = arith.mulf %10, %11 : vector<128x64xf32>
    %13 = arith.addf %7, %12 : vector<128x64xf32>
    %14 = vector.extract_strided_slice %1 {offsets = [0, 2], sizes = [128, 1], strides = [1, 1]} : vector<128x3xf32> to vector<128x1xf32>
    %15 = vector.extract_strided_slice %2 {offsets = [2, 0], sizes = [1, 64], strides = [1, 1]} : vector<3x64xf32> to vector<1x64xf32>
    %16 = vector.broadcast %14 : vector<128x1xf32> to vector<128x64xf32>
    %17 = vector.broadcast %15 : vector<1x64xf32> to vector<128x64xf32>
    %18 = arith.mulf %16, %17 : vector<128x64xf32>
    %19 = arith.addf %13, %18 : vector<128x64xf32>
    %c0_4 = arith.constant 0 : index
    %c0_5 = arith.constant 0 : index
    %20 = vector.load %arg4[%c0_4, %c0_5] : memref<1x64xf32, #tpu.memory_space<vmem>>, vector<1x64xf32>
    %21 = vector.broadcast %20 : vector<1x64xf32> to vector<128x64xf32>
    %22 = arith.addf %19, %21 : vector<128x64xf32>
    %cst = arith.constant 0.000000e+00 : f32
    %23 = vector.broadcast %cst : f32 to vector<128x64xf32>
    %24 = arith.maximumf %22, %23 : vector<128x64xf32>
    %25 = arith.truncf %24 : vector<128x64xf32> to vector<128x64xbf16>
    %c0_6 = arith.constant 0 : index
    %c0_7 = arith.constant 0 : index
    %26 = vector.load %arg5[%c0_6, %c0_7] : memref<64x128xbf16, #tpu.memory_space<vmem>>, vector<64x128xbf16>
    %cst_8 = arith.constant dense<0.000000e+00> : vector<128x128xf32>
    %27 = tpu.matmul %25, %26, %cst_8 {dimension_numbers = #tpu.dot_dimension_numbers<[1], [0], [0], [1], [0, 0, 1, 1], [], []>} : vector<128x64xbf16>, vector<64x128xbf16>, vector<128x128xf32> -> vector<128x128xf32>
    %c0_9 = arith.constant 0 : index
    %c0_10 = arith.constant 0 : index
    %28 = vector.load %arg6[%c0_9, %c0_10] : memref<1x128xf32, #tpu.memory_space<vmem>>, vector<1x128xf32>
    %29 = vector.broadcast %28 : vector<1x128xf32> to vector<128x128xf32>
    %30 = arith.addf %27, %29 : vector<128x128xf32>
    %cst_11 = arith.constant 0.000000e+00 : f32
    %31 = vector.broadcast %cst_11 : f32 to vector<128x128xf32>
    %32 = arith.maximumf %30, %31 : vector<128x128xf32>
    %33 = arith.truncf %32 : vector<128x128xf32> to vector<128x128xbf16>
    %c0_12 = arith.constant 0 : index
    %c0_13 = arith.constant 0 : index
    %34 = vector.load %arg7[%c0_12, %c0_13] : memref<128x1024xbf16, #tpu.memory_space<vmem>>, vector<128x1024xbf16>
    %cst_14 = arith.constant dense<0.000000e+00> : vector<128x1024xf32>
    %35 = tpu.matmul %33, %34, %cst_14 {dimension_numbers = #tpu.dot_dimension_numbers<[1], [0], [0], [1], [0, 0, 1, 1], [], []>} : vector<128x128xbf16>, vector<128x1024xbf16>, vector<128x1024xf32> -> vector<128x1024xf32>
    %36 = vector.shape_cast %35 : vector<128x1024xf32> to vector<2x64x1024xf32>
    %cst_15 = arith.constant dense<0xFF800000> : vector<2x1024xf32>
    %37 = vector.multi_reduction <maximumf>, %36, %cst_15 [1] : vector<2x64x1024xf32> to vector<2x1024xf32>
    %c0_i32 = arith.constant 0 : i32
    %38 = arith.cmpi eq, %arg1, %c0_i32 : i32
    %39 = arith.extui %38 : i1 to i32
    %c0_i32_16 = arith.constant 0 : i32
    %40 = arith.cmpi ne, %39, %c0_i32_16 : i32
    scf.if %40 {
      %cst_23 = arith.constant 0xFF800000 : f32
      %47 = vector.broadcast %cst_23 : f32 to vector<2x1024xf32>
      %c0_24 = arith.constant 0 : index
      %c0_25 = arith.constant 0 : index
      %48 = vector.load %arg16[%c0_24, %c0_25] : memref<2x1024xf32, #tpu.memory_space<vmem>>, vector<2x1024xf32>
      tpu.vector_store %arg16[%c0_24, %c0_25], %47 {strides = array<i32>} : memref<2x1024xf32, #tpu.memory_space<vmem>>, vector<2x1024xf32>,
    } else {
    }
    %c0_17 = arith.constant 0 : index
    %c0_18 = arith.constant 0 : index
    %41 = vector.load %arg16[%c0_17, %c0_18] : memref<2x1024xf32, #tpu.memory_space<vmem>>, vector<2x1024xf32>
    %42 = arith.maximumf %41, %37 : vector<2x1024xf32>
    %c0_19 = arith.constant 0 : index
    %c0_20 = arith.constant 0 : index
    %43 = vector.load %arg16[%c0_19, %c0_20] : memref<2x1024xf32, #tpu.memory_space<vmem>>, vector<2x1024xf32>
    tpu.vector_store %arg16[%c0_19, %c0_20], %42 {strides = array<i32>} : memref<2x1024xf32, #tpu.memory_space<vmem>>, vector<2x1024xf32>,
    %c0_i32_21 = arith.constant 0 : i32
    %44 = arith.cmpi eq, %arg1, %c0_i32_21 : i32
    %45 = arith.extui %44 : i1 to i32
    %c0_i32_22 = arith.constant 0 : i32
    %46 = arith.cmpi ne, %45, %c0_i32_22 : i32
    scf.if %46 {
      %c0_23 = arith.constant 0 : index
      %c0_24 = arith.constant 0 : index
      %47 = vector.load %arg16[%c0_23, %c0_24] : memref<2x1024xf32, #tpu.memory_space<vmem>>, vector<2x1024xf32>
      %c0_25 = arith.constant 0 : index
      %c0_26 = arith.constant 0 : index
      %48 = vector.load %arg8[%c0_25, %c0_26] : memref<1x1024xf32, #tpu.memory_space<vmem>>, vector<1x1024xf32>
      %49 = vector.broadcast %48 : vector<1x1024xf32> to vector<2x1024xf32>
      %50 = arith.addf %47, %49 : vector<2x1024xf32>
      %cst_27 = arith.constant 0.000000e+00 : f32
      %51 = vector.broadcast %cst_27 : f32 to vector<2x1024xf32>
      %52 = arith.maximumf %50, %51 : vector<2x1024xf32>
      %53 = arith.truncf %52 : vector<2x1024xf32> to vector<2x1024xbf16>
      %c0_28 = arith.constant 0 : index
      %c0_29 = arith.constant 0 : index
      %54 = vector.load %arg9[%c0_28, %c0_29] : memref<1024x512xbf16, #tpu.memory_space<vmem>>, vector<1024x512xbf16>
      %cst_30 = arith.constant dense<0.000000e+00> : vector<2x512xf32>
      %55 = tpu.matmul %53, %54, %cst_30 {dimension_numbers = #tpu.dot_dimension_numbers<[1], [0], [0], [1], [0, 0, 1, 1], [], []>} : vector<2x1024xbf16>, vector<1024x512xbf16>, vector<2x512xf32> -> vector<2x512xf32>
      %c0_31 = arith.constant 0 : index
      %c0_32 = arith.constant 0 : index
      %56 = vector.load %arg10[%c0_31, %c0_32] : memref<1x512xf32, #tpu.memory_space<vmem>>, vector<1x512xf32>
      %57 = vector.broadcast %56 : vector<1x512xf32> to vector<2x512xf32>
      %58 = arith.addf %55, %57 : vector<2x512xf32>
      %cst_33 = arith.constant 0.000000e+00 : f32
      %59 = vector.broadcast %cst_33 : f32 to vector<2x512xf32>
      %60 = arith.maximumf %58, %59 : vector<2x512xf32>
      %61 = arith.truncf %60 : vector<2x512xf32> to vector<2x512xbf16>
      %c0_34 = arith.constant 0 : index
      %c0_35 = arith.constant 0 : index
      %62 = vector.load %arg11[%c0_34, %c0_35] : memref<512x256xbf16, #tpu.memory_space<vmem>>, vector<512x256xbf16>
      %cst_36 = arith.constant dense<0.000000e+00> : vector<2x256xf32>
      %63 = tpu.matmul %61, %62, %cst_36 {dimension_numbers = #tpu.dot_dimension_numbers<[1], [0], [0], [1], [0, 0, 1, 1], [], []>} : vector<2x512xbf16>, vector<512x256xbf16>, vector<2x256xf32> -> vector<2x256xf32>
      %c0_37 = arith.constant 0 : index
      %c0_38 = arith.constant 0 : index
      %64 = vector.load %arg12[%c0_37, %c0_38] : memref<1x256xf32, #tpu.memory_space<vmem>>, vector<1x256xf32>
      %65 = vector.broadcast %64 : vector<1x256xf32> to vector<2x256xf32>
      %66 = arith.addf %63, %65 : vector<2x256xf32>
      %cst_39 = arith.constant 0.000000e+00 : f32
      %67 = vector.broadcast %cst_39 : f32 to vector<2x256xf32>
      %68 = arith.maximumf %66, %67 : vector<2x256xf32>
      %69 = arith.truncf %68 : vector<2x256xf32> to vector<2x256xbf16>
      %c0_40 = arith.constant 0 : index
      %c0_41 = arith.constant 0 : index
      %70 = vector.load %arg13[%c0_40, %c0_41] : memref<256x9xbf16, #tpu.memory_space<vmem>>, vector<256x9xbf16>
      %cst_42 = arith.constant dense<0.000000e+00> : vector<2x9xf32>
      %71 = tpu.matmul %69, %70, %cst_42 {dimension_numbers = #tpu.dot_dimension_numbers<[1], [0], [0], [1], [0, 0, 1, 1], [], []>} : vector<2x256xbf16>, vector<256x9xbf16>, vector<2x9xf32> -> vector<2x9xf32>
      %c0_43 = arith.constant 0 : index
      %c0_44 = arith.constant 0 : index
      %72 = vector.load %arg14[%c0_43, %c0_44] : memref<1x9xf32, #tpu.memory_space<vmem>>, vector<1x9xf32>
      %73 = vector.broadcast %72 : vector<1x9xf32> to vector<2x9xf32>
      %74 = arith.addf %71, %73 : vector<2x9xf32>
      %c0_45 = arith.constant 0 : index
      %c0_46 = arith.constant 0 : index
      %75 = vector.load %arg15[%c0_45, %c0_46] : memref<2x9xf32, #tpu.memory_space<vmem>>, vector<2x9xf32>
      tpu.vector_store %arg15[%c0_45, %c0_46], %74 {strides = array<i32>} : memref<2x9xf32, #tpu.memory_space<vmem>>, vector<2x9xf32>,
    } else {
    }
    return
  }
  func.func @transform_0(%arg0: i32, %arg1: i32) -> (i32, i32, i32) {
    %c0_i32 = arith.constant 0 : i32
    %c0_i32_0 = arith.constant 0 : i32
    return %arg0, %arg1, %c0_i32 : i32, i32, i32
  }
  func.func @transform_1(%arg0: i32, %arg1: i32) -> (i32, i32) {
    %c0_i32 = arith.constant 0 : i32
    %c0_i32_0 = arith.constant 0 : i32
    %c0_i32_1 = arith.constant 0 : i32
    return %c0_i32, %c0_i32_0 : i32, i32
  }
  func.func @transform_2(%arg0: i32, %arg1: i32) -> (i32, i32) {
    %c0_i32 = arith.constant 0 : i32
    %c0_i32_0 = arith.constant 0 : i32
    %c0_i32_1 = arith.constant 0 : i32
    return %c0_i32, %c0_i32_0 : i32, i32
  }
  func.func @transform_3(%arg0: i32, %arg1: i32) -> (i32, i32) {
    %c0_i32 = arith.constant 0 : i32
    %c0_i32_0 = arith.constant 0 : i32
    %c0_i32_1 = arith.constant 0 : i32
    return %c0_i32, %c0_i32_0 : i32, i32
  }
  func.func @transform_4(%arg0: i32, %arg1: i32) -> (i32, i32) {
    %c0_i32 = arith.constant 0 : i32
    %c0_i32_0 = arith.constant 0 : i32
    %c0_i32_1 = arith.constant 0 : i32
    return %c0_i32, %c0_i32_0 : i32, i32
  }
  func.func @transform_5(%arg0: i32, %arg1: i32) -> (i32, i32) {
    %c0_i32 = arith.constant 0 : i32
    %c0_i32_0 = arith.constant 0 : i32
    %c0_i32_1 = arith.constant 0 : i32
    return %c0_i32, %c0_i32_0 : i32, i32
  }
  func.func @transform_6(%arg0: i32, %arg1: i32) -> (i32, i32) {
    %c0_i32 = arith.constant 0 : i32
    %c0_i32_0 = arith.constant 0 : i32
    %c0_i32_1 = arith.constant 0 : i32
    return %c0_i32, %c0_i32_0 : i32, i32
  }
  func.func @transform_7(%arg0: i32, %arg1: i32) -> (i32, i32) {
    %c0_i32 = arith.constant 0 : i32
    %c0_i32_0 = arith.constant 0 : i32
    %c0_i32_1 = arith.constant 0 : i32
    return %c0_i32, %c0_i32_0 : i32, i32
  }
  func.func @transform_8(%arg0: i32, %arg1: i32) -> (i32, i32) {
    %c0_i32 = arith.constant 0 : i32
    %c0_i32_0 = arith.constant 0 : i32
    %c0_i32_1 = arith.constant 0 : i32
    return %c0_i32, %c0_i32_0 : i32, i32
  }
  func.func @transform_9(%arg0: i32, %arg1: i32) -> (i32, i32) {
    %c0_i32 = arith.constant 0 : i32
    %c0_i32_0 = arith.constant 0 : i32
    %c0_i32_1 = arith.constant 0 : i32
    return %c0_i32, %c0_i32_0 : i32, i32
  }
  func.func @transform_10(%arg0: i32, %arg1: i32) -> (i32, i32) {
    %c0_i32 = arith.constant 0 : i32
    %c0_i32_0 = arith.constant 0 : i32
    %c0_i32_1 = arith.constant 0 : i32
    return %c0_i32, %c0_i32_0 : i32, i32
  }
  func.func @transform_11(%arg0: i32, %arg1: i32) -> (i32, i32) {
    %c0_i32 = arith.constant 0 : i32
    %c0_i32_0 = arith.constant 0 : i32
    %c0_i32_1 = arith.constant 0 : i32
    return %c0_i32, %c0_i32_0 : i32, i32
  }
  func.func @transform_12(%arg0: i32, %arg1: i32) -> (i32, i32) {
    %c0_i32 = arith.constant 0 : i32
    %c0_i32_0 = arith.constant 0 : i32
    %c0_i32_1 = arith.constant 0 : i32
    return %c0_i32, %c0_i32_0 : i32, i32
  }
  func.func @transform_13(%arg0: i32, %arg1: i32) -> (i32, i32) {
    %c0_i32 = arith.constant 0 : i32
    %c0_i32_0 = arith.constant 0 : i32
    return %arg0, %c0_i32 : i32, i32
  }
}

</mosaic_0001>

<bundles_post_ra>
// kernel: tpu_custom_call.1
= control target key start
LH: loop header
LB: loop body
LE: loop exit
PB: predicated region body
PF: predicated region fallthrough
CT: control target
= control target key end

     0   :  { %18 = vsyncpa [#allocation4], 0  ;;  %s7274_s0 = inlined_call_operand.vmem [shape: f32[2,64,3], index: 0, kind: input, shape index: {}]   ;;  %s7275_s1 = inlined_call_operand.vmem [shape: f32[3,64], index: 1, kind: input, shape index: {}]   ;;  %s7276_s2 = inlined_call_operand.vmem [shape: f32[1,64], index: 2, kind: input, shape index: {}]   ;;  %s7277_s3 = inlined_call_operand.vmem [shape: bf16[64,128], index: 3, kind: input, shape index: {}]   ;;  %s7278_s4 = inlined_call_operand.vmem [shape: f32[1,128], index: 4, kind: input, shape index: {}]   ;;  %s7279_s5 = inlined_call_operand.hbm [shape: bf16[128,1024], index: 5, kind: input, shape index: {}]   ;;  %s7280_s6 = inlined_call_operand.vmem [shape: f32[1,1024], index: 6, kind: input, shape index: {}]   ;;  %s7281_s7 = inlined_call_operand.hbm [shape: bf16[1024,512], index: 7, kind: input, shape index: {}]   ;;  %s7282_s8 = inlined_call_operand.vmem [shape: f32[1,512], index: 8, kind: input, shape index: {}]   ;;  %s7283_s9 = inlined_call_operand.hbm [shape: bf16[512,256], index: 9, kind: input, shape index: {}]   ;;  %s7284_s10 = inlined_call_operand.vmem [shape: f32[1,256], index: 10, kind: input, shape index: {}]   ;;  %s7285_s11 = inlined_call_operand.vmem [shape: bf16[256,9], index: 11, kind: input, shape index: {}]   ;;  %s7286_s12 = inlined_call_operand.vmem [shape: f32[1,9], index: 12, kind: input, shape index: {}]   ;;  %s7287_s13 = inlined_call_operand.hbm [shape: f32[2,9], index: 13, kind: output, shape index: {}]  }
   0x1   :  { %19 = vsyncpa [#allocation7], 0  ;;  %s50_s27 = sshll.u32 %s7281_s7, 4  ;;  %s51_s27 = int_to_ptr.hbm [resolvable:$true] %s50_s27 }
   0x2   :  { %20 = vsyncpa [#allocation5], 0  ;;  %s6534_s28 = smov [#allocation6]   ;;  %s35_s15 = sshll.u32 %s7279_s5, 4  ;;  %s36_s15 = int_to_ptr.hbm [resolvable:$true] %s35_s15 }
   0x3   :  { %s52_s29 = sshll.u32 %s6534_s28, 4  ;;  %s6535_s16 = smov 256   ;;  %s53_s29 = int_to_ptr.vmem [resolvable:$true] %s52_s29 }
   0x4   :  { %s6536_s17 = smov 16   ;;  %s6537_s18 = smov [#allocation3]  }
   0x5   :  { %58 = dma.hbm_to_vmem [thread:$0]  %s51_s27, 32768, %s53_s29, [#allocation7], %s6535_s16, %s6535_s16, %s6536_s17  }
   0x6   :  { %s37_s19 = sshll.u32 %s6537_s18, 4  ;;  %s6538_s20 = smov 512   ;;  %s38_s19 = int_to_ptr.vmem [resolvable:$true] %s37_s19 }
   0x7   :  { %s6539_s21 = smov 32   ;;  %s65_s23 = sshll.u32 %s7283_s9, 4  ;;  %s66_s23 = int_to_ptr.hbm [resolvable:$true] %s65_s23 }
   0x8   :  { %43 = dma.hbm_to_vmem [thread:$0]  %s36_s15, 8192, %s38_s19, [#allocation4], %s6538_s20, %s6538_s20, %s6539_s21  }
   0x9   :  { %s6540_s24 = smov [#allocation8]   ;;  %s6541_s26 = smov 128  }
   0xa   :  { %s67_s25 = sshll.u32 %s6540_s24, 4  ;;  %s6542_s5 = smov 8   ;;  %s68_s25 = int_to_ptr.vmem [resolvable:$true] %s67_s25 }
   0xb   :  { %73 = dma.hbm_to_vmem [thread:$0]  %s66_s23, 8192, %s68_s25, [#allocation7], %s6541_s26, %s6541_s26, %s6542_s5  }
   0xc   :  { %6528 = dma.done.wait [#allocation4], 8192  }
   0xd   :  { %6529 = vsyncadd [#allocation4], 4294959104 }
   0xe   :  { %6530 = dma.done.wait [#allocation7], 40960  }
   0xf   :  { %6531 = vsyncadd [#allocation7], 4294926336  ;;  %v6543_v0 = vmov 1   ;;  %v6544_v1 = vmov 0   ;;  %v6545_v2 = vmov 2   ;;  %v93_v3 = vld [vmem:[%s7274_s0] sm:$0xff] }
  0x10   :  { %6390 = vset.pattern.permute.xlu1 %v6543_v0  ;;  %6389 = vset.pattern.permute.xlu0 %v6544_v1  ;;  %v94_v4 = vld [vmem:[%s7274_s0 + $0x8] sm:$0xff]  ;;  %v95_v5 = vld [vmem:[%s7274_s0 + $0x10] sm:$0xff]  ;;  %v96_v6 = vld [vmem:[%s7274_s0 + $0x18] sm:$0xff]  ;;  %vm481_vm0 = vcmask 523264   ;;  %vm1599_vm1 = vcmask 1041408   ;;  %vm1601_vm2 = vcmask 1045508  }
  0x11   :  { %6391 = vset.pattern.permute.xlu2 %v6545_v2  ;;  %208 = vperm.xlu1 %6390, %v93_v3   ;;  %v97_v7 = vld [vmem:[%s7274_s0 + $0x20] sm:$0xff]  ;;  %v98_v8 = vld [vmem:[%s7274_s0 + $0x28] sm:$0xff]  ;;  %v99_v9 = vld [vmem:[%s7274_s0 + $0x30] sm:$0xff]  ;;  %vm1603_vm3 = vcmask 1043456   ;;  %vm1619_vm4 = vcmask 1041409   ;;  %vm1621_vm5 = vcmask 1043459  }
  0x12   :  { %112 = vperm.xlu0 %6389, %v93_v3   ;;  %305 = vperm.xlu2 %6391, %v93_v3   ;;  %v100_v10 = vld [vmem:[%s7274_s0 + $0x38] sm:$0xff]  ;;  %v102_v11 = vld [vmem:[%s7274_s0 + $0x48] sm:$0xff]  ;;  %v103_v12 = vld [vmem:[%s7274_s0 + $0x50] sm:$0xff]  ;;  %vm1623_vm6 = vcmask 1045509   ;;  %vm1625_vm7 = vcmask 1047559   ;;  %s4337_s23 = sshll.u32 %s7287_s13, 4  ;;  %s4338_s23 = int_to_ptr.hbm [resolvable:$true] %s4337_s23 }
  0x13   :  { %v101_v13 = vld [vmem:[%s7274_s0 + $0x40] sm:$0xff]  ;;  %v104_v14 = vld [vmem:[%s7274_s0 + $0x58] sm:$0xff]  ;;  %v5974_v17 = vld [vmem:[%s7277_s3 + $0x10] sm:$0xff]  ;;  %vm4328_vm8 = vcmask 66560  }
  0x14   :  { %v105_v15 = vld [vmem:[%s7274_s0 + $0x60] sm:$0xff]  ;;  %v5975_v16 = vld [vmem:[%s7277_s3 + $0x18] sm:$0xff]  ;;  %v106_v18 = vld [vmem:[%s7274_s0 + $0x68] sm:$0xff] }
  0x15   :  { %510 = vmatpush.bf16.msra.mxu0 %v5975_v16  ;;  %v5973_v19 = vld [vmem:[%s7277_s3 + $0x8] sm:$0xff]  ;;  %v5972_v21 = vld [vmem:[%s7277_s3] sm:$0xff]  ;;  %v6711_v22 = vld [vmem:[%s7274_s0 + $0x70] sm:$0xff] }
  0x16   :  { %v109_v24 = vld [vmem:[%s7275_s1] sm:$0x7]  ;;  %v108_v52 = vld [vmem:[%s7274_s0 + $0x78] sm:$0xff] }
  0x17   :  { %v6719_v25 = vperm.slane %v109_v24, 1  ;;  %v6721_v26 = vperm.slane %v109_v24, 0  ;;  %v6723_v29 = vperm.slane %v109_v24, 2  ;;  %v6735_v40 = vld [vmem:[%s7276_s2] ss:$0 sm:$0xff] }
  0x19   :  { %212 = vperm.xlu1 %6390, %v94_v4   ;;  %511 = vmatpush.bf16.msra.mxu0 %v5974_v17 }
  0x1a   :  { %117 = vperm.xlu0 %6389, %v94_v4   ;;  %309 = vperm.xlu2 %6391, %v94_v4  }
  0x1d   :  { %512 = vmatpush.bf16.msra.mxu0 %v5973_v19 }
  0x21   :  { %6392 = vset.pattern.permute.xlu1 %v6544_v1  ;;  %513 = vmatpush.bf16.msra.mxu0 %v5972_v21 }
  0x22   :  { %122 = vperm.xlu0 %6389, %v95_v5   ;;  %127 = vperm.xlu1 %6392, %v96_v6  }
  0x23   :  { %6393 = vset.pattern.permute.xlu2 %v6543_v0 }
  0x24   :  { %216 = vperm.xlu2 %6393, %v95_v5  }
  0x2a   :  { %6394 = vset.pattern.permute.xlu0 %v6543_v0  ;;  %6395 = vset.pattern.permute.xlu1 %v6545_v2 }
  0x2b   :  { %220 = vperm.xlu0 %6394, %v96_v6   ;;  %313 = vperm.xlu1 %6395, %v95_v5  }
  0x2c   :  { %6396 = vset.pattern.permute.xlu2 %v6545_v2 }
  0x2d   :  { %317 = vperm.xlu2 %6396, %v96_v6  }
  0x33   :  { %224 = vperm.xlu0 %6394, %v97_v7   ;;  %6397 = vset.pattern.permute.xlu1 %v6544_v1 }
  0x34   :  { %132 = vperm.xlu1 %6397, %v97_v7  }
  0x35   :  { %6398 = vset.pattern.permute.xlu2 %v6544_v1 }
  0x36   :  { %137 = vperm.xlu2 %6398, %v98_v8  }
  0x3b   :  { %6401 = vset.pattern.permute.xlu0 %v6545_v2 }
  0x3c   :  { %325 = vperm.xlu0 %6401, %v98_v8   ;;  %6399 = vset.pattern.permute.xlu1 %v6543_v0 }
  0x3d   :  { %228 = vperm.xlu1 %6399, %v98_v8  }
  0x3e   :  { %6400 = vset.pattern.permute.xlu2 %v6545_v2 }
  0x3f   :  { %321 = vperm.xlu2 %6400, %v97_v7  }
  0x44   :  { %329 = vperm.xlu0 %6401, %v99_v9  }
  0x45   :  { %6402 = vset.pattern.permute.xlu1 %v6544_v1 }
  0x46   :  { %142 = vperm.xlu1 %6402, %v99_v9  }
  0x47   :  { %6403 = vset.pattern.permute.xlu2 %v6544_v1 }
  0x48   :  { %147 = vperm.xlu2 %6403, %v100_v10  }
  0x4c   :  { %6408 = vset.pattern.permute.xlu0 %v6544_v1 }
  0x4d   :  { %157 = vperm.xlu0 %6408, %v102_v11  }
  0x4e   :  { %6404 = vset.pattern.permute.xlu1 %v6543_v0 }
  0x4f   :  { %232 = vperm.xlu1 %6404, %v99_v9  }
  0x50   :  { %6405 = vset.pattern.permute.xlu2 %v6543_v0 }
  0x51   :  { %236 = vperm.xlu2 %6405, %v100_v10  }
  0x55   :  { %162 = vperm.xlu0 %6408, %v103_v12  }
  0x57   :  { %6406 = vset.pattern.permute.xlu1 %v6545_v2 }
  0x58   :  { %333 = vperm.xlu1 %6406, %v100_v10  }
  0x59   :  { %6407 = vset.pattern.permute.xlu2 %v6544_v1 }
  0x5a   :  { %152 = vperm.xlu2 %6407, %v101_v13  }
  0x5d   :  { %6415 = vset.pattern.permute.xlu0 %v6543_v0 }
  0x5e   :  { %252 = vperm.xlu0 %6415, %v104_v14  }
  0x60   :  { %6409 = vset.pattern.permute.xlu1 %v6543_v0 }
  0x61   :  { %240 = vperm.xlu1 %6409, %v101_v13  }
  0x62   :  { %6410 = vset.pattern.permute.xlu2 %v6543_v0 }
  0x63   :  { %244 = vperm.xlu2 %6410, %v102_v11  }
  0x66   :  { %256 = vperm.xlu0 %6415, %v105_v15  }
  0x69   :  { %6411 = vset.pattern.permute.xlu1 %v6545_v2 }
  0x6a   :  { %337 = vperm.xlu1 %6411, %v101_v13  }
  0x6b   :  { %6412 = vset.pattern.permute.xlu2 %v6545_v2 }
  0x6c   :  { %341 = vperm.xlu2 %6412, %v102_v11   ;;  %v306_v20 = vpop.permute.xlu2 %305 }
  0x6d   :  { %v369_v33 = vmul.f32 %v6723_v29, %v306_v20 }
  0x6e   :  { %6422 = vset.pattern.permute.xlu0 %v6545_v2 }
  0x6f   :  { %357 = vperm.xlu0 %6422, %v106_v18  }
  0x72   :  { %6413 = vset.pattern.permute.xlu1 %v6544_v1 }
  0x73   :  { %167 = vperm.xlu1 %6413, %v104_v14  }
  0x74   :  { %6414 = vset.pattern.permute.xlu2 %v6543_v0  ;;  %v310_v23 = vpop.permute.xlu2 %309 }
  0x75   :  { %248 = vperm.xlu2 %6414, %v103_v12   ;;  %v370_v41 = vmul.f32 %v6723_v29, %v310_v23 }
  0x77   :  { %361 = vperm.xlu0 %6422, %v6711_v22  }
  0x7b   :  { %6416 = vset.pattern.permute.xlu1 %v6545_v2 }
  0x7c   :  { %345 = vperm.xlu1 %6416, %v103_v12  }
  0x7d   :  { %6417 = vset.pattern.permute.xlu2 %v6545_v2 }
  0x7e   :  { %349 = vperm.xlu2 %6417, %v104_v14   ;;  %v217_v32 = vpop.permute.xlu2 %216 }
  0x7f   :  { %v274_v53 = vmul.f32 %v6719_v25, %v217_v32 }
  0x83   :  { %v209_v27 = vpop.permute.xlu1 %208 }
  0x84   :  { %v113_v28 = vpop.permute.xlu0 %112  ;;  %v272_v30 = vmul.f32 %v6719_v25, %v209_v27  ;;  %6418 = vset.pattern.permute.xlu1 %v6544_v1 }
  0x85   :  { %v191_v31 = vmul.f32 %v6721_v26, %v113_v28  ;;  %172 = vperm.xlu1 %6418, %v105_v15  }
  0x86   :  { %6419 = vset.pattern.permute.xlu2 %v6544_v1 }
  0x87   :  { %177 = vperm.xlu2 %6419, %v106_v18   ;;  %v288_v34 = vadd.f32 %v272_v30, %v191_v31  ;;  %v318_v43 = vpop.permute.xlu2 %317 }
  0x88   :  { %v372_v59 = vmul.f32 %v6723_v29, %v318_v43 }
  0x89   :  { %v385_v37 = vadd.f32 %v369_v33, %v288_v34 }
  0x8b   :  { %v213_v35 = vpop.permute.xlu1 %212  ;;  %v405_v45 = vadd.f32 %v6735_v40, %v385_v37 }
  0x8c   :  { %v118_v36 = vpop.permute.xlu0 %117  ;;  %v273_v38 = vmul.f32 %v6719_v25, %v213_v35 }
  0x8d   :  { %v192_v39 = vmul.f32 %v6721_v26, %v118_v36  ;;  %6420 = vset.pattern.permute.xlu1 %v6543_v0  ;;  %v421_v49 = vmax.f32 %v405_v45, 0.0 }
  0x8e   :  { %260 = vperm.xlu1 %6420, %v106_v18  }
  0x8f   :  { %v289_v42 = vadd.f32 %v273_v38, %v192_v39  ;;  %6421 = vset.pattern.permute.xlu2 %v6545_v2 }
  0x90   :  { %353 = vperm.xlu2 %6421, %v105_v15   ;;  %v138_v55 = vpop.permute.xlu2 %137 }
  0x91   :  { %v386_v44 = vadd.f32 %v370_v41, %v289_v42  ;;  %v196_v18 = vmul.f32 %v6721_v26, %v138_v55 }
  0x93   :  { %v406_v46 = vadd.f32 %v6735_v40, %v386_v44 }
  0x94   :  { %v123_v47 = vpop.permute.xlu0 %122  ;;  %v128_v48 = vpop.permute.xlu1 %127 }
  0x95   :  { %v422_v50 = vmax.f32 %v406_v46, 0.0  ;;  %v193_v54 = vmul.f32 %v6721_v26, %v123_v47  ;;  %v194_v58 = vmul.f32 %v6721_v26, %v128_v48 }
  0x96   :  { %6423 = vset.pattern.permute.xlu1 %v6544_v1 }
  0x97   :  { %v437_v51 = vpack.c.bf16 %v422_v50, %v421_v49  ;;  %182 = vperm.xlu1 %6423, %v6711_v22   ;;  %v290_v56 = vadd.f32 %v274_v53, %v193_v54 }
  0x98   :  { %6424 = vset.pattern.permute.xlu2 %v6544_v1 }
  0x99   :  { %4364 = vmatmul.msk.bf16.vlgmr.msra.gmra.mxu0 %vm481_vm0, %v437_v51  ;;  %187 = vperm.xlu2 %6424, %v108_v52   ;;  %v322_v5 = vpop.permute.xlu2 %321 }
  0x9a   :  { %v373_v15 = vmul.f32 %v6723_v29, %v322_v5 }
  0x9d   :  { %v221_v57 = vpop.permute.xlu0 %220  ;;  %v314_v61 = vpop.permute.xlu1 %313 }
  0x9e   :  { %v275_v60 = vmul.f32 %v6719_v25, %v221_v57  ;;  %v371_v62 = vmul.f32 %v6723_v29, %v314_v61 }
  0x9f   :  { %6425 = vset.pattern.permute.xlu1 %v6543_v0 }
  0xa0   :  { %v291_v63 = vadd.f32 %v275_v60, %v194_v58  ;;  %v387_v1 = vadd.f32 %v371_v62, %v290_v56  ;;  %264 = vperm.xlu1 %6425, %v6711_v22  }
  0xa1   :  { %6426 = vset.pattern.permute.xlu2 %v6543_v0 }
  0xa2   :  { %v388_v3 = vadd.f32 %v372_v59, %v291_v63  ;;  %268 = vperm.xlu2 %6426, %v108_v52   ;;  %v407_v4 = vadd.f32 %v6735_v40, %v387_v1  ;;  %v148_v0 = vpop.permute.xlu2 %147 }
  0xa3   :  { %v198_v41 = vmul.f32 %v6721_v26, %v148_v0  ;;  %v6032_v0 = vld [vmem:[#allocation3 + $0x1c4] sm:$0xf] }
  0xa4   :  { %v408_v6 = vadd.f32 %v6735_v40, %v388_v3  ;;  %v423_v7 = vmax.f32 %v407_v4, 0.0 }
  0xa5   :  { %v225_v8 = vpop.permute.xlu0 %224 }
  0xa6   :  { %v424_v9 = vmax.f32 %v408_v6, 0.0  ;;  %v133_v10 = vpop.permute.xlu1 %132  ;;  %v276_v13 = vmul.f32 %v6719_v25, %v225_v8 }
  0xa7   :  { %v195_v12 = vmul.f32 %v6721_v26, %v133_v10 }
  0xa8   :  { %v438_v11 = vpack.c.bf16 %v424_v9, %v423_v7  ;;  %6427 = vset.pattern.permute.xlu1 %v6545_v2 }
  0xa9   :  { %365 = vperm.xlu1 %6427, %v108_v52   ;;  %v292_v14 = vadd.f32 %v276_v13, %v195_v12  ;;  %v4598_v12 = vld [vmem:[#allocation3 + $0x1c0] sm:$0xf] }
  0xaa   :  { %4365 = vmatmul.msk.bf16.gmra.mxu0 %vm481_vm0, %v438_v11  ;;  %v6036_v13 = vld [vmem:[#allocation3 + $0x1dc] sm:$0xf0] }
  0xab   :  { %v389_v19 = vadd.f32 %v373_v15, %v292_v14  ;;  %v237_v24 = vpop.permute.xlu2 %236  ;;  %v4599_v15 = vor.u32 %v6036_v13, %v4598_v12  ;;  %v4472_v13 = vld [vmem:[#allocation3 + $0xe0] sm:$0xf0] }
  0xac   :  { %v279_v42 = vmul.f32 %v6719_v25, %v237_v24 }
  0xad   :  { %v409_v23 = vadd.f32 %v6735_v40, %v389_v19  ;;  %v6037_v19 = vld [vmem:[#allocation3 + $0x1e4] sm:$0xf0]  ;;  %963 = vmatpush.bf16.msra.mxu1 %v4599_v15 }
  0xae   :  { %v326_v16 = vpop.permute.xlu0 %325  ;;  %v295_v46 = vadd.f32 %v279_v42, %v198_v41  ;;  %v4608_v41 = vld [vmem:[#allocation3 + $0x1e8] sm:$0xf0] }
  0xaf   :  { %v229_v17 = vpop.permute.xlu1 %228  ;;  %v374_v21 = vmul.f32 %v6723_v29, %v326_v16  ;;  %v425_v28 = vmax.f32 %v409_v23, 0.0  ;;  %v4600_v16 = vld [vmem:[#allocation3 + $0x1e0] sm:$0xf0] }
  0xb0   :  { %v277_v20 = vmul.f32 %v6719_v25, %v229_v17  ;;  %v4606_v17 = vld [vmem:[#allocation3 + $0x1c8] sm:$0xf] }
  0xb1   :  { %v4607_v23 = vor.u32 %v6037_v19, %v4606_v17 }
  0xb2   :  { %v293_v22 = vadd.f32 %v277_v20, %v196_v18  ;;  %v4603_v18 = vor.u32 %v6032_v0, %v4600_v16  ;;  %v4478_v0 = vld [vmem:[#allocation3 + $0xc8] sm:$0xf] }
  0xb3   :  { %1061 = vmatpush.bf16.msra.mxu3 %v4607_v23 }
  0xb4   :  { %v390_v2 = vadd.f32 %v374_v21, %v293_v22  ;;  %v153_v33 = vpop.permute.xlu2 %152  ;;  %1012 = vmatpush.bf16.msra.mxu2 %v4603_v18 }
  0xb5   :  { %v199_v1 = vmul.f32 %v6721_v26, %v153_v33  ;;  %v4574_v33 = vld [vmem:[#allocation3 + $0x188] sm:$0xf] }
  0xb6   :  { %v410_v27 = vadd.f32 %v6735_v40, %v390_v2  ;;  %v330_v36 = vpop.permute.xlu0 %329 }
  0xb7   :  { %v375_v39 = vmul.f32 %v6723_v29, %v330_v36 }
  0xb8   :  { %v426_v30 = vmax.f32 %v410_v27, 0.0  ;;  %v143_v31 = vpop.permute.xlu1 %142  ;;  %v4566_v27 = vld [vmem:[#allocation3 + $0x180] sm:$0xf] }
  0xb9   :  { %v197_v37 = vmul.f32 %v6721_v26, %v143_v31 }
  0xba   :  { %v439_v32 = vpack.c.bf16 %v426_v30, %v425_v28  ;;  %v6028_v28 = vld [vmem:[#allocation3 + $0x19c] sm:$0xf0]  ;;  %v6024_v30 = vld [vmem:[#allocation3 + $0x184] sm:$0xf] }
  0xbb   :  { %v4567_v31 = vor.u32 %v6028_v28, %v4566_v27  ;;  %v4440_v27 = vld [vmem:[#allocation3 + $0xa0] sm:$0xf0]  ;;  %v4446_v28 = vld [vmem:[#allocation3 + $0x88] sm:$0xf] }
  0xbc   :  { %4366 = vmatmul.msk.bf16.gmra.mxu0 %vm481_vm0, %v439_v32  ;;  %v4568_v32 = vld [vmem:[#allocation3 + $0x1a0] sm:$0xf0] }
  0xbd   :  { %v245_v43 = vpop.permute.xlu2 %244  ;;  %964 = vmatpush.bf16.msra.mxu1 %v4567_v31  ;;  %v6025_v31 = vld [vmem:[#allocation3 + $0x18c] sm:$0xf] }
  0xbe   :  { %v281_v54 = vmul.f32 %v6719_v25, %v245_v43  ;;  %v4534_v43 = vld [vmem:[#allocation3 + $0x140] sm:$0xf] }
  0xbf   :  { %v158_v50 = vpop.permute.xlu0 %157 }
  0xc0   :  { %v200_v55 = vmul.f32 %v6721_v26, %v158_v50  ;;  %v4542_v50 = vld [vmem:[#allocation3 + $0x148] sm:$0xf] }
  0xc1   :  { %v233_v34 = vpop.permute.xlu1 %232 }
  0xc2   :  { %v278_v35 = vmul.f32 %v6719_v25, %v233_v34  ;;  %v297_v59 = vadd.f32 %v281_v54, %v200_v55  ;;  %v6029_v34 = vld [vmem:[#allocation3 + $0x1a4] sm:$0xf0]  ;;  %v4502_v55 = vld [vmem:[#allocation3 + $0x100] sm:$0xf] }
  0xc3   :  { %v4575_v36 = vor.u32 %v6029_v34, %v4574_v33 }
  0xc4   :  { %v294_v38 = vadd.f32 %v278_v35, %v197_v37  ;;  %v4571_v35 = vor.u32 %v6024_v30, %v4568_v32  ;;  %v5997_v30 = vld [vmem:[#allocation3 + $0xa4] sm:$0xf0]  ;;  %v4576_v32 = vld [vmem:[#allocation3 + $0x1a8] sm:$0xf0] }
  0xc5   :  { %1062 = vmatpush.bf16.msra.mxu3 %v4575_v36  ;;  %v4447_v34 = vor.u32 %v5997_v30, %v4446_v28  ;;  %v5977_v28 = vld [vmem:[#allocation3 + $0xc] sm:$0xf] }
  0xc6   :  { %v391_v44 = vadd.f32 %v375_v39, %v294_v38  ;;  %v342_v56 = vpop.permute.xlu2 %341  ;;  %v6033_v39 = vld [vmem:[#allocation3 + $0x1cc] sm:$0xf]  ;;  %1013 = vmatpush.bf16.msra.mxu2 %v4571_v35 }
  0xc7   :  { %v378_v60 = vmul.f32 %v6723_v29, %v342_v56  ;;  %v163_v61 = vpop.permute.xlu0 %162  ;;  %v4611_v42 = vor.u32 %v6033_v39, %v4608_v41  ;;  %v6012_v56 = vld [vmem:[#allocation3 + $0x11c] sm:$0xf0]  ;;  %v4384_v30 = vld [vmem:[#allocation3 + $0x28] sm:$0xf0] }
  0xc8   :  { %v411_v48 = vadd.f32 %v6735_v40, %v391_v44  ;;  %v6020_v44 = vld [vmem:[#allocation3 + $0x15c] sm:$0xf0] }
  0xc9   :  { %v394_v63 = vadd.f32 %v378_v60, %v297_v59  ;;  %1110 = vmatpush.bf16.msrb.mxu0 %v4611_v42  ;;  %v4503_v59 = vor.u32 %v6012_v56, %v4502_v55  ;;  %v4504_v60 = vld [vmem:[#allocation3 + $0x120] sm:$0xf0]  ;;  %v4406_v39 = vld [vmem:[#allocation3 + $0x40] sm:$0xf] }
  0xca   :  { %v334_v45 = vpop.permute.xlu1 %333  ;;  %v427_v52 = vmax.f32 %v411_v48, 0.0  ;;  %v4535_v48 = vor.u32 %v6020_v44, %v4534_v43  ;;  %v5988_v41 = vld [vmem:[#allocation3 + $0x5c] sm:$0xf0]  ;;  %v5984_v42 = vld [vmem:[#allocation3 + $0x44] sm:$0xf] }
  0xcb   :  { %v376_v47 = vmul.f32 %v6723_v29, %v334_v45  ;;  %v414_v6 = vadd.f32 %v6735_v40, %v394_v63  ;;  %v6016_v45 = vld [vmem:[#allocation3 + $0x144] sm:$0xf]  ;;  %v4407_v43 = vor.u32 %v5988_v41, %v4406_v39  ;;  %v4374_v55 = vld [vmem:[#allocation3] sm:$0xf] }
  0xcc   :  { %965 = vmatpush.bf16.msra.mxu1 %v4535_v48  ;;  %v4408_v44 = vld [vmem:[#allocation3 + $0x60] sm:$0xf0]  ;;  %v5980_v56 = vld [vmem:[#allocation3 + $0x1c] sm:$0xf0] }
  0xcd   :  { %v392_v49 = vadd.f32 %v376_v47, %v295_v46  ;;  %v430_v9 = vmax.f32 %v414_v6, 0.0  ;;  %v201_v46 = vmul.f32 %v6721_v26, %v163_v61  ;;  %v4510_v61 = vld [vmem:[#allocation3 + $0x108] sm:$0xf] }
  0xcf   :  { %v412_v51 = vadd.f32 %v6735_v40, %v392_v49  ;;  %v249_v4 = vpop.permute.xlu2 %248  ;;  %v4536_v49 = vld [vmem:[#allocation3 + $0x160] sm:$0xf0] }
  0xd0   :  { %v253_v11 = vpop.permute.xlu0 %252  ;;  %v282_v47 = vmul.f32 %v6719_v25, %v249_v4  ;;  %966 = vmatpush.bf16.msra.mxu1 %v4503_v59  ;;  %v4376_v59 = vld [vmem:[#allocation3 + $0x20] sm:$0xf0] }
  0xd1   :  { %v428_v53 = vmax.f32 %v412_v51, 0.0  ;;  %v283_v21 = vmul.f32 %v6719_v25, %v253_v11  ;;  %v6021_v51 = vld [vmem:[#allocation3 + $0x164] sm:$0xf0] }
  0xd3   :  { %v241_v57 = vpop.permute.xlu1 %240  ;;  %v440_v58 = vpack.c.bf16 %v428_v53, %v427_v52  ;;  %v4539_v52 = vor.u32 %v6016_v45, %v4536_v49  ;;  %v4543_v53 = vor.u32 %v6021_v51, %v4542_v50  ;;  %v4414_v45 = vld [vmem:[#allocation3 + $0x48] sm:$0xf]  ;;  %v6017_v49 = vld [vmem:[#allocation3 + $0x14c] sm:$0xf] }
  0xd4   :  { %v280_v62 = vmul.f32 %v6719_v25, %v241_v57  ;;  %v6008_v57 = vld [vmem:[#allocation3 + $0x104] sm:$0xf]  ;;  %v4544_v50 = vld [vmem:[#allocation3 + $0x168] sm:$0xf0] }
  0xd5   :  { %4367 = vmatmul.msk.bf16.gmra.mxu0 %vm481_vm0, %v440_v58  ;;  %1014 = vmatpush.bf16.msra.mxu2 %v4539_v52 }
  0xd6   :  { %v296_v5 = vadd.f32 %v280_v62, %v199_v1  ;;  %v298_v62 = vadd.f32 %v282_v47, %v201_v46  ;;  %1063 = vmatpush.bf16.msra.mxu3 %v4543_v53  ;;  %v4507_v1 = vor.u32 %v6008_v57, %v4504_v60  ;;  %v5989_v46 = vld [vmem:[#allocation3 + $0x64] sm:$0xf0]  ;;  %v4411_v47 = vor.u32 %v5984_v42, %v4408_v44  ;;  %v5976_v57 = vld [vmem:[#allocation3 + $0x4] sm:$0xf] }
  0xd7   :  { %v4415_v48 = vor.u32 %v5989_v46, %v4414_v45  ;;  %v4547_v53 = vor.u32 %v6017_v49, %v4544_v50  ;;  %v4382_v60 = vld [vmem:[#allocation3 + $0x8] sm:$0xf] }
  0xd8   :  { %v350_v24 = vpop.permute.xlu2 %349  ;;  %v257_v19 = vpop.permute.xlu0 %256 }
  0xd9   :  { %v380_v38 = vmul.f32 %v6723_v29, %v350_v24  ;;  %1015 = vmatpush.bf16.msra.mxu2 %v4507_v1  ;;  %v284_v36 = vmul.f32 %v6719_v25, %v257_v19  ;;  %v4379_v1 = vor.u32 %v5976_v57, %v4376_v59  ;;  %v5993_v19 = vld [vmem:[#allocation3 + $0x8c] sm:$0xf] }
  0xdc   :  { %v338_v3 = vpop.permute.xlu1 %337 }
  0xdd   :  { %v377_v7 = vmul.f32 %v6723_v29, %v338_v3  ;;  %v6013_v3 = vld [vmem:[#allocation3 + $0x124] sm:$0xf0] }
  0xdf   :  { %v393_v8 = vadd.f32 %v377_v7, %v296_v5  ;;  %v4511_v5 = vor.u32 %v6013_v3, %v4510_v61  ;;  %v5981_v61 = vld [vmem:[#allocation3 + $0x24] sm:$0xf0] }
  0xe0   :  { %v4383_v3 = vor.u32 %v5981_v61, %v4382_v60 }
  0xe1   :  { %v413_v10 = vadd.f32 %v6735_v40, %v393_v8  ;;  %v6795_v4 = vpop.permute.xlu2 %177  ;;  %v4470_v8 = vld [vmem:[#allocation3 + $0xc0] sm:$0xf]  ;;  %1064 = vmatpush.bf16.msra.mxu3 %v4511_v5  ;;  %v6009_v5 = vld [vmem:[#allocation3 + $0x10c] sm:$0xf] }
  0xe3   :  { %v429_v14 = vmax.f32 %v413_v10, 0.0  ;;  %v6000_v10 = vld [vmem:[#allocation3 + $0xc4] sm:$0xf] }
  0xe4   :  { %v4475_v15 = vor.u32 %v6000_v10, %v4472_v13 }
  0xe5   :  { %v168_v20 = vpop.permute.xlu1 %167  ;;  %v441_v22 = vpack.c.bf16 %v430_v9, %v429_v14  ;;  %v6004_v9 = vld [vmem:[#allocation3 + $0xdc] sm:$0xf0]  ;;  %v6005_v14 = vld [vmem:[#allocation3 + $0xe4] sm:$0xf0] }
  0xe6   :  { %v202_v2 = vmul.f32 %v6721_v26, %v168_v20  ;;  %v4471_v12 = vor.u32 %v6004_v9, %v4470_v8  ;;  %v4479_v16 = vor.u32 %v6005_v14, %v4478_v0  ;;  %1016 = vmatpush.bf16.msra.mxu2 %v4475_v15  ;;  %v4438_v20 = vld [vmem:[#allocation3 + $0x80] sm:$0xf]  ;;  %v4480_v0 = vld [vmem:[#allocation3 + $0xe8] sm:$0xf0] }
  0xe7   :  { %4368 = vmatmul.msk.bf16.gmra.mxu0 %vm481_vm0, %v441_v22  ;;  %v5992_v22 = vld [vmem:[#allocation3 + $0x84] sm:$0xf] }
  0xe8   :  { %v299_v37 = vadd.f32 %v283_v21, %v202_v2  ;;  %967 = vmatpush.bf16.msra.mxu1 %v4471_v12  ;;  %v5996_v21 = vld [vmem:[#allocation3 + $0x9c] sm:$0xf0]  ;;  %1065 = vmatpush.bf16.msra.mxu3 %v4479_v16  ;;  %v4443_v33 = vor.u32 %v5992_v22, %v4440_v27 }
  0xe9   :  { %v4439_v24 = vor.u32 %v5996_v21, %v4438_v20  ;;  %v4448_v20 = vld [vmem:[#allocation3 + $0xa8] sm:$0xf0] }
  0xea   :  { %v396_v54 = vadd.f32 %v380_v38, %v299_v37  ;;  %v4579_v37 = vor.u32 %v6025_v31, %v4576_v32  ;;  %v354_v38 = vpop.permute.xlu2 %353  ;;  %1017 = vmatpush.bf16.msra.mxu2 %v4443_v33  ;;  %v4451_v21 = vor.u32 %v5993_v19, %v4448_v20  ;;  %v4387_v32 = vor.u32 %v5977_v28, %v4384_v30  ;;  %v6039_v19 = vld [vmem:[#allocation3 + $0x1f4] sm:$0xf0]  ;;  %v4614_v28 = vld [vmem:[#allocation3 + $0x1d0] sm:$0xf] }
  0xeb   :  { %v381_v52 = vmul.f32 %v6723_v29, %v354_v38  ;;  %v6038_v30 = vld [vmem:[#allocation3 + $0x1ec] sm:$0xf0] }
  0xec   :  { %v416_v6 = vadd.f32 %v6735_v40, %v396_v54  ;;  %968 = vmatpush.bf16.msra.mxu1 %v4439_v24  ;;  %1111 = vmatpush.bf16.msrb.mxu0 %v4579_v37  ;;  %v358_v54 = vpop.permute.xlu0 %357  ;;  %v4416_v24 = vld [vmem:[#allocation3 + $0x68] sm:$0xf0] }
  0xed   :  { %1066 = vmatpush.bf16.msra.mxu3 %v4447_v34  ;;  %v382_v9 = vmul.f32 %v6723_v29, %v358_v54 }
  0xee   :  { %v346_v58 = vpop.permute.xlu1 %345  ;;  %v432_v17 = vmax.f32 %v416_v6, 0.0  ;;  %1018 = vmatpush.bf16.msra.mxu2 %v4411_v47  ;;  %v4512_v6 = vld [vmem:[#allocation3 + $0x128] sm:$0xf0] }
  0xef   :  { %v379_v63 = vmul.f32 %v6723_v29, %v346_v58  ;;  %v4375_v58 = vor.u32 %v5980_v56, %v4374_v55  ;;  %v4515_v10 = vor.u32 %v6009_v5, %v4512_v6 }
  0xf0   :  { %969 = vmatpush.bf16.msra.mxu1 %v4407_v43  ;;  %1112 = vmatpush.bf16.msrb.mxu0 %v4547_v53  ;;  %v6818_v43 = vld [vmem:[%s7278_s4] ss:$0 sm:$0xff] }
  0xf1   :  { %v395_v7 = vadd.f32 %v379_v63, %v298_v62  ;;  %1067 = vmatpush.bf16.msra.mxu3 %v4415_v48  ;;  %v204_v62 = vmul.f32 %v6721_v26, %v6795_v4  ;;  %v6001_v4 = vld [vmem:[#allocation3 + $0xcc] sm:$0xf] }
  0xf2   :  { %1019 = vmatpush.bf16.msra.mxu2 %v4379_v1  ;;  %v4483_v14 = vor.u32 %v6001_v4, %v4480_v0 }
  0xf3   :  { %v415_v11 = vadd.f32 %v6735_v40, %v395_v7  ;;  %v188_v22 = vpop.permute.xlu2 %187 }
  0xf4   :  { %970 = vmatpush.bf16.msra.mxu1 %v4375_v58  ;;  %1113 = vmatpush.bf16.msrb.mxu0 %v4515_v10  ;;  %v206_v39 = vmul.f32 %v6721_v26, %v188_v22  ;;  %v4624_v22 = vld [vmem:[#allocation3 + $0x1f8] sm:$0xf0] }
  0xf5   :  { %v431_v18 = vmax.f32 %v415_v11, 0.0  ;;  %1068 = vmatpush.bf16.msra.mxu3 %v4383_v3 }
  0xf7   :  { %v173_v23 = vpop.permute.xlu1 %172  ;;  %v442_v2 = vpack.c.bf16 %v432_v17, %v431_v18 }
  0xf8   :  { %v203_v35 = vmul.f32 %v6721_v26, %v173_v23  ;;  %1114 = vmatpush.bf16.msrb.mxu0 %v4483_v14  ;;  %v6034_v14 = vld [vmem:[#allocation3 + $0x1d4] sm:$0xf] }
  0xf9   :  { %4369 = vmatmul.msk.bf16.gmra.mxu0 %vm481_vm0, %v442_v2  ;;  %v5985_v2 = vld [vmem:[#allocation3 + $0x4c] sm:$0xf] }
  0xfa   :  { %v300_v51 = vadd.f32 %v284_v36, %v203_v35  ;;  %v4419_v27 = vor.u32 %v5985_v2, %v4416_v24  ;;  %v362_v35 = vpop.permute.xlu0 %361 }
  0xfb   :  { %v383_v41 = vmul.f32 %v6723_v29, %v362_v35 }
  0xfc   :  { %v397_v7 = vadd.f32 %v381_v52, %v300_v51  ;;  %1115 = vmatpush.bf16.msrb.mxu0 %v4451_v21  ;;  %v269_v36 = vpop.permute.xlu2 %268  ;;  %v6035_v21 = vld [vmem:[#allocation3 + $0x1dc] sm:$0xf] }
  0xfd   :  { %v287_v42 = vmul.f32 %v6719_v25, %v269_v36  ;;  %v6026_v36 = vld [vmem:[#allocation3 + $0x194] sm:$0xf] }
  0xfe   :  { %v417_v12 = vadd.f32 %v6735_v40, %v397_v7 }
  0xff   :  { %v303_v46 = vadd.f32 %v287_v42, %v206_v39  ;;  %v6027_v42 = vld [vmem:[#allocation3 + $0x19c] sm:$0xf] }
 0x100   :  { %v261_v63 = vpop.permute.xlu1 %260  ;;  %v433_v16 = vmax.f32 %v417_v12, 0.0  ;;  %1116 = vmatpush.bf16.msrb.mxu0 %v4419_v27 }
 0x101   :  { %v285_v8 = vmul.f32 %v6719_v25, %v261_v63 }
 0x103   :  { %v301_v11 = vadd.f32 %v285_v8, %v204_v62 }
 0x104   :  { %1117 = vmatpush.bf16.msrb.mxu0 %v4387_v32 }
 0x105   :  { %v398_v13 = vadd.f32 %v382_v9, %v301_v11 }
 0x107   :  { %v418_v15 = vadd.f32 %v6735_v40, %v398_v13 }
 0x109   :  { %v434_v17 = vmax.f32 %v418_v15, 0.0  ;;  %v183_v18 = vpop.permute.xlu1 %182  ;;  %v4616_v15 = vld [vmem:[#allocation3 + $0x1f0] sm:$0xf0] }
 0x10a   :  { %v205_v34 = vmul.f32 %v6721_v26, %v183_v18  ;;  %v4619_v18 = vor.u32 %v6034_v14, %v4616_v15  ;;  %v6011_v14 = vld [vmem:[#allocation3 + $0x11c] sm:$0xf] }
 0x10b   :  { %v443_v23 = vpack.c.bf16 %v434_v17, %v433_v16  ;;  %v4622_v16 = vld [vmem:[#allocation3 + $0x1d8] sm:$0xf]  ;;  %v4528_v15 = vld [vmem:[#allocation3 + $0x138] sm:$0xf0] }
 0x10c   :  { %v4623_v20 = vor.u32 %v6039_v19, %v4622_v16  ;;  %1208 = vmatpush.bf16.msrb.mxu2 %v4619_v18  ;;  %v4486_v19 = vld [vmem:[#allocation3 + $0xd0] sm:$0xf] }
 0x10d   :  { %4370 = vmatmul.msk.bf16.gmra.mxu0 %vm481_vm0, %v443_v23  ;;  %v4627_v23 = vor.u32 %v6035_v21, %v4624_v22  ;;  %v6002_v21 = vld [vmem:[#allocation3 + $0xd4] sm:$0xf] }
 0x10e   :  { %1257 = vmatpush.bf16.msrb.mxu3 %v4623_v20  ;;  %v6006_v20 = vld [vmem:[#allocation3 + $0xec] sm:$0xf0] }
 0x10f   :  { %1306 = vmatpush.bf16.msra.mxu0 %v4627_v23  ;;  %v4487_v23 = vor.u32 %v6006_v20, %v4486_v19 }
 0x112   :  { %v265_v31 = vpop.permute.xlu1 %264 }
 0x113   :  { %v286_v33 = vmul.f32 %v6719_v25, %v265_v31  ;;  %v4615_v31 = vor.u32 %v6038_v30, %v4614_v28 }
 0x115   :  { %v302_v38 = vadd.f32 %v286_v33, %v205_v34  ;;  %1159 = vmatpush.bf16.msrb.mxu1 %v4615_v31 }
 0x116   :  { %v515_v37 = vpop.f32.mrf.mxu0 }
 0x117   :  { %v399_v44 = vadd.f32 %v383_v41, %v302_v38  ;;  %v516_v47 = vadd.f32 %v6818_v43, %v515_v37  ;;  %v4584_v37 = vld [vmem:[#allocation3 + $0x1b0] sm:$0xf0]  ;;  %v4590_v38 = vld [vmem:[#allocation3 + $0x198] sm:$0xf] }
 0x118   :  { %v4587_v39 = vor.u32 %v6026_v36, %v4584_v37  ;;  %v6031_v41 = vld [vmem:[#allocation3 + $0x1b4] sm:$0xf0]  ;;  %v5998_v37 = vld [vmem:[#allocation3 + $0xac] sm:$0xf0] }
 0x119   :  { %v419_v51 = vadd.f32 %v6735_v40, %v399_v44  ;;  %v555_v52 = vmax.f32 %v516_v47, 0.0  ;;  %v4592_v44 = vld [vmem:[#allocation3 + $0x1b8] sm:$0xf0]  ;;  %v4582_v47 = vld [vmem:[#allocation3 + $0x190] sm:$0xf] }
 0x11a   :  { %1209 = vmatpush.bf16.msrb.mxu2 %v4587_v39  ;;  %v4456_v39 = vld [vmem:[#allocation3 + $0xb0] sm:$0xf0] }
 0x11b   :  { %v366_v45 = vpop.permute.xlu1 %365  ;;  %v435_v56 = vmax.f32 %v419_v51, 0.0 }
 0x11c   :  { %v384_v48 = vmul.f32 %v6723_v29, %v366_v45  ;;  %v4591_v45 = vor.u32 %v6031_v41, %v4590_v38  ;;  %v5994_v38 = vld [vmem:[#allocation3 + $0x94] sm:$0xf] }
 0x11e   :  { %v517_v49 = vpop.f32.mrf.mxu0  ;;  %v400_v50 = vadd.f32 %v384_v48, %v303_v46  ;;  %v4595_v46 = vor.u32 %v6027_v42, %v4592_v44  ;;  %v6030_v48 = vld [vmem:[#allocation3 + $0x1ac] sm:$0xf0]  ;;  %1258 = vmatpush.bf16.msrb.mxu3 %v4591_v45  ;;  %v4462_v45 = vld [vmem:[#allocation3 + $0x98] sm:$0xf] }
 0x11f   :  { %v518_v26 = vadd.f32 %v6818_v43, %v517_v49  ;;  %v4583_v49 = vor.u32 %v6030_v48, %v4582_v47  ;;  %v5995_v47 = vld [vmem:[#allocation3 + $0x9c] sm:$0xf] }
 0x120   :  { %v420_v25 = vadd.f32 %v6735_v40, %v400_v50  ;;  %1307 = vmatpush.bf16.msra.mxu0 %v4595_v46  ;;  %v5999_v46 = vld [vmem:[#allocation3 + $0xb4] sm:$0xf0]  ;;  %v4464_v48 = vld [vmem:[#allocation3 + $0xb8] sm:$0xf0] }
 0x121   :  { %v556_v53 = vmax.f32 %v518_v26, 0.0  ;;  %1160 = vmatpush.bf16.msrb.mxu1 %v4583_v49 }
 0x122   :  { %v436_v54 = vmax.f32 %v420_v25, 0.0 }
 0x123   :  { %v6825_v55 = vpack.c.bf16 %v556_v53, %v555_v52  ;;  %v6018_v53 = vld [vmem:[#allocation3 + $0x154] sm:$0xf] }
 0x124   :  { %v444_v57 = vpack.c.bf16 %v436_v54, %v435_v56  ;;  %v4552_v54 = vld [vmem:[#allocation3 + $0x170] sm:$0xf0] }
 0x125   :  { %971 = vmatmul.bf16.vlgmr.msra.gmra.mxu1 %v6825_v55  ;;  %1020 = vmatmul.bf16.vlgmr.msra.gmra.mxu2 %v6825_v55  ;;  %v4555_v56 = vor.u32 %v6018_v53, %v4552_v54  ;;  %v5986_v53 = vld [vmem:[#allocation3 + $0x54] sm:$0xf] }
 0x126   :  { %1069 = vmatmul.bf16.vlgmr.msra.gmra.mxu3 %v6825_v55  ;;  %4371 = vmatmul.msk.bf16.gmra.mxu0 %vm481_vm0, %v444_v57  ;;  %v4558_v57 = vld [vmem:[#allocation3 + $0x158] sm:$0xf] }
 0x127   :  { %v520_v29 = vpop.f32.mrf.mxu0  ;;  %1210 = vmatpush.bf16.msrb.mxu2 %v4555_v56  ;;  %v4424_v56 = vld [vmem:[#allocation3 + $0x70] sm:$0xf0] }
 0x128   :  { %v521_v58 = vadd.f32 %v6818_v43, %v520_v29  ;;  %v6023_v29 = vld [vmem:[#allocation3 + $0x174] sm:$0xf0] }
 0x12a   :  { %v557_v60 = vmax.f32 %v521_v58, 0.0 }
 0x12f   :  { %v522_v59 = vpop.f32.mrf.mxu0 }
 0x130   :  { %v523_v40 = vadd.f32 %v6818_v43, %v522_v59  ;;  %v4559_v59 = vor.u32 %v6023_v29, %v4558_v57  ;;  %v4430_v57 = vld [vmem:[#allocation3 + $0x58] sm:$0xf] }
 0x131   :  { %v5991_v29 = vld [vmem:[#allocation3 + $0x74] sm:$0xf0] }
 0x132   :  { %v558_v61 = vmax.f32 %v523_v40, 0.0  ;;  %1259 = vmatpush.bf16.msrb.mxu3 %v4559_v59  ;;  %v6019_v40 = vld [vmem:[#allocation3 + $0x15c] sm:$0xf]  ;;  %v4427_v59 = vor.u32 %v5986_v53, %v4424_v56 }
 0x134   :  { %v6833_v62 = vpack.c.bf16 %v558_v61, %v557_v60  ;;  %v4560_v60 = vld [vmem:[#allocation3 + $0x178] sm:$0xf0] }
 0x135   :  { %v4563_v61 = vor.u32 %v6019_v40, %v4560_v60  ;;  %v4431_v40 = vor.u32 %v5991_v29, %v4430_v57  ;;  %v5987_v60 = vld [vmem:[#allocation3 + $0x5c] sm:$0xf] }
 0x136   :  { %976 = vmatmul.bf16.gmra.mxu1 %v6833_v62  ;;  %1025 = vmatmul.bf16.gmra.mxu2 %v6833_v62 }
 0x137   :  { %1074 = vmatmul.bf16.gmra.mxu3 %v6833_v62  ;;  %1118 = vmatmul.bf16.vlgmr.msrb.gmra.mxu0 %v6825_v55 }
 0x138   :  { %1308 = vmatpush.bf16.msra.mxu0 %v4563_v61  ;;  %v4432_v61 = vld [vmem:[#allocation3 + $0x78] sm:$0xf0] }
 0x139   :  { %v525_v63 = vpop.f32.mrf.mxu0 }
 0x13a   :  { %v526_v1 = vadd.f32 %v6818_v43, %v525_v63  ;;  %v4550_v63 = vld [vmem:[#allocation3 + $0x150] sm:$0xf] }
 0x13c   :  { %v559_v6 = vmax.f32 %v526_v1, 0.0  ;;  %v6022_v1 = vld [vmem:[#allocation3 + $0x16c] sm:$0xf0] }
 0x141   :  { %v527_v3 = vpop.f32.mrf.mxu0 }
 0x142   :  { %v528_v5 = vadd.f32 %v6818_v43, %v527_v3 }
 0x144   :  { %v560_v7 = vmax.f32 %v528_v5, 0.0  ;;  %v4551_v5 = vor.u32 %v6022_v1, %v4550_v63  ;;  %v4435_v63 = vor.u32 %v5987_v60, %v4432_v61  ;;  %v4390_v1 = vld [vmem:[#allocation3 + $0x10] sm:$0xf] }
 0x146   :  { %v6841_v8 = vpack.c.bf16 %v560_v7, %v559_v6  ;;  %1161 = vmatpush.bf16.msrb.mxu1 %v4551_v5  ;;  %v4518_v6 = vld [vmem:[#allocation3 + $0x110] sm:$0xf]  ;;  %v5978_v5 = vld [vmem:[#allocation3 + $0x14] sm:$0xf] }
 0x147   :  { %1123 = vmatmul.bf16.gmra.mxu0 %v6833_v62  ;;  %v6014_v7 = vld [vmem:[#allocation3 + $0x12c] sm:$0xf0] }
 0x148   :  { %981 = vmatmul.bf16.gmra.mxu1 %v6841_v8  ;;  %1030 = vmatmul.bf16.gmra.mxu2 %v6841_v8 }
 0x149   :  { %1079 = vmatmul.bf16.gmra.mxu3 %v6841_v8 }
 0x152   :  { %v530_v9 = vpop.f32.mrf.mxu0 }
 0x153   :  { %v531_v10 = vadd.f32 %v6818_v43, %v530_v9  ;;  %v4519_v9 = vor.u32 %v6014_v7, %v4518_v6  ;;  %v4392_v7 = vld [vmem:[#allocation3 + $0x30] sm:$0xf0] }
 0x155   :  { %v561_v13 = vmax.f32 %v531_v10, 0.0  ;;  %v6010_v10 = vld [vmem:[#allocation3 + $0x114] sm:$0xf]  ;;  %1162 = vmatpush.bf16.msrb.mxu1 %v4519_v9  ;;  %v4398_v9 = vld [vmem:[#allocation3 + $0x18] sm:$0xf] }
 0x157   :  { %1128 = vmatmul.bf16.gmra.mxu0 %v6841_v8 }
 0x159   :  { %1163 = vmatpush.bf16.msrb.mxu1 %v4487_v23 }
 0x15a   :  { %v532_v11 = vpop.f32.mrf.mxu0 }
 0x15b   :  { %v533_v12 = vadd.f32 %v6818_v43, %v532_v11  ;;  %v4520_v11 = vld [vmem:[#allocation3 + $0x130] sm:$0xf0] }
 0x15d   :  { %v562_v4 = vmax.f32 %v533_v12, 0.0  ;;  %v4526_v12 = vld [vmem:[#allocation3 + $0x118] sm:$0xf] }
 0x15f   :  { %v6850_v0 = vpack.c.bf16 %v562_v4, %v561_v13  ;;  %v4523_v13 = vor.u32 %v6010_v10, %v4520_v11  ;;  %v6015_v4 = vld [vmem:[#allocation3 + $0x134] sm:$0xf0]  ;;  %v5979_v11 = vld [vmem:[#allocation3 + $0x1c] sm:$0xf] }
 0x160   :  { %v4527_v16 = vor.u32 %v6015_v4, %v4526_v12  ;;  %v5983_v10 = vld [vmem:[#allocation3 + $0x34] sm:$0xf0]  ;;  %v4400_v12 = vld [vmem:[#allocation3 + $0x38] sm:$0xf0] }
 0x161   :  { %986 = vmatmul.bf16.gmra.mxu1 %v6850_v0  ;;  %1035 = vmatmul.bf16.gmra.mxu2 %v6850_v0  ;;  %v4399_v4 = vor.u32 %v5983_v10, %v4398_v9 }
 0x162   :  { %1084 = vmatmul.bf16.gmra.mxu3 %v6850_v0  ;;  %1211 = vmatpush.bf16.msrb.mxu2 %v4523_v13  ;;  %v4395_v13 = vor.u32 %v5978_v5, %v4392_v7 }
 0x163   :  { %1260 = vmatpush.bf16.msrb.mxu3 %v4527_v16 }
 0x164   :  { %v535_v17 = vpop.f32.mrf.mxu0 }
 0x165   :  { %v536_v2 = vadd.f32 %v6818_v43, %v535_v17  ;;  %v4531_v17 = vor.u32 %v6011_v14, %v4528_v15  ;;  %v4403_v14 = vor.u32 %v5979_v11, %v4400_v12 }
 0x167   :  { %1133 = vmatmul.bf16.gmra.mxu0 %v6850_v0  ;;  %v563_v32 = vmax.f32 %v536_v2, 0.0  ;;  %v4488_v2 = vld [vmem:[#allocation3 + $0xf0] sm:$0xf0] }
 0x168   :  { %1309 = vmatpush.bf16.msra.mxu0 %v4531_v17  ;;  %v4491_v30 = vor.u32 %v6002_v21, %v4488_v2 }
 0x16a   :  { %1212 = vmatpush.bf16.msrb.mxu2 %v4491_v30 }
 0x16c   :  { %v537_v24 = vpop.f32.mrf.mxu0 }
 0x16d   :  { %v538_v27 = vadd.f32 %v6818_v43, %v537_v24  ;;  %v4494_v24 = vld [vmem:[#allocation3 + $0xd8] sm:$0xf] }
 0x16f   :  { %v564_v33 = vmax.f32 %v538_v27, 0.0  ;;  %v6007_v27 = vld [vmem:[#allocation3 + $0xf4] sm:$0xf0] }
 0x170   :  { %v4495_v31 = vor.u32 %v6007_v27, %v4494_v24 }
 0x171   :  { %v6858_v34 = vpack.c.bf16 %v564_v33, %v563_v32  ;;  %v6003_v32 = vld [vmem:[#allocation3 + $0xdc] sm:$0xf] }
 0x172   :  { %v4496_v33 = vld [vmem:[#allocation3 + $0xf8] sm:$0xf0]  ;;  %1261 = vmatpush.bf16.msrb.mxu3 %v4495_v31 }
 0x173   :  { %991 = vmatmul.bf16.gmra.mxu1 %v6858_v34  ;;  %1040 = vmatmul.bf16.gmra.mxu2 %v6858_v34  ;;  %v4499_v36 = vor.u32 %v6003_v32, %v4496_v33 }
 0x174   :  { %1089 = vmatmul.bf16.gmra.mxu3 %v6858_v34 }
 0x175   :  { %1310 = vmatpush.bf16.msra.mxu0 %v4499_v36 }
 0x176   :  { %v540_v35 = vpop.f32.mrf.mxu0 }
 0x177   :  { %1138 = vmatmul.bf16.gmra.mxu0 %v6858_v34  ;;  %v541_v50 = vadd.f32 %v6818_v43, %v540_v35  ;;  %v4454_v35 = vld [vmem:[#allocation3 + $0x90] sm:$0xf] }
 0x178   :  { %v4455_v44 = vor.u32 %v5998_v37, %v4454_v35 }
 0x179   :  { %v565_v52 = vmax.f32 %v541_v50, 0.0  ;;  %v4459_v50 = vor.u32 %v5994_v38, %v4456_v39 }
 0x17a   :  { %1164 = vmatpush.bf16.msrb.mxu1 %v4455_v44 }
 0x17b   :  { %1213 = vmatpush.bf16.msrb.mxu2 %v4459_v50 }
 0x17e   :  { %v542_v26 = vpop.f32.mrf.mxu0 }
 0x17f   :  { %v543_v51 = vadd.f32 %v6818_v43, %v542_v26  ;;  %v4463_v26 = vor.u32 %v5999_v46, %v4462_v45  ;;  %1214 = vmatpush.bf16.msrb.mxu2 %v4427_v59 }
 0x181   :  { %v566_v25 = vmax.f32 %v543_v51, 0.0  ;;  %v4467_v51 = vor.u32 %v5995_v47, %v4464_v48  ;;  %1262 = vmatpush.bf16.msrb.mxu3 %v4463_v26 }
 0x183   :  { %v6866_v58 = vpack.c.bf16 %v566_v25, %v565_v52  ;;  %v4422_v52 = vld [vmem:[#allocation3 + $0x50] sm:$0xf]  ;;  %1311 = vmatpush.bf16.msra.mxu0 %v4467_v51  ;;  %1215 = vmatpush.bf16.msrb.mxu2 %v4395_v13 }
 0x184   :  { %v5990_v25 = vld [vmem:[#allocation3 + $0x6c] sm:$0xf0] }
 0x185   :  { %996 = vmatmul.bf16.gmra.mxu1 %v6866_v58  ;;  %1045 = vmatmul.bf16.gmra.mxu2 %v6866_v58  ;;  %v4423_v54 = vor.u32 %v5990_v25, %v4422_v52 }
 0x186   :  { %1094 = vmatmul.bf16.gmra.mxu3 %v6866_v58 }
 0x187   :  { %1143 = vmatmul.bf16.gmra.mxu0 %v6866_v58  ;;  %1165 = vmatpush.bf16.msrb.mxu1 %v4423_v54 }
 0x188   :  { %1263 = vmatpush.bf16.msrb.mxu3 %v4431_v40  ;;  %1312 = vmatpush.bf16.msra.mxu0 %v4435_v63 }
 0x18a   :  { %v545_v3 = vpop.f32.mrf.mxu0 }
 0x18b   :  { %v546_v18 = vadd.f32 %v6818_v43, %v545_v3  ;;  %v5982_v3 = vld [vmem:[#allocation3 + $0x2c] sm:$0xf0] }
 0x18c   :  { %v4391_v6 = vor.u32 %v5982_v3, %v4390_v1  ;;  %1264 = vmatpush.bf16.msrb.mxu3 %v4399_v4  ;;  %1313 = vmatpush.bf16.msra.mxu0 %v4403_v14 }
 0x18d   :  { %v567_v41 = vmax.f32 %v546_v18, 0.0 }
 0x18e   :  { %1166 = vmatpush.bf16.msrb.mxu1 %v4391_v6 }
 0x192   :  { %v547_v22 = vpop.f32.mrf.mxu0 }
 0x193   :  { %v548_v28 = vadd.f32 %v6818_v43, %v547_v22 }
 0x195   :  { %v568_v42 = vmax.f32 %v548_v28, 0.0 }
 0x197   :  { %v6874_v49 = vpack.c.bf16 %v568_v42, %v567_v41 }
 0x199   :  { %1001 = vmatmul.bf16.gmra.mxu1 %v6874_v49  ;;  %1050 = vmatmul.bf16.gmra.mxu2 %v6874_v49 }
 0x19a   :  { %1099 = vmatmul.bf16.gmra.mxu3 %v6874_v49  ;;  %1148 = vmatmul.bf16.gmra.mxu0 %v6874_v49 }
 0x1a2   :  { %v972_v15 = vpop.f32.mrf.mxu1 }
 0x1a3   :  { %v550_v16 = vpop.f32.mrf.mxu0 }
 0x1a4   :  { %v551_v20 = vadd.f32 %v6818_v43, %v550_v16 }
 0x1a6   :  { %v569_v23 = vmax.f32 %v551_v20, 0.0 }
 0x1a8   :  { %v1021_v17 = vpop.f32.mrf.mxu2 }
 0x1a9   :  { %v1070_v18 = vpop.f32.mrf.mxu3 }
 0x1aa   :  { %v974_v19 = vpop.f32.mrf.mxu1 }
 0x1ab   :  { %v552_v21 = vpop.f32.mrf.mxu0  ;;  %v1355_v30 = vmax.f32 %v972_v15, %v974_v19 }
 0x1ac   :  { %v553_v22 = vadd.f32 %v6818_v43, %v552_v21 }
 0x1ae   :  { %v570_v2 = vmax.f32 %v553_v22, 0.0 }
 0x1b0   :  { %v1023_v24 = vpop.f32.mrf.mxu2  ;;  %v6882_v27 = vpack.c.bf16 %v570_v2, %v569_v23 }
 0x1b1   :  { %v1072_v28 = vpop.f32.mrf.mxu3  ;;  %v1368_v35 = vmax.f32 %v1021_v17, %v1023_v24 }
 0x1b2   :  { %1006 = vmatmul.bf16.gmra.mxu1 %v6882_v27  ;;  %1055 = vmatmul.bf16.gmra.mxu2 %v6882_v27  ;;  %v1381_v43 = vmax.f32 %v1070_v18, %v1072_v28 }
 0x1b3   :  { %v977_v31 = vpop.f32.mrf.mxu1  ;;  %1104 = vmatmul.bf16.gmra.mxu3 %v6882_v27  ;;  %1153 = vmatmul.bf16.gmra.mxu0 %v6882_v27 }
 0x1b4   :  { %v1356_v32 = vmax.f32 %v1355_v30, %v977_v31  ;;  %v1119_v33 = vpop.f32.mrf.mxu0 }
 0x1b9   :  { %v1026_v36 = vpop.f32.mrf.mxu2 }
 0x1ba   :  { %v1369_v37 = vmax.f32 %v1368_v35, %v1026_v36  ;;  %v1075_v38 = vpop.f32.mrf.mxu3 }
 0x1bb   :  { %v1382_v39 = vmax.f32 %v1381_v43, %v1075_v38  ;;  %v979_v42 = vpop.f32.mrf.mxu1 }
 0x1bc   :  { %v1121_v41 = vpop.f32.mrf.mxu0  ;;  %v1357_v47 = vmax.f32 %v1356_v32, %v979_v42 }
 0x1bd   :  { %v1394_v44 = vmax.f32 %v1119_v33, %v1121_v41 }
 0x1c1   :  { %v1028_v45 = vpop.f32.mrf.mxu2 }
 0x1c2   :  { %1167 = vmatmul.bf16.vlgmr.msrb.gmra.mxu1 %v6825_v55  ;;  %1216 = vmatmul.bf16.vlgmr.msrb.gmra.mxu2 %v6825_v55  ;;  %v1077_v48 = vpop.f32.mrf.mxu3  ;;  %v1370_v52 = vmax.f32 %v1369_v37, %v1028_v45 }
 0x1c3   :  { %1265 = vmatmul.bf16.vlgmr.msrb.gmra.mxu3 %v6825_v55  ;;  %1314 = vmatmul.bf16.vlgmr.msra.gmra.mxu0 %v6825_v55  ;;  %v1383_v25 = vmax.f32 %v1382_v39, %v1077_v48 }
 0x1c4   :  { %v1124_v46 = vpop.f32.mrf.mxu0 }
 0x1c5   :  { %v1395_v50 = vmax.f32 %v1394_v44, %v1124_v46  ;;  %v982_v26 = vpop.f32.mrf.mxu1 }
 0x1c6   :  { %v1358_v51 = vmax.f32 %v1357_v47, %v982_v26 }
 0x1cb   :  { %v1031_v53 = vpop.f32.mrf.mxu2 }
 0x1cc   :  { %v1126_v54 = vpop.f32.mrf.mxu0  ;;  %v1371_v56 = vmax.f32 %v1370_v52, %v1031_v53  ;;  %v1080_v57 = vpop.f32.mrf.mxu3 }
 0x1cd   :  { %v1384_v29 = vmax.f32 %v1383_v25, %v1080_v57  ;;  %v1396_v59 = vmax.f32 %v1395_v50, %v1126_v54  ;;  %v984_v60 = vpop.f32.mrf.mxu1 }
 0x1ce   :  { %v1359_v1 = vmax.f32 %v1358_v51, %v984_v60 }
 0x1d2   :  { %1172 = vmatmul.bf16.gmra.mxu1 %v6833_v62  ;;  %1221 = vmatmul.bf16.gmra.mxu2 %v6833_v62 }
 0x1d3   :  { %1270 = vmatmul.bf16.gmra.mxu3 %v6833_v62  ;;  %1319 = vmatmul.bf16.gmra.mxu0 %v6833_v62  ;;  %v1033_v63 = vpop.f32.mrf.mxu2 }
 0x1d4   :  { %v1129_v55 = vpop.f32.mrf.mxu0  ;;  %v1082_v3 = vpop.f32.mrf.mxu3  ;;  %v1372_v9 = vmax.f32 %v1371_v56, %v1033_v63 }
 0x1d5   :  { %v1397_v40 = vmax.f32 %v1396_v59, %v1129_v55  ;;  %v1385_v10 = vmax.f32 %v1384_v29, %v1082_v3 }
 0x1dc   :  { %v1131_v61 = vpop.f32.mrf.mxu0 }
 0x1dd   :  { %v1398_v7 = vmax.f32 %v1397_v40, %v1131_v61 }
 0x1de   :  { %v987_v5 = vpop.f32.mrf.mxu1 }
 0x1df   :  { %v1360_v6 = vmax.f32 %v1359_v1, %v987_v5 }
 0x1e2   :  { %1177 = vmatmul.bf16.gmra.mxu1 %v6841_v8  ;;  %1226 = vmatmul.bf16.gmra.mxu2 %v6841_v8 }
 0x1e3   :  { %1275 = vmatmul.bf16.gmra.mxu3 %v6841_v8  ;;  %1324 = vmatmul.bf16.gmra.mxu0 %v6841_v8 }
 0x1e4   :  { %v1134_v62 = vpop.f32.mrf.mxu0  ;;  %v1036_v12 = vpop.f32.mrf.mxu2 }
 0x1e5   :  { %v1399_v11 = vmax.f32 %v1398_v7, %v1134_v62  ;;  %v1373_v13 = vmax.f32 %v1372_v9, %v1036_v12  ;;  %v1085_v4 = vpop.f32.mrf.mxu3  ;;  %v4742_v7 = vld [vmem:[#allocation6 + $0xe0] sm:$0xf]  ;;  %v6070_v9 = vld [vmem:[#allocation6 + $0xec] sm:$0xf0] }
 0x1e6   :  { %v1386_v14 = vmax.f32 %v1385_v10, %v1085_v4  ;;  %v989_v15 = vpop.f32.mrf.mxu1  ;;  %v4743_v62 = vor.u32 %v6070_v9, %v4742_v7  ;;  %v4726_v10 = vld [vmem:[#allocation6 + $0xc0] sm:$0xf] }
 0x1e7   :  { %v1361_v16 = vmax.f32 %v1360_v6, %v989_v15  ;;  %v4646_v9 = vld [vmem:[#allocation6 + $0x20] sm:$0xf] }
 0x1e8   :  { %3248 = vmatpush.bf16.msra.mxu1 %v4743_v62  ;;  %v6046_v62 = vld [vmem:[#allocation6 + $0x2c] sm:$0xf0] }
 0x1e9   :  { %v1362_v17 = vrot.slane %v1361_v16, 4 }
 0x1eb   :  { %v1363_v18 = vmax.f32 %v1361_v16, %v1362_v17  ;;  %v6062_v16 = vld [vmem:[#allocation6 + $0xac] sm:$0xf0] }
 0x1ec   :  { %v1136_v19 = vpop.f32.mrf.mxu0  ;;  %v1038_v21 = vpop.f32.mrf.mxu2 }
 0x1ed   :  { %v1400_v20 = vmax.f32 %v1399_v11, %v1136_v19  ;;  %v1374_v22 = vmax.f32 %v1373_v13, %v1038_v21  ;;  %v1087_v23 = vpop.f32.mrf.mxu3  ;;  %v1364_v28 = vrot.slane %v1363_v18, 2  ;;  %v6066_v11 = vld [vmem:[#allocation6 + $0xcc] sm:$0xf0] }
 0x1ee   :  { %v1387_v24 = vmax.f32 %v1386_v14, %v1087_v23  ;;  %v4727_v13 = vor.u32 %v6066_v11, %v4726_v10  ;;  %v6058_v19 = vld [vmem:[#allocation6 + $0x8c] sm:$0xf0] }
 0x1ef   :  { %v1401_v2 = vrot.slane %v1400_v20, 4  ;;  %v1375_v8 = vrot.slane %v1374_v22, 4  ;;  %v1365_v43 = vmax.f32 %v1363_v18, %v1364_v28  ;;  %v4694_v18 = vld [vmem:[#allocation6 + $0x80] sm:$0xf]  ;;  %v6102_v23 = vld [vmem:[#allocation6 + $0x1ec] sm:$0xf0] }
 0x1f0   :  { %v1388_v31 = vrot.slane %v1387_v24, 4  ;;  %v6906_v26 = vpop.f32.mrf.mxu1  ;;  %3249 = vmatpush.bf16.msra.mxu1 %v4727_v13  ;;  %v4695_v21 = vor.u32 %v6058_v19, %v4694_v18  ;;  %v6090_v13 = vld [vmem:[#allocation6 + $0x18c] sm:$0xf0] }
 0x1f1   :  { %v1402_v30 = vmax.f32 %v1400_v20, %v1401_v2  ;;  %v1376_v32 = vmax.f32 %v1374_v22, %v1375_v8  ;;  %v1366_v44 = vrot.slane %v1365_v43, 1  ;;  %v4870_v22 = vld [vmem:[#allocation6 + $0x1e0] sm:$0xf]  ;;  %v6134_v8 = vld [vmem:[#allocation6 + $0x2ec] sm:$0xf0] }
 0x1f2   :  { %v1389_v35 = vmax.f32 %v1387_v24, %v1388_v31  ;;  %1182 = vmatmul.bf16.gmra.mxu1 %v6850_v0  ;;  %1231 = vmatmul.bf16.gmra.mxu2 %v6850_v0  ;;  %v4998_v2 = vld [vmem:[#allocation6 + $0x2e0] sm:$0xf]  ;;  %v4871_v28 = vor.u32 %v6102_v23, %v4870_v22  ;;  %v6042_v22 = vld [vmem:[#allocation6 + $0xc] sm:$0xf0] }
 0x1f3   :  { %v1403_v33 = vrot.slane %v1402_v30, 2  ;;  %v1377_v36 = vrot.slane %v1376_v32, 2  ;;  %1280 = vmatmul.bf16.gmra.mxu3 %v6850_v0  ;;  %1329 = vmatmul.bf16.gmra.mxu0 %v6850_v0  ;;  %v1367_v25 = vmax.f32 %v1365_v43, %v1366_v44  ;;  %v4678_v31 = vld [vmem:[#allocation6 + $0x60] sm:$0xf]  ;;  %v6050_v44 = vld [vmem:[#allocation6 + $0x4c] sm:$0xf0] }
 0x1f4   :  { %v1390_v38 = vrot.slane %v1389_v35, 2  ;;  %v6904_v48 = vpop.f32.mrf.mxu0  ;;  %3261 = vmatpush.bf16.msra.mxu2 %v4871_v28  ;;  %v4854_v43 = vld [vmem:[#allocation6 + $0x1c0] sm:$0xf] }
 0x1f5   :  { %v1404_v37 = vmax.f32 %v1402_v30, %v1403_v33  ;;  %v1378_v39 = vmax.f32 %v1376_v32, %v1377_v36  ;;  %v4999_v30 = vor.u32 %v6134_v8, %v4998_v2  ;;  %v6054_v32 = vld [vmem:[#allocation6 + $0x6c] sm:$0xf0]  ;;  %v4934_v28 = vld [vmem:[#allocation6 + $0x260] sm:$0xf] }
 0x1f6   :  { %v1391_v42 = vmax.f32 %v1389_v35, %v1390_v38  ;;  %v6913_v29 = vpop.f32.mrf.mxu2  ;;  %v4679_v35 = vor.u32 %v6054_v32, %v4678_v31  ;;  %v6098_v36 = vld [vmem:[#allocation6 + $0x1cc] sm:$0xf0]  ;;  %v5126_v31 = vld [vmem:[#allocation6 + $0x3e0] sm:$0xf] }
 0x1f7   :  { %v1405_v41 = vrot.slane %v1404_v37, 1  ;;  %v1379_v45 = vrot.slane %v1378_v39, 1  ;;  %v6915_v59 = vpop.f32.mrf.mxu3  ;;  %3274 = vmatpush.bf16.msra.mxu3 %v4999_v30  ;;  %v4855_v38 = vor.u32 %v6098_v36, %v4854_v43  ;;  %v6086_v2 = vld [vmem:[#allocation6 + $0x16c] sm:$0xf0] }
 0x1f8   :  { %v1392_v47 = vrot.slane %v1391_v42, 1  ;;  %v6921_v40 = vpop.f32.mrf.mxu1  ;;  %v6118_v30 = vld [vmem:[#allocation6 + $0x26c] sm:$0xf0] }
 0x1f9   :  { %v1406_v46 = vmax.f32 %v1404_v37, %v1405_v41  ;;  %v1380_v50 = vmax.f32 %v1378_v39, %v1379_v45  ;;  %v6130_v39 = vld [vmem:[#allocation6 + $0x2cc] sm:$0xf0]  ;;  %3262 = vmatpush.bf16.msra.mxu2 %v4855_v38 }
 0x1fa   :  { %v1393_v52 = vmax.f32 %v1391_v42, %v1392_v47  ;;  %v4662_v42 = vld [vmem:[#allocation6 + $0x40] sm:$0xf]  ;;  %v6094_v47 = vld [vmem:[#allocation6 + $0x1ac] sm:$0xf0] }
 0x1fb   :  { %v1589_v51 = vrot.slane %v1406_v46, 2  ;;  %v1587_v53 = vrot.slane %v1380_v50, 6  ;;  %v4663_v45 = vor.u32 %v6050_v44, %v4662_v42  ;;  %v4838_v46 = vld [vmem:[#allocation6 + $0x1a0] sm:$0xf] }
 0x1fc   :  { %v1588_v0 = vrot.slane %v1393_v52, 4  ;;  %v6917_v55 = vpop.f32.mrf.mxu0  ;;  %v4966_v50 = vld [vmem:[#allocation6 + $0x2a0] sm:$0xf]  ;;  %v4839_v52 = vor.u32 %v6094_v47, %v4838_v46  ;;  %v6162_v47 = vld [vmem:[#allocation6 + $0x3cc] sm:$0xf0] }
 0x1fd   :  { %v1600_v54 = vsel %vm1599_vm1, %v1367_v25, %v1587_v53  ;;  %v6126_v25 = vld [vmem:[#allocation6 + $0x2ac] sm:$0xf0]  ;;  %v1498_v53 = vmax.f32 %v6904_v48, %v6917_v55  ;;  %v5110_v46 = vld [vmem:[#allocation6 + $0x3c0] sm:$0xf] }
 0x1fe   :  { %v1602_v56 = vsel %vm1601_vm2, %v1588_v0, %v1589_v51  ;;  %v6925_v60 = vpop.f32.mrf.mxu2  ;;  %v1459_v51 = vmax.f32 %v6906_v26, %v6921_v40  ;;  %3263 = vmatpush.bf16.msra.mxu2 %v4839_v52  ;;  %v4647_v26 = vor.u32 %v6046_v62, %v4646_v9  ;;  %v4822_v40 = vld [vmem:[#allocation6 + $0x180] sm:$0xf]  ;;  %v5111_v52 = vor.u32 %v6162_v47, %v5110_v46  ;;  %v6078_v9 = vld [vmem:[#allocation6 + $0x12c] sm:$0xf0] }
 0x1ff   :  { %v6911_v57 = vsel %vm1603_vm3, %v1600_v54, %v1602_v56  ;;  %v6927_v61 = vpop.f32.mrf.mxu3  ;;  %v4967_v54 = vor.u32 %v6126_v25, %v4966_v50  ;;  %v1472_v18 = vmax.f32 %v6913_v29, %v6925_v60  ;;  %v5046_v46 = vld [vmem:[#allocation6 + $0x340] sm:$0xf]  ;;  %v6146_v47 = vld [vmem:[#allocation6 + $0x34c] sm:$0xf0] }
 0x202   :  { %1187 = vmatmul.bf16.gmra.mxu1 %v6858_v34  ;;  %1236 = vmatmul.bf16.gmra.mxu2 %v6858_v34  ;;  %v6929_v63 = vpop.f32.mrf.mxu1 }
 0x203   :  { %1285 = vmatmul.bf16.gmra.mxu3 %v6858_v34  ;;  %1334 = vmatmul.bf16.gmra.mxu0 %v6858_v34  ;;  %v1460_v56 = vmax.f32 %v1459_v51, %v6929_v63 }
 0x204   :  { %v6931_v1 = vpop.f32.mrf.mxu0 }
 0x205   :  { %v1499_v10 = vmax.f32 %v1498_v53, %v6931_v1 }
 0x208   :  { %v6933_v3 = vpop.f32.mrf.mxu2 }
 0x209   :  { %v6935_v5 = vpop.f32.mrf.mxu3  ;;  %v1473_v29 = vmax.f32 %v1472_v18, %v6933_v3  ;;  %v4935_v3 = vor.u32 %v6118_v30, %v4934_v28 }
 0x20a   :  { %v6941_v34 = vpop.f32.mrf.mxu1 }
 0x20b   :  { %v1461_v48 = vmax.f32 %v1460_v56, %v6941_v34  ;;  %v1485_v34 = vmax.f32 %v6915_v59, %v6927_v61  ;;  %v4774_v56 = vld [vmem:[#allocation6 + $0x120] sm:$0xf] }
 0x20c   :  { %v6943_v6 = vpop.f32.mrf.mxu0 }
 0x20d   :  { %v1500_v63 = vmax.f32 %v1499_v10, %v6943_v6  ;;  %v4806_v6 = vld [vmem:[#allocation6 + $0x160] sm:$0xf]  ;;  %v1486_v8 = vmax.f32 %v1485_v34, %v6935_v5  ;;  %v6082_v5 = vld [vmem:[#allocation6 + $0x14c] sm:$0xf0] }
 0x210   :  { %v6945_v12 = vpop.f32.mrf.mxu2 }
 0x211   :  { %v6947_v4 = vpop.f32.mrf.mxu3 }
 0x212   :  { %1192 = vmatmul.bf16.gmra.mxu1 %v6866_v58  ;;  %1241 = vmatmul.bf16.gmra.mxu2 %v6866_v58  ;;  %v1487_v43 = vmax.f32 %v1486_v8, %v6947_v4  ;;  %v5078_v8 = vld [vmem:[#allocation6 + $0x380] sm:$0xf] }
 0x213   :  { %1290 = vmatmul.bf16.gmra.mxu3 %v6866_v58  ;;  %1339 = vmatmul.bf16.gmra.mxu0 %v6866_v58  ;;  %v4710_v58 = vld [vmem:[#allocation6 + $0xa0] sm:$0xf] }
 0x214   :  { %v4711_v17 = vor.u32 %v6062_v16, %v4710_v58  ;;  %v4950_v58 = vld [vmem:[#allocation6 + $0x280] sm:$0xf]  ;;  %v4823_v16 = vor.u32 %v6090_v13, %v4822_v40  ;;  %v6110_v40 = vld [vmem:[#allocation6 + $0x22c] sm:$0xf0] }
 0x216   :  { %v6949_v14 = vpop.f32.mrf.mxu1  ;;  %3250 = vmatpush.bf16.msra.mxu1 %v4711_v17  ;;  %v6122_v17 = vld [vmem:[#allocation6 + $0x28c] sm:$0xf0]  ;;  %3264 = vmatpush.bf16.msra.mxu2 %v4823_v16 }
 0x217   :  { %v6951_v15 = vpop.f32.mrf.mxu0  ;;  %v1462_v19 = vmax.f32 %v1461_v48, %v6949_v14  ;;  %v4951_v1 = vor.u32 %v6122_v17, %v4950_v58 }
 0x218   :  { %v1501_v23 = vmax.f32 %v1500_v63, %v6951_v15  ;;  %v4807_v15 = vor.u32 %v6086_v2, %v4806_v6 }
 0x21a   :  { %3251 = vmatpush.bf16.msra.mxu1 %v4695_v21  ;;  %v4630_v21 = vld [vmem:[#allocation6] sm:$0xf]  ;;  %3265 = vmatpush.bf16.msra.mxu2 %v4807_v15 }
 0x21b   :  { %v4631_v14 = vor.u32 %v6042_v22, %v4630_v21  ;;  %v6074_v21 = vld [vmem:[#allocation6 + $0x10c] sm:$0xf0] }
 0x21c   :  { %v6955_v20 = vpop.f32.mrf.mxu2 }
 0x21d   :  { %v6959_v24 = vpop.f32.mrf.mxu3 }
 0x21e   :  { %v6961_v33 = vpop.f32.mrf.mxu1  ;;  %3252 = vmatpush.bf16.msra.mxu1 %v4679_v35  ;;  %v1488_v50 = vmax.f32 %v1487_v43, %v6959_v24  ;;  %v5094_v24 = vld [vmem:[#allocation6 + $0x3a0] sm:$0xf] }
 0x21f   :  { %v6963_v37 = vpop.f32.mrf.mxu0  ;;  %v1463_v60 = vmax.f32 %v1462_v19, %v6961_v33  ;;  %v6166_v33 = vld [vmem:[#allocation6 + $0x3ec] sm:$0xf0] }
 0x220   :  { %v1502_v59 = vmax.f32 %v1501_v23, %v6963_v37  ;;  %v5127_v38 = vor.u32 %v6166_v33, %v5126_v31 }
 0x222   :  { %1197 = vmatmul.bf16.gmra.mxu1 %v6874_v49  ;;  %1246 = vmatmul.bf16.gmra.mxu2 %v6874_v49 }
 0x223   :  { %1295 = vmatmul.bf16.gmra.mxu3 %v6874_v49  ;;  %1344 = vmatmul.bf16.gmra.mxu0 %v6874_v49  ;;  %v4982_v49 = vld [vmem:[#allocation6 + $0x2c0] sm:$0xf] }
 0x224   :  { %v4983_v41 = vor.u32 %v6130_v39, %v4982_v49  ;;  %v6969_v0 = vpop.f32.mrf.mxu2  ;;  %3253 = vmatpush.bf16.msra.mxu1 %v4663_v45  ;;  %v4790_v39 = vld [vmem:[#allocation6 + $0x140] sm:$0xf]  ;;  %v6114_v45 = vld [vmem:[#allocation6 + $0x24c] sm:$0xf0] }
 0x225   :  { %v6972_v7 = vpop.f32.mrf.mxu3 }
 0x226   :  { %3275 = vmatpush.bf16.msra.mxu3 %v4983_v41  ;;  %v4918_v41 = vld [vmem:[#allocation6 + $0x240] sm:$0xf] }
 0x227   :  { %v4919_v4 = vor.u32 %v6114_v45, %v4918_v41 }
 0x228   :  { %3254 = vmatpush.bf16.msra.mxu1 %v4647_v26  ;;  %v4902_v26 = vld [vmem:[#allocation6 + $0x220] sm:$0xf] }
 0x22a   :  { %3276 = vmatpush.bf16.msra.mxu3 %v4967_v54  ;;  %v1489_v54 = vmax.f32 %v1488_v50, %v6972_v7 }
 0x22c   :  { %3255 = vmatpush.bf16.msra.mxu1 %v4631_v14 }
 0x22e   :  { %3277 = vmatpush.bf16.msra.mxu3 %v4951_v1  ;;  %v4758_v1 = vld [vmem:[#allocation6 + $0x100] sm:$0xf] }
 0x22f   :  { %v1007_v11 = vpop.f32.mrf.mxu1  ;;  %v4759_v6 = vor.u32 %v6074_v21, %v4758_v1 }
 0x230   :  { %v1154_v55 = vpop.f32.mrf.mxu0  ;;  %v1464_v32 = vmax.f32 %v1463_v60, %v1007_v11  ;;  %3287 = vmatpush.bf16.msrb.mxu1 %v5127_v38  ;;  %v4775_v11 = vor.u32 %v6078_v9, %v4774_v56  ;;  %v6106_v60 = vld [vmem:[#allocation6 + $0x20c] sm:$0xf0] }
 0x231   :  { %v1503_v36 = vmax.f32 %v1502_v59, %v1154_v55  ;;  %v4903_v55 = vor.u32 %v6110_v40, %v4902_v26  ;;  %v6154_v59 = vld [vmem:[#allocation6 + $0x38c] sm:$0xf0] }
 0x232   :  { %1202 = vmatmul.bf16.gmra.mxu1 %v6882_v27  ;;  %1251 = vmatmul.bf16.gmra.mxu2 %v6882_v27  ;;  %v5079_v15 = vor.u32 %v6154_v59, %v5078_v8 }
 0x233   :  { %1300 = vmatmul.bf16.gmra.mxu3 %v6882_v27  ;;  %1349 = vmatmul.bf16.gmra.mxu0 %v6882_v27  ;;  %v1474_v27 = vmax.f32 %v1473_v29, %v6945_v12  ;;  %v4791_v12 = vor.u32 %v6082_v5, %v4790_v39  ;;  %v4886_v29 = vld [vmem:[#allocation6 + $0x200] sm:$0xf] }
 0x234   :  { %3278 = vmatpush.bf16.msra.mxu3 %v4935_v3  ;;  %3288 = vmatpush.bf16.msrb.mxu1 %v5111_v52  ;;  %v4887_v28 = vor.u32 %v6106_v60, %v4886_v29  ;;  %v6150_v3 = vld [vmem:[#allocation6 + $0x36c] sm:$0xf0]  ;;  %v5047_v52 = vor.u32 %v6146_v47, %v5046_v46 }
 0x235   :  { %v1056_v61 = vpop.f32.mrf.mxu2  ;;  %v1475_v37 = vmax.f32 %v1474_v27, %v6955_v20  ;;  %3266 = vmatpush.bf16.msra.mxu2 %v4791_v12 }
 0x236   :  { %v1105_v35 = vpop.f32.mrf.mxu3 }
 0x237   :  { %v1009_v49 = vpop.f32.mrf.mxu1  ;;  %v1476_v25 = vmax.f32 %v1475_v37, %v6969_v0  ;;  %v1490_v13 = vmax.f32 %v1489_v54, %v1105_v35  ;;  %v6158_v0 = vld [vmem:[#allocation6 + $0x3ac] sm:$0xf0]  ;;  %v5062_v35 = vld [vmem:[#allocation6 + $0x360] sm:$0xf] }
 0x238   :  { %v1465_v42 = vmax.f32 %v1464_v32, %v1009_v49  ;;  %v1156_v44 = vpop.f32.mrf.mxu0  ;;  %3279 = vmatpush.bf16.msra.mxu3 %v4919_v4  ;;  %v5095_v7 = vor.u32 %v6158_v0, %v5094_v24  ;;  %v7004_v32 = vld [vmem:[%s7280_s6] sm:$0xff]  ;;  %v5063_v49 = vor.u32 %v6150_v3, %v5062_v35 }
 0x239   :  { %v1504_v51 = vmax.f32 %v1503_v36, %v1156_v44  ;;  %v1477_v62 = vmax.f32 %v1476_v25, %v1056_v61  ;;  %3267 = vmatpush.bf16.msra.mxu2 %v4775_v11  ;;  %v1648_v41 = vperm.slane %v7004_v32, 1  ;;  %v1649_v37 = vperm.slane %v7004_v32, 2  ;;  %v6142_v11 = vld [vmem:[#allocation6 + $0x32c] sm:$0xf0] }
 0x23a   :  { %v1466_v53 = vrot.slane %v1465_v42, 4  ;;  %3289 = vmatpush.bf16.msrb.mxu1 %v5095_v7  ;;  %v1650_v4 = vperm.slane %v7004_v32, 3  ;;  %v1647_v54 = vperm.slane %v7004_v32, 0 }
 0x23b   :  { %v1505_v20 = vrot.slane %v1504_v51, 4 }
 0x23c   :  { %v1467_v10 = vmax.f32 %v1465_v42, %v1466_v53  ;;  %3280 = vmatpush.bf16.msra.mxu3 %v4903_v55  ;;  %v1657_v24 = vrot.slane %v1650_v4, 2 }
 0x23d   :  { %v1506_v58 = vmax.f32 %v1504_v51, %v1505_v20  ;;  %v1058_v48 = vpop.f32.mrf.mxu2  ;;  %3268 = vmatpush.bf16.msra.mxu2 %v4759_v6  ;;  %v1655_v20 = vrot.slane %v1648_v41, 6 }
 0x23e   :  { %v1478_v16 = vmax.f32 %v1477_v62, %v1058_v48  ;;  %v1107_v17 = vpop.f32.mrf.mxu3  ;;  %v1468_v22 = vrot.slane %v1467_v10, 2  ;;  %3290 = vmatpush.bf16.msrb.mxu1 %v5079_v15  ;;  %v1656_v62 = vrot.slane %v1649_v37, 4 }
 0x23f   :  { %v1507_v63 = vrot.slane %v1506_v58, 2  ;;  %v1491_v18 = vmax.f32 %v1490_v13, %v1107_v17  ;;  %v6997_v19 = vpop.f32.mrf.mxu1 }
 0x240   :  { %v1479_v34 = vrot.slane %v1478_v16, 4  ;;  %v6999_v23 = vpop.f32.mrf.mxu0  ;;  %v1469_v31 = vmax.f32 %v1467_v10, %v1468_v22  ;;  %3281 = vmatpush.bf16.msra.mxu3 %v4887_v28  ;;  %v5030_v10 = vld [vmem:[#allocation6 + $0x320] sm:$0xf]  ;;  %v1662_v29 = vsel %vm1601_vm2, %v1656_v62, %v1657_v24 }
 0x241   :  { %v1508_v14 = vmax.f32 %v1506_v58, %v1507_v63  ;;  %v1492_v2 = vrot.slane %v1491_v18, 4  ;;  %v5031_v58 = vor.u32 %v6142_v11, %v5030_v10  ;;  %v5014_v22 = vld [vmem:[#allocation6 + $0x300] sm:$0xf] }
 0x242   :  { %v1480_v61 = vmax.f32 %v1478_v16, %v1479_v34  ;;  %v1470_v44 = vrot.slane %v1469_v31, 1  ;;  %3291 = vmatpush.bf16.msrb.mxu1 %v5063_v49  ;;  %v6138_v34 = vld [vmem:[#allocation6 + $0x30c] sm:$0xf0] }
 0x243   :  { %v1493_v30 = vmax.f32 %v1491_v18, %v1492_v2  ;;  %v1509_v33 = vrot.slane %v1508_v14, 1  ;;  %v1661_v18 = vsel %vm1599_vm1, %v1647_v54, %v1655_v20  ;;  %v5015_v60 = vor.u32 %v6138_v34, %v5014_v22 }
 0x244   :  { %v1481_v27 = vrot.slane %v1480_v61, 2  ;;  %v1471_v56 = vmax.f32 %v1469_v31, %v1470_v44  ;;  %v1663_v2 = vsel %vm1603_vm3, %v1661_v18, %v1662_v29 }
 0x245   :  { %v1494_v43 = vrot.slane %v1493_v30, 2  ;;  %v7006_v36 = vpop.f32.mrf.mxu2  ;;  %v1510_v50 = vmax.f32 %v1508_v14, %v1509_v33 }
 0x246   :  { %v1482_v38 = vmax.f32 %v1480_v61, %v1481_v27  ;;  %v7008_v39 = vpop.f32.mrf.mxu3  ;;  %3292 = vmatpush.bf16.msrb.mxu1 %v5047_v52 }
 0x247   :  { %v1495_v5 = vmax.f32 %v1493_v30, %v1494_v43  ;;  %v1170_v42 = vpop.f32.mrf.mxu1  ;;  %v1595_v26 = vrot.slane %v1510_v50, 2 }
 0x248   :  { %v1483_v12 = vrot.slane %v1482_v38, 1  ;;  %v1317_v45 = vpop.f32.mrf.mxu0  ;;  %v1407_v55 = vmax.f32 %v6997_v19, %v1170_v42 }
 0x249   :  { %v1496_v51 = vrot.slane %v1495_v5, 1  ;;  %v1446_v17 = vmax.f32 %v6999_v23, %v1317_v45 }
 0x24a   :  { %v1484_v25 = vmax.f32 %v1482_v38, %v1483_v12  ;;  %3293 = vmatpush.bf16.msrb.mxu1 %v5031_v58 }
 0x24b   :  { %v1497_v53 = vmax.f32 %v1495_v5, %v1496_v51 }
 0x24c   :  { %v1593_v9 = vrot.slane %v1484_v25, 6 }
 0x24d   :  { %v1594_v40 = vrot.slane %v1497_v53, 4  ;;  %v1219_v13 = vpop.f32.mrf.mxu2 }
 0x24e   :  { %v1608_v48 = vsel %vm1599_vm1, %v1471_v56, %v1593_v9  ;;  %v1268_v0 = vpop.f32.mrf.mxu3  ;;  %v1420_v28 = vmax.f32 %v7006_v36, %v1219_v13  ;;  %3294 = vmatpush.bf16.msrb.mxu1 %v5015_v60 }
 0x24f   :  { %v1609_v16 = vsel %vm1601_vm2, %v1594_v40, %v1595_v26  ;;  %v1173_v7 = vpop.f32.mrf.mxu1  ;;  %v1433_v59 = vmax.f32 %v7008_v39, %v1268_v0 }
 0x250   :  { %v1610_v63 = vsel %vm1603_vm3, %v1608_v48, %v1609_v16  ;;  %v1408_v1 = vmax.f32 %v1407_v55, %v1173_v7  ;;  %v1320_v21 = vpop.f32.mrf.mxu0 }
 0x251   :  { %v1618_v6 = vrot.slane %v1610_v63, 7  ;;  %v1447_v19 = vmax.f32 %v1446_v17, %v1320_v21 }
 0x253   :  { %v1620_v23 = vsel %vm1619_vm4, %v1618_v6, %v6911_v57 }
 0x254   :  { %v1622_v14 = vsel %vm1621_vm5, %v1618_v6, %v1620_v23 }
 0x255   :  { %v1624_v8 = vsel %vm1623_vm6, %v1618_v6, %v1622_v14  ;;  %v1222_v61 = vpop.f32.mrf.mxu2 }
 0x256   :  { %v1626_v15 = vsel %vm1625_vm7, %v1618_v6, %v1624_v8  ;;  %v1421_v30 = vmax.f32 %v1420_v28, %v1222_v61  ;;  %v1271_v31 = vpop.f32.mrf.mxu3 }
 0x257   :  { %v1669_v27 = vadd.f32 %v1663_v2, %v1626_v15  ;;  %v1434_v35 = vmax.f32 %v1433_v59, %v1271_v31  ;;  %v1175_v57 = vpop.f32.mrf.mxu1 }
 0x258   :  { %v1322_v3 = vpop.f32.mrf.mxu0  ;;  %v1409_v49 = vmax.f32 %v1408_v1, %v1175_v57 }
 0x259   :  { %v1671_v33 = vmax.f32 %v1669_v27, 0.0  ;;  %v1448_v36 = vmax.f32 %v1447_v19, %v1322_v3 }
 0x25b   :  { %1675 = vst [vmem:[#allocation1] ss:$4 sm:$0xff] %v1671_v33 }
 0x25d   :  { %v1224_v43 = vpop.f32.mrf.mxu2 }
 0x25e   :  { %v1273_v38 = vpop.f32.mrf.mxu3  ;;  %v1422_v47 = vmax.f32 %v1421_v30, %v1224_v43 }
 0x25f   :  { %v1178_v5 = vpop.f32.mrf.mxu1  ;;  %v1435_v51 = vmax.f32 %v1434_v35, %v1273_v38 }
 0x260   :  { %v1410_v41 = vmax.f32 %v1409_v49, %v1178_v5  ;;  %v1325_v37 = vpop.f32.mrf.mxu0 }
 0x261   :  { %v1449_v39 = vmax.f32 %v1448_v36, %v1325_v37 }
 0x262   :  { %v1678_v42 = vld.sshfl [vmem:[#allocation1] sm:$0xff pattern:$0x73625140]  ;;  %v1679_v44 = vld.sshfl [vmem:[#allocation1 + $0x8] sm:$0xff pattern:$0x73625140] }
 0x263   :  { %v7029_v12 = vpack.c.bf16 %v1678_v42, %v1678_v42  ;;  %v7031_v45 = vpack.c.bf16 %v1679_v44, %v1679_v44  ;;  %v1680_v46 = vld.sshfl [vmem:[#allocation1 + $0x10] sm:$0xff pattern:$0x73625140]  ;;  %v1681_v24 = vld.sshfl [vmem:[#allocation1 + $0x18] sm:$0xff pattern:$0x73625140] }
 0x264   :  { %v7033_v50 = vpack.c.bf16 %v1680_v46, %v1680_v46  ;;  %v7038_v58 = vpack.c.bf16 %v1681_v24, %v1681_v24  ;;  %v5254_v46 = vld [vmem:[#allocation6 + $0x4e0] sm:$0xf] }
 0x265   :  { %3256 = vmatmul.bf16.vlgmr.msra.gmra.mxu1 %v7029_v12  ;;  %3269 = vmatmul.bf16.vlgmr.msra.gmra.mxu2 %v7031_v45  ;;  %v1227_v4 = vpop.f32.mrf.mxu2 }
 0x266   :  { %3282 = vmatmul.bf16.vlgmr.msra.gmra.mxu3 %v7033_v50  ;;  %v1423_v52 = vmax.f32 %v1422_v47, %v1227_v4  ;;  %v1276_v25 = vpop.f32.mrf.mxu3  ;;  %v6198_v47 = vld [vmem:[#allocation6 + $0x4ec] sm:$0xf0] }
 0x267   :  { %v1436_v53 = vmax.f32 %v1435_v51, %v1276_v25  ;;  %v1180_v54 = vpop.f32.mrf.mxu1  ;;  %v5255_v4 = vor.u32 %v6198_v47, %v5254_v46  ;;  %v6230_v25 = vld [vmem:[#allocation6 + $0x5ec] sm:$0xf0] }
 0x268   :  { %v1327_v20 = vpop.f32.mrf.mxu0  ;;  %v1411_v9 = vmax.f32 %v1410_v41, %v1180_v54 }
 0x269   :  { %v1450_v10 = vmax.f32 %v1449_v39, %v1327_v20  ;;  %3300 = vmatpush.bf16.msrb.mxu2 %v5255_v4  ;;  %v5462_v4 = vld [vmem:[#allocation6 + $0x680] sm:$0xf] }
 0x26d   :  { %v1229_v56 = vpop.f32.mrf.mxu2 }
 0x26e   :  { %v1278_v62 = vpop.f32.mrf.mxu3  ;;  %v1424_v48 = vmax.f32 %v1423_v52, %v1229_v56  ;;  %v5382_v52 = vld [vmem:[#allocation6 + $0x5e0] sm:$0xf]  ;;  %v6262_v56 = vld [vmem:[#allocation6 + $0x6ec] sm:$0xf0] }
 0x26f   :  { %v1183_v11 = vpop.f32.mrf.mxu1  ;;  %v1437_v55 = vmax.f32 %v1436_v53, %v1278_v62  ;;  %v5510_v53 = vld [vmem:[#allocation6 + $0x6e0] sm:$0xf]  ;;  %v5383_v20 = vor.u32 %v6230_v25, %v5382_v52  ;;  %v5256_v62 = vld [vmem:[#allocation6 + $0x4f0] sm:$0xf0]  ;;  %v6250_v52 = vld [vmem:[#allocation6 + $0x68c] sm:$0xf0] }
 0x270   :  { %v1412_v26 = vmax.f32 %v1411_v9, %v1183_v11  ;;  %v1330_v40 = vpop.f32.mrf.mxu0  ;;  %v6196_v9 = vld [vmem:[#allocation6 + $0x4e4] sm:$0xf] }
 0x271   :  { %v1451_v13 = vmax.f32 %v1450_v10, %v1330_v40  ;;  %v5259_v40 = vor.u32 %v6196_v9, %v5256_v62  ;;  %3313 = vmatpush.bf16.msrb.mxu3 %v5383_v20  ;;  %v6184_v20 = vld [vmem:[#allocation6 + $0x484] sm:$0xf] }
 0x273   :  { %3404 = vmatpush.bf16.msrb.mxu0 %v5259_v40 }
 0x275   :  { %3295 = vmatmul.bf16.vlgmr.msrb.gmra.mxu1 %v7038_v58  ;;  %v1232_v0 = vpop.f32.mrf.mxu2 }
 0x276   :  { %v1425_v16 = vmax.f32 %v1424_v48, %v1232_v0  ;;  %v1281_v17 = vpop.f32.mrf.mxu3  ;;  %v6194_v0 = vld [vmem:[#allocation6 + $0x4cc] sm:$0xf0] }
 0x277   :  { %v1438_v7 = vmax.f32 %v1437_v55, %v1281_v17  ;;  %v1185_v63 = vpop.f32.mrf.mxu1  ;;  %v5238_v55 = vld [vmem:[#allocation6 + $0x4c0] sm:$0xf] }
 0x278   :  { %v1413_v18 = vmax.f32 %v1412_v26, %v1185_v63  ;;  %v1332_v1 = vpop.f32.mrf.mxu0  ;;  %v5511_v26 = vor.u32 %v6262_v56, %v5510_v53  ;;  %v5366_v63 = vld [vmem:[#allocation6 + $0x5c0] sm:$0xf]  ;;  %v5208_v56 = vld [vmem:[#allocation6 + $0x490] sm:$0xf0] }
 0x279   :  { %v1452_v21 = vmax.f32 %v1451_v13, %v1332_v1  ;;  %v5494_v1 = vld [vmem:[#allocation6 + $0x6c0] sm:$0xf]  ;;  %v5211_v62 = vor.u32 %v6184_v20, %v5208_v56  ;;  %v6170_v56 = vld [vmem:[#allocation6 + $0x40c] sm:$0xf0] }
 0x27a   :  { %v1414_v22 = vrot.slane %v1413_v18, 4  ;;  %3326 = vmatpush.bf16.msra.mxu1 %v5511_v26  ;;  %v5318_v26 = vld [vmem:[#allocation6 + $0x560] sm:$0xf] }
 0x27b   :  { %v1453_v34 = vrot.slane %v1452_v21, 4  ;;  %v5142_v20 = vld [vmem:[#allocation6 + $0x400] sm:$0xf] }
 0x27c   :  { %v1415_v6 = vmax.f32 %v1413_v18, %v1414_v22  ;;  %v6226_v18 = vld [vmem:[#allocation6 + $0x5cc] sm:$0xf0] }
 0x27d   :  { %v1454_v29 = vmax.f32 %v1452_v21, %v1453_v34  ;;  %v1234_v19 = vpop.f32.mrf.mxu2  ;;  %v5367_v34 = vor.u32 %v6226_v18, %v5366_v63  ;;  %v5192_v63 = vld [vmem:[#allocation6 + $0x470] sm:$0xf0] }
 0x27e   :  { %v1426_v60 = vmax.f32 %v1425_v16, %v1234_v19  ;;  %v1283_v23 = vpop.f32.mrf.mxu3  ;;  %v1416_v8 = vrot.slane %v1415_v6, 2  ;;  %v5240_v19 = vld [vmem:[#allocation6 + $0x4d0] sm:$0xf0] }
 0x27f   :  { %v1455_v14 = vrot.slane %v1454_v29, 2  ;;  %v1439_v2 = vmax.f32 %v1438_v7, %v1283_v23  ;;  %v7041_v28 = vpop.f32.mrf.mxu1  ;;  %v5239_v7 = vor.u32 %v6194_v0, %v5238_v55  ;;  %3314 = vmatpush.bf16.msrb.mxu3 %v5367_v34  ;;  %v6246_v55 = vld [vmem:[#allocation6 + $0x66c] sm:$0xf0] }
 0x280   :  { %v1427_v59 = vrot.slane %v1426_v60, 4  ;;  %v7043_v61 = vpop.f32.mrf.mxu0  ;;  %v1417_v35 = vmax.f32 %v1415_v6, %v1416_v8  ;;  %v6258_v6 = vld [vmem:[#allocation6 + $0x6cc] sm:$0xf0]  ;;  %v5222_v8 = vld [vmem:[#allocation6 + $0x4a0] sm:$0xf] }
 0x281   :  { %v1456_v15 = vmax.f32 %v1454_v29, %v1455_v14  ;;  %v1440_v30 = vrot.slane %v1439_v2, 4  ;;  %v6192_v29 = vld [vmem:[#allocation6 + $0x4c4] sm:$0xf]  ;;  %3301 = vmatpush.bf16.msrb.mxu2 %v5239_v7  ;;  %v5495_v14 = vor.u32 %v6258_v6, %v5494_v1  ;;  %v6178_v34 = vld [vmem:[#allocation6 + $0x44c] sm:$0xf0] }
 0x282   :  { %v1428_v31 = vmax.f32 %v1426_v60, %v1427_v59  ;;  %v1418_v41 = vrot.slane %v1417_v35, 1  ;;  %v6190_v59 = vld [vmem:[#allocation6 + $0x4ac] sm:$0xf0]  ;;  %v6180_v7 = vld [vmem:[#allocation6 + $0x464] sm:$0xf] }
 0x283   :  { %v1441_v27 = vmax.f32 %v1439_v2, %v1440_v30  ;;  %v1457_v3 = vrot.slane %v1456_v15, 1  ;;  %v5243_v2 = vor.u32 %v6192_v29, %v5240_v19  ;;  %3327 = vmatpush.bf16.msra.mxu1 %v5495_v14  ;;  %v5223_v30 = vor.u32 %v6190_v59, %v5222_v8  ;;  %v5302_v6 = vld [vmem:[#allocation6 + $0x540] sm:$0xf]  ;;  %v6210_v14 = vld [vmem:[#allocation6 + $0x54c] sm:$0xf0] }
 0x284   :  { %v1429_v57 = vrot.slane %v1428_v31, 2  ;;  %v1419_v10 = vmax.f32 %v1417_v35, %v1418_v41  ;;  %v6254_v35 = vld [vmem:[#allocation6 + $0x6ac] sm:$0xf0]  ;;  %v5195_v18 = vor.u32 %v6180_v7, %v5192_v63  ;;  %v5144_v7 = vld [vmem:[#allocation6 + $0x410] sm:$0xf0] }
 0x285   :  { %v1442_v33 = vrot.slane %v1441_v27, 2  ;;  %v7045_v43 = vpop.f32.mrf.mxu2  ;;  %v1458_v42 = vmax.f32 %v1456_v15, %v1457_v3  ;;  %v5350_v15 = vld [vmem:[#allocation6 + $0x5a0] sm:$0xf]  ;;  %3405 = vmatpush.bf16.msrb.mxu0 %v5243_v2  ;;  %3302 = vmatpush.bf16.msrb.mxu2 %v5223_v30  ;;  %v6242_v8 = vld [vmem:[#allocation6 + $0x64c] sm:$0xf0] }
 0x286   :  { %v1430_v49 = vmax.f32 %v1428_v31, %v1429_v57  ;;  %v7047_v38 = vpop.f32.mrf.mxu3  ;;  %v6222_v31 = vld [vmem:[#allocation6 + $0x5ac] sm:$0xf0]  ;;  %v5430_v2 = vld [vmem:[#allocation6 + $0x640] sm:$0xf] }
 0x287   :  { %v1443_v36 = vmax.f32 %v1441_v27, %v1442_v33  ;;  %v7049_v5 = vpop.f32.mrf.mxu1  ;;  %v1592_v24 = vrot.slane %v1458_v42, 2  ;;  %v5478_v27 = vld [vmem:[#allocation6 + $0x6a0] sm:$0xf]  ;;  %v5351_v57 = vor.u32 %v6222_v31, %v5350_v15  ;;  %v6188_v33 = vld [vmem:[#allocation6 + $0x4a4] sm:$0xf]  ;;  %v5303_v15 = vor.u32 %v6210_v14, %v5302_v6 }
 0x288   :  { %v1431_v37 = vrot.slane %v1430_v49, 1  ;;  %v7051_v39 = vpop.f32.mrf.mxu0  ;;  %v5479_v3 = vor.u32 %v6254_v35, %v5478_v27  ;;  %v6186_v42 = vld [vmem:[#allocation6 + $0x48c] sm:$0xf0]  ;;  %v5431_v30 = vor.u32 %v6242_v8, %v5430_v2  ;;  %v6176_v31 = vld [vmem:[#allocation6 + $0x444] sm:$0xf] }
 0x289   :  { %v1444_v44 = vrot.slane %v1443_v36, 1  ;;  %3315 = vmatpush.bf16.msrb.mxu3 %v5351_v57  ;;  %v5176_v27 = vld [vmem:[#allocation6 + $0x450] sm:$0xf0]  ;;  %v5638_v63 = vld [vmem:[#allocation6 + $0x7e0] sm:$0xf] }
 0x28a   :  { %v1432_v51 = vmax.f32 %v1430_v49, %v1431_v37  ;;  %v5224_v49 = vld [vmem:[#allocation6 + $0x4b0] sm:$0xf0]  ;;  %v5206_v37 = vld [vmem:[#allocation6 + $0x480] sm:$0xf]  ;;  %3328 = vmatpush.bf16.msra.mxu1 %v5479_v3  ;;  %v5179_v57 = vor.u32 %v6176_v31, %v5176_v27  ;;  %v6068_v6 = vld [vmem:[#allocation6 + $0xe4] sm:$0xf] }
 0x28b   :  { %v1445_v54 = vmax.f32 %v1443_v36, %v1444_v44  ;;  %v5227_v36 = vor.u32 %v6188_v33, %v5224_v49  ;;  %v5334_v44 = vld [vmem:[#allocation6 + $0x580] sm:$0xf]  ;;  %v5207_v47 = vor.u32 %v6186_v42, %v5206_v37  ;;  %v6174_v33 = vld [vmem:[#allocation6 + $0x42c] sm:$0xf0]  ;;  %v6100_v8 = vld [vmem:[#allocation6 + $0x1e4] sm:$0xf] }
 0x28c   :  { %v1590_v11 = vrot.slane %v1432_v51, 6  ;;  %v6218_v51 = vld [vmem:[#allocation6 + $0x58c] sm:$0xf0]  ;;  %v5158_v3 = vld [vmem:[#allocation6 + $0x420] sm:$0xf] }
 0x28d   :  { %v1591_v13 = vrot.slane %v1445_v54, 4  ;;  %v7053_v48 = vpop.f32.mrf.mxu2  ;;  %3406 = vmatpush.bf16.msrb.mxu0 %v5227_v36  ;;  %v5335_v53 = vor.u32 %v6218_v51, %v5334_v44  ;;  %v5463_v54 = vor.u32 %v6250_v52, %v5462_v4  ;;  %3303 = vmatpush.bf16.msrb.mxu2 %v5207_v47  ;;  %v5286_v49 = vld [vmem:[#allocation6 + $0x520] sm:$0xf]  ;;  %v5159_v36 = vor.u32 %v6174_v33, %v5158_v3  ;;  %v6206_v37 = vld [vmem:[#allocation6 + $0x52c] sm:$0xf0] }
 0x28e   :  { %v1605_v16 = vsel %vm1599_vm1, %v1419_v10, %v1590_v11  ;;  %v7056_v17 = vpop.f32.mrf.mxu3  ;;  %v5190_v10 = vld [vmem:[#allocation6 + $0x460] sm:$0xf]  ;;  %v6182_v11 = vld [vmem:[#allocation6 + $0x46c] sm:$0xf0]  ;;  %v5287_v47 = vor.u32 %v6206_v37, %v5286_v49  ;;  %v6172_v4 = vld [vmem:[#allocation6 + $0x424] sm:$0xf] }
 0x28f   :  { %v1606_v21 = vsel %vm1601_vm2, %v1591_v13, %v1592_v24  ;;  %v7059_v22 = vpop.f32.mrf.mxu1  ;;  %3316 = vmatpush.bf16.msrb.mxu3 %v5335_v53  ;;  %3329 = vmatpush.bf16.msra.mxu1 %v5463_v54  ;;  %v5191_v40 = vor.u32 %v6182_v11, %v5190_v10  ;;  %v6214_v24 = vld [vmem:[#allocation6 + $0x56c] sm:$0xf0]  ;;  %v5446_v13 = vld [vmem:[#allocation6 + $0x660] sm:$0xf]  ;;  %v5160_v52 = vld [vmem:[#allocation6 + $0x430] sm:$0xf0]  ;;  %v5143_v11 = vor.u32 %v6170_v56, %v5142_v20 }
 0x290   :  { %v7062_v60 = vsel %vm1603_vm3, %v1605_v16, %v1606_v21  ;;  %v7064_v23 = vpop.f32.mrf.mxu0  ;;  %v5319_v0 = vor.u32 %v6214_v24, %v5318_v26  ;;  %v5447_v16 = vor.u32 %v6246_v55, %v5446_v13  ;;  %v5174_v21 = vld [vmem:[#allocation6 + $0x440] sm:$0xf]  ;;  %v6238_v44 = vld [vmem:[#allocation6 + $0x62c] sm:$0xf0]  ;;  %v5163_v53 = vor.u32 %v6172_v4, %v5160_v52  ;;  %v6071_v27 = vld [vmem:[#allocation6 + $0xf4] sm:$0xf0] }
 0x291   :  { %3407 = vmatpush.bf16.msrb.mxu0 %v5211_v62  ;;  %3304 = vmatpush.bf16.msrb.mxu2 %v5191_v40  ;;  %v5175_v19 = vor.u32 %v6178_v34, %v5174_v21  ;;  %v5414_v42 = vld [vmem:[#allocation6 + $0x620] sm:$0xf]  ;;  %v6202_v26 = vld [vmem:[#allocation6 + $0x50c] sm:$0xf0]  ;;  %v4728_v37 = vld [vmem:[#allocation6 + $0xd0] sm:$0xf0] }
 0x292   :  { %v5415_v51 = vor.u32 %v6238_v44, %v5414_v42  ;;  %v5270_v62 = vld [vmem:[#allocation6 + $0x500] sm:$0xf]  ;;  %v6234_v24 = vld [vmem:[#allocation6 + $0x60c] sm:$0xf0]  ;;  %v6096_v42 = vld [vmem:[#allocation6 + $0x1c4] sm:$0xf]  ;;  %v1511_v44 = vmax.f32 %v7041_v28, %v7049_v5 }
 0x293   :  { %3317 = vmatpush.bf16.msrb.mxu3 %v5319_v0  ;;  %3330 = vmatpush.bf16.msra.mxu1 %v5447_v16  ;;  %v5398_v40 = vld [vmem:[#allocation6 + $0x600] sm:$0xf]  ;;  %v5271_v55 = vor.u32 %v6202_v26, %v5270_v62  ;;  %v6168_v16 = vld [vmem:[#allocation6 + $0x404] sm:$0xf]  ;;  %v6294_v34 = vld [vmem:[#allocation6 + $0x7ec] sm:$0xf0] }
 0x294   :  { %v5399_v0 = vor.u32 %v6234_v24, %v5398_v40  ;;  %v5147_v21 = vor.u32 %v6168_v16, %v5144_v7  ;;  %v5639_v14 = vor.u32 %v6294_v34, %v5638_v63  ;;  %v6290_v3 = vld [vmem:[#allocation6 + $0x7cc] sm:$0xf0]  ;;  %v4734_v4 = vld [vmem:[#allocation6 + $0xc8] sm:$0xf]  ;;  %v6067_v52 = vld [vmem:[#allocation6 + $0xd4] sm:$0xf0] }
 0x295   :  { %v7066_v41 = vpop.f32.mrf.mxu2  ;;  %3408 = vmatpush.bf16.msrb.mxu0 %v5195_v18  ;;  %3305 = vmatpush.bf16.msrb.mxu2 %v5175_v19  ;;  %v4744_v19 = vld [vmem:[#allocation6 + $0xf0] sm:$0xf0]  ;;  %v4735_v62 = vor.u32 %v6067_v52, %v4734_v4  ;;  %v5606_v40 = vld [vmem:[#allocation6 + $0x7a0] sm:$0xf]  ;;  %v6286_v24 = vld [vmem:[#allocation6 + $0x7ac] sm:$0xf0] }
 0x296   :  { %v7068_v46 = vpop.f32.mrf.mxu3  ;;  %v4747_v2 = vor.u32 %v6068_v6, %v4744_v19  ;;  %v6060_v28 = vld [vmem:[#allocation6 + $0xa4] sm:$0xf]  ;;  %v4712_v16 = vld [vmem:[#allocation6 + $0xb0] sm:$0xf0]  ;;  %v4718_v34 = vld [vmem:[#allocation6 + $0xa8] sm:$0xf]  ;;  %v1524_v19 = vmax.f32 %v7045_v43, %v7053_v48 }
 0x297   :  { %v7070_v25 = vpop.f32.mrf.mxu1  ;;  %3318 = vmatpush.bf16.msrb.mxu3 %v5303_v15  ;;  %3331 = vmatpush.bf16.msra.mxu1 %v5431_v30  ;;  %v4872_v15 = vld [vmem:[#allocation6 + $0x1f0] sm:$0xf0]  ;;  %v4750_v30 = vld [vmem:[#allocation6 + $0xe8] sm:$0xf]  ;;  %v6063_v6 = vld [vmem:[#allocation6 + $0xb4] sm:$0xf0] }
 0x298   :  { %v7072_v9 = vpop.f32.mrf.mxu0  ;;  %v4875_v31 = vor.u32 %v6100_v8, %v4872_v15  ;;  %v4751_v33 = vor.u32 %v6071_v27, %v4750_v30  ;;  %v5590_v15 = vld [vmem:[#allocation6 + $0x780] sm:$0xf]  ;;  %v6056_v27 = vld [vmem:[#allocation6 + $0x84] sm:$0xf]  ;;  %v4680_v52 = vld [vmem:[#allocation6 + $0x70] sm:$0xf0] }
 0x299   :  { %3409 = vmatpush.bf16.msrb.mxu0 %v5179_v57  ;;  %3306 = vmatpush.bf16.msrb.mxu2 %v5159_v36  ;;  %v5622_v57 = vld [vmem:[#allocation6 + $0x7c0] sm:$0xf]  ;;  %v6064_v36 = vld [vmem:[#allocation6 + $0xc4] sm:$0xf] }
 0x29a   :  { %v5623_v49 = vor.u32 %v6290_v3, %v5622_v57  ;;  %v4696_v57 = vld [vmem:[#allocation6 + $0x90] sm:$0xf0] }
 0x29b   :  { %3319 = vmatpush.bf16.msrb.mxu3 %v5287_v47  ;;  %3332 = vmatpush.bf16.msra.mxu1 %v5415_v51  ;;  %v4731_v47 = vor.u32 %v6064_v36, %v4728_v37  ;;  %v4856_v51 = vld [vmem:[#allocation6 + $0x1d0] sm:$0xf0]  ;;  %v4699_v3 = vor.u32 %v6056_v27, %v4696_v57  ;;  %v6270_v27 = vld [vmem:[#allocation6 + $0x72c] sm:$0xf0] }
 0x29c   :  { %v4859_v56 = vor.u32 %v6096_v42, %v4856_v51 }
 0x29d   :  { %v7074_v1 = vpop.f32.mrf.mxu2  ;;  %3410 = vmatpush.bf16.msrb.mxu0 %v5163_v53  ;;  %3307 = vmatpush.bf16.msrb.mxu2 %v5143_v11  ;;  %v1550_v53 = vmax.f32 %v7043_v61, %v7051_v39  ;;  %v1512_v11 = vmax.f32 %v1511_v44, %v7059_v22  ;;  %v6092_v61 = vld [vmem:[#allocation6 + $0x1a4] sm:$0xf]  ;;  %v4840_v39 = vld [vmem:[#allocation6 + $0x1b0] sm:$0xf0]  ;;  %v5574_v44 = vld [vmem:[#allocation6 + $0x760] sm:$0xf] }
 0x29e   :  { %v7076_v29 = vpop.f32.mrf.mxu3  ;;  %v4843_v22 = vor.u32 %v6092_v61, %v4840_v39  ;;  %v5558_v39 = vld [vmem:[#allocation6 + $0x740] sm:$0xf] }
 0x29f   :  { %v7078_v59 = vpop.f32.mrf.mxu1  ;;  %3320 = vmatpush.bf16.msrb.mxu3 %v5271_v55  ;;  %3333 = vmatpush.bf16.msra.mxu1 %v5399_v0  ;;  %v1551_v5 = vmax.f32 %v1550_v53, %v7064_v23  ;;  %v5607_v0 = vor.u32 %v6286_v24, %v5606_v40  ;;  %v1513_v7 = vmax.f32 %v1512_v11, %v7070_v25  ;;  %v6084_v53 = vld [vmem:[#allocation6 + $0x164] sm:$0xf] }
 0x2a0   :  { %v7080_v35 = vpop.f32.mrf.mxu0  ;;  %v1525_v25 = vmax.f32 %v1524_v19, %v7066_v41 }
 0x2a1   :  { %3411 = vmatpush.bf16.msrb.mxu0 %v5147_v21  ;;  %3339 = vmatpush.bf16.msra.mxu2 %v5639_v14  ;;  %v4715_v21 = vor.u32 %v6060_v28, %v4712_v16  ;;  %v1552_v23 = vmax.f32 %v1551_v5, %v7072_v9  ;;  %v4719_v14 = vor.u32 %v6063_v6, %v4718_v34  ;;  %v6088_v9 = vld [vmem:[#allocation6 + $0x184] sm:$0xf]  ;;  %v4686_v28 = vld [vmem:[#allocation6 + $0x68] sm:$0xf]  ;;  %v6055_v5 = vld [vmem:[#allocation6 + $0x74] sm:$0xf0] }
 0x2a2   :  { %v1514_v8 = vmax.f32 %v1513_v7, %v7078_v59  ;;  %v6274_v7 = vld [vmem:[#allocation6 + $0x74c] sm:$0xf0]  ;;  %v6048_v34 = vld [vmem:[#allocation6 + $0x44] sm:$0xf]  ;;  %v4664_v6 = vld [vmem:[#allocation6 + $0x50] sm:$0xf0] }
 0x2a3   :  { %3352 = vmatpush.bf16.msra.mxu3 %v4747_v2  ;;  %3365 = vmatpush.bf16.msrb.mxu1 %v4875_v31  ;;  %v1537_v2 = vmax.f32 %v7047_v38, %v7056_v17  ;;  %v1553_v30 = vmax.f32 %v1552_v23, %v7080_v35  ;;  %v6282_v31 = vld [vmem:[#allocation6 + $0x78c] sm:$0xf0]  ;;  %v1526_v38 = vmax.f32 %v1525_v25, %v7074_v1  ;;  %v4824_v35 = vld [vmem:[#allocation6 + $0x190] sm:$0xf0] }
 0x2a4   :  { %v5591_v41 = vor.u32 %v6282_v31, %v5590_v15  ;;  %v6051_v31 = vld [vmem:[#allocation6 + $0x54] sm:$0xf0] }
 0x2a5   :  { %v7082_v54 = vpop.f32.mrf.mxu2  ;;  %3456 = vmatpush.bf16.msra.mxu0 %v4751_v33  ;;  %3340 = vmatpush.bf16.msra.mxu2 %v5623_v49  ;;  %v1538_v43 = vmax.f32 %v1537_v2, %v7068_v46  ;;  %v4702_v33 = vld [vmem:[#allocation6 + $0x88] sm:$0xf]  ;;  %v6059_v49 = vld [vmem:[#allocation6 + $0x94] sm:$0xf0]  ;;  %v4827_v46 = vor.u32 %v6088_v9, %v4824_v35  ;;  %v4792_v2 = vld [vmem:[#allocation6 + $0x150] sm:$0xf0] }
 0x2a6   :  { %v7084_v10 = vpop.f32.mrf.mxu3  ;;  %v1527_v51 = vmax.f32 %v1526_v38, %v7082_v54  ;;  %v4687_v54 = vor.u32 %v6055_v5, %v4686_v28  ;;  %v6044_v9 = vld [vmem:[#allocation6 + $0x24] sm:$0xf]  ;;  %v4648_v38 = vld [vmem:[#allocation6 + $0x30] sm:$0xf0] }
 0x2a7   :  { %v7086_v13 = vpop.f32.mrf.mxu1  ;;  %3353 = vmatpush.bf16.msra.mxu3 %v4731_v47  ;;  %3366 = vmatpush.bf16.msrb.mxu1 %v4859_v56  ;;  %v1539_v36 = vmax.f32 %v1538_v43, %v7076_v29  ;;  %v6052_v47 = vld [vmem:[#allocation6 + $0x64] sm:$0xf]  ;;  %v4808_v56 = vld [vmem:[#allocation6 + $0x170] sm:$0xf0] }
 0x2a8   :  { %v7088_v18 = vpop.f32.mrf.mxu0  ;;  %v1515_v48 = vmax.f32 %v1514_v8, %v7086_v13  ;;  %v6278_v13 = vld [vmem:[#allocation6 + $0x76c] sm:$0xf0]  ;;  %v4683_v40 = vor.u32 %v6052_v47, %v4680_v52  ;;  %v4811_v24 = vor.u32 %v6084_v53, %v4808_v56  ;;  %v4670_v8 = vld [vmem:[#allocation6 + $0x48] sm:$0xf]  ;;  %v6076_v35 = vld [vmem:[#allocation6 + $0x124] sm:$0xf] }
 0x2a9   :  { %3457 = vmatpush.bf16.msra.mxu0 %v4735_v62  ;;  %3341 = vmatpush.bf16.msra.mxu2 %v5607_v0  ;;  %v1554_v17 = vmax.f32 %v1553_v30, %v7088_v18  ;;  %v4703_v18 = vor.u32 %v6059_v49, %v4702_v33  ;;  %v5575_v29 = vor.u32 %v6278_v13, %v5574_v44  ;;  %v4776_v33 = vld [vmem:[#allocation6 + $0x130] sm:$0xf0]  ;;  %v6040_v53 = vld [vmem:[#allocation6 + $0x4] sm:$0xf] }
 0x2aa   :  { %v4632_v56 = vld [vmem:[#allocation6 + $0x10] sm:$0xf0] }
 0x2ab   :  { %3354 = vmatpush.bf16.msra.mxu3 %v4715_v21  ;;  %3367 = vmatpush.bf16.msrb.mxu1 %v4843_v22  ;;  %v5559_v22 = vor.u32 %v6274_v7, %v5558_v39 }
 0x2ad   :  { %v7094_v20 = vpop.f32.mrf.mxu2  ;;  %3458 = vmatpush.bf16.msra.mxu0 %v4719_v14  ;;  %3342 = vmatpush.bf16.msra.mxu2 %v5591_v41  ;;  %v6080_v14 = vld [vmem:[#allocation6 + $0x144] sm:$0xf] }
 0x2ae   :  { %v7097_v26 = vpop.f32.mrf.mxu3  ;;  %v1528_v16 = vmax.f32 %v1527_v51, %v7094_v20  ;;  %v4795_v30 = vor.u32 %v6080_v14, %v4792_v2 }
 0x2af   :  { %v1203_v55 = vpop.f32.mrf.mxu1  ;;  %3355 = vmatpush.bf16.msra.mxu3 %v4699_v3  ;;  %3368 = vmatpush.bf16.msrb.mxu1 %v4827_v46  ;;  %v4651_v3 = vor.u32 %v6044_v9, %v4648_v38  ;;  %v6047_v46 = vld [vmem:[#allocation6 + $0x34] sm:$0xf0] }
 0x2b0   :  { %v1350_v63 = vpop.f32.mrf.mxu0  ;;  %v1516_v37 = vmax.f32 %v1515_v48, %v1203_v55  ;;  %v1540_v55 = vmax.f32 %v1539_v36, %v7084_v10  ;;  %v4667_v10 = vor.u32 %v6048_v34, %v4664_v6  ;;  %v4671_v48 = vor.u32 %v6051_v31, %v4670_v8 }
 0x2b1   :  { %v1555_v1 = vmax.f32 %v1554_v17, %v1350_v63  ;;  %3459 = vmatpush.bf16.msra.mxu0 %v4703_v18  ;;  %3343 = vmatpush.bf16.msra.mxu2 %v5575_v29  ;;  %v4635_v29 = vor.u32 %v6040_v53, %v4632_v56  ;;  %v1653_v6 = vperm.slane %v7004_v32, 6  ;;  %v1651_v8 = vperm.slane %v7004_v32, 4 }
 0x2b2   :  { %v1541_v63 = vmax.f32 %v1540_v55, %v7097_v26  ;;  %v5542_v26 = vld [vmem:[#allocation6 + $0x720] sm:$0xf] }
 0x2b3   :  { %3356 = vmatpush.bf16.msra.mxu3 %v4683_v40  ;;  %3369 = vmatpush.bf16.msrb.mxu1 %v4811_v24  ;;  %v5543_v41 = vor.u32 %v6270_v27, %v5542_v26  ;;  %v6072_v40 = vld [vmem:[#allocation6 + $0x104] sm:$0xf]  ;;  %v4760_v24 = vld [vmem:[#allocation6 + $0x110] sm:$0xf0] }
 0x2b4   :  { %v4763_v55 = vor.u32 %v6072_v40, %v4760_v24 }
 0x2b5   :  { %v1252_v59 = vpop.f32.mrf.mxu2  ;;  %3460 = vmatpush.bf16.msra.mxu0 %v4687_v54  ;;  %3344 = vmatpush.bf16.msra.mxu2 %v5559_v22  ;;  %v6043_v54 = vld [vmem:[#allocation6 + $0x14] sm:$0xf0] }
 0x2b6   :  { %v1301_v42 = vpop.f32.mrf.mxu3  ;;  %v1529_v19 = vmax.f32 %v1528_v16, %v1252_v59 }
 0x2b7   :  { %v1205_v4 = vpop.f32.mrf.mxu1  ;;  %v1542_v15 = vmax.f32 %v1541_v63, %v1301_v42  ;;  %3357 = vmatpush.bf16.msra.mxu3 %v4667_v10  ;;  %3370 = vmatpush.bf16.msrb.mxu1 %v4795_v30  ;;  %v4654_v42 = vld [vmem:[#allocation6 + $0x28] sm:$0xf]  ;;  %v1659_v30 = vrot.slane %v1653_v6, 4 }
 0x2b8   :  { %v1517_v62 = vmax.f32 %v1516_v37, %v1205_v4  ;;  %v1352_v11 = vpop.f32.mrf.mxu0  ;;  %v4779_v37 = vor.u32 %v6076_v35, %v4776_v33  ;;  %v4655_v47 = vor.u32 %v6047_v46, %v4654_v42  ;;  %v6266_v4 = vld [vmem:[#allocation6 + $0x70c] sm:$0xf0]  ;;  %v1958_v33 = vld [vmem:[%s7282_s8] sm:$0xf]  ;;  %v5128_v42 = vld [vmem:[#allocation6 + $0x3f0] sm:$0xf0] }
 0x2b9   :  { %v1556_v0 = vmax.f32 %v1555_v1, %v1352_v11  ;;  %3461 = vmatpush.bf16.msra.mxu0 %v4671_v48  ;;  %v5526_v1 = vld [vmem:[#allocation6 + $0x700] sm:$0xf]  ;;  %3345 = vmatpush.bf16.msra.mxu2 %v5543_v41  ;;  %v5384_v46 = vld [vmem:[#allocation6 + $0x5f0] sm:$0xf0] }
 0x2ba   :  { %v1518_v61 = vrot.slane %v1517_v62, 4  ;;  %v5527_v52 = vor.u32 %v6266_v4, %v5526_v1 }
 0x2bb   :  { %v1557_v21 = vrot.slane %v1556_v0, 4  ;;  %3358 = vmatpush.bf16.msra.mxu3 %v4651_v3  ;;  %3371 = vmatpush.bf16.msrb.mxu1 %v4779_v37  ;;  %v6164_v37 = vld [vmem:[#allocation6 + $0x3e4] sm:$0xf] }
 0x2bc   :  { %v1519_v23 = vmax.f32 %v1517_v62, %v1518_v61 }
 0x2bd   :  { %v1558_v20 = vmax.f32 %v1556_v0, %v1557_v21  ;;  %v1254_v25 = vpop.f32.mrf.mxu2  ;;  %3462 = vmatpush.bf16.msra.mxu0 %v4655_v47  ;;  %v4638_v0 = vld [vmem:[#allocation6 + $0x8] sm:$0xf]  ;;  %3346 = vmatpush.bf16.msra.mxu2 %v5527_v52  ;;  %v1652_v21 = vperm.slane %v7004_v32, 5  ;;  %v6128_v47 = vld [vmem:[#allocation6 + $0x2c4] sm:$0xf]  ;;  %v1960_v52 = vperm.slane %v1958_v33, 0 }
 0x2be   :  { %v1530_v57 = vmax.f32 %v1529_v19, %v1254_v25  ;;  %v1303_v43 = vpop.f32.mrf.mxu3  ;;  %v1520_v49 = vrot.slane %v1519_v23, 2  ;;  %v4639_v61 = vor.u32 %v6043_v54, %v4638_v0  ;;  %v1654_v19 = vperm.slane %v7004_v32, 7  ;;  %v6224_v0 = vld [vmem:[#allocation6 + $0x5c4] sm:$0xf]  ;;  %v5368_v54 = vld [vmem:[#allocation6 + $0x5d0] sm:$0xf0] }
 0x2bf   :  { %v1559_v17 = vrot.slane %v1558_v20, 2  ;;  %v1543_v59 = vmax.f32 %v1542_v15, %v1303_v43  ;;  %3359 = vmatpush.bf16.msra.mxu3 %v4635_v29  ;;  %3372 = vmatpush.bf16.msrb.mxu1 %v4763_v55  ;;  %v1658_v15 = vrot.slane %v1652_v21, 6  ;;  %v4984_v29 = vld [vmem:[#allocation6 + $0x2d0] sm:$0xf0]  ;;  %v6124_v21 = vld [vmem:[#allocation6 + $0x2a4] sm:$0xf]  ;;  %v5371_v6 = vor.u32 %v6224_v0, %v5368_v54 }
 0x2c0   :  { %v1531_v36 = vrot.slane %v1530_v57, 4  ;;  %v1521_v62 = vmax.f32 %v1519_v23, %v1520_v49  ;;  %v1660_v31 = vrot.slane %v1654_v19, 2  ;;  %v6132_v49 = vld [vmem:[#allocation6 + $0x2e4] sm:$0xf]  ;;  %v5112_v55 = vld [vmem:[#allocation6 + $0x3d0] sm:$0xf0] }
 0x2c1   :  { %v1560_v44 = vmax.f32 %v1558_v20, %v1559_v17  ;;  %v1544_v13 = vrot.slane %v1543_v59, 4  ;;  %3463 = vmatpush.bf16.msra.mxu0 %v4639_v61  ;;  %v1664_v48 = vsel %vm1599_vm1, %v1651_v8, %v1658_v15  ;;  %v6195_v61 = vld [vmem:[#allocation6 + $0x4d4] sm:$0xf0]  ;;  %v5352_v15 = vld [vmem:[#allocation6 + $0x5b0] sm:$0xf0] }
 0x2c2   :  { %v1532_v51 = vmax.f32 %v1530_v57, %v1531_v36  ;;  %v1522_v7 = vrot.slane %v1521_v62, 1  ;;  %v1665_v9 = vsel %vm1601_vm2, %v1659_v30, %v1660_v31  ;;  %v5000_v36 = vld [vmem:[#allocation6 + $0x2f0] sm:$0xf0]  ;;  %v6116_v33 = vld [vmem:[#allocation6 + $0x264] sm:$0xf] }
 0x2c3   :  { %v1545_v18 = vmax.f32 %v1543_v59, %v1544_v13  ;;  %v1561_v28 = vrot.slane %v1560_v44, 1  ;;  %v1666_v17 = vsel %vm1603_vm3, %v1664_v48, %v1665_v9  ;;  %v6199_v13 = vld [vmem:[#allocation6 + $0x4f4] sm:$0xf0]  ;;  %v6144_v54 = vld [vmem:[#allocation6 + $0x344] sm:$0xf] }
 0x2c4   :  { %v1533_v11 = vrot.slane %v1532_v51, 2  ;;  %v1523_v14 = vmax.f32 %v1521_v62, %v1522_v7 }
 0x2c5   :  { %v1546_v5 = vrot.slane %v1545_v18, 2  ;;  %v1562_v22 = vmax.f32 %v1560_v44, %v1561_v28  ;;  %v5262_v44 = vld [vmem:[#allocation6 + $0x4e8] sm:$0xf] }
 0x2c6   :  { %v1534_v16 = vmax.f32 %v1532_v51, %v1533_v11  ;;  %v5131_v11 = vor.u32 %v6164_v37, %v5128_v42  ;;  %v5263_v28 = vor.u32 %v6199_v13, %v5262_v44  ;;  %v6148_v37 = vld [vmem:[#allocation6 + $0x364] sm:$0xf]  ;;  %v5064_v42 = vld [vmem:[#allocation6 + $0x370] sm:$0xf0] }
 0x2c7   :  { %v1547_v39 = vmax.f32 %v1545_v18, %v1546_v5  ;;  %v1598_v20 = vrot.slane %v1562_v22, 2  ;;  %v5003_v18 = vor.u32 %v6132_v49, %v5000_v36  ;;  %v6160_v5 = vld [vmem:[#allocation6 + $0x3c4] sm:$0xf]  ;;  %v4968_v22 = vld [vmem:[#allocation6 + $0x2b0] sm:$0xf0] }
 0x2c8   :  { %v1535_v63 = vrot.slane %v1534_v16, 1  ;;  %v4971_v31 = vor.u32 %v6124_v21, %v4968_v22  ;;  %v4936_v36 = vld [vmem:[#allocation6 + $0x270] sm:$0xf0] }
 0x2c9   :  { %v1548_v34 = vrot.slane %v1547_v39, 1 }
 0x2ca   :  { %v1536_v23 = vmax.f32 %v1534_v16, %v1535_v63  ;;  %v5246_v16 = vld [vmem:[#allocation6 + $0x4c8] sm:$0xf]  ;;  %v5115_v63 = vor.u32 %v6160_v5, %v5112_v55  ;;  %v4920_v5 = vld [vmem:[#allocation6 + $0x250] sm:$0xf0] }
 0x2cb   :  { %v1549_v10 = vmax.f32 %v1547_v39, %v1548_v34  ;;  %v4987_v39 = vor.u32 %v6128_v47, %v4984_v29  ;;  %v5247_v19 = vor.u32 %v6195_v61, %v5246_v16  ;;  %v6212_v47 = vld [vmem:[#allocation6 + $0x564] sm:$0xf]  ;;  %v5048_v16 = vld [vmem:[#allocation6 + $0x350] sm:$0xf0] }
 0x2cc   :  { %v1596_v2 = vrot.slane %v1536_v23, 6  ;;  %v6156_v23 = vld [vmem:[#allocation6 + $0x3a4] sm:$0xf]  ;;  %v5051_v22 = vor.u32 %v6144_v54, %v5048_v16 }
 0x2cd   :  { %v1597_v25 = vrot.slane %v1549_v10, 4  ;;  %v5096_v10 = vld [vmem:[#allocation6 + $0x3b0] sm:$0xf0]  ;;  %v6208_v61 = vld [vmem:[#allocation6 + $0x544] sm:$0xf] }
 0x2ce   :  { %v1611_v26 = vsel %vm1599_vm1, %v1523_v14, %v1596_v2  ;;  %v6220_v14 = vld [vmem:[#allocation6 + $0x5a4] sm:$0xf] }
 0x2cf   :  { %v1612_v27 = vsel %vm1601_vm2, %v1597_v25, %v1598_v20  ;;  %v5230_v20 = vld [vmem:[#allocation6 + $0x4a8] sm:$0xf]  ;;  %v6191_v25 = vld [vmem:[#allocation6 + $0x4b4] sm:$0xf0]  ;;  %v5355_v48 = vor.u32 %v6220_v14, %v5352_v15  ;;  %v5032_v14 = vld [vmem:[#allocation6 + $0x330] sm:$0xf0] }
 0x2d0   :  { %v1613_v57 = vsel %vm1603_vm3, %v1611_v26, %v1612_v27  ;;  %v5099_v27 = vor.u32 %v6156_v23, %v5096_v10  ;;  %v5231_v9 = vor.u32 %v6191_v25, %v5230_v20  ;;  %v6140_v10 = vld [vmem:[#allocation6 + $0x324] sm:$0xf]  ;;  %v5166_v15 = vld [vmem:[#allocation6 + $0x428] sm:$0xf]  ;;  %v6175_v20 = vld [vmem:[#allocation6 + $0x434] sm:$0xf0] }
 0x2d1   :  { %v1629_v43 = vrot.slane %v1613_v57, 7  ;;  %v6120_v57 = vld [vmem:[#allocation6 + $0x284] sm:$0xf] }
 0x2d3   :  { %v1630_v38 = vsel %vm1619_vm4, %v1629_v43, %v7062_v60  ;;  %v6228_v60 = vld [vmem:[#allocation6 + $0x5e4] sm:$0xf] }
 0x2d4   :  { %v1631_v32 = vsel %vm1621_vm5, %v1629_v43, %v1630_v38  ;;  %v5387_v24 = vor.u32 %v6228_v60, %v5384_v46  ;;  %v6152_v38 = vld [vmem:[#allocation6 + $0x384] sm:$0xf] }
 0x2d5   :  { %v1632_v59 = vsel %vm1623_vm6, %v1629_v43, %v1631_v32  ;;  %v5080_v32 = vld [vmem:[#allocation6 + $0x390] sm:$0xf0] }
 0x2d6   :  { %v1633_v41 = vsel %vm1625_vm7, %v1629_v43, %v1632_v59  ;;  %v4952_v43 = vld [vmem:[#allocation6 + $0x290] sm:$0xf0]  ;;  %v5083_v49 = vor.u32 %v6152_v38, %v5080_v32  ;;  %v5167_v38 = vor.u32 %v6175_v20, %v5166_v15  ;;  %v6280_v20 = vld [vmem:[#allocation6 + $0x784] sm:$0xf] }
 0x2d7   :  { %v1670_v3 = vadd.f32 %v1666_v17, %v1633_v41  ;;  %v6216_v17 = vld [vmem:[#allocation6 + $0x584] sm:$0xf]  ;;  %v5336_v59 = vld [vmem:[#allocation6 + $0x590] sm:$0xf0]  ;;  %v5214_v41 = vld [vmem:[#allocation6 + $0x488] sm:$0xf] }
 0x2d8   :  { %v5339_v46 = vor.u32 %v6216_v17, %v5336_v59  ;;  %v5272_v32 = vld [vmem:[#allocation6 + $0x510] sm:$0xf0]  ;;  %v6260_v17 = vld [vmem:[#allocation6 + $0x6e4] sm:$0xf] }
 0x2d9   :  { %v1672_v35 = vmax.f32 %v1670_v3, 0.0  ;;  %v6187_v3 = vld [vmem:[#allocation6 + $0x494] sm:$0xf0]  ;;  %v5512_v59 = vld [vmem:[#allocation6 + $0x6f0] sm:$0xf0] }
 0x2da   :  { %v5215_v44 = vor.u32 %v6187_v3, %v5214_v41  ;;  %v5150_v41 = vld [vmem:[#allocation6 + $0x408] sm:$0xf]  ;;  %v6171_v3 = vld [vmem:[#allocation6 + $0x414] sm:$0xf0]  ;;  %v5464_v15 = vld [vmem:[#allocation6 + $0x690] sm:$0xf0] }
 0x2db   :  { %1677 = vst [vmem:[#allocation1 + $0x20] ss:$4 sm:$0xff] %v1672_v35  ;;  %v4955_v35 = vor.u32 %v6120_v57, %v4952_v43  ;;  %v6136_v57 = vld [vmem:[#allocation6 + $0x304] sm:$0xf]  ;;  %v5016_v43 = vld [vmem:[#allocation6 + $0x310] sm:$0xf0] }
 0x2e2   :  { %v3257_v51 = vpop.f32.mrf.mxu1  ;;  %v1682_v1 = vld.sshfl [vmem:[#allocation1 + $0x20] sm:$0xff pattern:$0x73625140]  ;;  %v1683_v4 = vld.sshfl [vmem:[#allocation1 + $0x28] sm:$0xff pattern:$0x73625140] }
 0x2e3   :  { %v7136_v53 = vpack.c.bf16 %v1682_v1, %v1682_v1  ;;  %v7138_v56 = vpack.c.bf16 %v1683_v4, %v1683_v4  ;;  %v1684_v62 = vld.sshfl [vmem:[#allocation1 + $0x30] sm:$0xff pattern:$0x73625140]  ;;  %v3258_v7 = vadd.f32 %v3257_v51, %v1960_v52  ;;  %v1685_v13 = vld.sshfl [vmem:[#allocation1 + $0x38] sm:$0xff pattern:$0x73625140] }
 0x2e4   :  { %v7140_v40 = vpack.c.bf16 %v1684_v62, %v1684_v62  ;;  %v5320_v1 = vld [vmem:[#allocation6 + $0x570] sm:$0xf0]  ;;  %v5198_v4 = vld [vmem:[#allocation6 + $0x468] sm:$0xf]  ;;  %v4939_v62 = vor.u32 %v6116_v33, %v4936_v36  ;;  %v7148_v29 = vpack.c.bf16 %v1685_v13, %v1685_v13 }
 0x2e5   :  { %3308 = vmatmul.bf16.vlgmr.msrb.gmra.mxu2 %v7136_v53  ;;  %3321 = vmatmul.bf16.vlgmr.msrb.gmra.mxu3 %v7138_v56  ;;  %v5323_v55 = vor.u32 %v6212_v47, %v5320_v1  ;;  %v4878_v36 = vld [vmem:[#allocation6 + $0x1e8] sm:$0xf]  ;;  %v5151_v47 = vor.u32 %v6171_v3, %v5150_v41  ;;  %v5576_v41 = vld [vmem:[#allocation6 + $0x770] sm:$0xf0] }
 0x2e6   :  { %3334 = vmatmul.bf16.vlgmr.msra.gmra.mxu1 %v7140_v40  ;;  %3378 = vmatpush.bf16.msrb.mxu2 %v5003_v18  ;;  %v6183_v18 = vld [vmem:[#allocation6 + $0x474] sm:$0xf0]  ;;  %v4814_v3 = vld [vmem:[#allocation6 + $0x168] sm:$0xf] }
 0x2e7   :  { %3391 = vmatpush.bf16.msrb.mxu3 %v5131_v11  ;;  %3412 = vmatmul.bf16.vlgmr.msrb.gmra.mxu0 %v7136_v53  ;;  %v5199_v0 = vor.u32 %v6183_v18, %v5198_v4  ;;  %v6256_v4 = vld [vmem:[#allocation6 + $0x6c4] sm:$0xf]  ;;  %v5496_v18 = vld [vmem:[#allocation6 + $0x6d0] sm:$0xf0] }
 0x2e8   :  { %3417 = vmatpush.bf16.msra.mxu1 %v5387_v24  ;;  %3508 = vmatpush.bf16.msrb.mxu0 %v5263_v28  ;;  %v3270_v34 = vpop.f32.mrf.mxu2  ;;  %v5067_v24 = vor.u32 %v6148_v37, %v5064_v42  ;;  %v6112_v28 = vld [vmem:[#allocation6 + $0x244] sm:$0xf]  ;;  %v6103_v37 = vld [vmem:[#allocation6 + $0x1f4] sm:$0xf0]  ;;  %v5019_v42 = vor.u32 %v6136_v57, %v5016_v43  ;;  %v5499_v54 = vor.u32 %v6256_v4, %v5496_v18  ;;  %v4704_v57 = vld [vmem:[#allocation6 + $0x98] sm:$0xf0] }
 0x2e9   :  { %v3271_v2 = vadd.f32 %v3270_v34, %v3258_v7  ;;  %v3283_v8 = vpop.f32.mrf.mxu3  ;;  %v5182_v7 = vld [vmem:[#allocation6 + $0x448] sm:$0xf]  ;;  %v4923_v21 = vor.u32 %v6112_v28, %v4920_v5  ;;  %v6108_v34 = vld [vmem:[#allocation6 + $0x224] sm:$0xf]  ;;  %v4879_v1 = vor.u32 %v6103_v37, %v4878_v36  ;;  %v6099_v5 = vld [vmem:[#allocation6 + $0x1d4] sm:$0xf0] }
 0x2ea   :  { %3379 = vmatpush.bf16.msrb.mxu2 %v4987_v39  ;;  %v3259_v30 = vpop.f32.mrf.mxu1  ;;  %v5304_v39 = vld [vmem:[#allocation6 + $0x550] sm:$0xf0]  ;;  %v4862_v28 = vld [vmem:[#allocation6 + $0x1c8] sm:$0xf]  ;;  %v6049_v4 = vld [vmem:[#allocation6 + $0x4c] sm:$0xf] }
 0x2eb   :  { %v3284_v26 = vadd.f32 %v3283_v8, %v3271_v2  ;;  %3392 = vmatpush.bf16.msrb.mxu3 %v5115_v63  ;;  %v6179_v63 = vld [vmem:[#allocation6 + $0x454] sm:$0xf0]  ;;  %v6204_v2 = vld [vmem:[#allocation6 + $0x524] sm:$0xf]  ;;  %v5288_v8 = vld [vmem:[#allocation6 + $0x530] sm:$0xf0] }
 0x2ec   :  { %3418 = vmatpush.bf16.msra.mxu1 %v5371_v6  ;;  %3509 = vmatpush.bf16.msrb.mxu0 %v5247_v19  ;;  %v4904_v6 = vld [vmem:[#allocation6 + $0x230] sm:$0xf0]  ;;  %v5307_v19 = vor.u32 %v6208_v61, %v5304_v39  ;;  %v5183_v23 = vor.u32 %v6179_v63, %v5182_v7  ;;  %v4863_v61 = vor.u32 %v6099_v5, %v4862_v28  ;;  %v6252_v39 = vld [vmem:[#allocation6 + $0x6a4] sm:$0xf]  ;;  %v4672_v18 = vld [vmem:[#allocation6 + $0x58] sm:$0xf0] }
 0x2ed   :  { %v4907_v30 = vor.u32 %v6108_v34, %v4904_v6  ;;  %v5480_v7 = vld [vmem:[#allocation6 + $0x6b0] sm:$0xf0]  ;;  %v6284_v63 = vld [vmem:[#allocation6 + $0x7a4] sm:$0xf]  ;;  %v4846_v34 = vld [vmem:[#allocation6 + $0x1a8] sm:$0xf] }
 0x2ee   :  { %3380 = vmatpush.bf16.msrb.mxu2 %v4971_v31  ;;  %v6104_v31 = vld [vmem:[#allocation6 + $0x204] sm:$0xf]  ;;  %v6095_v6 = vld [vmem:[#allocation6 + $0x1b4] sm:$0xf0]  ;;  %v5416_v5 = vld [vmem:[#allocation6 + $0x630] sm:$0xf0] }
 0x2ef   :  { %3393 = vmatpush.bf16.msrb.mxu3 %v5099_v27  ;;  %v5035_v27 = vor.u32 %v6140_v10, %v5032_v14  ;;  %v5483_v10 = vor.u32 %v6252_v39, %v5480_v7  ;;  %v6236_v28 = vld [vmem:[#allocation6 + $0x624] sm:$0xf]  ;;  %v6045_v39 = vld [vmem:[#allocation6 + $0x2c] sm:$0xf]  ;;  %v4656_v7 = vld [vmem:[#allocation6 + $0x38] sm:$0xf0] }
 0x2f0   :  { %3419 = vmatpush.bf16.msra.mxu1 %v5355_v48  ;;  %3510 = vmatpush.bf16.msrb.mxu0 %v5231_v9  ;;  %v3272_v60 = vpop.f32.mrf.mxu2  ;;  %v6200_v48 = vld [vmem:[#allocation6 + $0x504] sm:$0xf]  ;;  %v5291_v9 = vor.u32 %v6204_v2, %v5288_v8  ;;  %v4847_v2 = vor.u32 %v6095_v6, %v4846_v34 }
 0x2f1   :  { %v3285_v51 = vpop.f32.mrf.mxu3  ;;  %v5515_v60 = vor.u32 %v6260_v17, %v5512_v59  ;;  %v5275_v13 = vor.u32 %v6200_v48, %v5272_v32  ;;  %v6248_v8 = vld [vmem:[#allocation6 + $0x684] sm:$0xf]  ;;  %v5448_v32 = vld [vmem:[#allocation6 + $0x670] sm:$0xf0] }
 0x2f2   :  { %3381 = vmatpush.bf16.msrb.mxu2 %v4955_v35  ;;  %v3296_v52 = vpop.f32.mrf.mxu1  ;;  %v6292_v35 = vld [vmem:[#allocation6 + $0x7e4] sm:$0xf]  ;;  %v5467_v43 = vor.u32 %v6248_v8, %v5464_v15  ;;  %v6041_v8 = vld [vmem:[#allocation6 + $0xc] sm:$0xf]  ;;  %v4640_v15 = vld [vmem:[#allocation6 + $0x18] sm:$0xf0] }
 0x2f3   :  { %3394 = vmatpush.bf16.msrb.mxu3 %v5083_v49  ;;  %v7146_v11 = vadd.f32 %v3296_v52, %v3284_v26  ;;  %v4888_v26 = vld [vmem:[#allocation6 + $0x210] sm:$0xf0]  ;;  %v6288_v52 = vld [vmem:[#allocation6 + $0x7c4] sm:$0xf] }
 0x2f4   :  { %3420 = vmatpush.bf16.msra.mxu1 %v5339_v46  ;;  %3511 = vmatpush.bf16.msrb.mxu0 %v5215_v44  ;;  %v4891_v33 = vor.u32 %v6104_v31, %v4888_v26  ;;  %v5640_v49 = vld [vmem:[#allocation6 + $0x7f0] sm:$0xf0]  ;;  %v6069_v46 = vld [vmem:[#allocation6 + $0xec] sm:$0xf]  ;;  %v4752_v44 = vld [vmem:[#allocation6 + $0xf8] sm:$0xf0] }
 0x2f5   :  { %3347 = vmatmul.bf16.vlgmr.msra.gmra.mxu2 %v7148_v29  ;;  %3360 = vmatmul.bf16.vlgmr.msra.gmra.mxu3 %v7029_v12  ;;  %v5643_v51 = vor.u32 %v6292_v35, %v5640_v49  ;;  %v4830_v31 = vld [vmem:[#allocation6 + $0x188] sm:$0xf]  ;;  %v6091_v26 = vld [vmem:[#allocation6 + $0x194] sm:$0xf0]  ;;  %v6276_v17 = vld [vmem:[#allocation6 + $0x764] sm:$0xf] }
 0x2f6   :  { %3373 = vmatmul.bf16.vlgmr.msrb.gmra.mxu1 %v7031_v45  ;;  %3382 = vmatpush.bf16.msrb.mxu2 %v4939_v62  ;;  %v4755_v62 = vor.u32 %v6069_v46, %v4752_v44  ;;  %v6087_v35 = vld [vmem:[#allocation6 + $0x174] sm:$0xf0]  ;;  %v4688_v49 = vld [vmem:[#allocation6 + $0x78] sm:$0xf0]  ;;  %v5579_v37 = vor.u32 %v6276_v17, %v5576_v41  ;;  %v5432_v46 = vld [vmem:[#allocation6 + $0x650] sm:$0xf0] }
 0x2f7   :  { %3395 = vmatpush.bf16.msrb.mxu3 %v5067_v24  ;;  %3464 = vmatmul.bf16.vlgmr.msra.gmra.mxu0 %v7029_v12  ;;  %v5624_v24 = vld [vmem:[#allocation6 + $0x7d0] sm:$0xf0]  ;;  %v6272_v44 = vld [vmem:[#allocation6 + $0x744] sm:$0xf] }
 0x2f8   :  { %3421 = vmatpush.bf16.msra.mxu1 %v5323_v55  ;;  %3512 = vmatpush.bf16.msrb.mxu0 %v5199_v0  ;;  %v6065_v55 = vld [vmem:[#allocation6 + $0xcc] sm:$0xf]  ;;  %v4736_v0 = vld [vmem:[#allocation6 + $0xd8] sm:$0xf0]  ;;  %v5627_v16 = vor.u32 %v6288_v52, %v5624_v24 }
 0x2fa   :  { %3383 = vmatpush.bf16.msrb.mxu2 %v4923_v21  ;;  %v3298_v25 = vpop.f32.mrf.mxu1  ;;  %v4739_v21 = vor.u32 %v6065_v55, %v4736_v0  ;;  %v6268_v55 = vld [vmem:[#allocation6 + $0x724] sm:$0xf]  ;;  %v4675_v0 = vor.u32 %v6049_v4, %v4672_v18  ;;  %v5102_v4 = vld [vmem:[#allocation6 + $0x3a8] sm:$0xf] }
 0x2fb   :  { %3396 = vmatpush.bf16.msrb.mxu3 %v5051_v22  ;;  %v5608_v22 = vld [vmem:[#allocation6 + $0x7b0] sm:$0xf0] }
 0x2fc   :  { %3422 = vmatpush.bf16.msra.mxu1 %v5307_v19  ;;  %3513 = vmatpush.bf16.msrb.mxu0 %v5183_v23  ;;  %v6061_v19 = vld [vmem:[#allocation6 + $0xac] sm:$0xf]  ;;  %v4720_v23 = vld [vmem:[#allocation6 + $0xb8] sm:$0xf0]  ;;  %v5611_v14 = vor.u32 %v6284_v63, %v5608_v22  ;;  %v5419_v63 = vor.u32 %v6236_v28, %v5416_v5  ;;  %v5400_v22 = vld [vmem:[#allocation6 + $0x610] sm:$0xf0] }
 0x2fd   :  { %v4723_v25 = vor.u32 %v6061_v19, %v4720_v23  ;;  %v6264_v19 = vld [vmem:[#allocation6 + $0x704] sm:$0xf]  ;;  %v5528_v23 = vld [vmem:[#allocation6 + $0x710] sm:$0xf0]  ;;  %v6189_v28 = vld [vmem:[#allocation6 + $0x4ac] sm:$0xf] }
 0x2fe   :  { %3384 = vmatpush.bf16.msrb.mxu2 %v4907_v30  ;;  %v5592_v30 = vld [vmem:[#allocation6 + $0x790] sm:$0xf0]  ;;  %v5232_v5 = vld [vmem:[#allocation6 + $0x4b8] sm:$0xf0] }
 0x2ff   :  { %3397 = vmatpush.bf16.msrb.mxu3 %v5035_v27  ;;  %v6057_v27 = vld [vmem:[#allocation6 + $0x8c] sm:$0xf]  ;;  %v5595_v48 = vor.u32 %v6280_v20, %v5592_v30  ;;  %v5006_v20 = vld [vmem:[#allocation6 + $0x2e8] sm:$0xf] }
 0x300   :  { %3423 = vmatpush.bf16.msra.mxu1 %v5291_v9  ;;  %3514 = vmatpush.bf16.msrb.mxu0 %v5167_v38  ;;  %v4831_v9 = vor.u32 %v6091_v26, %v4830_v31  ;;  %v6244_v38 = vld [vmem:[#allocation6 + $0x664] sm:$0xf]  ;;  %v4707_v59 = vor.u32 %v6057_v27, %v4704_v57  ;;  %v5134_v30 = vld [vmem:[#allocation6 + $0x3e8] sm:$0xf]  ;;  %v6167_v26 = vld [vmem:[#allocation6 + $0x3f4] sm:$0xf0] }
 0x301   :  { %v5451_v36 = vor.u32 %v6244_v38, %v5448_v32  ;;  %v5390_v27 = vld [vmem:[#allocation6 + $0x5e8] sm:$0xf]  ;;  %v6231_v57 = vld [vmem:[#allocation6 + $0x5f4] sm:$0xf0]  ;;  %v5264_v38 = vld [vmem:[#allocation6 + $0x4f8] sm:$0xf0]  ;;  %v4643_v32 = vor.u32 %v6041_v8, %v4640_v15 }
 0x302   :  { %3385 = vmatpush.bf16.msrb.mxu2 %v4891_v33  ;;  %v6053_v33 = vld [vmem:[#allocation6 + $0x6c] sm:$0xf]  ;;  %v5391_v41 = vor.u32 %v6231_v57, %v5390_v27  ;;  %v6151_v15 = vld [vmem:[#allocation6 + $0x374] sm:$0xf0] }
 0x303   :  { %3398 = vmatpush.bf16.msrb.mxu3 %v5019_v42  ;;  %v4815_v42 = vor.u32 %v6087_v35, %v4814_v3  ;;  %v4990_v3 = vld [vmem:[#allocation6 + $0x2c8] sm:$0xf]  ;;  %v6131_v35 = vld [vmem:[#allocation6 + $0x2d4] sm:$0xf0] }
 0x304   :  { %3424 = vmatpush.bf16.msra.mxu1 %v5275_v13  ;;  %3515 = vmatpush.bf16.msrb.mxu0 %v5151_v47  ;;  %v4691_v13 = vor.u32 %v6053_v33, %v4688_v49  ;;  %v5560_v47 = vld [vmem:[#allocation6 + $0x750] sm:$0xf0]  ;;  %v5118_v33 = vld [vmem:[#allocation6 + $0x3c8] sm:$0xf] }
 0x305   :  { %3386 = vmatmul.bf16.vlgmr.msrb.gmra.mxu2 %v7033_v50 }
 0x306   :  { %3430 = vmatpush.bf16.msra.mxu2 %v5515_v60  ;;  %3399 = vmatmul.bf16.vlgmr.msrb.gmra.mxu3 %v7038_v58  ;;  %v6240_v60 = vld [vmem:[#allocation6 + $0x644] sm:$0xf] }
 0x307   :  { %3443 = vmatpush.bf16.msra.mxu3 %v5643_v51  ;;  %3425 = vmatmul.bf16.vlgmr.msra.gmra.mxu1 %v7138_v56  ;;  %v4798_v51 = vld [vmem:[#allocation6 + $0x148] sm:$0xf]  ;;  %v5435_v52 = vor.u32 %v6240_v60, %v5432_v46  ;;  %v6193_v60 = vld [vmem:[#allocation6 + $0x4cc] sm:$0xf]  ;;  %v5248_v46 = vld [vmem:[#allocation6 + $0x4d8] sm:$0xf0] }
 0x308   :  { %3469 = vmatpush.bf16.msrb.mxu1 %v4879_v1  ;;  %3560 = vmatpush.bf16.msra.mxu0 %v4755_v62  ;;  %v6083_v1 = vld [vmem:[#allocation6 + $0x154] sm:$0xf0]  ;;  %v5563_v62 = vor.u32 %v6272_v44, %v5560_v47  ;;  %v4991_v44 = vor.u32 %v6131_v35, %v4990_v3  ;;  %v5251_v18 = vor.u32 %v6193_v60, %v5248_v46  ;;  %v5184_v3 = vld [vmem:[#allocation6 + $0x458] sm:$0xf0] }
 0x309   :  { %3516 = vmatmul.bf16.vlgmr.msrb.gmra.mxu0 %v7136_v53  ;;  %v4799_v24 = vor.u32 %v6083_v1, %v4798_v51  ;;  %v4974_v51 = vld [vmem:[#allocation6 + $0x2a8] sm:$0xf]  ;;  %v6127_v1 = vld [vmem:[#allocation6 + $0x2b4] sm:$0xf0] }
 0x30a   :  { %3431 = vmatpush.bf16.msra.mxu2 %v5499_v54  ;;  %v5544_v54 = vld [vmem:[#allocation6 + $0x730] sm:$0xf0]  ;;  %v6143_v46 = vld [vmem:[#allocation6 + $0x334] sm:$0xf0] }
 0x30b   :  { %3444 = vmatpush.bf16.msra.mxu3 %v5627_v16  ;;  %v4782_v16 = vld [vmem:[#allocation6 + $0x128] sm:$0xf]  ;;  %v5547_v34 = vor.u32 %v6268_v55, %v5544_v54  ;;  %v4975_v55 = vor.u32 %v6127_v1, %v4974_v51  ;;  %v5168_v51 = vld [vmem:[#allocation6 + $0x438] sm:$0xf0] }
 0x30c   :  { %3470 = vmatpush.bf16.msrb.mxu1 %v4863_v61  ;;  %3561 = vmatpush.bf16.msra.mxu0 %v4739_v21  ;;  %v6079_v61 = vld [vmem:[#allocation6 + $0x134] sm:$0xf0]  ;;  %v6232_v21 = vld [vmem:[#allocation6 + $0x604] sm:$0xf] }
 0x30d   :  { %v4783_v6 = vor.u32 %v6079_v61, %v4782_v16  ;;  %v5403_v31 = vor.u32 %v6232_v21, %v5400_v22  ;;  %v4958_v16 = vld [vmem:[#allocation6 + $0x288] sm:$0xf]  ;;  %v6123_v61 = vld [vmem:[#allocation6 + $0x294] sm:$0xf0] }
 0x30e   :  { %3432 = vmatpush.bf16.msra.mxu2 %v5483_v10  ;;  %v4766_v10 = vld [vmem:[#allocation6 + $0x108] sm:$0xf]  ;;  %v6219_v22 = vld [vmem:[#allocation6 + $0x594] sm:$0xf0] }
 0x30f   :  { %3445 = vmatpush.bf16.msra.mxu3 %v5611_v14  ;;  %v4659_v14 = vor.u32 %v6045_v39, %v4656_v7  ;;  %v5086_v39 = vld [vmem:[#allocation6 + $0x388] sm:$0xf]  ;;  %v5235_v7 = vor.u32 %v6189_v28, %v5232_v5  ;;  %v6139_v28 = vld [vmem:[#allocation6 + $0x314] sm:$0xf0] }
 0x310   :  { %3471 = vmatpush.bf16.msrb.mxu1 %v4847_v2  ;;  %3562 = vmatpush.bf16.msra.mxu0 %v4723_v25  ;;  %v6075_v2 = vld [vmem:[#allocation6 + $0x114] sm:$0xf0]  ;;  %v5342_v21 = vld [vmem:[#allocation6 + $0x588] sm:$0xf] }
 0x311   :  { %v6135_v25 = vld [vmem:[#allocation6 + $0x2f4] sm:$0xf0]  ;;  %v5278_v5 = vld [vmem:[#allocation6 + $0x508] sm:$0xf] }
 0x312   :  { %3433 = vmatpush.bf16.msra.mxu2 %v5467_v43  ;;  %v5531_v43 = vor.u32 %v6264_v19, %v5528_v23  ;;  %v5007_v17 = vor.u32 %v6135_v25, %v5006_v20  ;;  %v4959_v19 = vor.u32 %v6123_v61, %v4958_v16  ;;  %v5343_v23 = vor.u32 %v6219_v22, %v5342_v21  ;;  %v5326_v20 = vld [vmem:[#allocation6 + $0x568] sm:$0xf]  ;;  %v6215_v25 = vld [vmem:[#allocation6 + $0x574] sm:$0xf0]  ;;  %v5152_v16 = vld [vmem:[#allocation6 + $0x418] sm:$0xf0] }
 0x313   :  { %3446 = vmatpush.bf16.msra.mxu3 %v5595_v48  ;;  %v4767_v48 = vor.u32 %v6075_v2, %v4766_v10  ;;  %v4942_v10 = vld [vmem:[#allocation6 + $0x268] sm:$0xf]  ;;  %v5327_v57 = vor.u32 %v6215_v25, %v5326_v20  ;;  %v6295_v21 = vld [vmem:[#allocation6 + $0x7f4] sm:$0xf0]  ;;  %v6101_v22 = vld [vmem:[#allocation6 + $0x1ec] sm:$0xf] }
 0x314   :  { %3472 = vmatpush.bf16.msrb.mxu1 %v4831_v9  ;;  %3563 = vmatpush.bf16.msra.mxu0 %v4707_v59  ;;  %v6197_v9 = vld [vmem:[#allocation6 + $0x4ec] sm:$0xf]  ;;  %v5135_v59 = vor.u32 %v6167_v26, %v5134_v30  ;;  %v5070_v2 = vld [vmem:[#allocation6 + $0x368] sm:$0xf]  ;;  %v5710_v20 = vld [vmem:[#allocation8 + $0x70] sm:$0xf] }
 0x315   :  { %v5267_v49 = vor.u32 %v6197_v9, %v5264_v38  ;;  %v6181_v30 = vld [vmem:[#allocation6 + $0x46c] sm:$0xf]  ;;  %v5071_v27 = vor.u32 %v6151_v15, %v5070_v2  ;;  %v5054_v9 = vld [vmem:[#allocation6 + $0x348] sm:$0xf]  ;;  %v6311_v25 = vld [vmem:[#allocation8 + $0x74] sm:$0xf0] }
 0x316   :  { %3434 = vmatpush.bf16.msra.mxu2 %v5451_v36  ;;  %v6163_v36 = vld [vmem:[#allocation6 + $0x3d4] sm:$0xf0]  ;;  %v5518_v61 = vld [vmem:[#allocation6 + $0x6e8] sm:$0xf] }
 0x317   :  { %3447 = vmatpush.bf16.msra.mxu3 %v5579_v37  ;;  %v5374_v37 = vld [vmem:[#allocation6 + $0x5c8] sm:$0xf] }
 0x318   :  { %3473 = vmatpush.bf16.msrb.mxu1 %v4815_v42  ;;  %3564 = vmatpush.bf16.msra.mxu0 %v4691_v13  ;;  %v6227_v42 = vld [vmem:[#allocation6 + $0x5d4] sm:$0xf0]  ;;  %v5119_v13 = vor.u32 %v6163_v36, %v5118_v33  ;;  %v4910_v36 = vld [vmem:[#allocation6 + $0x228] sm:$0xf] }
 0x319   :  { %v5375_v47 = vor.u32 %v6227_v42, %v5374_v37  ;;  %v6111_v37 = vld [vmem:[#allocation6 + $0x234] sm:$0xf0]  ;;  %v5038_v42 = vld [vmem:[#allocation6 + $0x328] sm:$0xf] }
 0x31a   :  { %3435 = vmatpush.bf16.msra.mxu2 %v5435_v52  ;;  %v6159_v52 = vld [vmem:[#allocation6 + $0x3b4] sm:$0xf0]  ;;  %v4911_v1 = vor.u32 %v6111_v37, %v4910_v36  ;;  %v5630_v15 = vld [vmem:[#allocation6 + $0x7c8] sm:$0xf] }
 0x31b   :  { %3448 = vmatpush.bf16.msra.mxu3 %v5563_v62  ;;  %v5358_v62 = vld [vmem:[#allocation6 + $0x5a8] sm:$0xf]  ;;  %v6251_v36 = vld [vmem:[#allocation6 + $0x694] sm:$0xf0] }
 0x31c   :  { %3474 = vmatpush.bf16.msrb.mxu1 %v4799_v24  ;;  %3565 = vmatpush.bf16.msra.mxu0 %v4675_v0  ;;  %v6223_v24 = vld [vmem:[#allocation6 + $0x5b4] sm:$0xf0]  ;;  %v5103_v0 = vor.u32 %v6159_v52, %v5102_v4  ;;  %v4894_v4 = vld [vmem:[#allocation6 + $0x208] sm:$0xf]  ;;  %v5039_v52 = vor.u32 %v6143_v46, %v5038_v42 }
 0x31d   :  { %v5359_v54 = vor.u32 %v6223_v24, %v5358_v62  ;;  %v5022_v24 = vld [vmem:[#allocation6 + $0x308] sm:$0xf] }
 0x31e   :  { %3436 = vmatpush.bf16.msra.mxu2 %v5419_v63  ;;  %v6155_v63 = vld [vmem:[#allocation6 + $0x394] sm:$0xf0]  ;;  %v5598_v46 = vld [vmem:[#allocation6 + $0x788] sm:$0xf] }
 0x31f   :  { %3449 = vmatpush.bf16.msra.mxu3 %v5547_v34  ;;  %v6185_v34 = vld [vmem:[#allocation6 + $0x48c] sm:$0xf] }
 0x320   :  { %3475 = vmatpush.bf16.msrb.mxu1 %v4783_v6  ;;  %3566 = vmatpush.bf16.msra.mxu0 %v4659_v14  ;;  %v5216_v6 = vld [vmem:[#allocation6 + $0x498] sm:$0xf0]  ;;  %v6119_v14 = vld [vmem:[#allocation6 + $0x274] sm:$0xf0] }
 0x321   :  { %v5219_v8 = vor.u32 %v6185_v34, %v5216_v6  ;;  %v4943_v26 = vor.u32 %v6119_v14, %v4942_v10  ;;  %v4880_v34 = vld [vmem:[#allocation6 + $0x1f8] sm:$0xf0]  ;;  %v5023_v6 = vor.u32 %v6139_v28, %v5022_v24  ;;  %v5502_v10 = vld [vmem:[#allocation6 + $0x6c8] sm:$0xf]  ;;  %v6259_v14 = vld [vmem:[#allocation6 + $0x6d4] sm:$0xf0] }
 0x322   :  { %3437 = vmatpush.bf16.msra.mxu2 %v5403_v31  ;;  %v5200_v31 = vld [vmem:[#allocation6 + $0x478] sm:$0xf0]  ;;  %v5582_v28 = vld [vmem:[#allocation6 + $0x768] sm:$0xf] }
 0x323   :  { %3450 = vmatpush.bf16.msra.mxu3 %v5531_v43  ;;  %v4926_v43 = vld [vmem:[#allocation6 + $0x248] sm:$0xf]  ;;  %v5203_v38 = vor.u32 %v6181_v30, %v5200_v31  ;;  %v6291_v30 = vld [vmem:[#allocation6 + $0x7d4] sm:$0xf0]  ;;  %v6097_v31 = vld [vmem:[#allocation6 + $0x1cc] sm:$0xf] }
 0x324   :  { %3476 = vmatpush.bf16.msrb.mxu1 %v4767_v48  ;;  %3567 = vmatpush.bf16.msra.mxu0 %v4643_v32  ;;  %v6115_v48 = vld [vmem:[#allocation6 + $0x254] sm:$0xf0] }
 0x325   :  { %3438 = vmatmul.bf16.vlgmr.msra.gmra.mxu2 %v7140_v40  ;;  %v6147_v32 = vld [vmem:[#allocation6 + $0x354] sm:$0xf0]  ;;  %v4927_v35 = vor.u32 %v6115_v48, %v4926_v43  ;;  %v5711_v48 = vor.u32 %v6311_v25, %v5710_v20 }
 0x326   :  { %3482 = vmatpush.bf16.msrb.mxu2 %v5007_v17  ;;  %3451 = vmatmul.bf16.vlgmr.msra.gmra.mxu3 %v7148_v29  ;;  %v5310_v17 = vld [vmem:[#allocation6 + $0x548] sm:$0xf]  ;;  %v5055_v33 = vor.u32 %v6147_v32, %v5054_v9  ;;  %v6255_v43 = vld [vmem:[#allocation6 + $0x6b4] sm:$0xf0]  ;;  %v5631_v9 = vor.u32 %v6291_v30, %v5630_v15 }
 0x327   :  { %3495 = vmatpush.bf16.msrb.mxu3 %v5135_v59  ;;  %3477 = vmatmul.bf16.vlgmr.msrb.gmra.mxu1 %v7031_v45  ;;  %v6211_v59 = vld [vmem:[#allocation6 + $0x554] sm:$0xf0]  ;;  %v5614_v32 = vld [vmem:[#allocation6 + $0x7a8] sm:$0xf] }
 0x328   :  { %3521 = vmatpush.bf16.msra.mxu1 %v5391_v41  ;;  %3612 = vmatpush.bf16.msrb.mxu0 %v5267_v49  ;;  %v6177_v41 = vld [vmem:[#allocation6 + $0x44c] sm:$0xf]  ;;  %v5311_v49 = vor.u32 %v6211_v59, %v5310_v17  ;;  %v5702_v17 = vld [vmem:[#allocation8 + $0x60] sm:$0xf]  ;;  %v6309_v59 = vld [vmem:[#allocation8 + $0x64] sm:$0xf0] }
 0x329   :  { %3568 = vmatmul.bf16.vlgmr.msra.gmra.mxu0 %v7029_v12  ;;  %v5087_v12 = vor.u32 %v6155_v63, %v5086_v39  ;;  %v5187_v60 = vor.u32 %v6177_v41, %v5184_v3  ;;  %v6263_v39 = vld [vmem:[#allocation6 + $0x6f4] sm:$0xf0]  ;;  %v6093_v3 = vld [vmem:[#allocation6 + $0x1ac] sm:$0xf]  ;;  %v5703_v37 = vor.u32 %v6309_v59, %v5702_v17  ;;  %v5550_v30 = vld [vmem:[#allocation6 + $0x728] sm:$0xf] }
 0x32a   :  { %3483 = vmatpush.bf16.msrb.mxu2 %v4991_v44  ;;  %v5294_v44 = vld [vmem:[#allocation6 + $0x528] sm:$0xf]  ;;  %v6287_v41 = vld [vmem:[#allocation6 + $0x7b4] sm:$0xf0] }
 0x32b   :  { %3496 = vmatpush.bf16.msrb.mxu3 %v5119_v13  ;;  %v6207_v13 = vld [vmem:[#allocation6 + $0x534] sm:$0xf0]  ;;  %v5615_v42 = vor.u32 %v6287_v41, %v5614_v32  ;;  %v5534_v32 = vld [vmem:[#allocation6 + $0x708] sm:$0xf] }
 0x32c   :  { %3522 = vmatpush.bf16.msra.mxu1 %v5375_v47  ;;  %3613 = vmatpush.bf16.msrb.mxu0 %v5251_v18  ;;  %v6173_v47 = vld [vmem:[#allocation6 + $0x42c] sm:$0xf]  ;;  %v6107_v18 = vld [vmem:[#allocation6 + $0x214] sm:$0xf0]  ;;  %v5295_v62 = vor.u32 %v6207_v13, %v5294_v44  ;;  %v5694_v44 = vld [vmem:[#allocation8 + $0x50] sm:$0xf] }
 0x32d   :  { %v4895_v63 = vor.u32 %v6107_v18, %v4894_v4  ;;  %v6307_v13 = vld [vmem:[#allocation8 + $0x54] sm:$0xf0]  ;;  %v5454_v18 = vld [vmem:[#allocation6 + $0x668] sm:$0xf] }
 0x32e   :  { %3484 = vmatpush.bf16.msrb.mxu2 %v4975_v55  ;;  %v5171_v55 = vor.u32 %v6173_v47, %v5168_v51  ;;  %v6283_v47 = vld [vmem:[#allocation6 + $0x794] sm:$0xf0]  ;;  %v6089_v51 = vld [vmem:[#allocation6 + $0x18c] sm:$0xf] }
 0x32f   :  { %3497 = vmatpush.bf16.msrb.mxu3 %v5103_v0  ;;  %v6203_v0 = vld [vmem:[#allocation6 + $0x514] sm:$0xf0] }
 0x330   :  { %3523 = vmatpush.bf16.msra.mxu1 %v5359_v54  ;;  %3614 = vmatpush.bf16.msrb.mxu0 %v5235_v7  ;;  %v6169_v54 = vld [vmem:[#allocation6 + $0x40c] sm:$0xf]  ;;  %v5646_v7 = vld [vmem:[#allocation6 + $0x7e8] sm:$0xf] }
 0x331   :  { %v5647_v2 = vor.u32 %v6295_v21, %v5646_v7  ;;  %v6243_v7 = vld [vmem:[#allocation6 + $0x654] sm:$0xf0] }
 0x332   :  { %3485 = vmatpush.bf16.msrb.mxu2 %v4959_v19  ;;  %v5279_v19 = vor.u32 %v6203_v0, %v5278_v5  ;;  %v5686_v5 = vld [vmem:[#allocation8 + $0x40] sm:$0xf]  ;;  %v6279_v0 = vld [vmem:[#allocation6 + $0x774] sm:$0xf0] }
 0x333   :  { %3498 = vmatpush.bf16.msrb.mxu3 %v5087_v12  ;;  %v5155_v12 = vor.u32 %v6169_v54, %v5152_v16  ;;  %v6085_v54 = vld [vmem:[#allocation6 + $0x16c] sm:$0xf]  ;;  %v4816_v16 = vld [vmem:[#allocation6 + $0x178] sm:$0xf0]  ;;  %v5583_v21 = vor.u32 %v6279_v0, %v5582_v28  ;;  %v6297_v28 = vld [vmem:[#allocation8 + $0x4] sm:$0xf0] }
 0x334   :  { %3524 = vmatpush.bf16.msra.mxu1 %v5343_v23  ;;  %3615 = vmatpush.bf16.msrb.mxu0 %v5219_v8  ;;  %v5519_v23 = vor.u32 %v6263_v39, %v5518_v61  ;;  %v4883_v8 = vor.u32 %v6101_v22, %v4880_v34  ;;  %v5438_v39 = vld [vmem:[#allocation6 + $0x648] sm:$0xf]  ;;  %v4819_v22 = vor.u32 %v6085_v54, %v4816_v16  ;;  %v5120_v0 = vld [vmem:[#allocation6 + $0x3d8] sm:$0xf0]  ;;  %v6225_v54 = vld [vmem:[#allocation6 + $0x5cc] sm:$0xf] }
 0x335   :  { %v5566_v34 = vld [vmem:[#allocation6 + $0x748] sm:$0xf]  ;;  %v5376_v16 = vld [vmem:[#allocation6 + $0x5d8] sm:$0xf0] }
 0x336   :  { %3486 = vmatpush.bf16.msrb.mxu2 %v4943_v26  ;;  %v4864_v26 = vld [vmem:[#allocation6 + $0x1d8] sm:$0xf0] }
 0x337   :  { %3499 = vmatpush.bf16.msrb.mxu3 %v5071_v27  ;;  %v5503_v27 = vor.u32 %v6259_v14, %v5502_v10  ;;  %v4800_v10 = vld [vmem:[#allocation6 + $0x158] sm:$0xf0]  ;;  %v5439_v14 = vor.u32 %v6243_v7, %v5438_v39 }
 0x338   :  { %3525 = vmatpush.bf16.msra.mxu1 %v5327_v57  ;;  %3616 = vmatpush.bf16.msrb.mxu0 %v5203_v38  ;;  %v5486_v57 = vld [vmem:[#allocation6 + $0x6a8] sm:$0xf]  ;;  %v4867_v38 = vor.u32 %v6097_v31, %v4864_v26  ;;  %v5670_v31 = vld [vmem:[#allocation8 + $0x20] sm:$0xf]  ;;  %v5712_v39 = vld [vmem:[#allocation8 + $0x78] sm:$0xf0] }
 0x339   :  { %v6301_v26 = vld [vmem:[#allocation8 + $0x24] sm:$0xf0] }
 0x33a   :  { %3487 = vmatpush.bf16.msrb.mxu2 %v4927_v35  ;;  %v4848_v35 = vld [vmem:[#allocation6 + $0x1b8] sm:$0xf0]  ;;  %v5671_v17 = vor.u32 %v6301_v26, %v5670_v31 }
 0x33b   :  { %3500 = vmatpush.bf16.msrb.mxu3 %v5055_v33  ;;  %v5487_v33 = vor.u32 %v6255_v43, %v5486_v57  ;;  %v6077_v57 = vld [vmem:[#allocation6 + $0x12c] sm:$0xf]  ;;  %v4784_v43 = vld [vmem:[#allocation6 + $0x138] sm:$0xf0] }
 0x33c   :  { %3526 = vmatpush.bf16.msra.mxu1 %v5311_v49  ;;  %3617 = vmatpush.bf16.msrb.mxu0 %v5187_v60  ;;  %v5470_v49 = vld [vmem:[#allocation6 + $0x688] sm:$0xf]  ;;  %v4851_v60 = vor.u32 %v6093_v3, %v4848_v35  ;;  %v4787_v41 = vor.u32 %v6077_v57, %v4784_v43  ;;  %v6267_v3 = vld [vmem:[#allocation6 + $0x714] sm:$0xf0]  ;;  %v5662_v35 = vld [vmem:[#allocation8 + $0x10] sm:$0xf] }
 0x33d   :  { %v5471_v4 = vor.u32 %v6251_v36, %v5470_v49  ;;  %v6073_v49 = vld [vmem:[#allocation6 + $0x10c] sm:$0xf]  ;;  %v4768_v36 = vld [vmem:[#allocation6 + $0x118] sm:$0xf0] }
 0x33e   :  { %3488 = vmatpush.bf16.msrb.mxu2 %v4911_v1  ;;  %v4832_v1 = vld [vmem:[#allocation6 + $0x198] sm:$0xf0]  ;;  %v6217_v43 = vld [vmem:[#allocation6 + $0x58c] sm:$0xf] }
 0x33f   :  { %3501 = vmatpush.bf16.msrb.mxu3 %v5039_v52  ;;  %v5695_v52 = vor.u32 %v6307_v13, %v5694_v44  ;;  %v4835_v24 = vor.u32 %v6089_v51, %v4832_v1  ;;  %v6229_v13 = vld [vmem:[#allocation6 + $0x5ec] sm:$0xf]  ;;  %v5535_v1 = vor.u32 %v6267_v3, %v5534_v32  ;;  %v5088_v57 = vld [vmem:[#allocation6 + $0x398] sm:$0xf0] }
 0x340   :  { %3527 = vmatpush.bf16.msra.mxu1 %v5295_v62  ;;  %3618 = vmatpush.bf16.msrb.mxu0 %v5171_v55  ;;  %v5599_v62 = vor.u32 %v6283_v47, %v5598_v46  ;;  %v6305_v55 = vld [vmem:[#allocation8 + $0x44] sm:$0xf0]  ;;  %v5136_v46 = vld [vmem:[#allocation6 + $0x3f8] sm:$0xf0] }
 0x341   :  { %v5392_v47 = vld [vmem:[#allocation6 + $0x5f8] sm:$0xf0] }
 0x342   :  { %3489 = vmatpush.bf16.msrb.mxu2 %v4895_v63  ;;  %v5687_v63 = vor.u32 %v6305_v55, %v5686_v5  ;;  %v5395_v5 = vor.u32 %v6229_v13, %v5392_v47  ;;  %v6161_v55 = vld [vmem:[#allocation6 + $0x3cc] sm:$0xf]  ;;  %v5696_v32 = vld [vmem:[#allocation8 + $0x58] sm:$0xf0] }
 0x343   :  { %3502 = vmatpush.bf16.msrb.mxu3 %v5023_v6  ;;  %v5678_v6 = vld [vmem:[#allocation8 + $0x30] sm:$0xf]  ;;  %v4944_v3 = vld [vmem:[#allocation6 + $0x278] sm:$0xf0]  ;;  %v5688_v13 = vld [vmem:[#allocation8 + $0x48] sm:$0xf0] }
 0x344   :  { %3528 = vmatpush.bf16.msra.mxu1 %v5279_v19  ;;  %3619 = vmatpush.bf16.msrb.mxu0 %v5155_v12  ;;  %v6303_v19 = vld [vmem:[#allocation8 + $0x34] sm:$0xf0] }
 0x345   :  { %3490 = vmatmul.bf16.vlgmr.msrb.gmra.mxu2 %v7033_v50  ;;  %v6275_v12 = vld [vmem:[#allocation6 + $0x754] sm:$0xf0]  ;;  %v5679_v15 = vor.u32 %v6303_v19, %v5678_v6  ;;  %v5379_v6 = vor.u32 %v6225_v54, %v5376_v16  ;;  %v6157_v19 = vld [vmem:[#allocation6 + $0x3ac] sm:$0xf]  ;;  %v5680_v54 = vld [vmem:[#allocation8 + $0x38] sm:$0xf0] }
 0x346   :  { %3534 = vmatpush.bf16.msra.mxu2 %v5519_v23  ;;  %3503 = vmatmul.bf16.vlgmr.msrb.gmra.mxu3 %v7038_v58  ;;  %v6081_v23 = vld [vmem:[#allocation6 + $0x14c] sm:$0xf]  ;;  %v5567_v20 = vor.u32 %v6275_v12, %v5566_v34  ;;  %v4976_v34 = vld [vmem:[#allocation6 + $0x2b8] sm:$0xf0] }
 0x347   :  { %3547 = vmatpush.bf16.msra.mxu3 %v5647_v2  ;;  %3529 = vmatmul.bf16.vlgmr.msra.gmra.mxu1 %v7138_v56  ;;  %v5422_v2 = vld [vmem:[#allocation6 + $0x628] sm:$0xf]  ;;  %v4803_v25 = vor.u32 %v6081_v23, %v4800_v10  ;;  %v5104_v12 = vld [vmem:[#allocation6 + $0x3b8] sm:$0xf0]  ;;  %v6221_v23 = vld [vmem:[#allocation6 + $0x5ac] sm:$0xf] }
 0x348   :  { %3573 = vmatpush.bf16.msrb.mxu1 %v4883_v8  ;;  %3620 = vmatmul.bf16.vlgmr.msrb.gmra.mxu0 %v7136_v53  ;;  %v6247_v53 = vld [vmem:[#allocation6 + $0x674] sm:$0xf0] }
 0x349   :  { %4062 = vmatpush.bf16.msra.mxu0 %v5711_v48  ;;  %v5455_v61 = vor.u32 %v6247_v53, %v5454_v18  ;;  %v6239_v8 = vld [vmem:[#allocation6 + $0x634] sm:$0xf0]  ;;  %v6129_v18 = vld [vmem:[#allocation6 + $0x2cc] sm:$0xf] }
 0x34a   :  { %3535 = vmatpush.bf16.msra.mxu2 %v5503_v27  ;;  %v6271_v27 = vld [vmem:[#allocation6 + $0x734] sm:$0xf0]  ;;  %v5423_v48 = vor.u32 %v6239_v8, %v5422_v2  ;;  %v6308_v2 = vld [vmem:[#allocation8 + $0x64] sm:$0xf]  ;;  %v5704_v8 = vld [vmem:[#allocation8 + $0x68] sm:$0xf0] }
 0x34b   :  { %3548 = vmatpush.bf16.msra.mxu3 %v5631_v9  ;;  %v5406_v9 = vld [vmem:[#allocation6 + $0x608] sm:$0xf]  ;;  %v5551_v59 = vor.u32 %v6271_v27, %v5550_v30  ;;  %v4960_v30 = vld [vmem:[#allocation6 + $0x298] sm:$0xf0]  ;;  %v6153_v27 = vld [vmem:[#allocation6 + $0x38c] sm:$0xf] }
 0x34c   :  { %3574 = vmatpush.bf16.msrb.mxu1 %v4867_v38  ;;  %v6235_v38 = vld [vmem:[#allocation6 + $0x614] sm:$0xf0] }
 0x34d   :  { %4063 = vmatpush.bf16.msra.mxu0 %v5703_v37  ;;  %v6133_v37 = vld [vmem:[#allocation6 + $0x2ec] sm:$0xf]  ;;  %v5407_v44 = vor.u32 %v6235_v38, %v5406_v9  ;;  %v5344_v9 = vld [vmem:[#allocation6 + $0x598] sm:$0xf0]  ;;  %v6306_v38 = vld [vmem:[#allocation8 + $0x54] sm:$0xf] }
 0x34e   :  { %3536 = vmatpush.bf16.msra.mxu2 %v5487_v33  ;;  %v6299_v33 = vld [vmem:[#allocation8 + $0x14] sm:$0xf0] }
 0x34f   :  { %3549 = vmatpush.bf16.msra.mxu3 %v5615_v42  ;;  %v5008_v42 = vld [vmem:[#allocation6 + $0x2f8] sm:$0xf0]  ;;  %v5663_v51 = vor.u32 %v6299_v33, %v5662_v35  ;;  %v5347_v35 = vor.u32 %v6217_v43, %v5344_v9  ;;  %v6149_v33 = vld [vmem:[#allocation6 + $0x36c] sm:$0xf] }
 0x350   :  { %3575 = vmatpush.bf16.msrb.mxu1 %v4851_v60  ;;  %v6165_v60 = vld [vmem:[#allocation6 + $0x3ec] sm:$0xf]  ;;  %v5011_v53 = vor.u32 %v6133_v37, %v5008_v42  ;;  %v5699_v37 = vor.u32 %v6306_v38, %v5696_v32 }
 0x351   :  { %4064 = vmatpush.bf16.msra.mxu0 %v5695_v52  ;;  %v5139_v52 = vor.u32 %v6165_v60, %v5136_v46  ;;  %v5328_v46 = vld [vmem:[#allocation6 + $0x578] sm:$0xf0]  ;;  %v6201_v43 = vld [vmem:[#allocation6 + $0x50c] sm:$0xf] }
 0x352   :  { %3537 = vmatpush.bf16.msra.mxu2 %v5471_v4  ;;  %v4771_v4 = vor.u32 %v6073_v49, %v4768_v36  ;;  %v5072_v49 = vld [vmem:[#allocation6 + $0x378] sm:$0xf0]  ;;  %v6213_v36 = vld [vmem:[#allocation6 + $0x56c] sm:$0xf] }
 0x353   :  { %3550 = vmatpush.bf16.msra.mxu3 %v5599_v62  ;;  %v4992_v62 = vld [vmem:[#allocation6 + $0x2d8] sm:$0xf0]  ;;  %v6261_v32 = vld [vmem:[#allocation6 + $0x6ec] sm:$0xf] }
 0x354   :  { %3576 = vmatpush.bf16.msrb.mxu1 %v4835_v24  ;;  %v5654_v24 = vld [vmem:[#allocation8] sm:$0xf] }
 0x355   :  { %4065 = vmatpush.bf16.msra.mxu0 %v5687_v63  ;;  %v5655_v7 = vor.u32 %v6297_v28, %v5654_v24  ;;  %v4995_v63 = vor.u32 %v6129_v18, %v4992_v62  ;;  %v5331_v18 = vor.u32 %v6213_v36, %v5328_v46  ;;  %v5056_v62 = vld [vmem:[#allocation6 + $0x358] sm:$0xf0]  ;;  %v6209_v24 = vld [vmem:[#allocation6 + $0x54c] sm:$0xf] }
 0x356   :  { %3538 = vmatpush.bf16.msra.mxu2 %v5455_v61  ;;  %v6310_v61 = vld [vmem:[#allocation8 + $0x74] sm:$0xf]  ;;  %v5664_v46 = vld [vmem:[#allocation8 + $0x18] sm:$0xf0] }
 0x357   :  { %3551 = vmatpush.bf16.msra.mxu3 %v5583_v21  ;;  %v5123_v21 = vor.u32 %v6161_v55, %v5120_v0  ;;  %v5715_v10 = vor.u32 %v6310_v61, %v5712_v39  ;;  %v5312_v55 = vld [vmem:[#allocation6 + $0x558] sm:$0xf0]  ;;  %v6302_v0 = vld [vmem:[#allocation8 + $0x34] sm:$0xf]  ;;  %v6109_v39 = vld [vmem:[#allocation6 + $0x22c] sm:$0xf] }
 0x358   :  { %3577 = vmatpush.bf16.msrb.mxu1 %v4819_v22  ;;  %v6125_v22 = vld [vmem:[#allocation6 + $0x2ac] sm:$0xf] }
 0x359   :  { %4066 = vmatpush.bf16.msra.mxu0 %v5679_v15  ;;  %v4979_v15 = vor.u32 %v6125_v22, %v4976_v34  ;;  %v6141_v22 = vld [vmem:[#allocation6 + $0x32c] sm:$0xf]  ;;  %v5040_v34 = vld [vmem:[#allocation6 + $0x338] sm:$0xf0] }
 0x35a   :  { %3539 = vmatpush.bf16.msra.mxu2 %v5439_v14  ;;  %v5360_v14 = vld [vmem:[#allocation6 + $0x5b8] sm:$0xf0] }
 0x35b   :  { %3552 = vmatpush.bf16.msra.mxu3 %v5567_v20  ;;  %v5107_v20 = vor.u32 %v6157_v19, %v5104_v12  ;;  %v5363_v31 = vor.u32 %v6221_v23, %v5360_v14  ;;  %v5683_v19 = vor.u32 %v6302_v0, %v5680_v54  ;;  %v6300_v14 = vld [vmem:[#allocation8 + $0x24] sm:$0xf]  ;;  %v5656_v54 = vld [vmem:[#allocation8 + $0x8] sm:$0xf0] }
 0x35c   :  { %3578 = vmatpush.bf16.msrb.mxu1 %v4803_v25  ;;  %v6121_v25 = vld [vmem:[#allocation6 + $0x28c] sm:$0xf]  ;;  %v6296_v0 = vld [vmem:[#allocation8 + $0x4] sm:$0xf] }
 0x35d   :  { %4067 = vmatpush.bf16.msra.mxu0 %v5671_v17  ;;  %v4963_v17 = vor.u32 %v6121_v25, %v4960_v30  ;;  %v4896_v25 = vld [vmem:[#allocation6 + $0x218] sm:$0xf0]  ;;  %v6137_v30 = vld [vmem:[#allocation6 + $0x30c] sm:$0xf] }
 0x35e   :  { %3540 = vmatpush.bf16.msra.mxu2 %v5423_v48  ;;  %v5707_v48 = vor.u32 %v6308_v2, %v5704_v8  ;;  %v5672_v2 = vld [vmem:[#allocation8 + $0x28] sm:$0xf0] }
 0x35f   :  { %3553 = vmatpush.bf16.msra.mxu3 %v5551_v59  ;;  %v5091_v59 = vor.u32 %v6153_v27, %v5088_v57  ;;  %v5024_v57 = vld [vmem:[#allocation6 + $0x318] sm:$0xf0]  ;;  %v5675_v9 = vor.u32 %v6300_v14, %v5672_v2 }
 0x360   :  { %3579 = vmatpush.bf16.msrb.mxu1 %v4787_v41  ;;  %v6117_v41 = vld [vmem:[#allocation6 + $0x26c] sm:$0xf] }
 0x361   :  { %4068 = vmatpush.bf16.msra.mxu0 %v5663_v51  ;;  %v4947_v47 = vor.u32 %v6117_v41, %v4944_v3  ;;  %v5075_v51 = vor.u32 %v6149_v33, %v5072_v49  ;;  %v5648_v41 = vld [vmem:[#allocation6 + $0x7f8] sm:$0xf0]  ;;  %v5774_v3 = vld [vmem:[#allocation8 + $0xf0] sm:$0xf]  ;;  %v5027_v49 = vor.u32 %v6137_v30, %v5024_v57  ;;  %v6321_v30 = vld [vmem:[#allocation8 + $0xc4] sm:$0xf0] }
 0x362   :  { %3541 = vmatpush.bf16.msra.mxu2 %v5407_v44  ;;  %v6304_v44 = vld [vmem:[#allocation8 + $0x44] sm:$0xf]  ;;  %v6245_v57 = vld [vmem:[#allocation6 + $0x66c] sm:$0xf] }
 0x363   :  { %3554 = vmatpush.bf16.msra.mxu3 %v5535_v1  ;;  %v7169_v26 = vpop.f32.mrf.mxu1  ;;  %v6113_v1 = vld [vmem:[#allocation6 + $0x24c] sm:$0xf]  ;;  %v5691_v28 = vor.u32 %v6304_v44, %v5688_v13 }
 0x364   :  { %3580 = vmatpush.bf16.msrb.mxu1 %v4771_v4  ;;  %v4928_v4 = vld [vmem:[#allocation6 + $0x258] sm:$0xf0] }
 0x365   :  { %3542 = vmatmul.bf16.vlgmr.msra.gmra.mxu2 %v7140_v40  ;;  %4069 = vmatpush.bf16.msra.mxu0 %v5655_v7  ;;  %v4931_v16 = vor.u32 %v6113_v1, %v4928_v4  ;;  %v4912_v7 = vld [vmem:[#allocation6 + $0x238] sm:$0xf0]  ;;  %v6289_v4 = vld [vmem:[#allocation6 + $0x7cc] sm:$0xf] }
 0x366   :  { %3586 = vmatpush.bf16.msrb.mxu2 %v5011_v53  ;;  %3555 = vmatmul.bf16.vlgmr.msra.gmra.mxu3 %v7148_v29  ;;  %v4915_v8 = vor.u32 %v6109_v39, %v4912_v7  ;;  %v5504_v1 = vld [vmem:[#allocation6 + $0x6d8] sm:$0xf0]  ;;  %v6253_v39 = vld [vmem:[#allocation6 + $0x6ac] sm:$0xf] }
 0x367   :  { %3599 = vmatpush.bf16.msrb.mxu3 %v5139_v52  ;;  %3581 = vmatmul.bf16.vlgmr.msrb.gmra.mxu1 %v7031_v45  ;;  %v7171_v45 = vpop.f32.mrf.mxu0  ;;  %v6145_v52 = vld [vmem:[#allocation6 + $0x34c] sm:$0xf]  ;;  %v5488_v7 = vld [vmem:[#allocation6 + $0x6b8] sm:$0xf0] }
 0x368   :  { %3625 = vmatpush.bf16.msra.mxu1 %v5395_v5  ;;  %v3309_v42 = vpop.f32.mrf.mxu2  ;;  %v3322_v60 = vpop.f32.mrf.mxu3  ;;  %v5059_v61 = vor.u32 %v6145_v52, %v5056_v62  ;;  %v5632_v52 = vld [vmem:[#allocation6 + $0x7d8] sm:$0xf0]  ;;  %v5766_v62 = vld [vmem:[#allocation8 + $0xe0] sm:$0xf] }
 0x369   :  { %4114 = vmatpush.bf16.msrb.mxu0 %v5715_v10  ;;  %v5296_v10 = vld [vmem:[#allocation6 + $0x538] sm:$0xf0] }
 0x36a   :  { %3587 = vmatpush.bf16.msrb.mxu2 %v4995_v63  ;;  %v3310_v63 = vadd.f32 %v3309_v42, %v7146_v11 }
 0x36b   :  { %3600 = vmatpush.bf16.msrb.mxu3 %v5123_v21  ;;  %v3337_v53 = vpop.f32.mrf.mxu1  ;;  %v5315_v21 = vor.u32 %v6209_v24, %v5312_v55  ;;  %v6325_v24 = vld [vmem:[#allocation8 + $0xe4] sm:$0xf0] }
 0x36c   :  { %3626 = vmatpush.bf16.msra.mxu1 %v5379_v6  ;;  %v6205_v6 = vld [vmem:[#allocation6 + $0x52c] sm:$0xf]  ;;  %v3323_v11 = vadd.f32 %v3322_v60, %v3310_v63  ;;  %v6298_v60 = vld [vmem:[#allocation8 + $0x14] sm:$0xf] }
 0x36d   :  { %4115 = vmatpush.bf16.msrb.mxu0 %v5707_v48  ;;  %v5280_v48 = vld [vmem:[#allocation6 + $0x518] sm:$0xf0]  ;;  %v6285_v63 = vld [vmem:[#allocation6 + $0x7ac] sm:$0xf] }
 0x36e   :  { %3588 = vmatpush.bf16.msrb.mxu2 %v4979_v15  ;;  %v5043_v15 = vor.u32 %v6141_v22, %v5040_v34  ;;  %v5283_v36 = vor.u32 %v6201_v43, %v5280_v48  ;;  %v3336_v42 = vadd.f32 %v7169_v26, %v3323_v11  ;;  %v5616_v34 = vld [vmem:[#allocation6 + $0x7b8] sm:$0xf0]  ;;  %v6277_v48 = vld [vmem:[#allocation6 + $0x76c] sm:$0xf] }
 0x36f   :  { %3601 = vmatpush.bf16.msrb.mxu3 %v5107_v20  ;;  %v3415_v5 = vpop.f32.mrf.mxu0  ;;  %v6105_v20 = vld [vmem:[#allocation6 + $0x20c] sm:$0xf]  ;;  %v5456_v43 = vld [vmem:[#allocation6 + $0x678] sm:$0xf0] }
 0x370   :  { %3627 = vmatpush.bf16.msra.mxu1 %v5363_v31  ;;  %v3311_v12 = vpop.f32.mrf.mxu2  ;;  %v3324_v23 = vpop.f32.mrf.mxu3  ;;  %v5299_v31 = vor.u32 %v6205_v6, %v5296_v10  ;;  %v4899_v33 = vor.u32 %v6105_v20, %v4896_v25  ;;  %v5758_v6 = vld [vmem:[#allocation8 + $0xd0] sm:$0xf]  ;;  %v5619_v10 = vor.u32 %v6285_v63, %v5616_v34  ;;  %v5600_v20 = vld [vmem:[#allocation6 + $0x798] sm:$0xf0]  ;;  %v5750_v25 = vld [vmem:[#allocation8 + $0xc0] sm:$0xf] }
 0x371   :  { %4116 = vmatpush.bf16.msrb.mxu0 %v5699_v37  ;;  %v5659_v12 = vor.u32 %v6296_v0, %v5656_v54  ;;  %v5491_v23 = vor.u32 %v6253_v39, %v5488_v7  ;;  %v5408_v39 = vld [vmem:[#allocation6 + $0x618] sm:$0xf0]  ;;  %v6265_v7 = vld [vmem:[#allocation6 + $0x70c] sm:$0xf] }
 0x372   :  { %3589 = vmatpush.bf16.msrb.mxu2 %v4963_v17  ;;  %v5520_v17 = vld [vmem:[#allocation6 + $0x6f8] sm:$0xf0] }
 0x373   :  { %3602 = vmatpush.bf16.msrb.mxu3 %v5091_v59  ;;  %v7174_v27 = vpop.f32.mrf.mxu1  ;;  %v6293_v59 = vld [vmem:[#allocation6 + $0x7ec] sm:$0xf]  ;;  %v5523_v37 = vor.u32 %v6261_v32, %v5520_v17  ;;  %v5584_v17 = vld [vmem:[#allocation6 + $0x778] sm:$0xf0] }
 0x374   :  { %3628 = vmatpush.bf16.msra.mxu1 %v5347_v35  ;;  %v6327_v35 = vld [vmem:[#allocation8 + $0xf4] sm:$0xf0]  ;;  %v5651_v44 = vor.u32 %v6293_v59, %v5648_v41  ;;  %v5742_v59 = vld [vmem:[#allocation8 + $0xb0] sm:$0xf]  ;;  %v5536_v34 = vld [vmem:[#allocation6 + $0x718] sm:$0xf0] }
 0x375   :  { %4117 = vmatpush.bf16.msrb.mxu0 %v5691_v28  ;;  %v5667_v28 = vor.u32 %v6298_v60, %v5664_v46  ;;  %v6319_v41 = vld [vmem:[#allocation8 + $0xb4] sm:$0xf0]  ;;  %v5568_v60 = vld [vmem:[#allocation6 + $0x758] sm:$0xf0]  ;;  %v5734_v46 = vld [vmem:[#allocation8 + $0xa0] sm:$0xf] }
 0x376   :  { %3590 = vmatpush.bf16.msrb.mxu2 %v4947_v47 }
 0x377   :  { %3603 = vmatpush.bf16.msrb.mxu3 %v5075_v51  ;;  %v7176_v38 = vpop.f32.mrf.mxu0  ;;  %v6257_v51 = vld [vmem:[#allocation6 + $0x6cc] sm:$0xf] }
 0x378   :  { %3629 = vmatpush.bf16.msra.mxu1 %v5331_v18  ;;  %v3348_v13 = vpop.f32.mrf.mxu2  ;;  %v7179_v47 = vpop.f32.mrf.mxu3  ;;  %v5775_v18 = vor.u32 %v6327_v35, %v5774_v3  ;;  %v5507_v55 = vor.u32 %v6257_v51, %v5504_v1  ;;  %v5459_v3 = vor.u32 %v6245_v57, %v5456_v43  ;;  %v5587_v35 = vor.u32 %v6277_v48, %v5584_v17  ;;  %v6320_v57 = vld [vmem:[#allocation8 + $0xc4] sm:$0xf]  ;;  %v5752_v48 = vld [vmem:[#allocation8 + $0xc8] sm:$0xf0]  ;;  %v6343_v17 = vld [vmem:[#allocation8 + $0x174] sm:$0xf0] }
 0x379   :  { %4118 = vmatpush.bf16.msrb.mxu0 %v5683_v19  ;;  %v3349_v53 = vadd.f32 %v3348_v13, %v3336_v42  ;;  %v6323_v19 = vld [vmem:[#allocation8 + $0xd4] sm:$0xf0] }
 0x37a   :  { %3591 = vmatpush.bf16.msrb.mxu2 %v4931_v16 }
 0x37b   :  { %3604 = vmatpush.bf16.msrb.mxu3 %v5059_v61  ;;  %v3664_v26 = vmax.f32 %v3349_v53, 0.0  ;;  %v3376_v5 = vpop.f32.mrf.mxu1  ;;  %v5635_v61 = vor.u32 %v6289_v4, %v5632_v52  ;;  %v5424_v53 = vld [vmem:[#allocation6 + $0x638] sm:$0xf0]  ;;  %v6269_v52 = vld [vmem:[#allocation6 + $0x72c] sm:$0xf] }
 0x37c   :  { %3630 = vmatpush.bf16.msra.mxu1 %v5315_v21  ;;  %v5767_v21 = vor.u32 %v6325_v24, %v5766_v62  ;;  %v6315_v5 = vld [vmem:[#allocation8 + $0x94] sm:$0xf0] }
 0x37d   :  { %4119 = vmatpush.bf16.msrb.mxu0 %v5675_v9  ;;  %v7181_v22 = vpack.c.bf16 %v3664_v26, %v3664_v26  ;;  %v5751_v9 = vor.u32 %v6321_v30, %v5750_v25  ;;  %v5726_v26 = vld [vmem:[#allocation8 + $0x90] sm:$0xf] }
 0x37e   :  { %3592 = vmatpush.bf16.msrb.mxu2 %v4915_v8  ;;  %v6249_v8 = vld [vmem:[#allocation6 + $0x68c] sm:$0xf]  ;;  %v5727_v63 = vor.u32 %v6315_v5, %v5726_v26  ;;  %v6337_v26 = vld [vmem:[#allocation8 + $0x144] sm:$0xf0] }
 0x37f   :  { %3605 = vmatpush.bf16.msrb.mxu3 %v5043_v15  ;;  %v3467_v16 = vpop.f32.mrf.mxu0  ;;  %4070 = vmatmul.bf16.vlgmr.msra.gmra.mxu0 %v7181_v22  ;;  %v5472_v15 = vld [vmem:[#allocation6 + $0x698] sm:$0xf0] }
 0x380   :  { %3631 = vmatpush.bf16.msra.mxu1 %v5299_v31  ;;  %v3350_v14 = vpop.f32.mrf.mxu2  ;;  %v3363_v2 = vpop.f32.mrf.mxu3 }
 0x381   :  { %4120 = vmatpush.bf16.msrb.mxu0 %v5667_v28  ;;  %v5552_v28 = vld [vmem:[#allocation6 + $0x738] sm:$0xf0] }
 0x382   :  { %3593 = vmatpush.bf16.msrb.mxu2 %v4899_v33  ;;  %v6241_v33 = vld [vmem:[#allocation6 + $0x64c] sm:$0xf]  ;;  %v5555_v16 = vor.u32 %v6269_v52, %v5552_v28  ;;  %v5814_v28 = vld [vmem:[#allocation8 + $0x140] sm:$0xf] }
 0x383   :  { %3606 = vmatpush.bf16.msrb.mxu3 %v5027_v49  ;;  %v5440_v49 = vld [vmem:[#allocation6 + $0x658] sm:$0xf0] }
 0x384   :  { %3632 = vmatpush.bf16.msra.mxu1 %v5283_v36  ;;  %v7187_v11 = vpop.f32.mrf.mxu1  ;;  %v6273_v36 = vld [vmem:[#allocation6 + $0x74c] sm:$0xf]  ;;  %v5443_v51 = vor.u32 %v6241_v33, %v5440_v49  ;;  %v6318_v49 = vld [vmem:[#allocation8 + $0xb4] sm:$0xf] }
 0x385   :  { %3594 = vmatmul.bf16.vlgmr.msrb.gmra.mxu2 %v7033_v50  ;;  %v6281_v50 = vld [vmem:[#allocation6 + $0x78c] sm:$0xf]  ;;  %4121 = vmatpush.bf16.msrb.mxu0 %v5659_v12  ;;  %v5571_v4 = vor.u32 %v6273_v36, %v5568_v60 }
 0x386   :  { %3638 = vmatpush.bf16.msra.mxu2 %v5523_v37  ;;  %3607 = vmatmul.bf16.vlgmr.msrb.gmra.mxu3 %v7038_v58  ;;  %v5759_v58 = vor.u32 %v6323_v19, %v5758_v6  ;;  %v5603_v31 = vor.u32 %v6281_v50, %v5600_v20  ;;  %v5743_v37 = vor.u32 %v6319_v41, %v5742_v59  ;;  %v5718_v6 = vld [vmem:[#allocation8 + $0x80] sm:$0xf]  ;;  %v6313_v19 = vld [vmem:[#allocation8 + $0x84] sm:$0xf0]  ;;  %v6324_v50 = vld [vmem:[#allocation8 + $0xe4] sm:$0xf] }
 0x387   :  { %3651 = vmatpush.bf16.msra.mxu3 %v5651_v44  ;;  %3633 = vmatmul.bf16.vlgmr.msra.gmra.mxu1 %v7138_v56  ;;  %v5475_v56 = vor.u32 %v6249_v8, %v5472_v15  ;;  %v7189_v32 = vpop.f32.mrf.mxu0  ;;  %v6317_v44 = vld [vmem:[#allocation8 + $0xa4] sm:$0xf0]  ;;  %v5719_v8 = vor.u32 %v6313_v19, %v5718_v6 }
 0x388   :  { %4075 = vmatpush.bf16.msrb.mxu1 %v5775_v18  ;;  %v3387_v42 = vpop.f32.mrf.mxu2  ;;  %v6237_v18 = vld [vmem:[#allocation6 + $0x62c] sm:$0xf]  ;;  %v5735_v62 = vor.u32 %v6317_v44, %v5734_v46  ;;  %v6341_v41 = vld [vmem:[#allocation8 + $0x164] sm:$0xf0]  ;;  %v5822_v44 = vld [vmem:[#allocation8 + $0x150] sm:$0xf] }
 0x389   :  { %v3400_v13 = vpop.f32.mrf.mxu3  ;;  %v5427_v54 = vor.u32 %v6237_v18, %v5424_v53  ;;  %v5736_v46 = vld [vmem:[#allocation8 + $0xa8] sm:$0xf0]  ;;  %v6314_v53 = vld [vmem:[#allocation8 + $0x94] sm:$0xf]  ;;  %v6333_v6 = vld [vmem:[#allocation8 + $0x124] sm:$0xf0] }
 0x38a   :  { %3639 = vmatpush.bf16.msra.mxu2 %v5507_v55  ;;  %v7194_v55 = vld [vmem:[%s7282_s8] sm:$0xf] }
 0x38b   :  { %3652 = vmatpush.bf16.msra.mxu3 %v5635_v61  ;;  %v1961_v0 = vperm.slane %v7194_v55, 1  ;;  %v6233_v61 = vld [vmem:[#allocation6 + $0x60c] sm:$0xf] }
 0x38c   :  { %4076 = vmatpush.bf16.msrb.mxu1 %v5767_v21  ;;  %v3428_v1 = vpop.f32.mrf.mxu1  ;;  %v5411_v14 = vor.u32 %v6233_v61, %v5408_v39  ;;  %v5806_v61 = vld [vmem:[#allocation8 + $0x130] sm:$0xf]  ;;  %v6335_v39 = vld [vmem:[#allocation8 + $0x134] sm:$0xf0] }
 0x38d   :  { %v3362_v2 = vadd.f32 %v7179_v47, %v1961_v0  ;;  %v5815_v0 = vor.u32 %v6337_v26, %v5814_v28  ;;  %v5902_v26 = vld [vmem:[#allocation8 + $0x1f0] sm:$0xf] }
 0x38e   :  { %3640 = vmatpush.bf16.msra.mxu2 %v5491_v23  ;;  %v6326_v23 = vld [vmem:[#allocation8 + $0xf4] sm:$0xf] }
 0x38f   :  { %3653 = vmatpush.bf16.msra.mxu3 %v5619_v10  ;;  %v3519_v24 = vpop.f32.mrf.mxu0  ;;  %4122 = vmatmul.bf16.vlgmr.msrb.gmra.mxu0 %v7181_v22  ;;  %v5776_v10 = vld [vmem:[#allocation8 + $0xf8] sm:$0xf0]  ;;  %v5539_v22 = vor.u32 %v6265_v7, %v5536_v34  ;;  %v3375_v20 = vadd.f32 %v7174_v27, %v3362_v2  ;;  %v5830_v27 = vld [vmem:[#allocation8 + $0x160] sm:$0xf]  ;;  %v6331_v2 = vld [vmem:[#allocation8 + $0x114] sm:$0xf0] }
 0x390   :  { %4077 = vmatpush.bf16.msrb.mxu1 %v5759_v58  ;;  %v3389_v21 = vpop.f32.mrf.mxu2  ;;  %v5779_v15 = vor.u32 %v6326_v23, %v5776_v10  ;;  %v5768_v58 = vld [vmem:[#allocation8 + $0xe8] sm:$0xf0]  ;;  %v5728_v24 = vld [vmem:[#allocation8 + $0x98] sm:$0xf0]  ;;  %v5798_v34 = vld [vmem:[#allocation8 + $0x120] sm:$0xf] }
 0x391   :  { %v3402_v12 = vpop.f32.mrf.mxu3  ;;  %v5771_v25 = vor.u32 %v6324_v50, %v5768_v58  ;;  %v3388_v30 = vadd.f32 %v3387_v42, %v3375_v20  ;;  %v6316_v42 = vld [vmem:[#allocation8 + $0xa4] sm:$0xf]  ;;  %v5807_v21 = vor.u32 %v6335_v39, %v5806_v61  ;;  %v5799_v10 = vor.u32 %v6333_v6, %v5798_v34  ;;  %v6342_v58 = vld [vmem:[#allocation8 + $0x174] sm:$0xf]  ;;  %v5840_v20 = vld [vmem:[#allocation8 + $0x178] sm:$0xf0] }
 0x392   :  { %3641 = vmatpush.bf16.msra.mxu2 %v5475_v56  ;;  %v6322_v56 = vld [vmem:[#allocation8 + $0xd4] sm:$0xf]  ;;  %v5886_v61 = vld [vmem:[#allocation8 + $0x1d0] sm:$0xf]  ;;  %v6355_v39 = vld [vmem:[#allocation8 + $0x1d4] sm:$0xf0] }
 0x393   :  { %3654 = vmatpush.bf16.msra.mxu3 %v5603_v31  ;;  %v5760_v31 = vld [vmem:[#allocation8 + $0xd8] sm:$0xf0]  ;;  %v3401_v43 = vadd.f32 %v3400_v13, %v3388_v30  ;;  %v6339_v13 = vld [vmem:[#allocation8 + $0x154] sm:$0xf0]  ;;  %v1962_v30 = vperm.slane %v7194_v55, 2 }
 0x394   :  { %4078 = vmatpush.bf16.msrb.mxu1 %v5751_v9  ;;  %v5763_v47 = vor.u32 %v6322_v56, %v5760_v31  ;;  %v5838_v9 = vld [vmem:[#allocation8 + $0x170] sm:$0xf]  ;;  %v5823_v1 = vor.u32 %v6339_v13, %v5822_v44  ;;  %v6340_v56 = vld [vmem:[#allocation8 + $0x164] sm:$0xf]  ;;  %v5832_v31 = vld [vmem:[#allocation8 + $0x168] sm:$0xf0] }
 0x395   :  { %v5839_v59 = vor.u32 %v6343_v17, %v5838_v9  ;;  %v6338_v9 = vld [vmem:[#allocation8 + $0x154] sm:$0xf]  ;;  %v5824_v17 = vld [vmem:[#allocation8 + $0x158] sm:$0xf0]  ;;  %v6332_v13 = vld [vmem:[#allocation8 + $0x124] sm:$0xf] }
 0x396   :  { %3642 = vmatpush.bf16.msra.mxu2 %v5459_v3  ;;  %v5755_v3 = vor.u32 %v6320_v57, %v5752_v48  ;;  %v3466_v48 = vadd.f32 %v7176_v38, %v1962_v30  ;;  %v6334_v38 = vld [vmem:[#allocation8 + $0x134] sm:$0xf]  ;;  %v5808_v44 = vld [vmem:[#allocation8 + $0x138] sm:$0xf0] }
 0x397   :  { %3655 = vmatpush.bf16.msra.mxu3 %v5587_v35  ;;  %v5831_v35 = vor.u32 %v6341_v41, %v5830_v27  ;;  %v5827_v27 = vor.u32 %v6338_v9, %v5824_v17  ;;  %v6345_v9 = vld [vmem:[#allocation8 + $0x184] sm:$0xf0]  ;;  %v6358_v17 = vld [vmem:[#allocation8 + $0x1f4] sm:$0xf] }
 0x398   :  { %4079 = vmatpush.bf16.msrb.mxu1 %v5743_v37 }
 0x39a   :  { %3643 = vmatpush.bf16.msra.mxu2 %v5443_v51 }
 0x39b   :  { %3656 = vmatpush.bf16.msra.mxu3 %v5571_v4 }
 0x39c   :  { %4080 = vmatpush.bf16.msrb.mxu1 %v5735_v62 }
 0x39e   :  { %3644 = vmatpush.bf16.msra.mxu2 %v5427_v54 }
 0x39f   :  { %3657 = vmatpush.bf16.msra.mxu3 %v5555_v16  ;;  %v6312_v16 = vld [vmem:[#allocation8 + $0x84] sm:$0xf] }
 0x3a0   :  { %4081 = vmatpush.bf16.msrb.mxu1 %v5727_v63  ;;  %v5720_v63 = vld [vmem:[#allocation8 + $0x88] sm:$0xf0] }
 0x3a1   :  { %v5723_v23 = vor.u32 %v6312_v16, %v5720_v63  ;;  %v5887_v63 = vor.u32 %v6355_v39, %v5886_v61  ;;  %v6344_v39 = vld [vmem:[#allocation8 + $0x184] sm:$0xf] }
 0x3a2   :  { %3645 = vmatpush.bf16.msra.mxu2 %v5411_v14  ;;  %v5790_v14 = vld [vmem:[#allocation8 + $0x110] sm:$0xf] }
 0x3a3   :  { %3658 = vmatpush.bf16.msra.mxu3 %v5539_v22  ;;  %v5791_v22 = vor.u32 %v6331_v2, %v5790_v14 }
 0x3a4   :  { %4082 = vmatpush.bf16.msrb.mxu1 %v5719_v8  ;;  %v7203_v33 = vpop.f32.mrf.mxu1  ;;  %v5782_v8 = vld [vmem:[#allocation8 + $0x100] sm:$0xf] }
 0x3a5   :  { %3646 = vmatmul.bf16.vlgmr.msra.gmra.mxu2 %v7140_v40  ;;  %v3414_v40 = vadd.f32 %v7171_v45, %v3401_v43  ;;  %v5739_v45 = vor.u32 %v6316_v42, %v5736_v46 }
 0x3a6   :  { %3659 = vmatmul.bf16.vlgmr.msra.gmra.mxu3 %v7148_v29  ;;  %4088 = vmatpush.bf16.msrb.mxu2 %v5839_v59  ;;  %v5744_v29 = vld [vmem:[#allocation8 + $0xb8] sm:$0xf0]  ;;  %v7205_v36 = vpop.f32.mrf.mxu0  ;;  %v3479_v59 = vadd.f32 %v7203_v33, %v3466_v48  ;;  %v5846_v48 = vld [vmem:[#allocation8 + $0x180] sm:$0xf] }
 0x3a7   :  { %v5747_v37 = vor.u32 %v6318_v49, %v5744_v29  ;;  %v3427_v60 = vadd.f32 %v7187_v11, %v3414_v40  ;;  %v5731_v11 = vor.u32 %v6314_v53, %v5728_v24  ;;  %v6336_v40 = vld [vmem:[#allocation8 + $0x144] sm:$0xf]  ;;  %v5816_v49 = vld [vmem:[#allocation8 + $0x148] sm:$0xf0]  ;;  %v5792_v53 = vld [vmem:[#allocation8 + $0x118] sm:$0xf0] }
 0x3a8   :  { %4127 = vmatpush.bf16.msra.mxu1 %v5779_v15  ;;  %v3439_v51 = vpop.f32.mrf.mxu2  ;;  %v6329_v15 = vld [vmem:[#allocation8 + $0x104] sm:$0xf0]  ;;  %v5784_v24 = vld [vmem:[#allocation8 + $0x108] sm:$0xf0] }
 0x3a9   :  { %v3440_v4 = vadd.f32 %v3439_v51, %v3427_v60  ;;  %v3452_v18 = vpop.f32.mrf.mxu3  ;;  %v5783_v50 = vor.u32 %v6329_v15, %v5782_v8  ;;  %v5819_v60 = vor.u32 %v6336_v40, %v5816_v49  ;;  %v5811_v51 = vor.u32 %v6334_v38, %v5808_v44  ;;  %v6351_v8 = vld [vmem:[#allocation8 + $0x1b4] sm:$0xf0]  ;;  %v5862_v15 = vld [vmem:[#allocation8 + $0x1a0] sm:$0xf] }
 0x3aa   :  { %4089 = vmatpush.bf16.msrb.mxu2 %v5831_v35  ;;  %v1963_v49 = vperm.slane %v7194_v55, 3 }
 0x3ab   :  { %v3453_v52 = vadd.f32 %v3452_v18, %v3440_v4 }
 0x3ac   :  { %4128 = vmatpush.bf16.msra.mxu1 %v5771_v25  ;;  %v3480_v62 = vpop.f32.mrf.mxu1  ;;  %v5843_v25 = vor.u32 %v6342_v58, %v5840_v20  ;;  %v6349_v20 = vld [vmem:[#allocation8 + $0x1a4] sm:$0xf0] }
 0x3ad   :  { %v3665_v54 = vmax.f32 %v3453_v52, 0.0  ;;  %v6328_v62 = vld [vmem:[#allocation8 + $0x104] sm:$0xf] }
 0x3ae   :  { %4090 = vmatpush.bf16.msrb.mxu2 %v5823_v1  ;;  %v3571_v5 = vpop.f32.mrf.mxu0  ;;  %v5800_v1 = vld [vmem:[#allocation8 + $0x128] sm:$0xf0]  ;;  %v5787_v28 = vor.u32 %v6328_v62, %v5784_v24  ;;  %v6350_v62 = vld [vmem:[#allocation8 + $0x1b4] sm:$0xf]  ;;  %v5872_v24 = vld [vmem:[#allocation8 + $0x1b8] sm:$0xf0] }
 0x3af   :  { %v3669_v7 = vpack.c.bf16 %v3665_v54, %v3665_v54  ;;  %v5803_v18 = vor.u32 %v6332_v13, %v5800_v1  ;;  %v6357_v54 = vld [vmem:[#allocation8 + $0x1e4] sm:$0xf0] }
 0x3b0   :  { %4129 = vmatpush.bf16.msra.mxu1 %v5763_v47  ;;  %v3441_v19 = vpop.f32.mrf.mxu2  ;;  %v5835_v47 = vor.u32 %v6340_v56, %v5832_v31  ;;  %v5863_v56 = vor.u32 %v6349_v20, %v5862_v15  ;;  %v5854_v31 = vld [vmem:[#allocation8 + $0x190] sm:$0xf] }
 0x3b1   :  { %v3454_v12 = vpop.f32.mrf.mxu3  ;;  %4083 = vmatmul.bf16.vlgmr.msrb.gmra.mxu1 %v3669_v7  ;;  %v5878_v19 = vld [vmem:[#allocation8 + $0x1c0] sm:$0xf] }
 0x3b2   :  { %4091 = vmatpush.bf16.msrb.mxu2 %v5815_v0  ;;  %v5894_v0 = vld [vmem:[#allocation8 + $0x1e0] sm:$0xf]  ;;  %v6353_v12 = vld [vmem:[#allocation8 + $0x1c4] sm:$0xf0] }
 0x3b3   :  { %v5879_v14 = vor.u32 %v6353_v12, %v5878_v19 }
 0x3b4   :  { %4130 = vmatpush.bf16.msra.mxu1 %v5755_v3 }
 0x3b6   :  { %4092 = vmatpush.bf16.msrb.mxu2 %v5807_v21 }
 0x3b8   :  { %4131 = vmatpush.bf16.msra.mxu1 %v5747_v37 }
 0x3ba   :  { %4093 = vmatpush.bf16.msrb.mxu2 %v5799_v10 }
 0x3bc   :  { %4132 = vmatpush.bf16.msra.mxu1 %v5739_v45  ;;  %v6330_v45 = vld [vmem:[#allocation8 + $0x114] sm:$0xf] }
 0x3bd   :  { %v5795_v52 = vor.u32 %v6330_v45, %v5792_v53 }
 0x3be   :  { %4094 = vmatpush.bf16.msrb.mxu2 %v5791_v22  ;;  %v5870_v22 = vld [vmem:[#allocation8 + $0x1b0] sm:$0xf] }
 0x3bf   :  { %v5871_v58 = vor.u32 %v6351_v8, %v5870_v22 }
 0x3c0   :  { %4133 = vmatpush.bf16.msra.mxu1 %v5731_v11  ;;  %v5895_v11 = vor.u32 %v6357_v54, %v5894_v0 }
 0x3c2   :  { %4095 = vmatpush.bf16.msrb.mxu2 %v5783_v50 }
 0x3c4   :  { %4134 = vmatpush.bf16.msra.mxu1 %v5723_v23  ;;  %v3530_v57 = vpop.f32.mrf.mxu1 }
 0x3c5   :  { %v7209_v43 = vpop.f32.mrf.mxu0 }
 0x3c6   :  { %4140 = vmatpush.bf16.msra.mxu2 %v5843_v25 }
 0x3c7   :  { %4135 = vmatmul.bf16.vlgmr.msra.gmra.mxu1 %v3669_v7 }
 0x3c8   :  { %v3491_v41 = vpop.f32.mrf.mxu2 }
 0x3c9   :  { %v3504_v3 = vpop.f32.mrf.mxu3  ;;  %v3492_v35 = vadd.f32 %v3491_v41, %v3479_v59  ;;  %v5904_v59 = vld [vmem:[#allocation8 + $0x1f8] sm:$0xf0] }
 0x3ca   :  { %4141 = vmatpush.bf16.msra.mxu2 %v5835_v47  ;;  %v6347_v47 = vld [vmem:[#allocation8 + $0x194] sm:$0xf0]  ;;  %v5907_v41 = vor.u32 %v6358_v17, %v5904_v59  ;;  %v6374_v17 = vld [vmem:[%s7285_s11 + $0x70] sm:$0xff]  ;;  %v6365_v59 = vld [vmem:[%s7285_s11 + $0x28] sm:$0xff] }
 0x3cb   :  { %v3505_v29 = vadd.f32 %v3504_v3, %v3492_v35  ;;  %v6356_v3 = vld [vmem:[#allocation8 + $0x1e4] sm:$0xf]  ;;  %v5896_v35 = vld [vmem:[#allocation8 + $0x1e8] sm:$0xf0] }
 0x3cc   :  { %v3532_v37 = vpop.f32.mrf.mxu1  ;;  %v5899_v40 = vor.u32 %v6356_v3, %v5896_v35  ;;  %v6363_v3 = vld [vmem:[%s7285_s11 + $0x18] sm:$0xff] }
 0x3cd   :  { %v3623_v42 = vpop.f32.mrf.mxu0  ;;  %v3518_v46 = vadd.f32 %v7189_v32, %v3505_v29  ;;  %v6359_v32 = vld [vmem:[#allocation8 + $0x1f4] sm:$0xf0] }
 0x3ce   :  { %4142 = vmatpush.bf16.msra.mxu2 %v5827_v27  ;;  %v5903_v5 = vor.u32 %v6359_v32, %v5902_v26  ;;  %v5847_v27 = vor.u32 %v6345_v9, %v5846_v48  ;;  %v3570_v42 = vadd.f32 %v7205_v36, %v1963_v49  ;;  %v5875_v36 = vor.u32 %v6350_v62, %v5872_v24  ;;  %v5864_v26 = vld [vmem:[#allocation8 + $0x1a8] sm:$0xf0]  ;;  %v6375_v48 = vld [vmem:[%s7285_s11 + $0x78] sm:$0xff] }
 0x3cf   :  { %v3531_v7 = vadd.f32 %v3530_v57, %v3518_v46  ;;  %v5855_v57 = vor.u32 %v6347_v47, %v5854_v31  ;;  %v5888_v46 = vld [vmem:[#allocation8 + $0x1d8] sm:$0xf0]  ;;  %v6366_v9 = vld [vmem:[%s7285_s11 + $0x30] sm:$0xff]  ;;  %4315 = vmatpush.bf16.msrb.mxu1 %v6375_v48 }
 0x3d0   :  { %v3493_v33 = vpop.f32.mrf.mxu2  ;;  %4101 = vmatpush.bf16.msrb.mxu3 %v5903_v5 }
 0x3d1   :  { %v3506_v4 = vpop.f32.mrf.mxu3  ;;  %v6352_v33 = vld [vmem:[#allocation8 + $0x1c4] sm:$0xf] }
 0x3d2   :  { %4143 = vmatpush.bf16.msra.mxu2 %v5819_v60  ;;  %v6354_v60 = vld [vmem:[#allocation8 + $0x1d4] sm:$0xf]  ;;  %v5880_v4 = vld [vmem:[#allocation8 + $0x1c8] sm:$0xf0] }
 0x3d3   :  { %v5891_v38 = vor.u32 %v6354_v60, %v5888_v46  ;;  %4316 = vmatpush.bf16.msrb.mxu1 %v6374_v17  ;;  %v6360_v60 = vld [vmem:[%s7285_s11] sm:$0xff] }
 0x3d4   :  { %4102 = vmatpush.bf16.msrb.mxu3 %v5895_v11  ;;  %v6346_v11 = vld [vmem:[#allocation8 + $0x194] sm:$0xf]  ;;  %v6372_v46 = vld [vmem:[%s7285_s11 + $0x60] sm:$0xff] }
 0x3d6   :  { %4144 = vmatpush.bf16.msra.mxu2 %v5811_v51 }
 0x3d8   :  { %4103 = vmatpush.bf16.msrb.mxu3 %v5887_v63 }
 0x3da   :  { %4145 = vmatpush.bf16.msra.mxu2 %v5803_v18  ;;  %v5883_v18 = vor.u32 %v6352_v33, %v5880_v4 }
 0x3dc   :  { %4104 = vmatpush.bf16.msrb.mxu3 %v5879_v14  ;;  %v3736_v14 = vld [vmem:[%s7284_s10] sm:$0x3] }
 0x3dd   :  { %v3738_v8 = vperm.slane %v3736_v14, 0 }
 0x3de   :  { %4146 = vmatpush.bf16.msra.mxu2 %v5795_v52 }
 0x3e0   :  { %4105 = vmatpush.bf16.msrb.mxu3 %v5871_v58 }
 0x3e2   :  { %4147 = vmatpush.bf16.msra.mxu2 %v5787_v28  ;;  %v6348_v28 = vld [vmem:[#allocation8 + $0x1a4] sm:$0xf] }
 0x3e3   :  { %v5867_v0 = vor.u32 %v6348_v28, %v5864_v26 }
 0x3e4   :  { %v3582_v16 = vpop.f32.mrf.mxu1  ;;  %4106 = vmatpush.bf16.msrb.mxu3 %v5863_v56 }
 0x3e5   :  { %v3583_v44 = vadd.f32 %v3582_v16, %v3570_v42  ;;  %v5856_v16 = vld [vmem:[#allocation8 + $0x198] sm:$0xf0]  ;;  %v6373_v42 = vld [vmem:[%s7285_s11 + $0x68] sm:$0xff] }
 0x3e6   :  { %v5859_v61 = vor.u32 %v6346_v11, %v5856_v16  ;;  %4317 = vmatpush.bf16.msrb.mxu1 %v6373_v42 }
 0x3e8   :  { %v3543_v21 = vpop.f32.mrf.mxu2  ;;  %4107 = vmatpush.bf16.msrb.mxu3 %v5855_v57  ;;  %v6367_v57 = vld [vmem:[%s7285_s11 + $0x38] sm:$0xff] }
 0x3e9   :  { %v3544_v34 = vadd.f32 %v3543_v21, %v3531_v7  ;;  %v3556_v6 = vpop.f32.mrf.mxu3  ;;  %v5848_v7 = vld [vmem:[#allocation8 + $0x188] sm:$0xf0]  ;;  %4302 = vmatpush.bf16.msra.mxu0 %v6367_v57 }
 0x3ea   :  { %v5851_v63 = vor.u32 %v6344_v39, %v5848_v7  ;;  %4318 = vmatpush.bf16.msrb.mxu1 %v6372_v46 }
 0x3eb   :  { %v3557_v23 = vadd.f32 %v3556_v6, %v3544_v34 }
 0x3ec   :  { %v3584_v10 = vpop.f32.mrf.mxu1  ;;  %4108 = vmatpush.bf16.msrb.mxu3 %v5847_v27 }
 0x3ed   :  { %v3666_v2 = vmax.f32 %v3557_v23, 0.0  ;;  %4303 = vmatpush.bf16.msra.mxu0 %v6366_v9 }
 0x3ef   :  { %v3670_v50 = vpack.c.bf16 %v3666_v2, %v3666_v2 }
 0x3f0   :  { %v3545_v25 = vpop.f32.mrf.mxu2  ;;  %4153 = vmatpush.bf16.msra.mxu3 %v5907_v41  ;;  %v6364_v41 = vld [vmem:[%s7285_s11 + $0x20] sm:$0xff] }
 0x3f1   :  { %v3558_v30 = vpop.f32.mrf.mxu3  ;;  %4096 = vmatmul.bf16.vlgmr.msrb.gmra.mxu2 %v3670_v50  ;;  %v3739_v25 = vperm.slane %v3736_v14, 1  ;;  %4304 = vmatpush.bf16.msra.mxu0 %v6365_v59 }
 0x3f4   :  { %4154 = vmatpush.bf16.msra.mxu3 %v5899_v40  ;;  %v6362_v40 = vld [vmem:[%s7285_s11 + $0x10] sm:$0xff] }
 0x3f5   :  { %4305 = vmatpush.bf16.msra.mxu0 %v6364_v41 }
 0x3f8   :  { %4155 = vmatpush.bf16.msra.mxu3 %v5891_v38  ;;  %v6371_v38 = vld [vmem:[%s7285_s11 + $0x58] sm:$0xff] }
 0x3f9   :  { %4306 = vmatpush.bf16.msra.mxu0 %v6363_v3  ;;  %4319 = vmatpush.bf16.msrb.mxu1 %v6371_v38 }
 0x3fc   :  { %v4071_v37 = vpop.f32.mrf.mxu0  ;;  %4156 = vmatpush.bf16.msra.mxu3 %v5883_v18 }
 0x3fd   :  { %v4072_v15 = vadd.f32 %v4071_v37, %v3738_v8  ;;  %4307 = vmatpush.bf16.msra.mxu0 %v6362_v40  ;;  %v6361_v37 = vld [vmem:[%s7285_s11 + $0x8] sm:$0xff] }
 0x400   :  { %4157 = vmatpush.bf16.msra.mxu3 %v5875_v36 }
 0x401   :  { %4148 = vmatmul.bf16.vlgmr.msra.gmra.mxu2 %v3670_v50  ;;  %4308 = vmatpush.bf16.msra.mxu0 %v6361_v37 }
 0x404   :  { %v3634_v29 = vpop.f32.mrf.mxu1  ;;  %v4073_v55 = vpop.f32.mrf.mxu0  ;;  %4158 = vmatpush.bf16.msra.mxu3 %v5867_v0 }
 0x405   :  { %4309 = vmatpush.bf16.msra.mxu0 %v6360_v60 }
 0x408   :  { %v3595_v13 = vpop.f32.mrf.mxu2  ;;  %4159 = vmatpush.bf16.msra.mxu3 %v5859_v61 }
 0x409   :  { %v3608_v51 = vpop.f32.mrf.mxu3  ;;  %v3596_v1 = vadd.f32 %v3595_v13, %v3583_v44  ;;  %v6370_v44 = vld [vmem:[%s7285_s11 + $0x50] sm:$0xff]  ;;  %v6369_v13 = vld [vmem:[%s7285_s11 + $0x48] sm:$0xff] }
 0x40a   :  { %4320 = vmatpush.bf16.msrb.mxu1 %v6370_v44 }
 0x40b   :  { %v3609_v45 = vadd.f32 %v3608_v51, %v3596_v1  ;;  %v6368_v51 = vld [vmem:[%s7285_s11 + $0x40] sm:$0xff]  ;;  %s6546_s11 = smov [#allocation9]  }
 0x40c   :  { %v3636_v53 = vpop.f32.mrf.mxu1  ;;  %v4123_v54 = vpop.f32.mrf.mxu0  ;;  %4160 = vmatpush.bf16.msra.mxu3 %v5851_v63  ;;  %s4335_s21 = sshll.u32 %s6546_s11, 4  ;;  %s4336_s21 = int_to_ptr.vmem [resolvable:$true] %s4335_s21 }
 0x40d   :  { %v3622_v52 = vadd.f32 %v7209_v43, %v3609_v45  ;;  %v4124_v30 = vadd.f32 %v4123_v54, %v3739_v25 }
 0x40e   :  { %4321 = vmatpush.bf16.msrb.mxu1 %v6369_v13 }
 0x40f   :  { %v3635_v43 = vadd.f32 %v3634_v29, %v3622_v52 }
 0x410   :  { %v3597_v32 = vpop.f32.mrf.mxu2 }
 0x411   :  { %v3610_v5 = vpop.f32.mrf.mxu3 }
 0x412   :  { %4322 = vmatpush.bf16.msrb.mxu1 %v6368_v51  ;;  %v6430_v5 = vld [vmem:[%s7286_s12] ss:$0 sm:$0xff] }
 0x414   :  { %v4125_v21 = vpop.f32.mrf.mxu0 }
 0x428   :  { %v3647_v34 = vpop.f32.mrf.mxu2 }
 0x429   :  { %v3648_v6 = vadd.f32 %v3647_v34, %v3635_v43  ;;  %v3660_v19 = vpop.f32.mrf.mxu3 }
 0x42b   :  { %v3661_v12 = vadd.f32 %v3660_v19, %v3648_v6 }
 0x42d   :  { %v3667_v23 = vmax.f32 %v3661_v12, 0.0 }
 0x42e   :  { %v4084_v50 = vpop.f32.mrf.mxu1 }
 0x42f   :  { %v3671_v10 = vpack.c.bf16 %v3667_v23, %v3667_v23  ;;  %v4085_v58 = vadd.f32 %v4084_v50, %v4072_v15 }
 0x430   :  { %v3649_v2 = vpop.f32.mrf.mxu2 }
 0x431   :  { %v3662_v22 = vpop.f32.mrf.mxu3  ;;  %4109 = vmatmul.bf16.vlgmr.msrb.gmra.mxu3 %v3671_v10 }
 0x436   :  { %v4086_v20 = vpop.f32.mrf.mxu1 }
 0x441   :  { %4161 = vmatmul.bf16.vlgmr.msra.gmra.mxu3 %v3671_v10 }
 0x444   :  { %v4136_v56 = vpop.f32.mrf.mxu1 }
 0x445   :  { %v4137_v31 = vadd.f32 %v4136_v56, %v4124_v30 }
 0x44c   :  { %v4138_v47 = vpop.f32.mrf.mxu1 }
 0x474   :  { %v4097_v27 = vpop.f32.mrf.mxu2 }
 0x475   :  { %v4098_v1 = vadd.f32 %v4097_v27, %v4085_v58 }
 0x47c   :  { %v4099_v35 = vpop.f32.mrf.mxu2 }
 0x484   :  { %v4149_v49 = vpop.f32.mrf.mxu2 }
 0x485   :  { %v4150_v55 = vadd.f32 %v4149_v49, %v4137_v31 }
 0x48c   :  { %v4151_v29 = vpop.f32.mrf.mxu2 }
 0x4b4   :  { %v4110_v33 = vpop.f32.mrf.mxu3 }
 0x4b5   :  { %v4111_v4 = vadd.f32 %v4110_v33, %v4098_v1 }
 0x4b7   :  { %v4166_v18 = vmax.f32 %v4111_v4, 0.0 }
 0x4b9   :  { %v4168_v45 = vpack.c.bf16 %v4166_v18, %v4166_v18 }
 0x4bb   :  { %4310 = vmatmul.bf16.vlgmr.msra.gmra.mxu0 %v4168_v45 }
 0x4bc   :  { %v4112_v53 = vpop.f32.mrf.mxu3 }
 0x4c4   :  { %v4162_v52 = vpop.f32.mrf.mxu3 }
 0x4c5   :  { %v4163_v62 = vadd.f32 %v4162_v52, %v4150_v55 }
 0x4c7   :  { %v4167_v24 = vmax.f32 %v4163_v62, 0.0 }
 0x4c9   :  { %v4169_v36 = vpack.c.bf16 %v4167_v24, %v4167_v24 }
 0x4cb   :  { %4323 = vmatmul.bf16.vlgmr.msrb.gmra.mxu1 %v4169_v36 }
 0x4cc   :  { %v4164_v28 = vpop.f32.mrf.mxu3 }
 0x538   :  { %v4311_v26 = vpop.f32.mrf.mxu0 }
 0x539   :  { %v4312_v0 = vadd.f32 %v6430_v5, %v4311_v26 }
 0x540   :  { %v4313_v32 = vpop.f32.mrf.mxu0 }
 0x548   :  { %v4324_v54 = vpop.f32.mrf.mxu1 }
 0x549   :  { %v4325_v11 = vadd.f32 %v4324_v54, %v4312_v0 }
 0x54b   :  { %4329 = vst.msk [vmem:[#allocation9] sm:$0x3] %vm4328_vm8, %v4325_v11 }
 0x54c   :  { %4340 = dma.vmem_to_hbm [thread:$0]  %s4336_s21, 32, %s4338_s23, [#allocation5]  }
 0x550   :  { %v4326_v16 = vpop.f32.mrf.mxu1 }
 0x551   :  { %6532 = dma.done.wait [#allocation5], 32  }
 0x552   :  { %6533 = vsyncadd [#allocation5], 4294967264 }
 0x553   :  { %4345 = vsyncpa [#allocation4], 1 }
 0x554   :  { %4346 = vsyncpa [#allocation7], 1 }
 0x555   :  { %4347 = vsyncpa [#allocation5], 1 }

// kernel: tpu_custom_call.1
= control target key start
LH: loop header
LB: loop body
LE: loop exit
PB: predicated region body
PF: predicated region fallthrough
CT: control target
= control target key end

     0   :  { %18 = vsyncpa [#allocation4], 0  ;;  %s7274_s0 = inlined_call_operand.vmem [shape: f32[2,64,3], index: 0, kind: input, shape index: {}]   ;;  %s7275_s1 = inlined_call_operand.vmem [shape: f32[3,64], index: 1, kind: input, shape index: {}]   ;;  %s7276_s2 = inlined_call_operand.vmem [shape: f32[1,64], index: 2, kind: input, shape index: {}]   ;;  %s7277_s3 = inlined_call_operand.vmem [shape: bf16[64,128], index: 3, kind: input, shape index: {}]   ;;  %s7278_s4 = inlined_call_operand.vmem [shape: f32[1,128], index: 4, kind: input, shape index: {}]   ;;  %s7279_s5 = inlined_call_operand.hbm [shape: bf16[128,1024], index: 5, kind: input, shape index: {}]   ;;  %s7280_s6 = inlined_call_operand.vmem [shape: f32[1,1024], index: 6, kind: input, shape index: {}]   ;;  %s7281_s7 = inlined_call_operand.hbm [shape: bf16[1024,512], index: 7, kind: input, shape index: {}]   ;;  %s7282_s8 = inlined_call_operand.vmem [shape: f32[1,512], index: 8, kind: input, shape index: {}]   ;;  %s7283_s9 = inlined_call_operand.hbm [shape: bf16[512,256], index: 9, kind: input, shape index: {}]   ;;  %s7284_s10 = inlined_call_operand.vmem [shape: f32[1,256], index: 10, kind: input, shape index: {}]   ;;  %s7285_s11 = inlined_call_operand.vmem [shape: bf16[256,9], index: 11, kind: input, shape index: {}]   ;;  %s7286_s12 = inlined_call_operand.vmem [shape: f32[1,9], index: 12, kind: input, shape index: {}]   ;;  %s7287_s13 = inlined_call_operand.hbm [shape: f32[2,9], index: 13, kind: output, shape index: {}]  }
   0x1   :  { %19 = vsyncpa [#allocation7], 0  ;;  %s50_s27 = sshll.u32 %s7281_s7, 4  ;;  %s51_s27 = int_to_ptr.hbm [resolvable:$true] %s50_s27 }
   0x2   :  { %20 = vsyncpa [#allocation5], 0  ;;  %s6534_s28 = smov [#allocation6]   ;;  %s35_s15 = sshll.u32 %s7279_s5, 4  ;;  %s36_s15 = int_to_ptr.hbm [resolvable:$true] %s35_s15 }
   0x3   :  { %s52_s29 = sshll.u32 %s6534_s28, 4  ;;  %s6535_s16 = smov 256   ;;  %s53_s29 = int_to_ptr.vmem [resolvable:$true] %s52_s29 }
   0x4   :  { %s6536_s17 = smov 16   ;;  %s6537_s18 = smov [#allocation3]  }
   0x5   :  { %58 = dma.hbm_to_vmem [thread:$0]  %s51_s27, 32768, %s53_s29, [#allocation7], %s6535_s16, %s6535_s16, %s6536_s17  }
   0x6   :  { %s37_s19 = sshll.u32 %s6537_s18, 4  ;;  %s6538_s20 = smov 512   ;;  %s38_s19 = int_to_ptr.vmem [resolvable:$true] %s37_s19 }
   0x7   :  { %s6539_s21 = smov 32   ;;  %s65_s23 = sshll.u32 %s7283_s9, 4  ;;  %s66_s23 = int_to_ptr.hbm [resolvable:$true] %s65_s23 }
   0x8   :  { %43 = dma.hbm_to_vmem [thread:$0]  %s36_s15, 8192, %s38_s19, [#allocation4], %s6538_s20, %s6538_s20, %s6539_s21  }
   0x9   :  { %s6540_s24 = smov [#allocation8]   ;;  %s6541_s26 = smov 128  }
   0xa   :  { %s67_s25 = sshll.u32 %s6540_s24, 4  ;;  %s6542_s5 = smov 8   ;;  %s68_s25 = int_to_ptr.vmem [resolvable:$true] %s67_s25 }
   0xb   :  { %73 = dma.hbm_to_vmem [thread:$0]  %s66_s23, 8192, %s68_s25, [#allocation7], %s6541_s26, %s6541_s26, %s6542_s5  }
   0xc   :  { %6528 = dma.done.wait [#allocation4], 8192  }
   0xd   :  { %6529 = vsyncadd [#allocation4], 4294959104 }
   0xe   :  { %6530 = dma.done.wait [#allocation7], 40960  }
   0xf   :  { %6531 = vsyncadd [#allocation7], 4294926336  ;;  %v6543_v0 = vmov 1   ;;  %v6544_v1 = vmov 0   ;;  %v6545_v2 = vmov 2   ;;  %v93_v3 = vld [vmem:[%s7274_s0] sm:$0xff] }
  0x10   :  { %6390 = vset.pattern.permute.xlu1 %v6543_v0  ;;  %6389 = vset.pattern.permute.xlu0 %v6544_v1  ;;  %v94_v4 = vld [vmem:[%s7274_s0 + $0x8] sm:$0xff]  ;;  %v95_v5 = vld [vmem:[%s7274_s0 + $0x10] sm:$0xff]  ;;  %v96_v6 = vld [vmem:[%s7274_s0 + $0x18] sm:$0xff]  ;;  %vm481_vm0 = vcmask 523264   ;;  %vm1599_vm1 = vcmask 1041408   ;;  %vm1601_vm2 = vcmask 1045508  }
  0x11   :  { %6391 = vset.pattern.permute.xlu2 %v6545_v2  ;;  %208 = vperm.xlu1 %6390, %v93_v3   ;;  %v97_v7 = vld [vmem:[%s7274_s0 + $0x20] sm:$0xff]  ;;  %v98_v8 = vld [vmem:[%s7274_s0 + $0x28] sm:$0xff]  ;;  %v99_v9 = vld [vmem:[%s7274_s0 + $0x30] sm:$0xff]  ;;  %vm1603_vm3 = vcmask 1043456   ;;  %vm1619_vm4 = vcmask 1041409   ;;  %vm1621_vm5 = vcmask 1043459  }
  0x12   :  { %112 = vperm.xlu0 %6389, %v93_v3   ;;  %305 = vperm.xlu2 %6391, %v93_v3   ;;  %v100_v10 = vld [vmem:[%s7274_s0 + $0x38] sm:$0xff]  ;;  %v102_v11 = vld [vmem:[%s7274_s0 + $0x48] sm:$0xff]  ;;  %v103_v12 = vld [vmem:[%s7274_s0 + $0x50] sm:$0xff]  ;;  %vm1623_vm6 = vcmask 1045509   ;;  %vm1625_vm7 = vcmask 1047559   ;;  %s4337_s23 = sshll.u32 %s7287_s13, 4  ;;  %s4338_s23 = int_to_ptr.hbm [resolvable:$true] %s4337_s23 }
  0x13   :  { %v101_v13 = vld [vmem:[%s7274_s0 + $0x40] sm:$0xff]  ;;  %v104_v14 = vld [vmem:[%s7274_s0 + $0x58] sm:$0xff]  ;;  %v5974_v17 = vld [vmem:[%s7277_s3 + $0x10] sm:$0xff]  ;;  %vm4328_vm8 = vcmask 66560  }
  0x14   :  { %v105_v15 = vld [vmem:[%s7274_s0 + $0x60] sm:$0xff]  ;;  %v5975_v16 = vld [vmem:[%s7277_s3 + $0x18] sm:$0xff]  ;;  %v106_v18 = vld [vmem:[%s7274_s0 + $0x68] sm:$0xff] }
  0x15   :  { %510 = vmatpush.bf16.msra.mxu0 %v5975_v16  ;;  %v5973_v19 = vld [vmem:[%s7277_s3 + $0x8] sm:$0xff]  ;;  %v5972_v21 = vld [vmem:[%s7277_s3] sm:$0xff]  ;;  %v6711_v22 = vld [vmem:[%s7274_s0 + $0x70] sm:$0xff] }
  0x16   :  { %v109_v24 = vld [vmem:[%s7275_s1] sm:$0x7]  ;;  %v108_v52 = vld [vmem:[%s7274_s0 + $0x78] sm:$0xff] }
  0x17   :  { %v6719_v25 = vperm.slane %v109_v24, 1  ;;  %v6721_v26 = vperm.slane %v109_v24, 0  ;;  %v6723_v29 = vperm.slane %v109_v24, 2  ;;  %v6735_v40 = vld [vmem:[%s7276_s2] ss:$0 sm:$0xff] }
  0x19   :  { %212 = vperm.xlu1 %6390, %v94_v4   ;;  %511 = vmatpush.bf16.msra.mxu0 %v5974_v17 }
  0x1a   :  { %117 = vperm.xlu0 %6389, %v94_v4   ;;  %309 = vperm.xlu2 %6391, %v94_v4  }
  0x1d   :  { %512 = vmatpush.bf16.msra.mxu0 %v5973_v19 }
  0x21   :  { %6392 = vset.pattern.permute.xlu1 %v6544_v1  ;;  %513 = vmatpush.bf16.msra.mxu0 %v5972_v21 }
  0x22   :  { %122 = vperm.xlu0 %6389, %v95_v5   ;;  %127 = vperm.xlu1 %6392, %v96_v6  }
  0x23   :  { %6393 = vset.pattern.permute.xlu2 %v6543_v0 }
  0x24   :  { %216 = vperm.xlu2 %6393, %v95_v5  }
  0x2a   :  { %6394 = vset.pattern.permute.xlu0 %v6543_v0  ;;  %6395 = vset.pattern.permute.xlu1 %v6545_v2 }
  0x2b   :  { %220 = vperm.xlu0 %6394, %v96_v6   ;;  %313 = vperm.xlu1 %6395, %v95_v5  }
  0x2c   :  { %6396 = vset.pattern.permute.xlu2 %v6545_v2 }
  0x2d   :  { %317 = vperm.xlu2 %6396, %v96_v6  }
  0x33   :  { %224 = vperm.xlu0 %6394, %v97_v7   ;;  %6397 = vset.pattern.permute.xlu1 %v6544_v1 }
  0x34   :  { %132 = vperm.xlu1 %6397, %v97_v7  }
  0x35   :  { %6398 = vset.pattern.permute.xlu2 %v6544_v1 }
  0x36   :  { %137 = vperm.xlu2 %6398, %v98_v8  }
  0x3b   :  { %6401 = vset.pattern.permute.xlu0 %v6545_v2 }
  0x3c   :  { %325 = vperm.xlu0 %6401, %v98_v8   ;;  %6399 = vset.pattern.permute.xlu1 %v6543_v0 }
  0x3d   :  { %228 = vperm.xlu1 %6399, %v98_v8  }
  0x3e   :  { %6400 = vset.pattern.permute.xlu2 %v6545_v2 }
  0x3f   :  { %321 = vperm.xlu2 %6400, %v97_v7  }
  0x44   :  { %329 = vperm.xlu0 %6401, %v99_v9  }
  0x45   :  { %6402 = vset.pattern.permute.xlu1 %v6544_v1 }
  0x46   :  { %142 = vperm.xlu1 %6402, %v99_v9  }
  0x47   :  { %6403 = vset.pattern.permute.xlu2 %v6544_v1 }
  0x48   :  { %147 = vperm.xlu2 %6403, %v100_v10  }
  0x4c   :  { %6408 = vset.pattern.permute.xlu0 %v6544_v1 }
  0x4d   :  { %157 = vperm.xlu0 %6408, %v102_v11  }
  0x4e   :  { %6404 = vset.pattern.permute.xlu1 %v6543_v0 }
  0x4f   :  { %232 = vperm.xlu1 %6404, %v99_v9  }
  0x50   :  { %6405 = vset.pattern.permute.xlu2 %v6543_v0 }
  0x51   :  { %236 = vperm.xlu2 %6405, %v100_v10  }
  0x55   :  { %162 = vperm.xlu0 %6408, %v103_v12  }
  0x57   :  { %6406 = vset.pattern.permute.xlu1 %v6545_v2 }
  0x58   :  { %333 = vperm.xlu1 %6406, %v100_v10  }
  0x59   :  { %6407 = vset.pattern.permute.xlu2 %v6544_v1 }
  0x5a   :  { %152 = vperm.xlu2 %6407, %v101_v13  }
  0x5d   :  { %6415 = vset.pattern.permute.xlu0 %v6543_v0 }
  0x5e   :  { %252 = vperm.xlu0 %6415, %v104_v14  }
  0x60   :  { %6409 = vset.pattern.permute.xlu1 %v6543_v0 }
  0x61   :  { %240 = vperm.xlu1 %6409, %v101_v13  }
  0x62   :  { %6410 = vset.pattern.permute.xlu2 %v6543_v0 }
  0x63   :  { %244 = vperm.xlu2 %6410, %v102_v11  }
  0x66   :  { %256 = vperm.xlu0 %6415, %v105_v15  }
  0x69   :  { %6411 = vset.pattern.permute.xlu1 %v6545_v2 }
  0x6a   :  { %337 = vperm.xlu1 %6411, %v101_v13  }
  0x6b   :  { %6412 = vset.pattern.permute.xlu2 %v6545_v2 }
  0x6c   :  { %341 = vperm.xlu2 %6412, %v102_v11   ;;  %v306_v20 = vpop.permute.xlu2 %305 }
  0x6d   :  { %v369_v33 = vmul.f32 %v6723_v29, %v306_v20 }
  0x6e   :  { %6422 = vset.pattern.permute.xlu0 %v6545_v2 }
  0x6f   :  { %357 = vperm.xlu0 %6422, %v106_v18  }
  0x72   :  { %6413 = vset.pattern.permute.xlu1 %v6544_v1 }
  0x73   :  { %167 = vperm.xlu1 %6413, %v104_v14  }
  0x74   :  { %6414 = vset.pattern.permute.xlu2 %v6543_v0  ;;  %v310_v23 = vpop.permute.xlu2 %309 }
  0x75   :  { %248 = vperm.xlu2 %6414, %v103_v12   ;;  %v370_v41 = vmul.f32 %v6723_v29, %v310_v23 }
  0x77   :  { %361 = vperm.xlu0 %6422, %v6711_v22  }
  0x7b   :  { %6416 = vset.pattern.permute.xlu1 %v6545_v2 }
  0x7c   :  { %345 = vperm.xlu1 %6416, %v103_v12  }
  0x7d   :  { %6417 = vset.pattern.permute.xlu2 %v6545_v2 }
  0x7e   :  { %349 = vperm.xlu2 %6417, %v104_v14   ;;  %v217_v32 = vpop.permute.xlu2 %216 }
  0x7f   :  { %v274_v53 = vmul.f32 %v6719_v25, %v217_v32 }
  0x83   :  { %v209_v27 = vpop.permute.xlu1 %208 }
  0x84   :  { %v113_v28 = vpop.permute.xlu0 %112  ;;  %v272_v30 = vmul.f32 %v6719_v25, %v209_v27  ;;  %6418 = vset.pattern.permute.xlu1 %v6544_v1 }
  0x85   :  { %v191_v31 = vmul.f32 %v6721_v26, %v113_v28  ;;  %172 = vperm.xlu1 %6418, %v105_v15  }
  0x86   :  { %6419 = vset.pattern.permute.xlu2 %v6544_v1 }
  0x87   :  { %177 = vperm.xlu2 %6419, %v106_v18   ;;  %v288_v34 = vadd.f32 %v272_v30, %v191_v31  ;;  %v318_v43 = vpop.permute.xlu2 %317 }
  0x88   :  { %v372_v59 = vmul.f32 %v6723_v29, %v318_v43 }
  0x89   :  { %v385_v37 = vadd.f32 %v369_v33, %v288_v34 }
  0x8b   :  { %v213_v35 = vpop.permute.xlu1 %212  ;;  %v405_v45 = vadd.f32 %v6735_v40, %v385_v37 }
  0x8c   :  { %v118_v36 = vpop.permute.xlu0 %117  ;;  %v273_v38 = vmul.f32 %v6719_v25, %v213_v35 }
  0x8d   :  { %v192_v39 = vmul.f32 %v6721_v26, %v118_v36  ;;  %6420 = vset.pattern.permute.xlu1 %v6543_v0  ;;  %v421_v49 = vmax.f32 %v405_v45, 0.0 }
  0x8e   :  { %260 = vperm.xlu1 %6420, %v106_v18  }
  0x8f   :  { %v289_v42 = vadd.f32 %v273_v38, %v192_v39  ;;  %6421 = vset.pattern.permute.xlu2 %v6545_v2 }
  0x90   :  { %353 = vperm.xlu2 %6421, %v105_v15   ;;  %v138_v55 = vpop.permute.xlu2 %137 }
  0x91   :  { %v386_v44 = vadd.f32 %v370_v41, %v289_v42  ;;  %v196_v18 = vmul.f32 %v6721_v26, %v138_v55 }
  0x93   :  { %v406_v46 = vadd.f32 %v6735_v40, %v386_v44 }
  0x94   :  { %v123_v47 = vpop.permute.xlu0 %122  ;;  %v128_v48 = vpop.permute.xlu1 %127 }
  0x95   :  { %v422_v50 = vmax.f32 %v406_v46, 0.0  ;;  %v193_v54 = vmul.f32 %v6721_v26, %v123_v47  ;;  %v194_v58 = vmul.f32 %v6721_v26, %v128_v48 }
  0x96   :  { %6423 = vset.pattern.permute.xlu1 %v6544_v1 }
  0x97   :  { %v437_v51 = vpack.c.bf16 %v422_v50, %v421_v49  ;;  %182 = vperm.xlu1 %6423, %v6711_v22   ;;  %v290_v56 = vadd.f32 %v274_v53, %v193_v54 }
  0x98   :  { %6424 = vset.pattern.permute.xlu2 %v6544_v1 }
  0x99   :  { %4364 = vmatmul.msk.bf16.vlgmr.msra.gmra.mxu0 %vm481_vm0, %v437_v51  ;;  %187 = vperm.xlu2 %6424, %v108_v52   ;;  %v322_v5 = vpop.permute.xlu2 %321 }
  0x9a   :  { %v373_v15 = vmul.f32 %v6723_v29, %v322_v5 }
  0x9d   :  { %v221_v57 = vpop.permute.xlu0 %220  ;;  %v314_v61 = vpop.permute.xlu1 %313 }
  0x9e   :  { %v275_v60 = vmul.f32 %v6719_v25, %v221_v57  ;;  %v371_v62 = vmul.f32 %v6723_v29, %v314_v61 }
  0x9f   :  { %6425 = vset.pattern.permute.xlu1 %v6543_v0 }
  0xa0   :  { %v291_v63 = vadd.f32 %v275_v60, %v194_v58  ;;  %v387_v1 = vadd.f32 %v371_v62, %v290_v56  ;;  %264 = vperm.xlu1 %6425, %v6711_v22  }
  0xa1   :  { %6426 = vset.pattern.permute.xlu2 %v6543_v0 }
  0xa2   :  { %v388_v3 = vadd.f32 %v372_v59, %v291_v63  ;;  %268 = vperm.xlu2 %6426, %v108_v52   ;;  %v407_v4 = vadd.f32 %v6735_v40, %v387_v1  ;;  %v148_v0 = vpop.permute.xlu2 %147 }
  0xa3   :  { %v198_v41 = vmul.f32 %v6721_v26, %v148_v0  ;;  %v6032_v0 = vld [vmem:[#allocation3 + $0x1c4] sm:$0xf] }
  0xa4   :  { %v408_v6 = vadd.f32 %v6735_v40, %v388_v3  ;;  %v423_v7 = vmax.f32 %v407_v4, 0.0 }
  0xa5   :  { %v225_v8 = vpop.permute.xlu0 %224 }
  0xa6   :  { %v424_v9 = vmax.f32 %v408_v6, 0.0  ;;  %v133_v10 = vpop.permute.xlu1 %132  ;;  %v276_v13 = vmul.f32 %v6719_v25, %v225_v8 }
  0xa7   :  { %v195_v12 = vmul.f32 %v6721_v26, %v133_v10 }
  0xa8   :  { %v438_v11 = vpack.c.bf16 %v424_v9, %v423_v7  ;;  %6427 = vset.pattern.permute.xlu1 %v6545_v2 }
  0xa9   :  { %365 = vperm.xlu1 %6427, %v108_v52   ;;  %v292_v14 = vadd.f32 %v276_v13, %v195_v12  ;;  %v4598_v12 = vld [vmem:[#allocation3 + $0x1c0] sm:$0xf] }
  0xaa   :  { %4365 = vmatmul.msk.bf16.gmra.mxu0 %vm481_vm0, %v438_v11  ;;  %v6036_v13 = vld [vmem:[#allocation3 + $0x1dc] sm:$0xf0] }
  0xab   :  { %v389_v19 = vadd.f32 %v373_v15, %v292_v14  ;;  %v237_v24 = vpop.permute.xlu2 %236  ;;  %v4599_v15 = vor.u32 %v6036_v13, %v4598_v12  ;;  %v4472_v13 = vld [vmem:[#allocation3 + $0xe0] sm:$0xf0] }
  0xac   :  { %v279_v42 = vmul.f32 %v6719_v25, %v237_v24 }
  0xad   :  { %v409_v23 = vadd.f32 %v6735_v40, %v389_v19  ;;  %v6037_v19 = vld [vmem:[#allocation3 + $0x1e4] sm:$0xf0]  ;;  %963 = vmatpush.bf16.msra.mxu1 %v4599_v15 }
  0xae   :  { %v326_v16 = vpop.permute.xlu0 %325  ;;  %v295_v46 = vadd.f32 %v279_v42, %v198_v41  ;;  %v4608_v41 = vld [vmem:[#allocation3 + $0x1e8] sm:$0xf0] }
  0xaf   :  { %v229_v17 = vpop.permute.xlu1 %228  ;;  %v374_v21 = vmul.f32 %v6723_v29, %v326_v16  ;;  %v425_v28 = vmax.f32 %v409_v23, 0.0  ;;  %v4600_v16 = vld [vmem:[#allocation3 + $0x1e0] sm:$0xf0] }
  0xb0   :  { %v277_v20 = vmul.f32 %v6719_v25, %v229_v17  ;;  %v4606_v17 = vld [vmem:[#allocation3 + $0x1c8] sm:$0xf] }
  0xb1   :  { %v4607_v23 = vor.u32 %v6037_v19, %v4606_v17 }
  0xb2   :  { %v293_v22 = vadd.f32 %v277_v20, %v196_v18  ;;  %v4603_v18 = vor.u32 %v6032_v0, %v4600_v16  ;;  %v4478_v0 = vld [vmem:[#allocation3 + $0xc8] sm:$0xf] }
  0xb3   :  { %1061 = vmatpush.bf16.msra.mxu3 %v4607_v23 }
  0xb4   :  { %v390_v2 = vadd.f32 %v374_v21, %v293_v22  ;;  %v153_v33 = vpop.permute.xlu2 %152  ;;  %1012 = vmatpush.bf16.msra.mxu2 %v4603_v18 }
  0xb5   :  { %v199_v1 = vmul.f32 %v6721_v26, %v153_v33  ;;  %v4574_v33 = vld [vmem:[#allocation3 + $0x188] sm:$0xf] }
  0xb6   :  { %v410_v27 = vadd.f32 %v6735_v40, %v390_v2  ;;  %v330_v36 = vpop.permute.xlu0 %329 }
  0xb7   :  { %v375_v39 = vmul.f32 %v6723_v29, %v330_v36 }
  0xb8   :  { %v426_v30 = vmax.f32 %v410_v27, 0.0  ;;  %v143_v31 = vpop.permute.xlu1 %142  ;;  %v4566_v27 = vld [vmem:[#allocation3 + $0x180] sm:$0xf] }
  0xb9   :  { %v197_v37 = vmul.f32 %v6721_v26, %v143_v31 }
  0xba   :  { %v439_v32 = vpack.c.bf16 %v426_v30, %v425_v28  ;;  %v6028_v28 = vld [vmem:[#allocation3 + $0x19c] sm:$0xf0]  ;;  %v6024_v30 = vld [vmem:[#allocation3 + $0x184] sm:$0xf] }
  0xbb   :  { %v4567_v31 = vor.u32 %v6028_v28, %v4566_v27  ;;  %v4440_v27 = vld [vmem:[#allocation3 + $0xa0] sm:$0xf0]  ;;  %v4446_v28 = vld [vmem:[#allocation3 + $0x88] sm:$0xf] }
  0xbc   :  { %4366 = vmatmul.msk.bf16.gmra.mxu0 %vm481_vm0, %v439_v32  ;;  %v4568_v32 = vld [vmem:[#allocation3 + $0x1a0] sm:$0xf0] }
  0xbd   :  { %v245_v43 = vpop.permute.xlu2 %244  ;;  %964 = vmatpush.bf16.msra.mxu1 %v4567_v31  ;;  %v6025_v31 = vld [vmem:[#allocation3 + $0x18c] sm:$0xf] }
  0xbe   :  { %v281_v54 = vmul.f32 %v6719_v25, %v245_v43  ;;  %v4534_v43 = vld [vmem:[#allocation3 + $0x140] sm:$0xf] }
  0xbf   :  { %v158_v50 = vpop.permute.xlu0 %157 }
  0xc0   :  { %v200_v55 = vmul.f32 %v6721_v26, %v158_v50  ;;  %v4542_v50 = vld [vmem:[#allocation3 + $0x148] sm:$0xf] }
  0xc1   :  { %v233_v34 = vpop.permute.xlu1 %232 }
  0xc2   :  { %v278_v35 = vmul.f32 %v6719_v25, %v233_v34  ;;  %v297_v59 = vadd.f32 %v281_v54, %v200_v55  ;;  %v6029_v34 = vld [vmem:[#allocation3 + $0x1a4] sm:$0xf0]  ;;  %v4502_v55 = vld [vmem:[#allocation3 + $0x100] sm:$0xf] }
  0xc3   :  { %v4575_v36 = vor.u32 %v6029_v34, %v4574_v33 }
  0xc4   :  { %v294_v38 = vadd.f32 %v278_v35, %v197_v37  ;;  %v4571_v35 = vor.u32 %v6024_v30, %v4568_v32  ;;  %v5997_v30 = vld [vmem:[#allocation3 + $0xa4] sm:$0xf0]  ;;  %v4576_v32 = vld [vmem:[#allocation3 + $0x1a8] sm:$0xf0] }
  0xc5   :  { %1062 = vmatpush.bf16.msra.mxu3 %v4575_v36  ;;  %v4447_v34 = vor.u32 %v5997_v30, %v4446_v28  ;;  %v5977_v28 = vld [vmem:[#allocation3 + $0xc] sm:$0xf] }
  0xc6   :  { %v391_v44 = vadd.f32 %v375_v39, %v294_v38  ;;  %v342_v56 = vpop.permute.xlu2 %341  ;;  %v6033_v39 = vld [vmem:[#allocation3 + $0x1cc] sm:$0xf]  ;;  %1013 = vmatpush.bf16.msra.mxu2 %v4571_v35 }
  0xc7   :  { %v378_v60 = vmul.f32 %v6723_v29, %v342_v56  ;;  %v163_v61 = vpop.permute.xlu0 %162  ;;  %v4611_v42 = vor.u32 %v6033_v39, %v4608_v41  ;;  %v6012_v56 = vld [vmem:[#allocation3 + $0x11c] sm:$0xf0]  ;;  %v4384_v30 = vld [vmem:[#allocation3 + $0x28] sm:$0xf0] }
  0xc8   :  { %v411_v48 = vadd.f32 %v6735_v40, %v391_v44  ;;  %v6020_v44 = vld [vmem:[#allocation3 + $0x15c] sm:$0xf0] }
  0xc9   :  { %v394_v63 = vadd.f32 %v378_v60, %v297_v59  ;;  %1110 = vmatpush.bf16.msrb.mxu0 %v4611_v42  ;;  %v4503_v59 = vor.u32 %v6012_v56, %v4502_v55  ;;  %v4504_v60 = vld [vmem:[#allocation3 + $0x120] sm:$0xf0]  ;;  %v4406_v39 = vld [vmem:[#allocation3 + $0x40] sm:$0xf] }
  0xca   :  { %v334_v45 = vpop.permute.xlu1 %333  ;;  %v427_v52 = vmax.f32 %v411_v48, 0.0  ;;  %v4535_v48 = vor.u32 %v6020_v44, %v4534_v43  ;;  %v5988_v41 = vld [vmem:[#allocation3 + $0x5c] sm:$0xf0]  ;;  %v5984_v42 = vld [vmem:[#allocation3 + $0x44] sm:$0xf] }
  0xcb   :  { %v376_v47 = vmul.f32 %v6723_v29, %v334_v45  ;;  %v414_v6 = vadd.f32 %v6735_v40, %v394_v63  ;;  %v6016_v45 = vld [vmem:[#allocation3 + $0x144] sm:$0xf]  ;;  %v4407_v43 = vor.u32 %v5988_v41, %v4406_v39  ;;  %v4374_v55 = vld [vmem:[#allocation3] sm:$0xf] }
  0xcc   :  { %965 = vmatpush.bf16.msra.mxu1 %v4535_v48  ;;  %v4408_v44 = vld [vmem:[#allocation3 + $0x60] sm:$0xf0]  ;;  %v5980_v56 = vld [vmem:[#allocation3 + $0x1c] sm:$0xf0] }
  0xcd   :  { %v392_v49 = vadd.f32 %v376_v47, %v295_v46  ;;  %v430_v9 = vmax.f32 %v414_v6, 0.0  ;;  %v201_v46 = vmul.f32 %v6721_v26, %v163_v61  ;;  %v4510_v61 = vld [vmem:[#allocation3 + $0x108] sm:$0xf] }
  0xcf   :  { %v412_v51 = vadd.f32 %v6735_v40, %v392_v49  ;;  %v249_v4 = vpop.permute.xlu2 %248  ;;  %v4536_v49 = vld [vmem:[#allocation3 + $0x160] sm:$0xf0] }
  0xd0   :  { %v253_v11 = vpop.permute.xlu0 %252  ;;  %v282_v47 = vmul.f32 %v6719_v25, %v249_v4  ;;  %966 = vmatpush.bf16.msra.mxu1 %v4503_v59  ;;  %v4376_v59 = vld [vmem:[#allocation3 + $0x20] sm:$0xf0] }
  0xd1   :  { %v428_v53 = vmax.f32 %v412_v51, 0.0  ;;  %v283_v21 = vmul.f32 %v6719_v25, %v253_v11  ;;  %v6021_v51 = vld [vmem:[#allocation3 + $0x164] sm:$0xf0] }
  0xd3   :  { %v241_v57 = vpop.permute.xlu1 %240  ;;  %v440_v58 = vpack.c.bf16 %v428_v53, %v427_v52  ;;  %v4539_v52 = vor.u32 %v6016_v45, %v4536_v49  ;;  %v4543_v53 = vor.u32 %v6021_v51, %v4542_v50  ;;  %v4414_v45 = vld [vmem:[#allocation3 + $0x48] sm:$0xf]  ;;  %v6017_v49 = vld [vmem:[#allocation3 + $0x14c] sm:$0xf] }
  0xd4   :  { %v280_v62 = vmul.f32 %v6719_v25, %v241_v57  ;;  %v6008_v57 = vld [vmem:[#allocation3 + $0x104] sm:$0xf]  ;;  %v4544_v50 = vld [vmem:[#allocation3 + $0x168] sm:$0xf0] }
  0xd5   :  { %4367 = vmatmul.msk.bf16.gmra.mxu0 %vm481_vm0, %v440_v58  ;;  %1014 = vmatpush.bf16.msra.mxu2 %v4539_v52 }
  0xd6   :  { %v296_v5 = vadd.f32 %v280_v62, %v199_v1  ;;  %v298_v62 = vadd.f32 %v282_v47, %v201_v46  ;;  %1063 = vmatpush.bf16.msra.mxu3 %v4543_v53  ;;  %v4507_v1 = vor.u32 %v6008_v57, %v4504_v60  ;;  %v5989_v46 = vld [vmem:[#allocation3 + $0x64] sm:$0xf0]  ;;  %v4411_v47 = vor.u32 %v5984_v42, %v4408_v44  ;;  %v5976_v57 = vld [vmem:[#allocation3 + $0x4] sm:$0xf] }
  0xd7   :  { %v4415_v48 = vor.u32 %v5989_v46, %v4414_v45  ;;  %v4547_v53 = vor.u32 %v6017_v49, %v4544_v50  ;;  %v4382_v60 = vld [vmem:[#allocation3 + $0x8] sm:$0xf] }
  0xd8   :  { %v350_v24 = vpop.permute.xlu2 %349  ;;  %v257_v19 = vpop.permute.xlu0 %256 }
  0xd9   :  { %v380_v38 = vmul.f32 %v6723_v29, %v350_v24  ;;  %1015 = vmatpush.bf16.msra.mxu2 %v4507_v1  ;;  %v284_v36 = vmul.f32 %v6719_v25, %v257_v19  ;;  %v4379_v1 = vor.u32 %v5976_v57, %v4376_v59  ;;  %v5993_v19 = vld [vmem:[#allocation3 + $0x8c] sm:$0xf] }
  0xdc   :  { %v338_v3 = vpop.permute.xlu1 %337 }
  0xdd   :  { %v377_v7 = vmul.f32 %v6723_v29, %v338_v3  ;;  %v6013_v3 = vld [vmem:[#allocation3 + $0x124] sm:$0xf0] }
  0xdf   :  { %v393_v8 = vadd.f32 %v377_v7, %v296_v5  ;;  %v4511_v5 = vor.u32 %v6013_v3, %v4510_v61  ;;  %v5981_v61 = vld [vmem:[#allocation3 + $0x24] sm:$0xf0] }
  0xe0   :  { %v4383_v3 = vor.u32 %v5981_v61, %v4382_v60 }
  0xe1   :  { %v413_v10 = vadd.f32 %v6735_v40, %v393_v8  ;;  %v6795_v4 = vpop.permute.xlu2 %177  ;;  %v4470_v8 = vld [vmem:[#allocation3 + $0xc0] sm:$0xf]  ;;  %1064 = vmatpush.bf16.msra.mxu3 %v4511_v5  ;;  %v6009_v5 = vld [vmem:[#allocation3 + $0x10c] sm:$0xf] }
  0xe3   :  { %v429_v14 = vmax.f32 %v413_v10, 0.0  ;;  %v6000_v10 = vld [vmem:[#allocation3 + $0xc4] sm:$0xf] }
  0xe4   :  { %v4475_v15 = vor.u32 %v6000_v10, %v4472_v13 }
  0xe5   :  { %v168_v20 = vpop.permute.xlu1 %167  ;;  %v441_v22 = vpack.c.bf16 %v430_v9, %v429_v14  ;;  %v6004_v9 = vld [vmem:[#allocation3 + $0xdc] sm:$0xf0]  ;;  %v6005_v14 = vld [vmem:[#allocation3 + $0xe4] sm:$0xf0] }
  0xe6   :  { %v202_v2 = vmul.f32 %v6721_v26, %v168_v20  ;;  %v4471_v12 = vor.u32 %v6004_v9, %v4470_v8  ;;  %v4479_v16 = vor.u32 %v6005_v14, %v4478_v0  ;;  %1016 = vmatpush.bf16.msra.mxu2 %v4475_v15  ;;  %v4438_v20 = vld [vmem:[#allocation3 + $0x80] sm:$0xf]  ;;  %v4480_v0 = vld [vmem:[#allocation3 + $0xe8] sm:$0xf0] }
  0xe7   :  { %4368 = vmatmul.msk.bf16.gmra.mxu0 %vm481_vm0, %v441_v22  ;;  %v5992_v22 = vld [vmem:[#allocation3 + $0x84] sm:$0xf] }
  0xe8   :  { %v299_v37 = vadd.f32 %v283_v21, %v202_v2  ;;  %967 = vmatpush.bf16.msra.mxu1 %v4471_v12  ;;  %v5996_v21 = vld [vmem:[#allocation3 + $0x9c] sm:$0xf0]  ;;  %1065 = vmatpush.bf16.msra.mxu3 %v4479_v16  ;;  %v4443_v33 = vor.u32 %v5992_v22, %v4440_v27 }
  0xe9   :  { %v4439_v24 = vor.u32 %v5996_v21, %v4438_v20  ;;  %v4448_v20 = vld [vmem:[#allocation3 + $0xa8] sm:$0xf0] }
  0xea   :  { %v396_v54 = vadd.f32 %v380_v38, %v299_v37  ;;  %v4579_v37 = vor.u32 %v6025_v31, %v4576_v32  ;;  %v354_v38 = vpop.permute.xlu2 %353  ;;  %1017 = vmatpush.bf16.msra.mxu2 %v4443_v33  ;;  %v4451_v21 = vor.u32 %v5993_v19, %v4448_v20  ;;  %v4387_v32 = vor.u32 %v5977_v28, %v4384_v30  ;;  %v6039_v19 = vld [vmem:[#allocation3 + $0x1f4] sm:$0xf0]  ;;  %v4614_v28 = vld [vmem:[#allocation3 + $0x1d0] sm:$0xf] }
  0xeb   :  { %v381_v52 = vmul.f32 %v6723_v29, %v354_v38  ;;  %v6038_v30 = vld [vmem:[#allocation3 + $0x1ec] sm:$0xf0] }
  0xec   :  { %v416_v6 = vadd.f32 %v6735_v40, %v396_v54  ;;  %968 = vmatpush.bf16.msra.mxu1 %v4439_v24  ;;  %1111 = vmatpush.bf16.msrb.mxu0 %v4579_v37  ;;  %v358_v54 = vpop.permute.xlu0 %357  ;;  %v4416_v24 = vld [vmem:[#allocation3 + $0x68] sm:$0xf0] }
  0xed   :  { %1066 = vmatpush.bf16.msra.mxu3 %v4447_v34  ;;  %v382_v9 = vmul.f32 %v6723_v29, %v358_v54 }
  0xee   :  { %v346_v58 = vpop.permute.xlu1 %345  ;;  %v432_v17 = vmax.f32 %v416_v6, 0.0  ;;  %1018 = vmatpush.bf16.msra.mxu2 %v4411_v47  ;;  %v4512_v6 = vld [vmem:[#allocation3 + $0x128] sm:$0xf0] }
  0xef   :  { %v379_v63 = vmul.f32 %v6723_v29, %v346_v58  ;;  %v4375_v58 = vor.u32 %v5980_v56, %v4374_v55  ;;  %v4515_v10 = vor.u32 %v6009_v5, %v4512_v6 }
  0xf0   :  { %969 = vmatpush.bf16.msra.mxu1 %v4407_v43  ;;  %1112 = vmatpush.bf16.msrb.mxu0 %v4547_v53  ;;  %v6818_v43 = vld [vmem:[%s7278_s4] ss:$0 sm:$0xff] }
  0xf1   :  { %v395_v7 = vadd.f32 %v379_v63, %v298_v62  ;;  %1067 = vmatpush.bf16.msra.mxu3 %v4415_v48  ;;  %v204_v62 = vmul.f32 %v6721_v26, %v6795_v4  ;;  %v6001_v4 = vld [vmem:[#allocation3 + $0xcc] sm:$0xf] }
  0xf2   :  { %1019 = vmatpush.bf16.msra.mxu2 %v4379_v1  ;;  %v4483_v14 = vor.u32 %v6001_v4, %v4480_v0 }
  0xf3   :  { %v415_v11 = vadd.f32 %v6735_v40, %v395_v7  ;;  %v188_v22 = vpop.permute.xlu2 %187 }
  0xf4   :  { %970 = vmatpush.bf16.msra.mxu1 %v4375_v58  ;;  %1113 = vmatpush.bf16.msrb.mxu0 %v4515_v10  ;;  %v206_v39 = vmul.f32 %v6721_v26, %v188_v22  ;;  %v4624_v22 = vld [vmem:[#allocation3 + $0x1f8] sm:$0xf0] }
  0xf5   :  { %v431_v18 = vmax.f32 %v415_v11, 0.0  ;;  %1068 = vmatpush.bf16.msra.mxu3 %v4383_v3 }
  0xf7   :  { %v173_v23 = vpop.permute.xlu1 %172  ;;  %v442_v2 = vpack.c.bf16 %v432_v17, %v431_v18 }
  0xf8   :  { %v203_v35 = vmul.f32 %v6721_v26, %v173_v23  ;;  %1114 = vmatpush.bf16.msrb.mxu0 %v4483_v14  ;;  %v6034_v14 = vld [vmem:[#allocation3 + $0x1d4] sm:$0xf] }
  0xf9   :  { %4369 = vmatmul.msk.bf16.gmra.mxu0 %vm481_vm0, %v442_v2  ;;  %v5985_v2 = vld [vmem:[#allocation3 + $0x4c] sm:$0xf] }
  0xfa   :  { %v300_v51 = vadd.f32 %v284_v36, %v203_v35  ;;  %v4419_v27 = vor.u32 %v5985_v2, %v4416_v24  ;;  %v362_v35 = vpop.permute.xlu0 %361 }
  0xfb   :  { %v383_v41 = vmul.f32 %v6723_v29, %v362_v35 }
  0xfc   :  { %v397_v7 = vadd.f32 %v381_v52, %v300_v51  ;;  %1115 = vmatpush.bf16.msrb.mxu0 %v4451_v21  ;;  %v269_v36 = vpop.permute.xlu2 %268  ;;  %v6035_v21 = vld [vmem:[#allocation3 + $0x1dc] sm:$0xf] }
  0xfd   :  { %v287_v42 = vmul.f32 %v6719_v25, %v269_v36  ;;  %v6026_v36 = vld [vmem:[#allocation3 + $0x194] sm:$0xf] }
  0xfe   :  { %v417_v12 = vadd.f32 %v6735_v40, %v397_v7 }
  0xff   :  { %v303_v46 = vadd.f32 %v287_v42, %v206_v39  ;;  %v6027_v42 = vld [vmem:[#allocation3 + $0x19c] sm:$0xf] }
 0x100   :  { %v261_v63 = vpop.permute.xlu1 %260  ;;  %v433_v16 = vmax.f32 %v417_v12, 0.0  ;;  %1116 = vmatpush.bf16.msrb.mxu0 %v4419_v27 }
 0x101   :  { %v285_v8 = vmul.f32 %v6719_v25, %v261_v63 }
 0x103   :  { %v301_v11 = vadd.f32 %v285_v8, %v204_v62 }
 0x104   :  { %1117 = vmatpush.bf16.msrb.mxu0 %v4387_v32 }
 0x105   :  { %v398_v13 = vadd.f32 %v382_v9, %v301_v11 }
 0x107   :  { %v418_v15 = vadd.f32 %v6735_v40, %v398_v13 }
 0x109   :  { %v434_v17 = vmax.f32 %v418_v15, 0.0  ;;  %v183_v18 = vpop.permute.xlu1 %182  ;;  %v4616_v15 = vld [vmem:[#allocation3 + $0x1f0] sm:$0xf0] }
 0x10a   :  { %v205_v34 = vmul.f32 %v6721_v26, %v183_v18  ;;  %v4619_v18 = vor.u32 %v6034_v14, %v4616_v15  ;;  %v6011_v14 = vld [vmem:[#allocation3 + $0x11c] sm:$0xf] }
 0x10b   :  { %v443_v23 = vpack.c.bf16 %v434_v17, %v433_v16  ;;  %v4622_v16 = vld [vmem:[#allocation3 + $0x1d8] sm:$0xf]  ;;  %v4528_v15 = vld [vmem:[#allocation3 + $0x138] sm:$0xf0] }
 0x10c   :  { %v4623_v20 = vor.u32 %v6039_v19, %v4622_v16  ;;  %1208 = vmatpush.bf16.msrb.mxu2 %v4619_v18  ;;  %v4486_v19 = vld [vmem:[#allocation3 + $0xd0] sm:$0xf] }
 0x10d   :  { %4370 = vmatmul.msk.bf16.gmra.mxu0 %vm481_vm0, %v443_v23  ;;  %v4627_v23 = vor.u32 %v6035_v21, %v4624_v22  ;;  %v6002_v21 = vld [vmem:[#allocation3 + $0xd4] sm:$0xf] }
 0x10e   :  { %1257 = vmatpush.bf16.msrb.mxu3 %v4623_v20  ;;  %v6006_v20 = vld [vmem:[#allocation3 + $0xec] sm:$0xf0] }
 0x10f   :  { %1306 = vmatpush.bf16.msra.mxu0 %v4627_v23  ;;  %v4487_v23 = vor.u32 %v6006_v20, %v4486_v19 }
 0x112   :  { %v265_v31 = vpop.permute.xlu1 %264 }
 0x113   :  { %v286_v33 = vmul.f32 %v6719_v25, %v265_v31  ;;  %v4615_v31 = vor.u32 %v6038_v30, %v4614_v28 }
 0x115   :  { %v302_v38 = vadd.f32 %v286_v33, %v205_v34  ;;  %1159 = vmatpush.bf16.msrb.mxu1 %v4615_v31 }
 0x116   :  { %v515_v37 = vpop.f32.mrf.mxu0 }
 0x117   :  { %v399_v44 = vadd.f32 %v383_v41, %v302_v38  ;;  %v516_v47 = vadd.f32 %v6818_v43, %v515_v37  ;;  %v4584_v37 = vld [vmem:[#allocation3 + $0x1b0] sm:$0xf0]  ;;  %v4590_v38 = vld [vmem:[#allocation3 + $0x198] sm:$0xf] }
 0x118   :  { %v4587_v39 = vor.u32 %v6026_v36, %v4584_v37  ;;  %v6031_v41 = vld [vmem:[#allocation3 + $0x1b4] sm:$0xf0]  ;;  %v5998_v37 = vld [vmem:[#allocation3 + $0xac] sm:$0xf0] }
 0x119   :  { %v419_v51 = vadd.f32 %v6735_v40, %v399_v44  ;;  %v555_v52 = vmax.f32 %v516_v47, 0.0  ;;  %v4592_v44 = vld [vmem:[#allocation3 + $0x1b8] sm:$0xf0]  ;;  %v4582_v47 = vld [vmem:[#allocation3 + $0x190] sm:$0xf] }
 0x11a   :  { %1209 = vmatpush.bf16.msrb.mxu2 %v4587_v39  ;;  %v4456_v39 = vld [vmem:[#allocation3 + $0xb0] sm:$0xf0] }
 0x11b   :  { %v366_v45 = vpop.permute.xlu1 %365  ;;  %v435_v56 = vmax.f32 %v419_v51, 0.0 }
 0x11c   :  { %v384_v48 = vmul.f32 %v6723_v29, %v366_v45  ;;  %v4591_v45 = vor.u32 %v6031_v41, %v4590_v38  ;;  %v5994_v38 = vld [vmem:[#allocation3 + $0x94] sm:$0xf] }
 0x11e   :  { %v517_v49 = vpop.f32.mrf.mxu0  ;;  %v400_v50 = vadd.f32 %v384_v48, %v303_v46  ;;  %v4595_v46 = vor.u32 %v6027_v42, %v4592_v44  ;;  %v6030_v48 = vld [vmem:[#allocation3 + $0x1ac] sm:$0xf0]  ;;  %1258 = vmatpush.bf16.msrb.mxu3 %v4591_v45  ;;  %v4462_v45 = vld [vmem:[#allocation3 + $0x98] sm:$0xf] }
 0x11f   :  { %v518_v26 = vadd.f32 %v6818_v43, %v517_v49  ;;  %v4583_v49 = vor.u32 %v6030_v48, %v4582_v47  ;;  %v5995_v47 = vld [vmem:[#allocation3 + $0x9c] sm:$0xf] }
 0x120   :  { %v420_v25 = vadd.f32 %v6735_v40, %v400_v50  ;;  %1307 = vmatpush.bf16.msra.mxu0 %v4595_v46  ;;  %v5999_v46 = vld [vmem:[#allocation3 + $0xb4] sm:$0xf0]  ;;  %v4464_v48 = vld [vmem:[#allocation3 + $0xb8] sm:$0xf0] }
 0x121   :  { %v556_v53 = vmax.f32 %v518_v26, 0.0  ;;  %1160 = vmatpush.bf16.msrb.mxu1 %v4583_v49 }
 0x122   :  { %v436_v54 = vmax.f32 %v420_v25, 0.0 }
 0x123   :  { %v6825_v55 = vpack.c.bf16 %v556_v53, %v555_v52  ;;  %v6018_v53 = vld [vmem:[#allocation3 + $0x154] sm:$0xf] }
 0x124   :  { %v444_v57 = vpack.c.bf16 %v436_v54, %v435_v56  ;;  %v4552_v54 = vld [vmem:[#allocation3 + $0x170] sm:$0xf0] }
 0x125   :  { %971 = vmatmul.bf16.vlgmr.msra.gmra.mxu1 %v6825_v55  ;;  %1020 = vmatmul.bf16.vlgmr.msra.gmra.mxu2 %v6825_v55  ;;  %v4555_v56 = vor.u32 %v6018_v53, %v4552_v54  ;;  %v5986_v53 = vld [vmem:[#allocation3 + $0x54] sm:$0xf] }
 0x126   :  { %1069 = vmatmul.bf16.vlgmr.msra.gmra.mxu3 %v6825_v55  ;;  %4371 = vmatmul.msk.bf16.gmra.mxu0 %vm481_vm0, %v444_v57  ;;  %v4558_v57 = vld [vmem:[#allocation3 + $0x158] sm:$0xf] }
 0x127   :  { %v520_v29 = vpop.f32.mrf.mxu0  ;;  %1210 = vmatpush.bf16.msrb.mxu2 %v4555_v56  ;;  %v4424_v56 = vld [vmem:[#allocation3 + $0x70] sm:$0xf0] }
 0x128   :  { %v521_v58 = vadd.f32 %v6818_v43, %v520_v29  ;;  %v6023_v29 = vld [vmem:[#allocation3 + $0x174] sm:$0xf0] }
 0x12a   :  { %v557_v60 = vmax.f32 %v521_v58, 0.0 }
 0x12f   :  { %v522_v59 = vpop.f32.mrf.mxu0 }
 0x130   :  { %v523_v40 = vadd.f32 %v6818_v43, %v522_v59  ;;  %v4559_v59 = vor.u32 %v6023_v29, %v4558_v57  ;;  %v4430_v57 = vld [vmem:[#allocation3 + $0x58] sm:$0xf] }
 0x131   :  { %v5991_v29 = vld [vmem:[#allocation3 + $0x74] sm:$0xf0] }
 0x132   :  { %v558_v61 = vmax.f32 %v523_v40, 0.0  ;;  %1259 = vmatpush.bf16.msrb.mxu3 %v4559_v59  ;;  %v6019_v40 = vld [vmem:[#allocation3 + $0x15c] sm:$0xf]  ;;  %v4427_v59 = vor.u32 %v5986_v53, %v4424_v56 }
 0x134   :  { %v6833_v62 = vpack.c.bf16 %v558_v61, %v557_v60  ;;  %v4560_v60 = vld [vmem:[#allocation3 + $0x178] sm:$0xf0] }
 0x135   :  { %v4563_v61 = vor.u32 %v6019_v40, %v4560_v60  ;;  %v4431_v40 = vor.u32 %v5991_v29, %v4430_v57  ;;  %v5987_v60 = vld [vmem:[#allocation3 + $0x5c] sm:$0xf] }
 0x136   :  { %976 = vmatmul.bf16.gmra.mxu1 %v6833_v62  ;;  %1025 = vmatmul.bf16.gmra.mxu2 %v6833_v62 }
 0x137   :  { %1074 = vmatmul.bf16.gmra.mxu3 %v6833_v62  ;;  %1118 = vmatmul.bf16.vlgmr.msrb.gmra.mxu0 %v6825_v55 }
 0x138   :  { %1308 = vmatpush.bf16.msra.mxu0 %v4563_v61  ;;  %v4432_v61 = vld [vmem:[#allocation3 + $0x78] sm:$0xf0] }
 0x139   :  { %v525_v63 = vpop.f32.mrf.mxu0 }
 0x13a   :  { %v526_v1 = vadd.f32 %v6818_v43, %v525_v63  ;;  %v4550_v63 = vld [vmem:[#allocation3 + $0x150] sm:$0xf] }
 0x13c   :  { %v559_v6 = vmax.f32 %v526_v1, 0.0  ;;  %v6022_v1 = vld [vmem:[#allocation3 + $0x16c] sm:$0xf0] }
 0x141   :  { %v527_v3 = vpop.f32.mrf.mxu0 }
 0x142   :  { %v528_v5 = vadd.f32 %v6818_v43, %v527_v3 }
 0x144   :  { %v560_v7 = vmax.f32 %v528_v5, 0.0  ;;  %v4551_v5 = vor.u32 %v6022_v1, %v4550_v63  ;;  %v4435_v63 = vor.u32 %v5987_v60, %v4432_v61  ;;  %v4390_v1 = vld [vmem:[#allocation3 + $0x10] sm:$0xf] }
 0x146   :  { %v6841_v8 = vpack.c.bf16 %v560_v7, %v559_v6  ;;  %1161 = vmatpush.bf16.msrb.mxu1 %v4551_v5  ;;  %v4518_v6 = vld [vmem:[#allocation3 + $0x110] sm:$0xf]  ;;  %v5978_v5 = vld [vmem:[#allocation3 + $0x14] sm:$0xf] }
 0x147   :  { %1123 = vmatmul.bf16.gmra.mxu0 %v6833_v62  ;;  %v6014_v7 = vld [vmem:[#allocation3 + $0x12c] sm:$0xf0] }
 0x148   :  { %981 = vmatmul.bf16.gmra.mxu1 %v6841_v8  ;;  %1030 = vmatmul.bf16.gmra.mxu2 %v6841_v8 }
 0x149   :  { %1079 = vmatmul.bf16.gmra.mxu3 %v6841_v8 }
 0x152   :  { %v530_v9 = vpop.f32.mrf.mxu0 }
 0x153   :  { %v531_v10 = vadd.f32 %v6818_v43, %v530_v9  ;;  %v4519_v9 = vor.u32 %v6014_v7, %v4518_v6  ;;  %v4392_v7 = vld [vmem:[#allocation3 + $0x30] sm:$0xf0] }
 0x155   :  { %v561_v13 = vmax.f32 %v531_v10, 0.0  ;;  %v6010_v10 = vld [vmem:[#allocation3 + $0x114] sm:$0xf]  ;;  %1162 = vmatpush.bf16.msrb.mxu1 %v4519_v9  ;;  %v4398_v9 = vld [vmem:[#allocation3 + $0x18] sm:$0xf] }
 0x157   :  { %1128 = vmatmul.bf16.gmra.mxu0 %v6841_v8 }
 0x159   :  { %1163 = vmatpush.bf16.msrb.mxu1 %v4487_v23 }
 0x15a   :  { %v532_v11 = vpop.f32.mrf.mxu0 }
 0x15b   :  { %v533_v12 = vadd.f32 %v6818_v43, %v532_v11  ;;  %v4520_v11 = vld [vmem:[#allocation3 + $0x130] sm:$0xf0] }
 0x15d   :  { %v562_v4 = vmax.f32 %v533_v12, 0.0  ;;  %v4526_v12 = vld [vmem:[#allocation3 + $0x118] sm:$0xf] }
 0x15f   :  { %v6850_v0 = vpack.c.bf16 %v562_v4, %v561_v13  ;;  %v4523_v13 = vor.u32 %v6010_v10, %v4520_v11  ;;  %v6015_v4 = vld [vmem:[#allocation3 + $0x134] sm:$0xf0]  ;;  %v5979_v11 = vld [vmem:[#allocation3 + $0x1c] sm:$0xf] }
 0x160   :  { %v4527_v16 = vor.u32 %v6015_v4, %v4526_v12  ;;  %v5983_v10 = vld [vmem:[#allocation3 + $0x34] sm:$0xf0]  ;;  %v4400_v12 = vld [vmem:[#allocation3 + $0x38] sm:$0xf0] }
 0x161   :  { %986 = vmatmul.bf16.gmra.mxu1 %v6850_v0  ;;  %1035 = vmatmul.bf16.gmra.mxu2 %v6850_v0  ;;  %v4399_v4 = vor.u32 %v5983_v10, %v4398_v9 }
 0x162   :  { %1084 = vmatmul.bf16.gmra.mxu3 %v6850_v0  ;;  %1211 = vmatpush.bf16.msrb.mxu2 %v4523_v13  ;;  %v4395_v13 = vor.u32 %v5978_v5, %v4392_v7 }
 0x163   :  { %1260 = vmatpush.bf16.msrb.mxu3 %v4527_v16 }
 0x164   :  { %v535_v17 = vpop.f32.mrf.mxu0 }
 0x165   :  { %v536_v2 = vadd.f32 %v6818_v43, %v535_v17  ;;  %v4531_v17 = vor.u32 %v6011_v14, %v4528_v15  ;;  %v4403_v14 = vor.u32 %v5979_v11, %v4400_v12 }
 0x167   :  { %1133 = vmatmul.bf16.gmra.mxu0 %v6850_v0  ;;  %v563_v32 = vmax.f32 %v536_v2, 0.0  ;;  %v4488_v2 = vld [vmem:[#allocation3 + $0xf0] sm:$0xf0] }
 0x168   :  { %1309 = vmatpush.bf16.msra.mxu0 %v4531_v17  ;;  %v4491_v30 = vor.u32 %v6002_v21, %v4488_v2 }
 0x16a   :  { %1212 = vmatpush.bf16.msrb.mxu2 %v4491_v30 }
 0x16c   :  { %v537_v24 = vpop.f32.mrf.mxu0 }
 0x16d   :  { %v538_v27 = vadd.f32 %v6818_v43, %v537_v24  ;;  %v4494_v24 = vld [vmem:[#allocation3 + $0xd8] sm:$0xf] }
 0x16f   :  { %v564_v33 = vmax.f32 %v538_v27, 0.0  ;;  %v6007_v27 = vld [vmem:[#allocation3 + $0xf4] sm:$0xf0] }
 0x170   :  { %v4495_v31 = vor.u32 %v6007_v27, %v4494_v24 }
 0x171   :  { %v6858_v34 = vpack.c.bf16 %v564_v33, %v563_v32  ;;  %v6003_v32 = vld [vmem:[#allocation3 + $0xdc] sm:$0xf] }
 0x172   :  { %v4496_v33 = vld [vmem:[#allocation3 + $0xf8] sm:$0xf0]  ;;  %1261 = vmatpush.bf16.msrb.mxu3 %v4495_v31 }
 0x173   :  { %991 = vmatmul.bf16.gmra.mxu1 %v6858_v34  ;;  %1040 = vmatmul.bf16.gmra.mxu2 %v6858_v34  ;;  %v4499_v36 = vor.u32 %v6003_v32, %v4496_v33 }
 0x174   :  { %1089 = vmatmul.bf16.gmra.mxu3 %v6858_v34 }
 0x175   :  { %1310 = vmatpush.bf16.msra.mxu0 %v4499_v36 }
 0x176   :  { %v540_v35 = vpop.f32.mrf.mxu0 }
 0x177   :  { %1138 = vmatmul.bf16.gmra.mxu0 %v6858_v34  ;;  %v541_v50 = vadd.f32 %v6818_v43, %v540_v35  ;;  %v4454_v35 = vld [vmem:[#allocation3 + $0x90] sm:$0xf] }
 0x178   :  { %v4455_v44 = vor.u32 %v5998_v37, %v4454_v35 }
 0x179   :  { %v565_v52 = vmax.f32 %v541_v50, 0.0  ;;  %v4459_v50 = vor.u32 %v5994_v38, %v4456_v39 }
 0x17a   :  { %1164 = vmatpush.bf16.msrb.mxu1 %v4455_v44 }
 0x17b   :  { %1213 = vmatpush.bf16.msrb.mxu2 %v4459_v50 }
 0x17e   :  { %v542_v26 = vpop.f32.mrf.mxu0 }
 0x17f   :  { %v543_v51 = vadd.f32 %v6818_v43, %v542_v26  ;;  %v4463_v26 = vor.u32 %v5999_v46, %v4462_v45  ;;  %1214 = vmatpush.bf16.msrb.mxu2 %v4427_v59 }
 0x181   :  { %v566_v25 = vmax.f32 %v543_v51, 0.0  ;;  %v4467_v51 = vor.u32 %v5995_v47, %v4464_v48  ;;  %1262 = vmatpush.bf16.msrb.mxu3 %v4463_v26 }
 0x183   :  { %v6866_v58 = vpack.c.bf16 %v566_v25, %v565_v52  ;;  %v4422_v52 = vld [vmem:[#allocation3 + $0x50] sm:$0xf]  ;;  %1311 = vmatpush.bf16.msra.mxu0 %v4467_v51  ;;  %1215 = vmatpush.bf16.msrb.mxu2 %v4395_v13 }
 0x184   :  { %v5990_v25 = vld [vmem:[#allocation3 + $0x6c] sm:$0xf0] }
 0x185   :  { %996 = vmatmul.bf16.gmra.mxu1 %v6866_v58  ;;  %1045 = vmatmul.bf16.gmra.mxu2 %v6866_v58  ;;  %v4423_v54 = vor.u32 %v5990_v25, %v4422_v52 }
 0x186   :  { %1094 = vmatmul.bf16.gmra.mxu3 %v6866_v58 }
 0x187   :  { %1143 = vmatmul.bf16.gmra.mxu0 %v6866_v58  ;;  %1165 = vmatpush.bf16.msrb.mxu1 %v4423_v54 }
 0x188   :  { %1263 = vmatpush.bf16.msrb.mxu3 %v4431_v40  ;;  %1312 = vmatpush.bf16.msra.mxu0 %v4435_v63 }
 0x18a   :  { %v545_v3 = vpop.f32.mrf.mxu0 }
 0x18b   :  { %v546_v18 = vadd.f32 %v6818_v43, %v545_v3  ;;  %v5982_v3 = vld [vmem:[#allocation3 + $0x2c] sm:$0xf0] }
 0x18c   :  { %v4391_v6 = vor.u32 %v5982_v3, %v4390_v1  ;;  %1264 = vmatpush.bf16.msrb.mxu3 %v4399_v4  ;;  %1313 = vmatpush.bf16.msra.mxu0 %v4403_v14 }
 0x18d   :  { %v567_v41 = vmax.f32 %v546_v18, 0.0 }
 0x18e   :  { %1166 = vmatpush.bf16.msrb.mxu1 %v4391_v6 }
 0x192   :  { %v547_v22 = vpop.f32.mrf.mxu0 }
 0x193   :  { %v548_v28 = vadd.f32 %v6818_v43, %v547_v22 }
 0x195   :  { %v568_v42 = vmax.f32 %v548_v28, 0.0 }
 0x197   :  { %v6874_v49 = vpack.c.bf16 %v568_v42, %v567_v41 }
 0x199   :  { %1001 = vmatmul.bf16.gmra.mxu1 %v6874_v49  ;;  %1050 = vmatmul.bf16.gmra.mxu2 %v6874_v49 }
 0x19a   :  { %1099 = vmatmul.bf16.gmra.mxu3 %v6874_v49  ;;  %1148 = vmatmul.bf16.gmra.mxu0 %v6874_v49 }
 0x1a2   :  { %v972_v15 = vpop.f32.mrf.mxu1 }
 0x1a3   :  { %v550_v16 = vpop.f32.mrf.mxu0 }
 0x1a4   :  { %v551_v20 = vadd.f32 %v6818_v43, %v550_v16 }
 0x1a6   :  { %v569_v23 = vmax.f32 %v551_v20, 0.0 }
 0x1a8   :  { %v1021_v17 = vpop.f32.mrf.mxu2 }
 0x1a9   :  { %v1070_v18 = vpop.f32.mrf.mxu3 }
 0x1aa   :  { %v974_v19 = vpop.f32.mrf.mxu1 }
 0x1ab   :  { %v552_v21 = vpop.f32.mrf.mxu0  ;;  %v1355_v30 = vmax.f32 %v972_v15, %v974_v19 }
 0x1ac   :  { %v553_v22 = vadd.f32 %v6818_v43, %v552_v21 }
 0x1ae   :  { %v570_v2 = vmax.f32 %v553_v22, 0.0 }
 0x1b0   :  { %v1023_v24 = vpop.f32.mrf.mxu2  ;;  %v6882_v27 = vpack.c.bf16 %v570_v2, %v569_v23 }
 0x1b1   :  { %v1072_v28 = vpop.f32.mrf.mxu3  ;;  %v1368_v35 = vmax.f32 %v1021_v17, %v1023_v24 }
 0x1b2   :  { %1006 = vmatmul.bf16.gmra.mxu1 %v6882_v27  ;;  %1055 = vmatmul.bf16.gmra.mxu2 %v6882_v27  ;;  %v1381_v43 = vmax.f32 %v1070_v18, %v1072_v28 }
 0x1b3   :  { %v977_v31 = vpop.f32.mrf.mxu1  ;;  %1104 = vmatmul.bf16.gmra.mxu3 %v6882_v27  ;;  %1153 = vmatmul.bf16.gmra.mxu0 %v6882_v27 }
 0x1b4   :  { %v1356_v32 = vmax.f32 %v1355_v30, %v977_v31  ;;  %v1119_v33 = vpop.f32.mrf.mxu0 }
 0x1b9   :  { %v1026_v36 = vpop.f32.mrf.mxu2 }
 0x1ba   :  { %v1369_v37 = vmax.f32 %v1368_v35, %v1026_v36  ;;  %v1075_v38 = vpop.f32.mrf.mxu3 }
 0x1bb   :  { %v1382_v39 = vmax.f32 %v1381_v43, %v1075_v38  ;;  %v979_v42 = vpop.f32.mrf.mxu1 }
 0x1bc   :  { %v1121_v41 = vpop.f32.mrf.mxu0  ;;  %v1357_v47 = vmax.f32 %v1356_v32, %v979_v42 }
 0x1bd   :  { %v1394_v44 = vmax.f32 %v1119_v33, %v1121_v41 }
 0x1c1   :  { %v1028_v45 = vpop.f32.mrf.mxu2 }
 0x1c2   :  { %1167 = vmatmul.bf16.vlgmr.msrb.gmra.mxu1 %v6825_v55  ;;  %1216 = vmatmul.bf16.vlgmr.msrb.gmra.mxu2 %v6825_v55  ;;  %v1077_v48 = vpop.f32.mrf.mxu3  ;;  %v1370_v52 = vmax.f32 %v1369_v37, %v1028_v45 }
 0x1c3   :  { %1265 = vmatmul.bf16.vlgmr.msrb.gmra.mxu3 %v6825_v55  ;;  %1314 = vmatmul.bf16.vlgmr.msra.gmra.mxu0 %v6825_v55  ;;  %v1383_v25 = vmax.f32 %v1382_v39, %v1077_v48 }
 0x1c4   :  { %v1124_v46 = vpop.f32.mrf.mxu0 }
 0x1c5   :  { %v1395_v50 = vmax.f32 %v1394_v44, %v1124_v46  ;;  %v982_v26 = vpop.f32.mrf.mxu1 }
 0x1c6   :  { %v1358_v51 = vmax.f32 %v1357_v47, %v982_v26 }
 0x1cb   :  { %v1031_v53 = vpop.f32.mrf.mxu2 }
 0x1cc   :  { %v1126_v54 = vpop.f32.mrf.mxu0  ;;  %v1371_v56 = vmax.f32 %v1370_v52, %v1031_v53  ;;  %v1080_v57 = vpop.f32.mrf.mxu3 }
 0x1cd   :  { %v1384_v29 = vmax.f32 %v1383_v25, %v1080_v57  ;;  %v1396_v59 = vmax.f32 %v1395_v50, %v1126_v54  ;;  %v984_v60 = vpop.f32.mrf.mxu1 }
 0x1ce   :  { %v1359_v1 = vmax.f32 %v1358_v51, %v984_v60 }
 0x1d2   :  { %1172 = vmatmul.bf16.gmra.mxu1 %v6833_v62  ;;  %1221 = vmatmul.bf16.gmra.mxu2 %v6833_v62 }
 0x1d3   :  { %1270 = vmatmul.bf16.gmra.mxu3 %v6833_v62  ;;  %1319 = vmatmul.bf16.gmra.mxu0 %v6833_v62  ;;  %v1033_v63 = vpop.f32.mrf.mxu2 }
 0x1d4   :  { %v1129_v55 = vpop.f32.mrf.mxu0  ;;  %v1082_v3 = vpop.f32.mrf.mxu3  ;;  %v1372_v9 = vmax.f32 %v1371_v56, %v1033_v63 }
 0x1d5   :  { %v1397_v40 = vmax.f32 %v1396_v59, %v1129_v55  ;;  %v1385_v10 = vmax.f32 %v1384_v29, %v1082_v3 }
 0x1dc   :  { %v1131_v61 = vpop.f32.mrf.mxu0 }
 0x1dd   :  { %v1398_v7 = vmax.f32 %v1397_v40, %v1131_v61 }
 0x1de   :  { %v987_v5 = vpop.f32.mrf.mxu1 }
 0x1df   :  { %v1360_v6 = vmax.f32 %v1359_v1, %v987_v5 }
 0x1e2   :  { %1177 = vmatmul.bf16.gmra.mxu1 %v6841_v8  ;;  %1226 = vmatmul.bf16.gmra.mxu2 %v6841_v8 }
 0x1e3   :  { %1275 = vmatmul.bf16.gmra.mxu3 %v6841_v8  ;;  %1324 = vmatmul.bf16.gmra.mxu0 %v6841_v8 }
 0x1e4   :  { %v1134_v62 = vpop.f32.mrf.mxu0  ;;  %v1036_v12 = vpop.f32.mrf.mxu2 }
 0x1e5   :  { %v1399_v11 = vmax.f32 %v1398_v7, %v1134_v62  ;;  %v1373_v13 = vmax.f32 %v1372_v9, %v1036_v12  ;;  %v1085_v4 = vpop.f32.mrf.mxu3  ;;  %v4742_v7 = vld [vmem:[#allocation6 + $0xe0] sm:$0xf]  ;;  %v6070_v9 = vld [vmem:[#allocation6 + $0xec] sm:$0xf0] }
 0x1e6   :  { %v1386_v14 = vmax.f32 %v1385_v10, %v1085_v4  ;;  %v989_v15 = vpop.f32.mrf.mxu1  ;;  %v4743_v62 = vor.u32 %v6070_v9, %v4742_v7  ;;  %v4726_v10 = vld [vmem:[#allocation6 + $0xc0] sm:$0xf] }
 0x1e7   :  { %v1361_v16 = vmax.f32 %v1360_v6, %v989_v15  ;;  %v4646_v9 = vld [vmem:[#allocation6 + $0x20] sm:$0xf] }
 0x1e8   :  { %3248 = vmatpush.bf16.msra.mxu1 %v4743_v62  ;;  %v6046_v62 = vld [vmem:[#allocation6 + $0x2c] sm:$0xf0] }
 0x1e9   :  { %v1362_v17 = vrot.slane %v1361_v16, 4 }
 0x1eb   :  { %v1363_v18 = vmax.f32 %v1361_v16, %v1362_v17  ;;  %v6062_v16 = vld [vmem:[#allocation6 + $0xac] sm:$0xf0] }
 0x1ec   :  { %v1136_v19 = vpop.f32.mrf.mxu0  ;;  %v1038_v21 = vpop.f32.mrf.mxu2 }
 0x1ed   :  { %v1400_v20 = vmax.f32 %v1399_v11, %v1136_v19  ;;  %v1374_v22 = vmax.f32 %v1373_v13, %v1038_v21  ;;  %v1087_v23 = vpop.f32.mrf.mxu3  ;;  %v1364_v28 = vrot.slane %v1363_v18, 2  ;;  %v6066_v11 = vld [vmem:[#allocation6 + $0xcc] sm:$0xf0] }
 0x1ee   :  { %v1387_v24 = vmax.f32 %v1386_v14, %v1087_v23  ;;  %v4727_v13 = vor.u32 %v6066_v11, %v4726_v10  ;;  %v6058_v19 = vld [vmem:[#allocation6 + $0x8c] sm:$0xf0] }
 0x1ef   :  { %v1401_v2 = vrot.slane %v1400_v20, 4  ;;  %v1375_v8 = vrot.slane %v1374_v22, 4  ;;  %v1365_v43 = vmax.f32 %v1363_v18, %v1364_v28  ;;  %v4694_v18 = vld [vmem:[#allocation6 + $0x80] sm:$0xf]  ;;  %v6102_v23 = vld [vmem:[#allocation6 + $0x1ec] sm:$0xf0] }
 0x1f0   :  { %v1388_v31 = vrot.slane %v1387_v24, 4  ;;  %v6906_v26 = vpop.f32.mrf.mxu1  ;;  %3249 = vmatpush.bf16.msra.mxu1 %v4727_v13  ;;  %v4695_v21 = vor.u32 %v6058_v19, %v4694_v18  ;;  %v6090_v13 = vld [vmem:[#allocation6 + $0x18c] sm:$0xf0] }
 0x1f1   :  { %v1402_v30 = vmax.f32 %v1400_v20, %v1401_v2  ;;  %v1376_v32 = vmax.f32 %v1374_v22, %v1375_v8  ;;  %v1366_v44 = vrot.slane %v1365_v43, 1  ;;  %v4870_v22 = vld [vmem:[#allocation6 + $0x1e0] sm:$0xf]  ;;  %v6134_v8 = vld [vmem:[#allocation6 + $0x2ec] sm:$0xf0] }
 0x1f2   :  { %v1389_v35 = vmax.f32 %v1387_v24, %v1388_v31  ;;  %1182 = vmatmul.bf16.gmra.mxu1 %v6850_v0  ;;  %1231 = vmatmul.bf16.gmra.mxu2 %v6850_v0  ;;  %v4998_v2 = vld [vmem:[#allocation6 + $0x2e0] sm:$0xf]  ;;  %v4871_v28 = vor.u32 %v6102_v23, %v4870_v22  ;;  %v6042_v22 = vld [vmem:[#allocation6 + $0xc] sm:$0xf0] }
 0x1f3   :  { %v1403_v33 = vrot.slane %v1402_v30, 2  ;;  %v1377_v36 = vrot.slane %v1376_v32, 2  ;;  %1280 = vmatmul.bf16.gmra.mxu3 %v6850_v0  ;;  %1329 = vmatmul.bf16.gmra.mxu0 %v6850_v0  ;;  %v1367_v25 = vmax.f32 %v1365_v43, %v1366_v44  ;;  %v4678_v31 = vld [vmem:[#allocation6 + $0x60] sm:$0xf]  ;;  %v6050_v44 = vld [vmem:[#allocation6 + $0x4c] sm:$0xf0] }
 0x1f4   :  { %v1390_v38 = vrot.slane %v1389_v35, 2  ;;  %v6904_v48 = vpop.f32.mrf.mxu0  ;;  %3261 = vmatpush.bf16.msra.mxu2 %v4871_v28  ;;  %v4854_v43 = vld [vmem:[#allocation6 + $0x1c0] sm:$0xf] }
 0x1f5   :  { %v1404_v37 = vmax.f32 %v1402_v30, %v1403_v33  ;;  %v1378_v39 = vmax.f32 %v1376_v32, %v1377_v36  ;;  %v4999_v30 = vor.u32 %v6134_v8, %v4998_v2  ;;  %v6054_v32 = vld [vmem:[#allocation6 + $0x6c] sm:$0xf0]  ;;  %v4934_v28 = vld [vmem:[#allocation6 + $0x260] sm:$0xf] }
 0x1f6   :  { %v1391_v42 = vmax.f32 %v1389_v35, %v1390_v38  ;;  %v6913_v29 = vpop.f32.mrf.mxu2  ;;  %v4679_v35 = vor.u32 %v6054_v32, %v4678_v31  ;;  %v6098_v36 = vld [vmem:[#allocation6 + $0x1cc] sm:$0xf0]  ;;  %v5126_v31 = vld [vmem:[#allocation6 + $0x3e0] sm:$0xf] }
 0x1f7   :  { %v1405_v41 = vrot.slane %v1404_v37, 1  ;;  %v1379_v45 = vrot.slane %v1378_v39, 1  ;;  %v6915_v59 = vpop.f32.mrf.mxu3  ;;  %3274 = vmatpush.bf16.msra.mxu3 %v4999_v30  ;;  %v4855_v38 = vor.u32 %v6098_v36, %v4854_v43  ;;  %v6086_v2 = vld [vmem:[#allocation6 + $0x16c] sm:$0xf0] }
 0x1f8   :  { %v1392_v47 = vrot.slane %v1391_v42, 1  ;;  %v6921_v40 = vpop.f32.mrf.mxu1  ;;  %v6118_v30 = vld [vmem:[#allocation6 + $0x26c] sm:$0xf0] }
 0x1f9   :  { %v1406_v46 = vmax.f32 %v1404_v37, %v1405_v41  ;;  %v1380_v50 = vmax.f32 %v1378_v39, %v1379_v45  ;;  %v6130_v39 = vld [vmem:[#allocation6 + $0x2cc] sm:$0xf0]  ;;  %3262 = vmatpush.bf16.msra.mxu2 %v4855_v38 }
 0x1fa   :  { %v1393_v52 = vmax.f32 %v1391_v42, %v1392_v47  ;;  %v4662_v42 = vld [vmem:[#allocation6 + $0x40] sm:$0xf]  ;;  %v6094_v47 = vld [vmem:[#allocation6 + $0x1ac] sm:$0xf0] }
 0x1fb   :  { %v1589_v51 = vrot.slane %v1406_v46, 2  ;;  %v1587_v53 = vrot.slane %v1380_v50, 6  ;;  %v4663_v45 = vor.u32 %v6050_v44, %v4662_v42  ;;  %v4838_v46 = vld [vmem:[#allocation6 + $0x1a0] sm:$0xf] }
 0x1fc   :  { %v1588_v0 = vrot.slane %v1393_v52, 4  ;;  %v6917_v55 = vpop.f32.mrf.mxu0  ;;  %v4966_v50 = vld [vmem:[#allocation6 + $0x2a0] sm:$0xf]  ;;  %v4839_v52 = vor.u32 %v6094_v47, %v4838_v46  ;;  %v6162_v47 = vld [vmem:[#allocation6 + $0x3cc] sm:$0xf0] }
 0x1fd   :  { %v1600_v54 = vsel %vm1599_vm1, %v1367_v25, %v1587_v53  ;;  %v6126_v25 = vld [vmem:[#allocation6 + $0x2ac] sm:$0xf0]  ;;  %v1498_v53 = vmax.f32 %v6904_v48, %v6917_v55  ;;  %v5110_v46 = vld [vmem:[#allocation6 + $0x3c0] sm:$0xf] }
 0x1fe   :  { %v1602_v56 = vsel %vm1601_vm2, %v1588_v0, %v1589_v51  ;;  %v6925_v60 = vpop.f32.mrf.mxu2  ;;  %v1459_v51 = vmax.f32 %v6906_v26, %v6921_v40  ;;  %3263 = vmatpush.bf16.msra.mxu2 %v4839_v52  ;;  %v4647_v26 = vor.u32 %v6046_v62, %v4646_v9  ;;  %v4822_v40 = vld [vmem:[#allocation6 + $0x180] sm:$0xf]  ;;  %v5111_v52 = vor.u32 %v6162_v47, %v5110_v46  ;;  %v6078_v9 = vld [vmem:[#allocation6 + $0x12c] sm:$0xf0] }
 0x1ff   :  { %v6911_v57 = vsel %vm1603_vm3, %v1600_v54, %v1602_v56  ;;  %v6927_v61 = vpop.f32.mrf.mxu3  ;;  %v4967_v54 = vor.u32 %v6126_v25, %v4966_v50  ;;  %v1472_v18 = vmax.f32 %v6913_v29, %v6925_v60  ;;  %v5046_v46 = vld [vmem:[#allocation6 + $0x340] sm:$0xf]  ;;  %v6146_v47 = vld [vmem:[#allocation6 + $0x34c] sm:$0xf0] }
 0x202   :  { %1187 = vmatmul.bf16.gmra.mxu1 %v6858_v34  ;;  %1236 = vmatmul.bf16.gmra.mxu2 %v6858_v34  ;;  %v6929_v63 = vpop.f32.mrf.mxu1 }
 0x203   :  { %1285 = vmatmul.bf16.gmra.mxu3 %v6858_v34  ;;  %1334 = vmatmul.bf16.gmra.mxu0 %v6858_v34  ;;  %v1460_v56 = vmax.f32 %v1459_v51, %v6929_v63 }
 0x204   :  { %v6931_v1 = vpop.f32.mrf.mxu0 }
 0x205   :  { %v1499_v10 = vmax.f32 %v1498_v53, %v6931_v1 }
 0x208   :  { %v6933_v3 = vpop.f32.mrf.mxu2 }
 0x209   :  { %v6935_v5 = vpop.f32.mrf.mxu3  ;;  %v1473_v29 = vmax.f32 %v1472_v18, %v6933_v3  ;;  %v4935_v3 = vor.u32 %v6118_v30, %v4934_v28 }
 0x20a   :  { %v6941_v34 = vpop.f32.mrf.mxu1 }
 0x20b   :  { %v1461_v48 = vmax.f32 %v1460_v56, %v6941_v34  ;;  %v1485_v34 = vmax.f32 %v6915_v59, %v6927_v61  ;;  %v4774_v56 = vld [vmem:[#allocation6 + $0x120] sm:$0xf] }
 0x20c   :  { %v6943_v6 = vpop.f32.mrf.mxu0 }
 0x20d   :  { %v1500_v63 = vmax.f32 %v1499_v10, %v6943_v6  ;;  %v4806_v6 = vld [vmem:[#allocation6 + $0x160] sm:$0xf]  ;;  %v1486_v8 = vmax.f32 %v1485_v34, %v6935_v5  ;;  %v6082_v5 = vld [vmem:[#allocation6 + $0x14c] sm:$0xf0] }
 0x210   :  { %v6945_v12 = vpop.f32.mrf.mxu2 }
 0x211   :  { %v6947_v4 = vpop.f32.mrf.mxu3 }
 0x212   :  { %1192 = vmatmul.bf16.gmra.mxu1 %v6866_v58  ;;  %1241 = vmatmul.bf16.gmra.mxu2 %v6866_v58  ;;  %v1487_v43 = vmax.f32 %v1486_v8, %v6947_v4  ;;  %v5078_v8 = vld [vmem:[#allocation6 + $0x380] sm:$0xf] }
 0x213   :  { %1290 = vmatmul.bf16.gmra.mxu3 %v6866_v58  ;;  %1339 = vmatmul.bf16.gmra.mxu0 %v6866_v58  ;;  %v4710_v58 = vld [vmem:[#allocation6 + $0xa0] sm:$0xf] }
 0x214   :  { %v4711_v17 = vor.u32 %v6062_v16, %v4710_v58  ;;  %v4950_v58 = vld [vmem:[#allocation6 + $0x280] sm:$0xf]  ;;  %v4823_v16 = vor.u32 %v6090_v13, %v4822_v40  ;;  %v6110_v40 = vld [vmem:[#allocation6 + $0x22c] sm:$0xf0] }
 0x216   :  { %v6949_v14 = vpop.f32.mrf.mxu1  ;;  %3250 = vmatpush.bf16.msra.mxu1 %v4711_v17  ;;  %v6122_v17 = vld [vmem:[#allocation6 + $0x28c] sm:$0xf0]  ;;  %3264 = vmatpush.bf16.msra.mxu2 %v4823_v16 }
 0x217   :  { %v6951_v15 = vpop.f32.mrf.mxu0  ;;  %v1462_v19 = vmax.f32 %v1461_v48, %v6949_v14  ;;  %v4951_v1 = vor.u32 %v6122_v17, %v4950_v58 }
 0x218   :  { %v1501_v23 = vmax.f32 %v1500_v63, %v6951_v15  ;;  %v4807_v15 = vor.u32 %v6086_v2, %v4806_v6 }
 0x21a   :  { %3251 = vmatpush.bf16.msra.mxu1 %v4695_v21  ;;  %v4630_v21 = vld [vmem:[#allocation6] sm:$0xf]  ;;  %3265 = vmatpush.bf16.msra.mxu2 %v4807_v15 }
 0x21b   :  { %v4631_v14 = vor.u32 %v6042_v22, %v4630_v21  ;;  %v6074_v21 = vld [vmem:[#allocation6 + $0x10c] sm:$0xf0] }
 0x21c   :  { %v6955_v20 = vpop.f32.mrf.mxu2 }
 0x21d   :  { %v6959_v24 = vpop.f32.mrf.mxu3 }
 0x21e   :  { %v6961_v33 = vpop.f32.mrf.mxu1  ;;  %3252 = vmatpush.bf16.msra.mxu1 %v4679_v35  ;;  %v1488_v50 = vmax.f32 %v1487_v43, %v6959_v24  ;;  %v5094_v24 = vld [vmem:[#allocation6 + $0x3a0] sm:$0xf] }
 0x21f   :  { %v6963_v37 = vpop.f32.mrf.mxu0  ;;  %v1463_v60 = vmax.f32 %v1462_v19, %v6961_v33  ;;  %v6166_v33 = vld [vmem:[#allocation6 + $0x3ec] sm:$0xf0] }
 0x220   :  { %v1502_v59 = vmax.f32 %v1501_v23, %v6963_v37  ;;  %v5127_v38 = vor.u32 %v6166_v33, %v5126_v31 }
 0x222   :  { %1197 = vmatmul.bf16.gmra.mxu1 %v6874_v49  ;;  %1246 = vmatmul.bf16.gmra.mxu2 %v6874_v49 }
 0x223   :  { %1295 = vmatmul.bf16.gmra.mxu3 %v6874_v49  ;;  %1344 = vmatmul.bf16.gmra.mxu0 %v6874_v49  ;;  %v4982_v49 = vld [vmem:[#allocation6 + $0x2c0] sm:$0xf] }
 0x224   :  { %v4983_v41 = vor.u32 %v6130_v39, %v4982_v49  ;;  %v6969_v0 = vpop.f32.mrf.mxu2  ;;  %3253 = vmatpush.bf16.msra.mxu1 %v4663_v45  ;;  %v4790_v39 = vld [vmem:[#allocation6 + $0x140] sm:$0xf]  ;;  %v6114_v45 = vld [vmem:[#allocation6 + $0x24c] sm:$0xf0] }
 0x225   :  { %v6972_v7 = vpop.f32.mrf.mxu3 }
 0x226   :  { %3275 = vmatpush.bf16.msra.mxu3 %v4983_v41  ;;  %v4918_v41 = vld [vmem:[#allocation6 + $0x240] sm:$0xf] }
 0x227   :  { %v4919_v4 = vor.u32 %v6114_v45, %v4918_v41 }
 0x228   :  { %3254 = vmatpush.bf16.msra.mxu1 %v4647_v26  ;;  %v4902_v26 = vld [vmem:[#allocation6 + $0x220] sm:$0xf] }
 0x22a   :  { %3276 = vmatpush.bf16.msra.mxu3 %v4967_v54  ;;  %v1489_v54 = vmax.f32 %v1488_v50, %v6972_v7 }
 0x22c   :  { %3255 = vmatpush.bf16.msra.mxu1 %v4631_v14 }
 0x22e   :  { %3277 = vmatpush.bf16.msra.mxu3 %v4951_v1  ;;  %v4758_v1 = vld [vmem:[#allocation6 + $0x100] sm:$0xf] }
 0x22f   :  { %v1007_v11 = vpop.f32.mrf.mxu1  ;;  %v4759_v6 = vor.u32 %v6074_v21, %v4758_v1 }
 0x230   :  { %v1154_v55 = vpop.f32.mrf.mxu0  ;;  %v1464_v32 = vmax.f32 %v1463_v60, %v1007_v11  ;;  %3287 = vmatpush.bf16.msrb.mxu1 %v5127_v38  ;;  %v4775_v11 = vor.u32 %v6078_v9, %v4774_v56  ;;  %v6106_v60 = vld [vmem:[#allocation6 + $0x20c] sm:$0xf0] }
 0x231   :  { %v1503_v36 = vmax.f32 %v1502_v59, %v1154_v55  ;;  %v4903_v55 = vor.u32 %v6110_v40, %v4902_v26  ;;  %v6154_v59 = vld [vmem:[#allocation6 + $0x38c] sm:$0xf0] }
 0x232   :  { %1202 = vmatmul.bf16.gmra.mxu1 %v6882_v27  ;;  %1251 = vmatmul.bf16.gmra.mxu2 %v6882_v27  ;;  %v5079_v15 = vor.u32 %v6154_v59, %v5078_v8 }
 0x233   :  { %1300 = vmatmul.bf16.gmra.mxu3 %v6882_v27  ;;  %1349 = vmatmul.bf16.gmra.mxu0 %v6882_v27  ;;  %v1474_v27 = vmax.f32 %v1473_v29, %v6945_v12  ;;  %v4791_v12 = vor.u32 %v6082_v5, %v4790_v39  ;;  %v4886_v29 = vld [vmem:[#allocation6 + $0x200] sm:$0xf] }
 0x234   :  { %3278 = vmatpush.bf16.msra.mxu3 %v4935_v3  ;;  %3288 = vmatpush.bf16.msrb.mxu1 %v5111_v52  ;;  %v4887_v28 = vor.u32 %v6106_v60, %v4886_v29  ;;  %v6150_v3 = vld [vmem:[#allocation6 + $0x36c] sm:$0xf0]  ;;  %v5047_v52 = vor.u32 %v6146_v47, %v5046_v46 }
 0x235   :  { %v1056_v61 = vpop.f32.mrf.mxu2  ;;  %v1475_v37 = vmax.f32 %v1474_v27, %v6955_v20  ;;  %3266 = vmatpush.bf16.msra.mxu2 %v4791_v12 }
 0x236   :  { %v1105_v35 = vpop.f32.mrf.mxu3 }
 0x237   :  { %v1009_v49 = vpop.f32.mrf.mxu1  ;;  %v1476_v25 = vmax.f32 %v1475_v37, %v6969_v0  ;;  %v1490_v13 = vmax.f32 %v1489_v54, %v1105_v35  ;;  %v6158_v0 = vld [vmem:[#allocation6 + $0x3ac] sm:$0xf0]  ;;  %v5062_v35 = vld [vmem:[#allocation6 + $0x360] sm:$0xf] }
 0x238   :  { %v1465_v42 = vmax.f32 %v1464_v32, %v1009_v49  ;;  %v1156_v44 = vpop.f32.mrf.mxu0  ;;  %3279 = vmatpush.bf16.msra.mxu3 %v4919_v4  ;;  %v5095_v7 = vor.u32 %v6158_v0, %v5094_v24  ;;  %v7004_v32 = vld [vmem:[%s7280_s6] sm:$0xff]  ;;  %v5063_v49 = vor.u32 %v6150_v3, %v5062_v35 }
 0x239   :  { %v1504_v51 = vmax.f32 %v1503_v36, %v1156_v44  ;;  %v1477_v62 = vmax.f32 %v1476_v25, %v1056_v61  ;;  %3267 = vmatpush.bf16.msra.mxu2 %v4775_v11  ;;  %v1648_v41 = vperm.slane %v7004_v32, 1  ;;  %v1649_v37 = vperm.slane %v7004_v32, 2  ;;  %v6142_v11 = vld [vmem:[#allocation6 + $0x32c] sm:$0xf0] }
 0x23a   :  { %v1466_v53 = vrot.slane %v1465_v42, 4  ;;  %3289 = vmatpush.bf16.msrb.mxu1 %v5095_v7  ;;  %v1650_v4 = vperm.slane %v7004_v32, 3  ;;  %v1647_v54 = vperm.slane %v7004_v32, 0 }
 0x23b   :  { %v1505_v20 = vrot.slane %v1504_v51, 4 }
 0x23c   :  { %v1467_v10 = vmax.f32 %v1465_v42, %v1466_v53  ;;  %3280 = vmatpush.bf16.msra.mxu3 %v4903_v55  ;;  %v1657_v24 = vrot.slane %v1650_v4, 2 }
 0x23d   :  { %v1506_v58 = vmax.f32 %v1504_v51, %v1505_v20  ;;  %v1058_v48 = vpop.f32.mrf.mxu2  ;;  %3268 = vmatpush.bf16.msra.mxu2 %v4759_v6  ;;  %v1655_v20 = vrot.slane %v1648_v41, 6 }
 0x23e   :  { %v1478_v16 = vmax.f32 %v1477_v62, %v1058_v48  ;;  %v1107_v17 = vpop.f32.mrf.mxu3  ;;  %v1468_v22 = vrot.slane %v1467_v10, 2  ;;  %3290 = vmatpush.bf16.msrb.mxu1 %v5079_v15  ;;  %v1656_v62 = vrot.slane %v1649_v37, 4 }
 0x23f   :  { %v1507_v63 = vrot.slane %v1506_v58, 2  ;;  %v1491_v18 = vmax.f32 %v1490_v13, %v1107_v17  ;;  %v6997_v19 = vpop.f32.mrf.mxu1 }
 0x240   :  { %v1479_v34 = vrot.slane %v1478_v16, 4  ;;  %v6999_v23 = vpop.f32.mrf.mxu0  ;;  %v1469_v31 = vmax.f32 %v1467_v10, %v1468_v22  ;;  %3281 = vmatpush.bf16.msra.mxu3 %v4887_v28  ;;  %v5030_v10 = vld [vmem:[#allocation6 + $0x320] sm:$0xf]  ;;  %v1662_v29 = vsel %vm1601_vm2, %v1656_v62, %v1657_v24 }
 0x241   :  { %v1508_v14 = vmax.f32 %v1506_v58, %v1507_v63  ;;  %v1492_v2 = vrot.slane %v1491_v18, 4  ;;  %v5031_v58 = vor.u32 %v6142_v11, %v5030_v10  ;;  %v5014_v22 = vld [vmem:[#allocation6 + $0x300] sm:$0xf] }
 0x242   :  { %v1480_v61 = vmax.f32 %v1478_v16, %v1479_v34  ;;  %v1470_v44 = vrot.slane %v1469_v31, 1  ;;  %3291 = vmatpush.bf16.msrb.mxu1 %v5063_v49  ;;  %v6138_v34 = vld [vmem:[#allocation6 + $0x30c] sm:$0xf0] }
 0x243   :  { %v1493_v30 = vmax.f32 %v1491_v18, %v1492_v2  ;;  %v1509_v33 = vrot.slane %v1508_v14, 1  ;;  %v1661_v18 = vsel %vm1599_vm1, %v1647_v54, %v1655_v20  ;;  %v5015_v60 = vor.u32 %v6138_v34, %v5014_v22 }
 0x244   :  { %v1481_v27 = vrot.slane %v1480_v61, 2  ;;  %v1471_v56 = vmax.f32 %v1469_v31, %v1470_v44  ;;  %v1663_v2 = vsel %vm1603_vm3, %v1661_v18, %v1662_v29 }
 0x245   :  { %v1494_v43 = vrot.slane %v1493_v30, 2  ;;  %v7006_v36 = vpop.f32.mrf.mxu2  ;;  %v1510_v50 = vmax.f32 %v1508_v14, %v1509_v33 }
 0x246   :  { %v1482_v38 = vmax.f32 %v1480_v61, %v1481_v27  ;;  %v7008_v39 = vpop.f32.mrf.mxu3  ;;  %3292 = vmatpush.bf16.msrb.mxu1 %v5047_v52 }
 0x247   :  { %v1495_v5 = vmax.f32 %v1493_v30, %v1494_v43  ;;  %v1170_v42 = vpop.f32.mrf.mxu1  ;;  %v1595_v26 = vrot.slane %v1510_v50, 2 }
 0x248   :  { %v1483_v12 = vrot.slane %v1482_v38, 1  ;;  %v1317_v45 = vpop.f32.mrf.mxu0  ;;  %v1407_v55 = vmax.f32 %v6997_v19, %v1170_v42 }
 0x249   :  { %v1496_v51 = vrot.slane %v1495_v5, 1  ;;  %v1446_v17 = vmax.f32 %v6999_v23, %v1317_v45 }
 0x24a   :  { %v1484_v25 = vmax.f32 %v1482_v38, %v1483_v12  ;;  %3293 = vmatpush.bf16.msrb.mxu1 %v5031_v58 }
 0x24b   :  { %v1497_v53 = vmax.f32 %v1495_v5, %v1496_v51 }
 0x24c   :  { %v1593_v9 = vrot.slane %v1484_v25, 6 }
 0x24d   :  { %v1594_v40 = vrot.slane %v1497_v53, 4  ;;  %v1219_v13 = vpop.f32.mrf.mxu2 }
 0x24e   :  { %v1608_v48 = vsel %vm1599_vm1, %v1471_v56, %v1593_v9  ;;  %v1268_v0 = vpop.f32.mrf.mxu3  ;;  %v1420_v28 = vmax.f32 %v7006_v36, %v1219_v13  ;;  %3294 = vmatpush.bf16.msrb.mxu1 %v5015_v60 }
 0x24f   :  { %v1609_v16 = vsel %vm1601_vm2, %v1594_v40, %v1595_v26  ;;  %v1173_v7 = vpop.f32.mrf.mxu1  ;;  %v1433_v59 = vmax.f32 %v7008_v39, %v1268_v0 }
 0x250   :  { %v1610_v63 = vsel %vm1603_vm3, %v1608_v48, %v1609_v16  ;;  %v1408_v1 = vmax.f32 %v1407_v55, %v1173_v7  ;;  %v1320_v21 = vpop.f32.mrf.mxu0 }
 0x251   :  { %v1618_v6 = vrot.slane %v1610_v63, 7  ;;  %v1447_v19 = vmax.f32 %v1446_v17, %v1320_v21 }
 0x253   :  { %v1620_v23 = vsel %vm1619_vm4, %v1618_v6, %v6911_v57 }
 0x254   :  { %v1622_v14 = vsel %vm1621_vm5, %v1618_v6, %v1620_v23 }
 0x255   :  { %v1624_v8 = vsel %vm1623_vm6, %v1618_v6, %v1622_v14  ;;  %v1222_v61 = vpop.f32.mrf.mxu2 }
 0x256   :  { %v1626_v15 = vsel %vm1625_vm7, %v1618_v6, %v1624_v8  ;;  %v1421_v30 = vmax.f32 %v1420_v28, %v1222_v61  ;;  %v1271_v31 = vpop.f32.mrf.mxu3 }
 0x257   :  { %v1669_v27 = vadd.f32 %v1663_v2, %v1626_v15  ;;  %v1434_v35 = vmax.f32 %v1433_v59, %v1271_v31  ;;  %v1175_v57 = vpop.f32.mrf.mxu1 }
 0x258   :  { %v1322_v3 = vpop.f32.mrf.mxu0  ;;  %v1409_v49 = vmax.f32 %v1408_v1, %v1175_v57 }
 0x259   :  { %v1671_v33 = vmax.f32 %v1669_v27, 0.0  ;;  %v1448_v36 = vmax.f32 %v1447_v19, %v1322_v3 }
 0x25b   :  { %1675 = vst [vmem:[#allocation1] ss:$4 sm:$0xff] %v1671_v33 }
 0x25d   :  { %v1224_v43 = vpop.f32.mrf.mxu2 }
 0x25e   :  { %v1273_v38 = vpop.f32.mrf.mxu3  ;;  %v1422_v47 = vmax.f32 %v1421_v30, %v1224_v43 }
 0x25f   :  { %v1178_v5 = vpop.f32.mrf.mxu1  ;;  %v1435_v51 = vmax.f32 %v1434_v35, %v1273_v38 }
 0x260   :  { %v1410_v41 = vmax.f32 %v1409_v49, %v1178_v5  ;;  %v1325_v37 = vpop.f32.mrf.mxu0 }
 0x261   :  { %v1449_v39 = vmax.f32 %v1448_v36, %v1325_v37 }
 0x262   :  { %v1678_v42 = vld.sshfl [vmem:[#allocation1] sm:$0xff pattern:$0x73625140]  ;;  %v1679_v44 = vld.sshfl [vmem:[#allocation1 + $0x8] sm:$0xff pattern:$0x73625140] }
 0x263   :  { %v7029_v12 = vpack.c.bf16 %v1678_v42, %v1678_v42  ;;  %v7031_v45 = vpack.c.bf16 %v1679_v44, %v1679_v44  ;;  %v1680_v46 = vld.sshfl [vmem:[#allocation1 + $0x10] sm:$0xff pattern:$0x73625140]  ;;  %v1681_v24 = vld.sshfl [vmem:[#allocation1 + $0x18] sm:$0xff pattern:$0x73625140] }
 0x264   :  { %v7033_v50 = vpack.c.bf16 %v1680_v46, %v1680_v46  ;;  %v7038_v58 = vpack.c.bf16 %v1681_v24, %v1681_v24  ;;  %v5254_v46 = vld [vmem:[#allocation6 + $0x4e0] sm:$0xf] }
 0x265   :  { %3256 = vmatmul.bf16.vlgmr.msra.gmra.mxu1 %v7029_v12  ;;  %3269 = vmatmul.bf16.vlgmr.msra.gmra.mxu2 %v7031_v45  ;;  %v1227_v4 = vpop.f32.mrf.mxu2 }
 0x266   :  { %3282 = vmatmul.bf16.vlgmr.msra.gmra.mxu3 %v7033_v50  ;;  %v1423_v52 = vmax.f32 %v1422_v47, %v1227_v4  ;;  %v1276_v25 = vpop.f32.mrf.mxu3  ;;  %v6198_v47 = vld [vmem:[#allocation6 + $0x4ec] sm:$0xf0] }
 0x267   :  { %v1436_v53 = vmax.f32 %v1435_v51, %v1276_v25  ;;  %v1180_v54 = vpop.f32.mrf.mxu1  ;;  %v5255_v4 = vor.u32 %v6198_v47, %v5254_v46  ;;  %v6230_v25 = vld [vmem:[#allocation6 + $0x5ec] sm:$0xf0] }
 0x268   :  { %v1327_v20 = vpop.f32.mrf.mxu0  ;;  %v1411_v9 = vmax.f32 %v1410_v41, %v1180_v54 }
 0x269   :  { %v1450_v10 = vmax.f32 %v1449_v39, %v1327_v20  ;;  %3300 = vmatpush.bf16.msrb.mxu2 %v5255_v4  ;;  %v5462_v4 = vld [vmem:[#allocation6 + $0x680] sm:$0xf] }
 0x26d   :  { %v1229_v56 = vpop.f32.mrf.mxu2 }
 0x26e   :  { %v1278_v62 = vpop.f32.mrf.mxu3  ;;  %v1424_v48 = vmax.f32 %v1423_v52, %v1229_v56  ;;  %v5382_v52 = vld [vmem:[#allocation6 + $0x5e0] sm:$0xf]  ;;  %v6262_v56 = vld [vmem:[#allocation6 + $0x6ec] sm:$0xf0] }
 0x26f   :  { %v1183_v11 = vpop.f32.mrf.mxu1  ;;  %v1437_v55 = vmax.f32 %v1436_v53, %v1278_v62  ;;  %v5510_v53 = vld [vmem:[#allocation6 + $0x6e0] sm:$0xf]  ;;  %v5383_v20 = vor.u32 %v6230_v25, %v5382_v52  ;;  %v5256_v62 = vld [vmem:[#allocation6 + $0x4f0] sm:$0xf0]  ;;  %v6250_v52 = vld [vmem:[#allocation6 + $0x68c] sm:$0xf0] }
 0x270   :  { %v1412_v26 = vmax.f32 %v1411_v9, %v1183_v11  ;;  %v1330_v40 = vpop.f32.mrf.mxu0  ;;  %v6196_v9 = vld [vmem:[#allocation6 + $0x4e4] sm:$0xf] }
 0x271   :  { %v1451_v13 = vmax.f32 %v1450_v10, %v1330_v40  ;;  %v5259_v40 = vor.u32 %v6196_v9, %v5256_v62  ;;  %3313 = vmatpush.bf16.msrb.mxu3 %v5383_v20  ;;  %v6184_v20 = vld [vmem:[#allocation6 + $0x484] sm:$0xf] }
 0x273   :  { %3404 = vmatpush.bf16.msrb.mxu0 %v5259_v40 }
 0x275   :  { %3295 = vmatmul.bf16.vlgmr.msrb.gmra.mxu1 %v7038_v58  ;;  %v1232_v0 = vpop.f32.mrf.mxu2 }
 0x276   :  { %v1425_v16 = vmax.f32 %v1424_v48, %v1232_v0  ;;  %v1281_v17 = vpop.f32.mrf.mxu3  ;;  %v6194_v0 = vld [vmem:[#allocation6 + $0x4cc] sm:$0xf0] }
 0x277   :  { %v1438_v7 = vmax.f32 %v1437_v55, %v1281_v17  ;;  %v1185_v63 = vpop.f32.mrf.mxu1  ;;  %v5238_v55 = vld [vmem:[#allocation6 + $0x4c0] sm:$0xf] }
 0x278   :  { %v1413_v18 = vmax.f32 %v1412_v26, %v1185_v63  ;;  %v1332_v1 = vpop.f32.mrf.mxu0  ;;  %v5511_v26 = vor.u32 %v6262_v56, %v5510_v53  ;;  %v5366_v63 = vld [vmem:[#allocation6 + $0x5c0] sm:$0xf]  ;;  %v5208_v56 = vld [vmem:[#allocation6 + $0x490] sm:$0xf0] }
 0x279   :  { %v1452_v21 = vmax.f32 %v1451_v13, %v1332_v1  ;;  %v5494_v1 = vld [vmem:[#allocation6 + $0x6c0] sm:$0xf]  ;;  %v5211_v62 = vor.u32 %v6184_v20, %v5208_v56  ;;  %v6170_v56 = vld [vmem:[#allocation6 + $0x40c] sm:$0xf0] }
 0x27a   :  { %v1414_v22 = vrot.slane %v1413_v18, 4  ;;  %3326 = vmatpush.bf16.msra.mxu1 %v5511_v26  ;;  %v5318_v26 = vld [vmem:[#allocation6 + $0x560] sm:$0xf] }
 0x27b   :  { %v1453_v34 = vrot.slane %v1452_v21, 4  ;;  %v5142_v20 = vld [vmem:[#allocation6 + $0x400] sm:$0xf] }
 0x27c   :  { %v1415_v6 = vmax.f32 %v1413_v18, %v1414_v22  ;;  %v6226_v18 = vld [vmem:[#allocation6 + $0x5cc] sm:$0xf0] }
 0x27d   :  { %v1454_v29 = vmax.f32 %v1452_v21, %v1453_v34  ;;  %v1234_v19 = vpop.f32.mrf.mxu2  ;;  %v5367_v34 = vor.u32 %v6226_v18, %v5366_v63  ;;  %v5192_v63 = vld [vmem:[#allocation6 + $0x470] sm:$0xf0] }
 0x27e   :  { %v1426_v60 = vmax.f32 %v1425_v16, %v1234_v19  ;;  %v1283_v23 = vpop.f32.mrf.mxu3  ;;  %v1416_v8 = vrot.slane %v1415_v6, 2  ;;  %v5240_v19 = vld [vmem:[#allocation6 + $0x4d0] sm:$0xf0] }
 0x27f   :  { %v1455_v14 = vrot.slane %v1454_v29, 2  ;;  %v1439_v2 = vmax.f32 %v1438_v7, %v1283_v23  ;;  %v7041_v28 = vpop.f32.mrf.mxu1  ;;  %v5239_v7 = vor.u32 %v6194_v0, %v5238_v55  ;;  %3314 = vmatpush.bf16.msrb.mxu3 %v5367_v34  ;;  %v6246_v55 = vld [vmem:[#allocation6 + $0x66c] sm:$0xf0] }
 0x280   :  { %v1427_v59 = vrot.slane %v1426_v60, 4  ;;  %v7043_v61 = vpop.f32.mrf.mxu0  ;;  %v1417_v35 = vmax.f32 %v1415_v6, %v1416_v8  ;;  %v6258_v6 = vld [vmem:[#allocation6 + $0x6cc] sm:$0xf0]  ;;  %v5222_v8 = vld [vmem:[#allocation6 + $0x4a0] sm:$0xf] }
 0x281   :  { %v1456_v15 = vmax.f32 %v1454_v29, %v1455_v14  ;;  %v1440_v30 = vrot.slane %v1439_v2, 4  ;;  %v6192_v29 = vld [vmem:[#allocation6 + $0x4c4] sm:$0xf]  ;;  %3301 = vmatpush.bf16.msrb.mxu2 %v5239_v7  ;;  %v5495_v14 = vor.u32 %v6258_v6, %v5494_v1  ;;  %v6178_v34 = vld [vmem:[#allocation6 + $0x44c] sm:$0xf0] }
 0x282   :  { %v1428_v31 = vmax.f32 %v1426_v60, %v1427_v59  ;;  %v1418_v41 = vrot.slane %v1417_v35, 1  ;;  %v6190_v59 = vld [vmem:[#allocation6 + $0x4ac] sm:$0xf0]  ;;  %v6180_v7 = vld [vmem:[#allocation6 + $0x464] sm:$0xf] }
 0x283   :  { %v1441_v27 = vmax.f32 %v1439_v2, %v1440_v30  ;;  %v1457_v3 = vrot.slane %v1456_v15, 1  ;;  %v5243_v2 = vor.u32 %v6192_v29, %v5240_v19  ;;  %3327 = vmatpush.bf16.msra.mxu1 %v5495_v14  ;;  %v5223_v30 = vor.u32 %v6190_v59, %v5222_v8  ;;  %v5302_v6 = vld [vmem:[#allocation6 + $0x540] sm:$0xf]  ;;  %v6210_v14 = vld [vmem:[#allocation6 + $0x54c] sm:$0xf0] }
 0x284   :  { %v1429_v57 = vrot.slane %v1428_v31, 2  ;;  %v1419_v10 = vmax.f32 %v1417_v35, %v1418_v41  ;;  %v6254_v35 = vld [vmem:[#allocation6 + $0x6ac] sm:$0xf0]  ;;  %v5195_v18 = vor.u32 %v6180_v7, %v5192_v63  ;;  %v5144_v7 = vld [vmem:[#allocation6 + $0x410] sm:$0xf0] }
 0x285   :  { %v1442_v33 = vrot.slane %v1441_v27, 2  ;;  %v7045_v43 = vpop.f32.mrf.mxu2  ;;  %v1458_v42 = vmax.f32 %v1456_v15, %v1457_v3  ;;  %v5350_v15 = vld [vmem:[#allocation6 + $0x5a0] sm:$0xf]  ;;  %3405 = vmatpush.bf16.msrb.mxu0 %v5243_v2  ;;  %3302 = vmatpush.bf16.msrb.mxu2 %v5223_v30  ;;  %v6242_v8 = vld [vmem:[#allocation6 + $0x64c] sm:$0xf0] }
 0x286   :  { %v1430_v49 = vmax.f32 %v1428_v31, %v1429_v57  ;;  %v7047_v38 = vpop.f32.mrf.mxu3  ;;  %v6222_v31 = vld [vmem:[#allocation6 + $0x5ac] sm:$0xf0]  ;;  %v5430_v2 = vld [vmem:[#allocation6 + $0x640] sm:$0xf] }
 0x287   :  { %v1443_v36 = vmax.f32 %v1441_v27, %v1442_v33  ;;  %v7049_v5 = vpop.f32.mrf.mxu1  ;;  %v1592_v24 = vrot.slane %v1458_v42, 2  ;;  %v5478_v27 = vld [vmem:[#allocation6 + $0x6a0] sm:$0xf]  ;;  %v5351_v57 = vor.u32 %v6222_v31, %v5350_v15  ;;  %v6188_v33 = vld [vmem:[#allocation6 + $0x4a4] sm:$0xf]  ;;  %v5303_v15 = vor.u32 %v6210_v14, %v5302_v6 }
 0x288   :  { %v1431_v37 = vrot.slane %v1430_v49, 1  ;;  %v7051_v39 = vpop.f32.mrf.mxu0  ;;  %v5479_v3 = vor.u32 %v6254_v35, %v5478_v27  ;;  %v6186_v42 = vld [vmem:[#allocation6 + $0x48c] sm:$0xf0]  ;;  %v5431_v30 = vor.u32 %v6242_v8, %v5430_v2  ;;  %v6176_v31 = vld [vmem:[#allocation6 + $0x444] sm:$0xf] }
 0x289   :  { %v1444_v44 = vrot.slane %v1443_v36, 1  ;;  %3315 = vmatpush.bf16.msrb.mxu3 %v5351_v57  ;;  %v5176_v27 = vld [vmem:[#allocation6 + $0x450] sm:$0xf0]  ;;  %v5638_v63 = vld [vmem:[#allocation6 + $0x7e0] sm:$0xf] }
 0x28a   :  { %v1432_v51 = vmax.f32 %v1430_v49, %v1431_v37  ;;  %v5224_v49 = vld [vmem:[#allocation6 + $0x4b0] sm:$0xf0]  ;;  %v5206_v37 = vld [vmem:[#allocation6 + $0x480] sm:$0xf]  ;;  %3328 = vmatpush.bf16.msra.mxu1 %v5479_v3  ;;  %v5179_v57 = vor.u32 %v6176_v31, %v5176_v27  ;;  %v6068_v6 = vld [vmem:[#allocation6 + $0xe4] sm:$0xf] }
 0x28b   :  { %v1445_v54 = vmax.f32 %v1443_v36, %v1444_v44  ;;  %v5227_v36 = vor.u32 %v6188_v33, %v5224_v49  ;;  %v5334_v44 = vld [vmem:[#allocation6 + $0x580] sm:$0xf]  ;;  %v5207_v47 = vor.u32 %v6186_v42, %v5206_v37  ;;  %v6174_v33 = vld [vmem:[#allocation6 + $0x42c] sm:$0xf0]  ;;  %v6100_v8 = vld [vmem:[#allocation6 + $0x1e4] sm:$0xf] }
 0x28c   :  { %v1590_v11 = vrot.slane %v1432_v51, 6  ;;  %v6218_v51 = vld [vmem:[#allocation6 + $0x58c] sm:$0xf0]  ;;  %v5158_v3 = vld [vmem:[#allocation6 + $0x420] sm:$0xf] }
 0x28d   :  { %v1591_v13 = vrot.slane %v1445_v54, 4  ;;  %v7053_v48 = vpop.f32.mrf.mxu2  ;;  %3406 = vmatpush.bf16.msrb.mxu0 %v5227_v36  ;;  %v5335_v53 = vor.u32 %v6218_v51, %v5334_v44  ;;  %v5463_v54 = vor.u32 %v6250_v52, %v5462_v4  ;;  %3303 = vmatpush.bf16.msrb.mxu2 %v5207_v47  ;;  %v5286_v49 = vld [vmem:[#allocation6 + $0x520] sm:$0xf]  ;;  %v5159_v36 = vor.u32 %v6174_v33, %v5158_v3  ;;  %v6206_v37 = vld [vmem:[#allocation6 + $0x52c] sm:$0xf0] }
 0x28e   :  { %v1605_v16 = vsel %vm1599_vm1, %v1419_v10, %v1590_v11  ;;  %v7056_v17 = vpop.f32.mrf.mxu3  ;;  %v5190_v10 = vld [vmem:[#allocation6 + $0x460] sm:$0xf]  ;;  %v6182_v11 = vld [vmem:[#allocation6 + $0x46c] sm:$0xf0]  ;;  %v5287_v47 = vor.u32 %v6206_v37, %v5286_v49  ;;  %v6172_v4 = vld [vmem:[#allocation6 + $0x424] sm:$0xf] }
 0x28f   :  { %v1606_v21 = vsel %vm1601_vm2, %v1591_v13, %v1592_v24  ;;  %v7059_v22 = vpop.f32.mrf.mxu1  ;;  %3316 = vmatpush.bf16.msrb.mxu3 %v5335_v53  ;;  %3329 = vmatpush.bf16.msra.mxu1 %v5463_v54  ;;  %v5191_v40 = vor.u32 %v6182_v11, %v5190_v10  ;;  %v6214_v24 = vld [vmem:[#allocation6 + $0x56c] sm:$0xf0]  ;;  %v5446_v13 = vld [vmem:[#allocation6 + $0x660] sm:$0xf]  ;;  %v5160_v52 = vld [vmem:[#allocation6 + $0x430] sm:$0xf0]  ;;  %v5143_v11 = vor.u32 %v6170_v56, %v5142_v20 }
 0x290   :  { %v7062_v60 = vsel %vm1603_vm3, %v1605_v16, %v1606_v21  ;;  %v7064_v23 = vpop.f32.mrf.mxu0  ;;  %v5319_v0 = vor.u32 %v6214_v24, %v5318_v26  ;;  %v5447_v16 = vor.u32 %v6246_v55, %v5446_v13  ;;  %v5174_v21 = vld [vmem:[#allocation6 + $0x440] sm:$0xf]  ;;  %v6238_v44 = vld [vmem:[#allocation6 + $0x62c] sm:$0xf0]  ;;  %v5163_v53 = vor.u32 %v6172_v4, %v5160_v52  ;;  %v6071_v27 = vld [vmem:[#allocation6 + $0xf4] sm:$0xf0] }
 0x291   :  { %3407 = vmatpush.bf16.msrb.mxu0 %v5211_v62  ;;  %3304 = vmatpush.bf16.msrb.mxu2 %v5191_v40  ;;  %v5175_v19 = vor.u32 %v6178_v34, %v5174_v21  ;;  %v5414_v42 = vld [vmem:[#allocation6 + $0x620] sm:$0xf]  ;;  %v6202_v26 = vld [vmem:[#allocation6 + $0x50c] sm:$0xf0]  ;;  %v4728_v37 = vld [vmem:[#allocation6 + $0xd0] sm:$0xf0] }
 0x292   :  { %v5415_v51 = vor.u32 %v6238_v44, %v5414_v42  ;;  %v5270_v62 = vld [vmem:[#allocation6 + $0x500] sm:$0xf]  ;;  %v6234_v24 = vld [vmem:[#allocation6 + $0x60c] sm:$0xf0]  ;;  %v6096_v42 = vld [vmem:[#allocation6 + $0x1c4] sm:$0xf]  ;;  %v1511_v44 = vmax.f32 %v7041_v28, %v7049_v5 }
 0x293   :  { %3317 = vmatpush.bf16.msrb.mxu3 %v5319_v0  ;;  %3330 = vmatpush.bf16.msra.mxu1 %v5447_v16  ;;  %v5398_v40 = vld [vmem:[#allocation6 + $0x600] sm:$0xf]  ;;  %v5271_v55 = vor.u32 %v6202_v26, %v5270_v62  ;;  %v6168_v16 = vld [vmem:[#allocation6 + $0x404] sm:$0xf]  ;;  %v6294_v34 = vld [vmem:[#allocation6 + $0x7ec] sm:$0xf0] }
 0x294   :  { %v5399_v0 = vor.u32 %v6234_v24, %v5398_v40  ;;  %v5147_v21 = vor.u32 %v6168_v16, %v5144_v7  ;;  %v5639_v14 = vor.u32 %v6294_v34, %v5638_v63  ;;  %v6290_v3 = vld [vmem:[#allocation6 + $0x7cc] sm:$0xf0]  ;;  %v4734_v4 = vld [vmem:[#allocation6 + $0xc8] sm:$0xf]  ;;  %v6067_v52 = vld [vmem:[#allocation6 + $0xd4] sm:$0xf0] }
 0x295   :  { %v7066_v41 = vpop.f32.mrf.mxu2  ;;  %3408 = vmatpush.bf16.msrb.mxu0 %v5195_v18  ;;  %3305 = vmatpush.bf16.msrb.mxu2 %v5175_v19  ;;  %v4744_v19 = vld [vmem:[#allocation6 + $0xf0] sm:$0xf0]  ;;  %v4735_v62 = vor.u32 %v6067_v52, %v4734_v4  ;;  %v5606_v40 = vld [vmem:[#allocation6 + $0x7a0] sm:$0xf]  ;;  %v6286_v24 = vld [vmem:[#allocation6 + $0x7ac] sm:$0xf0] }
 0x296   :  { %v7068_v46 = vpop.f32.mrf.mxu3  ;;  %v4747_v2 = vor.u32 %v6068_v6, %v4744_v19  ;;  %v6060_v28 = vld [vmem:[#allocation6 + $0xa4] sm:$0xf]  ;;  %v4712_v16 = vld [vmem:[#allocation6 + $0xb0] sm:$0xf0]  ;;  %v4718_v34 = vld [vmem:[#allocation6 + $0xa8] sm:$0xf]  ;;  %v1524_v19 = vmax.f32 %v7045_v43, %v7053_v48 }
 0x297   :  { %v7070_v25 = vpop.f32.mrf.mxu1  ;;  %3318 = vmatpush.bf16.msrb.mxu3 %v5303_v15  ;;  %3331 = vmatpush.bf16.msra.mxu1 %v5431_v30  ;;  %v4872_v15 = vld [vmem:[#allocation6 + $0x1f0] sm:$0xf0]  ;;  %v4750_v30 = vld [vmem:[#allocation6 + $0xe8] sm:$0xf]  ;;  %v6063_v6 = vld [vmem:[#allocation6 + $0xb4] sm:$0xf0] }
 0x298   :  { %v7072_v9 = vpop.f32.mrf.mxu0  ;;  %v4875_v31 = vor.u32 %v6100_v8, %v4872_v15  ;;  %v4751_v33 = vor.u32 %v6071_v27, %v4750_v30  ;;  %v5590_v15 = vld [vmem:[#allocation6 + $0x780] sm:$0xf]  ;;  %v6056_v27 = vld [vmem:[#allocation6 + $0x84] sm:$0xf]  ;;  %v4680_v52 = vld [vmem:[#allocation6 + $0x70] sm:$0xf0] }
 0x299   :  { %3409 = vmatpush.bf16.msrb.mxu0 %v5179_v57  ;;  %3306 = vmatpush.bf16.msrb.mxu2 %v5159_v36  ;;  %v5622_v57 = vld [vmem:[#allocation6 + $0x7c0] sm:$0xf]  ;;  %v6064_v36 = vld [vmem:[#allocation6 + $0xc4] sm:$0xf] }
 0x29a   :  { %v5623_v49 = vor.u32 %v6290_v3, %v5622_v57  ;;  %v4696_v57 = vld [vmem:[#allocation6 + $0x90] sm:$0xf0] }
 0x29b   :  { %3319 = vmatpush.bf16.msrb.mxu3 %v5287_v47  ;;  %3332 = vmatpush.bf16.msra.mxu1 %v5415_v51  ;;  %v4731_v47 = vor.u32 %v6064_v36, %v4728_v37  ;;  %v4856_v51 = vld [vmem:[#allocation6 + $0x1d0] sm:$0xf0]  ;;  %v4699_v3 = vor.u32 %v6056_v27, %v4696_v57  ;;  %v6270_v27 = vld [vmem:[#allocation6 + $0x72c] sm:$0xf0] }
 0x29c   :  { %v4859_v56 = vor.u32 %v6096_v42, %v4856_v51 }
 0x29d   :  { %v7074_v1 = vpop.f32.mrf.mxu2  ;;  %3410 = vmatpush.bf16.msrb.mxu0 %v5163_v53  ;;  %3307 = vmatpush.bf16.msrb.mxu2 %v5143_v11  ;;  %v1550_v53 = vmax.f32 %v7043_v61, %v7051_v39  ;;  %v1512_v11 = vmax.f32 %v1511_v44, %v7059_v22  ;;  %v6092_v61 = vld [vmem:[#allocation6 + $0x1a4] sm:$0xf]  ;;  %v4840_v39 = vld [vmem:[#allocation6 + $0x1b0] sm:$0xf0]  ;;  %v5574_v44 = vld [vmem:[#allocation6 + $0x760] sm:$0xf] }
 0x29e   :  { %v7076_v29 = vpop.f32.mrf.mxu3  ;;  %v4843_v22 = vor.u32 %v6092_v61, %v4840_v39  ;;  %v5558_v39 = vld [vmem:[#allocation6 + $0x740] sm:$0xf] }
 0x29f   :  { %v7078_v59 = vpop.f32.mrf.mxu1  ;;  %3320 = vmatpush.bf16.msrb.mxu3 %v5271_v55  ;;  %3333 = vmatpush.bf16.msra.mxu1 %v5399_v0  ;;  %v1551_v5 = vmax.f32 %v1550_v53, %v7064_v23  ;;  %v5607_v0 = vor.u32 %v6286_v24, %v5606_v40  ;;  %v1513_v7 = vmax.f32 %v1512_v11, %v7070_v25  ;;  %v6084_v53 = vld [vmem:[#allocation6 + $0x164] sm:$0xf] }
 0x2a0   :  { %v7080_v35 = vpop.f32.mrf.mxu0  ;;  %v1525_v25 = vmax.f32 %v1524_v19, %v7066_v41 }
 0x2a1   :  { %3411 = vmatpush.bf16.msrb.mxu0 %v5147_v21  ;;  %3339 = vmatpush.bf16.msra.mxu2 %v5639_v14  ;;  %v4715_v21 = vor.u32 %v6060_v28, %v4712_v16  ;;  %v1552_v23 = vmax.f32 %v1551_v5, %v7072_v9  ;;  %v4719_v14 = vor.u32 %v6063_v6, %v4718_v34  ;;  %v6088_v9 = vld [vmem:[#allocation6 + $0x184] sm:$0xf]  ;;  %v4686_v28 = vld [vmem:[#allocation6 + $0x68] sm:$0xf]  ;;  %v6055_v5 = vld [vmem:[#allocation6 + $0x74] sm:$0xf0] }
 0x2a2   :  { %v1514_v8 = vmax.f32 %v1513_v7, %v7078_v59  ;;  %v6274_v7 = vld [vmem:[#allocation6 + $0x74c] sm:$0xf0]  ;;  %v6048_v34 = vld [vmem:[#allocation6 + $0x44] sm:$0xf]  ;;  %v4664_v6 = vld [vmem:[#allocation6 + $0x50] sm:$0xf0] }
 0x2a3   :  { %3352 = vmatpush.bf16.msra.mxu3 %v4747_v2  ;;  %3365 = vmatpush.bf16.msrb.mxu1 %v4875_v31  ;;  %v1537_v2 = vmax.f32 %v7047_v38, %v7056_v17  ;;  %v1553_v30 = vmax.f32 %v1552_v23, %v7080_v35  ;;  %v6282_v31 = vld [vmem:[#allocation6 + $0x78c] sm:$0xf0]  ;;  %v1526_v38 = vmax.f32 %v1525_v25, %v7074_v1  ;;  %v4824_v35 = vld [vmem:[#allocation6 + $0x190] sm:$0xf0] }
 0x2a4   :  { %v5591_v41 = vor.u32 %v6282_v31, %v5590_v15  ;;  %v6051_v31 = vld [vmem:[#allocation6 + $0x54] sm:$0xf0] }
 0x2a5   :  { %v7082_v54 = vpop.f32.mrf.mxu2  ;;  %3456 = vmatpush.bf16.msra.mxu0 %v4751_v33  ;;  %3340 = vmatpush.bf16.msra.mxu2 %v5623_v49  ;;  %v1538_v43 = vmax.f32 %v1537_v2, %v7068_v46  ;;  %v4702_v33 = vld [vmem:[#allocation6 + $0x88] sm:$0xf]  ;;  %v6059_v49 = vld [vmem:[#allocation6 + $0x94] sm:$0xf0]  ;;  %v4827_v46 = vor.u32 %v6088_v9, %v4824_v35  ;;  %v4792_v2 = vld [vmem:[#allocation6 + $0x150] sm:$0xf0] }
 0x2a6   :  { %v7084_v10 = vpop.f32.mrf.mxu3  ;;  %v1527_v51 = vmax.f32 %v1526_v38, %v7082_v54  ;;  %v4687_v54 = vor.u32 %v6055_v5, %v4686_v28  ;;  %v6044_v9 = vld [vmem:[#allocation6 + $0x24] sm:$0xf]  ;;  %v4648_v38 = vld [vmem:[#allocation6 + $0x30] sm:$0xf0] }
 0x2a7   :  { %v7086_v13 = vpop.f32.mrf.mxu1  ;;  %3353 = vmatpush.bf16.msra.mxu3 %v4731_v47  ;;  %3366 = vmatpush.bf16.msrb.mxu1 %v4859_v56  ;;  %v1539_v36 = vmax.f32 %v1538_v43, %v7076_v29  ;;  %v6052_v47 = vld [vmem:[#allocation6 + $0x64] sm:$0xf]  ;;  %v4808_v56 = vld [vmem:[#allocation6 + $0x170] sm:$0xf0] }
 0x2a8   :  { %v7088_v18 = vpop.f32.mrf.mxu0  ;;  %v1515_v48 = vmax.f32 %v1514_v8, %v7086_v13  ;;  %v6278_v13 = vld [vmem:[#allocation6 + $0x76c] sm:$0xf0]  ;;  %v4683_v40 = vor.u32 %v6052_v47, %v4680_v52  ;;  %v4811_v24 = vor.u32 %v6084_v53, %v4808_v56  ;;  %v4670_v8 = vld [vmem:[#allocation6 + $0x48] sm:$0xf]  ;;  %v6076_v35 = vld [vmem:[#allocation6 + $0x124] sm:$0xf] }
 0x2a9   :  { %3457 = vmatpush.bf16.msra.mxu0 %v4735_v62  ;;  %3341 = vmatpush.bf16.msra.mxu2 %v5607_v0  ;;  %v1554_v17 = vmax.f32 %v1553_v30, %v7088_v18  ;;  %v4703_v18 = vor.u32 %v6059_v49, %v4702_v33  ;;  %v5575_v29 = vor.u32 %v6278_v13, %v5574_v44  ;;  %v4776_v33 = vld [vmem:[#allocation6 + $0x130] sm:$0xf0]  ;;  %v6040_v53 = vld [vmem:[#allocation6 + $0x4] sm:$0xf] }
 0x2aa   :  { %v4632_v56 = vld [vmem:[#allocation6 + $0x10] sm:$0xf0] }
 0x2ab   :  { %3354 = vmatpush.bf16.msra.mxu3 %v4715_v21  ;;  %3367 = vmatpush.bf16.msrb.mxu1 %v4843_v22  ;;  %v5559_v22 = vor.u32 %v6274_v7, %v5558_v39 }
 0x2ad   :  { %v7094_v20 = vpop.f32.mrf.mxu2  ;;  %3458 = vmatpush.bf16.msra.mxu0 %v4719_v14  ;;  %3342 = vmatpush.bf16.msra.mxu2 %v5591_v41  ;;  %v6080_v14 = vld [vmem:[#allocation6 + $0x144] sm:$0xf] }
 0x2ae   :  { %v7097_v26 = vpop.f32.mrf.mxu3  ;;  %v1528_v16 = vmax.f32 %v1527_v51, %v7094_v20  ;;  %v4795_v30 = vor.u32 %v6080_v14, %v4792_v2 }
 0x2af   :  { %v1203_v55 = vpop.f32.mrf.mxu1  ;;  %3355 = vmatpush.bf16.msra.mxu3 %v4699_v3  ;;  %3368 = vmatpush.bf16.msrb.mxu1 %v4827_v46  ;;  %v4651_v3 = vor.u32 %v6044_v9, %v4648_v38  ;;  %v6047_v46 = vld [vmem:[#allocation6 + $0x34] sm:$0xf0] }
 0x2b0   :  { %v1350_v63 = vpop.f32.mrf.mxu0  ;;  %v1516_v37 = vmax.f32 %v1515_v48, %v1203_v55  ;;  %v1540_v55 = vmax.f32 %v1539_v36, %v7084_v10  ;;  %v4667_v10 = vor.u32 %v6048_v34, %v4664_v6  ;;  %v4671_v48 = vor.u32 %v6051_v31, %v4670_v8 }
 0x2b1   :  { %v1555_v1 = vmax.f32 %v1554_v17, %v1350_v63  ;;  %3459 = vmatpush.bf16.msra.mxu0 %v4703_v18  ;;  %3343 = vmatpush.bf16.msra.mxu2 %v5575_v29  ;;  %v4635_v29 = vor.u32 %v6040_v53, %v4632_v56  ;;  %v1653_v6 = vperm.slane %v7004_v32, 6  ;;  %v1651_v8 = vperm.slane %v7004_v32, 4 }
 0x2b2   :  { %v1541_v63 = vmax.f32 %v1540_v55, %v7097_v26  ;;  %v5542_v26 = vld [vmem:[#allocation6 + $0x720] sm:$0xf] }
 0x2b3   :  { %3356 = vmatpush.bf16.msra.mxu3 %v4683_v40  ;;  %3369 = vmatpush.bf16.msrb.mxu1 %v4811_v24  ;;  %v5543_v41 = vor.u32 %v6270_v27, %v5542_v26  ;;  %v6072_v40 = vld [vmem:[#allocation6 + $0x104] sm:$0xf]  ;;  %v4760_v24 = vld [vmem:[#allocation6 + $0x110] sm:$0xf0] }
 0x2b4   :  { %v4763_v55 = vor.u32 %v6072_v40, %v4760_v24 }
 0x2b5   :  { %v1252_v59 = vpop.f32.mrf.mxu2  ;;  %3460 = vmatpush.bf16.msra.mxu0 %v4687_v54  ;;  %3344 = vmatpush.bf16.msra.mxu2 %v5559_v22  ;;  %v6043_v54 = vld [vmem:[#allocation6 + $0x14] sm:$0xf0] }
 0x2b6   :  { %v1301_v42 = vpop.f32.mrf.mxu3  ;;  %v1529_v19 = vmax.f32 %v1528_v16, %v1252_v59 }
 0x2b7   :  { %v1205_v4 = vpop.f32.mrf.mxu1  ;;  %v1542_v15 = vmax.f32 %v1541_v63, %v1301_v42  ;;  %3357 = vmatpush.bf16.msra.mxu3 %v4667_v10  ;;  %3370 = vmatpush.bf16.msrb.mxu1 %v4795_v30  ;;  %v4654_v42 = vld [vmem:[#allocation6 + $0x28] sm:$0xf]  ;;  %v1659_v30 = vrot.slane %v1653_v6, 4 }
 0x2b8   :  { %v1517_v62 = vmax.f32 %v1516_v37, %v1205_v4  ;;  %v1352_v11 = vpop.f32.mrf.mxu0  ;;  %v4779_v37 = vor.u32 %v6076_v35, %v4776_v33  ;;  %v4655_v47 = vor.u32 %v6047_v46, %v4654_v42  ;;  %v6266_v4 = vld [vmem:[#allocation6 + $0x70c] sm:$0xf0]  ;;  %v1958_v33 = vld [vmem:[%s7282_s8] sm:$0xf]  ;;  %v5128_v42 = vld [vmem:[#allocation6 + $0x3f0] sm:$0xf0] }
 0x2b9   :  { %v1556_v0 = vmax.f32 %v1555_v1, %v1352_v11  ;;  %3461 = vmatpush.bf16.msra.mxu0 %v4671_v48  ;;  %v5526_v1 = vld [vmem:[#allocation6 + $0x700] sm:$0xf]  ;;  %3345 = vmatpush.bf16.msra.mxu2 %v5543_v41  ;;  %v5384_v46 = vld [vmem:[#allocation6 + $0x5f0] sm:$0xf0] }
 0x2ba   :  { %v1518_v61 = vrot.slane %v1517_v62, 4  ;;  %v5527_v52 = vor.u32 %v6266_v4, %v5526_v1 }
 0x2bb   :  { %v1557_v21 = vrot.slane %v1556_v0, 4  ;;  %3358 = vmatpush.bf16.msra.mxu3 %v4651_v3  ;;  %3371 = vmatpush.bf16.msrb.mxu1 %v4779_v37  ;;  %v6164_v37 = vld [vmem:[#allocation6 + $0x3e4] sm:$0xf] }
 0x2bc   :  { %v1519_v23 = vmax.f32 %v1517_v62, %v1518_v61 }
 0x2bd   :  { %v1558_v20 = vmax.f32 %v1556_v0, %v1557_v21  ;;  %v1254_v25 = vpop.f32.mrf.mxu2  ;;  %3462 = vmatpush.bf16.msra.mxu0 %v4655_v47  ;;  %v4638_v0 = vld [vmem:[#allocation6 + $0x8] sm:$0xf]  ;;  %3346 = vmatpush.bf16.msra.mxu2 %v5527_v52  ;;  %v1652_v21 = vperm.slane %v7004_v32, 5  ;;  %v6128_v47 = vld [vmem:[#allocation6 + $0x2c4] sm:$0xf]  ;;  %v1960_v52 = vperm.slane %v1958_v33, 0 }
 0x2be   :  { %v1530_v57 = vmax.f32 %v1529_v19, %v1254_v25  ;;  %v1303_v43 = vpop.f32.mrf.mxu3  ;;  %v1520_v49 = vrot.slane %v1519_v23, 2  ;;  %v4639_v61 = vor.u32 %v6043_v54, %v4638_v0  ;;  %v1654_v19 = vperm.slane %v7004_v32, 7  ;;  %v6224_v0 = vld [vmem:[#allocation6 + $0x5c4] sm:$0xf]  ;;  %v5368_v54 = vld [vmem:[#allocation6 + $0x5d0] sm:$0xf0] }
 0x2bf   :  { %v1559_v17 = vrot.slane %v1558_v20, 2  ;;  %v1543_v59 = vmax.f32 %v1542_v15, %v1303_v43  ;;  %3359 = vmatpush.bf16.msra.mxu3 %v4635_v29  ;;  %3372 = vmatpush.bf16.msrb.mxu1 %v4763_v55  ;;  %v1658_v15 = vrot.slane %v1652_v21, 6  ;;  %v4984_v29 = vld [vmem:[#allocation6 + $0x2d0] sm:$0xf0]  ;;  %v6124_v21 = vld [vmem:[#allocation6 + $0x2a4] sm:$0xf]  ;;  %v5371_v6 = vor.u32 %v6224_v0, %v5368_v54 }
 0x2c0   :  { %v1531_v36 = vrot.slane %v1530_v57, 4  ;;  %v1521_v62 = vmax.f32 %v1519_v23, %v1520_v49  ;;  %v1660_v31 = vrot.slane %v1654_v19, 2  ;;  %v6132_v49 = vld [vmem:[#allocation6 + $0x2e4] sm:$0xf]  ;;  %v5112_v55 = vld [vmem:[#allocation6 + $0x3d0] sm:$0xf0] }
 0x2c1   :  { %v1560_v44 = vmax.f32 %v1558_v20, %v1559_v17  ;;  %v1544_v13 = vrot.slane %v1543_v59, 4  ;;  %3463 = vmatpush.bf16.msra.mxu0 %v4639_v61  ;;  %v1664_v48 = vsel %vm1599_vm1, %v1651_v8, %v1658_v15  ;;  %v6195_v61 = vld [vmem:[#allocation6 + $0x4d4] sm:$0xf0]  ;;  %v5352_v15 = vld [vmem:[#allocation6 + $0x5b0] sm:$0xf0] }
 0x2c2   :  { %v1532_v51 = vmax.f32 %v1530_v57, %v1531_v36  ;;  %v1522_v7 = vrot.slane %v1521_v62, 1  ;;  %v1665_v9 = vsel %vm1601_vm2, %v1659_v30, %v1660_v31  ;;  %v5000_v36 = vld [vmem:[#allocation6 + $0x2f0] sm:$0xf0]  ;;  %v6116_v33 = vld [vmem:[#allocation6 + $0x264] sm:$0xf] }
 0x2c3   :  { %v1545_v18 = vmax.f32 %v1543_v59, %v1544_v13  ;;  %v1561_v28 = vrot.slane %v1560_v44, 1  ;;  %v1666_v17 = vsel %vm1603_vm3, %v1664_v48, %v1665_v9  ;;  %v6199_v13 = vld [vmem:[#allocation6 + $0x4f4] sm:$0xf0]  ;;  %v6144_v54 = vld [vmem:[#allocation6 + $0x344] sm:$0xf] }
 0x2c4   :  { %v1533_v11 = vrot.slane %v1532_v51, 2  ;;  %v1523_v14 = vmax.f32 %v1521_v62, %v1522_v7 }
 0x2c5   :  { %v1546_v5 = vrot.slane %v1545_v18, 2  ;;  %v1562_v22 = vmax.f32 %v1560_v44, %v1561_v28  ;;  %v5262_v44 = vld [vmem:[#allocation6 + $0x4e8] sm:$0xf] }
 0x2c6   :  { %v1534_v16 = vmax.f32 %v1532_v51, %v1533_v11  ;;  %v5131_v11 = vor.u32 %v6164_v37, %v5128_v42  ;;  %v5263_v28 = vor.u32 %v6199_v13, %v5262_v44  ;;  %v6148_v37 = vld [vmem:[#allocation6 + $0x364] sm:$0xf]  ;;  %v5064_v42 = vld [vmem:[#allocation6 + $0x370] sm:$0xf0] }
 0x2c7   :  { %v1547_v39 = vmax.f32 %v1545_v18, %v1546_v5  ;;  %v1598_v20 = vrot.slane %v1562_v22, 2  ;;  %v5003_v18 = vor.u32 %v6132_v49, %v5000_v36  ;;  %v6160_v5 = vld [vmem:[#allocation6 + $0x3c4] sm:$0xf]  ;;  %v4968_v22 = vld [vmem:[#allocation6 + $0x2b0] sm:$0xf0] }
 0x2c8   :  { %v1535_v63 = vrot.slane %v1534_v16, 1  ;;  %v4971_v31 = vor.u32 %v6124_v21, %v4968_v22  ;;  %v4936_v36 = vld [vmem:[#allocation6 + $0x270] sm:$0xf0] }
 0x2c9   :  { %v1548_v34 = vrot.slane %v1547_v39, 1 }
 0x2ca   :  { %v1536_v23 = vmax.f32 %v1534_v16, %v1535_v63  ;;  %v5246_v16 = vld [vmem:[#allocation6 + $0x4c8] sm:$0xf]  ;;  %v5115_v63 = vor.u32 %v6160_v5, %v5112_v55  ;;  %v4920_v5 = vld [vmem:[#allocation6 + $0x250] sm:$0xf0] }
 0x2cb   :  { %v1549_v10 = vmax.f32 %v1547_v39, %v1548_v34  ;;  %v4987_v39 = vor.u32 %v6128_v47, %v4984_v29  ;;  %v5247_v19 = vor.u32 %v6195_v61, %v5246_v16  ;;  %v6212_v47 = vld [vmem:[#allocation6 + $0x564] sm:$0xf]  ;;  %v5048_v16 = vld [vmem:[#allocation6 + $0x350] sm:$0xf0] }
 0x2cc   :  { %v1596_v2 = vrot.slane %v1536_v23, 6  ;;  %v6156_v23 = vld [vmem:[#allocation6 + $0x3a4] sm:$0xf]  ;;  %v5051_v22 = vor.u32 %v6144_v54, %v5048_v16 }
 0x2cd   :  { %v1597_v25 = vrot.slane %v1549_v10, 4  ;;  %v5096_v10 = vld [vmem:[#allocation6 + $0x3b0] sm:$0xf0]  ;;  %v6208_v61 = vld [vmem:[#allocation6 + $0x544] sm:$0xf] }
 0x2ce   :  { %v1611_v26 = vsel %vm1599_vm1, %v1523_v14, %v1596_v2  ;;  %v6220_v14 = vld [vmem:[#allocation6 + $0x5a4] sm:$0xf] }
 0x2cf   :  { %v1612_v27 = vsel %vm1601_vm2, %v1597_v25, %v1598_v20  ;;  %v5230_v20 = vld [vmem:[#allocation6 + $0x4a8] sm:$0xf]  ;;  %v6191_v25 = vld [vmem:[#allocation6 + $0x4b4] sm:$0xf0]  ;;  %v5355_v48 = vor.u32 %v6220_v14, %v5352_v15  ;;  %v5032_v14 = vld [vmem:[#allocation6 + $0x330] sm:$0xf0] }
 0x2d0   :  { %v1613_v57 = vsel %vm1603_vm3, %v1611_v26, %v1612_v27  ;;  %v5099_v27 = vor.u32 %v6156_v23, %v5096_v10  ;;  %v5231_v9 = vor.u32 %v6191_v25, %v5230_v20  ;;  %v6140_v10 = vld [vmem:[#allocation6 + $0x324] sm:$0xf]  ;;  %v5166_v15 = vld [vmem:[#allocation6 + $0x428] sm:$0xf]  ;;  %v6175_v20 = vld [vmem:[#allocation6 + $0x434] sm:$0xf0] }
 0x2d1   :  { %v1629_v43 = vrot.slane %v1613_v57, 7  ;;  %v6120_v57 = vld [vmem:[#allocation6 + $0x284] sm:$0xf] }
 0x2d3   :  { %v1630_v38 = vsel %vm1619_vm4, %v1629_v43, %v7062_v60  ;;  %v6228_v60 = vld [vmem:[#allocation6 + $0x5e4] sm:$0xf] }
 0x2d4   :  { %v1631_v32 = vsel %vm1621_vm5, %v1629_v43, %v1630_v38  ;;  %v5387_v24 = vor.u32 %v6228_v60, %v5384_v46  ;;  %v6152_v38 = vld [vmem:[#allocation6 + $0x384] sm:$0xf] }
 0x2d5   :  { %v1632_v59 = vsel %vm1623_vm6, %v1629_v43, %v1631_v32  ;;  %v5080_v32 = vld [vmem:[#allocation6 + $0x390] sm:$0xf0] }
 0x2d6   :  { %v1633_v41 = vsel %vm1625_vm7, %v1629_v43, %v1632_v59  ;;  %v4952_v43 = vld [vmem:[#allocation6 + $0x290] sm:$0xf0]  ;;  %v5083_v49 = vor.u32 %v6152_v38, %v5080_v32  ;;  %v5167_v38 = vor.u32 %v6175_v20, %v5166_v15  ;;  %v6280_v20 = vld [vmem:[#allocation6 + $0x784] sm:$0xf] }
 0x2d7   :  { %v1670_v3 = vadd.f32 %v1666_v17, %v1633_v41  ;;  %v6216_v17 = vld [vmem:[#allocation6 + $0x584] sm:$0xf]  ;;  %v5336_v59 = vld [vmem:[#allocation6 + $0x590] sm:$0xf0]  ;;  %v5214_v41 = vld [vmem:[#allocation6 + $0x488] sm:$0xf] }
 0x2d8   :  { %v5339_v46 = vor.u32 %v6216_v17, %v5336_v59  ;;  %v5272_v32 = vld [vmem:[#allocation6 + $0x510] sm:$0xf0]  ;;  %v6260_v17 = vld [vmem:[#allocation6 + $0x6e4] sm:$0xf] }
 0x2d9   :  { %v1672_v35 = vmax.f32 %v1670_v3, 0.0  ;;  %v6187_v3 = vld [vmem:[#allocation6 + $0x494] sm:$0xf0]  ;;  %v5512_v59 = vld [vmem:[#allocation6 + $0x6f0] sm:$0xf0] }
 0x2da   :  { %v5215_v44 = vor.u32 %v6187_v3, %v5214_v41  ;;  %v5150_v41 = vld [vmem:[#allocation6 + $0x408] sm:$0xf]  ;;  %v6171_v3 = vld [vmem:[#allocation6 + $0x414] sm:$0xf0]  ;;  %v5464_v15 = vld [vmem:[#allocation6 + $0x690] sm:$0xf0] }
 0x2db   :  { %1677 = vst [vmem:[#allocation1 + $0x20] ss:$4 sm:$0xff] %v1672_v35  ;;  %v4955_v35 = vor.u32 %v6120_v57, %v4952_v43  ;;  %v6136_v57 = vld [vmem:[#allocation6 + $0x304] sm:$0xf]  ;;  %v5016_v43 = vld [vmem:[#allocation6 + $0x310] sm:$0xf0] }
 0x2e2   :  { %v3257_v51 = vpop.f32.mrf.mxu1  ;;  %v1682_v1 = vld.sshfl [vmem:[#allocation1 + $0x20] sm:$0xff pattern:$0x73625140]  ;;  %v1683_v4 = vld.sshfl [vmem:[#allocation1 + $0x28] sm:$0xff pattern:$0x73625140] }
 0x2e3   :  { %v7136_v53 = vpack.c.bf16 %v1682_v1, %v1682_v1  ;;  %v7138_v56 = vpack.c.bf16 %v1683_v4, %v1683_v4  ;;  %v1684_v62 = vld.sshfl [vmem:[#allocation1 + $0x30] sm:$0xff pattern:$0x73625140]  ;;  %v3258_v7 = vadd.f32 %v3257_v51, %v1960_v52  ;;  %v1685_v13 = vld.sshfl [vmem:[#allocation1 + $0x38] sm:$0xff pattern:$0x73625140] }
 0x2e4   :  { %v7140_v40 = vpack.c.bf16 %v1684_v62, %v1684_v62  ;;  %v5320_v1 = vld [vmem:[#allocation6 + $0x570] sm:$0xf0]  ;;  %v5198_v4 = vld [vmem:[#allocation6 + $0x468] sm:$0xf]  ;;  %v4939_v62 = vor.u32 %v6116_v33, %v4936_v36  ;;  %v7148_v29 = vpack.c.bf16 %v1685_v13, %v1685_v13 }
 0x2e5   :  { %3308 = vmatmul.bf16.vlgmr.msrb.gmra.mxu2 %v7136_v53  ;;  %3321 = vmatmul.bf16.vlgmr.msrb.gmra.mxu3 %v7138_v56  ;;  %v5323_v55 = vor.u32 %v6212_v47, %v5320_v1  ;;  %v4878_v36 = vld [vmem:[#allocation6 + $0x1e8] sm:$0xf]  ;;  %v5151_v47 = vor.u32 %v6171_v3, %v5150_v41  ;;  %v5576_v41 = vld [vmem:[#allocation6 + $0x770] sm:$0xf0] }
 0x2e6   :  { %3334 = vmatmul.bf16.vlgmr.msra.gmra.mxu1 %v7140_v40  ;;  %3378 = vmatpush.bf16.msrb.mxu2 %v5003_v18  ;;  %v6183_v18 = vld [vmem:[#allocation6 + $0x474] sm:$0xf0]  ;;  %v4814_v3 = vld [vmem:[#allocation6 + $0x168] sm:$0xf] }
 0x2e7   :  { %3391 = vmatpush.bf16.msrb.mxu3 %v5131_v11  ;;  %3412 = vmatmul.bf16.vlgmr.msrb.gmra.mxu0 %v7136_v53  ;;  %v5199_v0 = vor.u32 %v6183_v18, %v5198_v4  ;;  %v6256_v4 = vld [vmem:[#allocation6 + $0x6c4] sm:$0xf]  ;;  %v5496_v18 = vld [vmem:[#allocation6 + $0x6d0] sm:$0xf0] }
 0x2e8   :  { %3417 = vmatpush.bf16.msra.mxu1 %v5387_v24  ;;  %3508 = vmatpush.bf16.msrb.mxu0 %v5263_v28  ;;  %v3270_v34 = vpop.f32.mrf.mxu2  ;;  %v5067_v24 = vor.u32 %v6148_v37, %v5064_v42  ;;  %v6112_v28 = vld [vmem:[#allocation6 + $0x244] sm:$0xf]  ;;  %v6103_v37 = vld [vmem:[#allocation6 + $0x1f4] sm:$0xf0]  ;;  %v5019_v42 = vor.u32 %v6136_v57, %v5016_v43  ;;  %v5499_v54 = vor.u32 %v6256_v4, %v5496_v18  ;;  %v4704_v57 = vld [vmem:[#allocation6 + $0x98] sm:$0xf0] }
 0x2e9   :  { %v3271_v2 = vadd.f32 %v3270_v34, %v3258_v7  ;;  %v3283_v8 = vpop.f32.mrf.mxu3  ;;  %v5182_v7 = vld [vmem:[#allocation6 + $0x448] sm:$0xf]  ;;  %v4923_v21 = vor.u32 %v6112_v28, %v4920_v5  ;;  %v6108_v34 = vld [vmem:[#allocation6 + $0x224] sm:$0xf]  ;;  %v4879_v1 = vor.u32 %v6103_v37, %v4878_v36  ;;  %v6099_v5 = vld [vmem:[#allocation6 + $0x1d4] sm:$0xf0] }
 0x2ea   :  { %3379 = vmatpush.bf16.msrb.mxu2 %v4987_v39  ;;  %v3259_v30 = vpop.f32.mrf.mxu1  ;;  %v5304_v39 = vld [vmem:[#allocation6 + $0x550] sm:$0xf0]  ;;  %v4862_v28 = vld [vmem:[#allocation6 + $0x1c8] sm:$0xf]  ;;  %v6049_v4 = vld [vmem:[#allocation6 + $0x4c] sm:$0xf] }
 0x2eb   :  { %v3284_v26 = vadd.f32 %v3283_v8, %v3271_v2  ;;  %3392 = vmatpush.bf16.msrb.mxu3 %v5115_v63  ;;  %v6179_v63 = vld [vmem:[#allocation6 + $0x454] sm:$0xf0]  ;;  %v6204_v2 = vld [vmem:[#allocation6 + $0x524] sm:$0xf]  ;;  %v5288_v8 = vld [vmem:[#allocation6 + $0x530] sm:$0xf0] }
 0x2ec   :  { %3418 = vmatpush.bf16.msra.mxu1 %v5371_v6  ;;  %3509 = vmatpush.bf16.msrb.mxu0 %v5247_v19  ;;  %v4904_v6 = vld [vmem:[#allocation6 + $0x230] sm:$0xf0]  ;;  %v5307_v19 = vor.u32 %v6208_v61, %v5304_v39  ;;  %v5183_v23 = vor.u32 %v6179_v63, %v5182_v7  ;;  %v4863_v61 = vor.u32 %v6099_v5, %v4862_v28  ;;  %v6252_v39 = vld [vmem:[#allocation6 + $0x6a4] sm:$0xf]  ;;  %v4672_v18 = vld [vmem:[#allocation6 + $0x58] sm:$0xf0] }
 0x2ed   :  { %v4907_v30 = vor.u32 %v6108_v34, %v4904_v6  ;;  %v5480_v7 = vld [vmem:[#allocation6 + $0x6b0] sm:$0xf0]  ;;  %v6284_v63 = vld [vmem:[#allocation6 + $0x7a4] sm:$0xf]  ;;  %v4846_v34 = vld [vmem:[#allocation6 + $0x1a8] sm:$0xf] }
 0x2ee   :  { %3380 = vmatpush.bf16.msrb.mxu2 %v4971_v31  ;;  %v6104_v31 = vld [vmem:[#allocation6 + $0x204] sm:$0xf]  ;;  %v6095_v6 = vld [vmem:[#allocation6 + $0x1b4] sm:$0xf0]  ;;  %v5416_v5 = vld [vmem:[#allocation6 + $0x630] sm:$0xf0] }
 0x2ef   :  { %3393 = vmatpush.bf16.msrb.mxu3 %v5099_v27  ;;  %v5035_v27 = vor.u32 %v6140_v10, %v5032_v14  ;;  %v5483_v10 = vor.u32 %v6252_v39, %v5480_v7  ;;  %v6236_v28 = vld [vmem:[#allocation6 + $0x624] sm:$0xf]  ;;  %v6045_v39 = vld [vmem:[#allocation6 + $0x2c] sm:$0xf]  ;;  %v4656_v7 = vld [vmem:[#allocation6 + $0x38] sm:$0xf0] }
 0x2f0   :  { %3419 = vmatpush.bf16.msra.mxu1 %v5355_v48  ;;  %3510 = vmatpush.bf16.msrb.mxu0 %v5231_v9  ;;  %v3272_v60 = vpop.f32.mrf.mxu2  ;;  %v6200_v48 = vld [vmem:[#allocation6 + $0x504] sm:$0xf]  ;;  %v5291_v9 = vor.u32 %v6204_v2, %v5288_v8  ;;  %v4847_v2 = vor.u32 %v6095_v6, %v4846_v34 }
 0x2f1   :  { %v3285_v51 = vpop.f32.mrf.mxu3  ;;  %v5515_v60 = vor.u32 %v6260_v17, %v5512_v59  ;;  %v5275_v13 = vor.u32 %v6200_v48, %v5272_v32  ;;  %v6248_v8 = vld [vmem:[#allocation6 + $0x684] sm:$0xf]  ;;  %v5448_v32 = vld [vmem:[#allocation6 + $0x670] sm:$0xf0] }
 0x2f2   :  { %3381 = vmatpush.bf16.msrb.mxu2 %v4955_v35  ;;  %v3296_v52 = vpop.f32.mrf.mxu1  ;;  %v6292_v35 = vld [vmem:[#allocation6 + $0x7e4] sm:$0xf]  ;;  %v5467_v43 = vor.u32 %v6248_v8, %v5464_v15  ;;  %v6041_v8 = vld [vmem:[#allocation6 + $0xc] sm:$0xf]  ;;  %v4640_v15 = vld [vmem:[#allocation6 + $0x18] sm:$0xf0] }
 0x2f3   :  { %3394 = vmatpush.bf16.msrb.mxu3 %v5083_v49  ;;  %v7146_v11 = vadd.f32 %v3296_v52, %v3284_v26  ;;  %v4888_v26 = vld [vmem:[#allocation6 + $0x210] sm:$0xf0]  ;;  %v6288_v52 = vld [vmem:[#allocation6 + $0x7c4] sm:$0xf] }
 0x2f4   :  { %3420 = vmatpush.bf16.msra.mxu1 %v5339_v46  ;;  %3511 = vmatpush.bf16.msrb.mxu0 %v5215_v44  ;;  %v4891_v33 = vor.u32 %v6104_v31, %v4888_v26  ;;  %v5640_v49 = vld [vmem:[#allocation6 + $0x7f0] sm:$0xf0]  ;;  %v6069_v46 = vld [vmem:[#allocation6 + $0xec] sm:$0xf]  ;;  %v4752_v44 = vld [vmem:[#allocation6 + $0xf8] sm:$0xf0] }
 0x2f5   :  { %3347 = vmatmul.bf16.vlgmr.msra.gmra.mxu2 %v7148_v29  ;;  %3360 = vmatmul.bf16.vlgmr.msra.gmra.mxu3 %v7029_v12  ;;  %v5643_v51 = vor.u32 %v6292_v35, %v5640_v49  ;;  %v4830_v31 = vld [vmem:[#allocation6 + $0x188] sm:$0xf]  ;;  %v6091_v26 = vld [vmem:[#allocation6 + $0x194] sm:$0xf0]  ;;  %v6276_v17 = vld [vmem:[#allocation6 + $0x764] sm:$0xf] }
 0x2f6   :  { %3373 = vmatmul.bf16.vlgmr.msrb.gmra.mxu1 %v7031_v45  ;;  %3382 = vmatpush.bf16.msrb.mxu2 %v4939_v62  ;;  %v4755_v62 = vor.u32 %v6069_v46, %v4752_v44  ;;  %v6087_v35 = vld [vmem:[#allocation6 + $0x174] sm:$0xf0]  ;;  %v4688_v49 = vld [vmem:[#allocation6 + $0x78] sm:$0xf0]  ;;  %v5579_v37 = vor.u32 %v6276_v17, %v5576_v41  ;;  %v5432_v46 = vld [vmem:[#allocation6 + $0x650] sm:$0xf0] }
 0x2f7   :  { %3395 = vmatpush.bf16.msrb.mxu3 %v5067_v24  ;;  %3464 = vmatmul.bf16.vlgmr.msra.gmra.mxu0 %v7029_v12  ;;  %v5624_v24 = vld [vmem:[#allocation6 + $0x7d0] sm:$0xf0]  ;;  %v6272_v44 = vld [vmem:[#allocation6 + $0x744] sm:$0xf] }
 0x2f8   :  { %3421 = vmatpush.bf16.msra.mxu1 %v5323_v55  ;;  %3512 = vmatpush.bf16.msrb.mxu0 %v5199_v0  ;;  %v6065_v55 = vld [vmem:[#allocation6 + $0xcc] sm:$0xf]  ;;  %v4736_v0 = vld [vmem:[#allocation6 + $0xd8] sm:$0xf0]  ;;  %v5627_v16 = vor.u32 %v6288_v52, %v5624_v24 }
 0x2fa   :  { %3383 = vmatpush.bf16.msrb.mxu2 %v4923_v21  ;;  %v3298_v25 = vpop.f32.mrf.mxu1  ;;  %v4739_v21 = vor.u32 %v6065_v55, %v4736_v0  ;;  %v6268_v55 = vld [vmem:[#allocation6 + $0x724] sm:$0xf]  ;;  %v4675_v0 = vor.u32 %v6049_v4, %v4672_v18  ;;  %v5102_v4 = vld [vmem:[#allocation6 + $0x3a8] sm:$0xf] }
 0x2fb   :  { %3396 = vmatpush.bf16.msrb.mxu3 %v5051_v22  ;;  %v5608_v22 = vld [vmem:[#allocation6 + $0x7b0] sm:$0xf0] }
 0x2fc   :  { %3422 = vmatpush.bf16.msra.mxu1 %v5307_v19  ;;  %3513 = vmatpush.bf16.msrb.mxu0 %v5183_v23  ;;  %v6061_v19 = vld [vmem:[#allocation6 + $0xac] sm:$0xf]  ;;  %v4720_v23 = vld [vmem:[#allocation6 + $0xb8] sm:$0xf0]  ;;  %v5611_v14 = vor.u32 %v6284_v63, %v5608_v22  ;;  %v5419_v63 = vor.u32 %v6236_v28, %v5416_v5  ;;  %v5400_v22 = vld [vmem:[#allocation6 + $0x610] sm:$0xf0] }
 0x2fd   :  { %v4723_v25 = vor.u32 %v6061_v19, %v4720_v23  ;;  %v6264_v19 = vld [vmem:[#allocation6 + $0x704] sm:$0xf]  ;;  %v5528_v23 = vld [vmem:[#allocation6 + $0x710] sm:$0xf0]  ;;  %v6189_v28 = vld [vmem:[#allocation6 + $0x4ac] sm:$0xf] }
 0x2fe   :  { %3384 = vmatpush.bf16.msrb.mxu2 %v4907_v30  ;;  %v5592_v30 = vld [vmem:[#allocation6 + $0x790] sm:$0xf0]  ;;  %v5232_v5 = vld [vmem:[#allocation6 + $0x4b8] sm:$0xf0] }
 0x2ff   :  { %3397 = vmatpush.bf16.msrb.mxu3 %v5035_v27  ;;  %v6057_v27 = vld [vmem:[#allocation6 + $0x8c] sm:$0xf]  ;;  %v5595_v48 = vor.u32 %v6280_v20, %v5592_v30  ;;  %v5006_v20 = vld [vmem:[#allocation6 + $0x2e8] sm:$0xf] }
 0x300   :  { %3423 = vmatpush.bf16.msra.mxu1 %v5291_v9  ;;  %3514 = vmatpush.bf16.msrb.mxu0 %v5167_v38  ;;  %v4831_v9 = vor.u32 %v6091_v26, %v4830_v31  ;;  %v6244_v38 = vld [vmem:[#allocation6 + $0x664] sm:$0xf]  ;;  %v4707_v59 = vor.u32 %v6057_v27, %v4704_v57  ;;  %v5134_v30 = vld [vmem:[#allocation6 + $0x3e8] sm:$0xf]  ;;  %v6167_v26 = vld [vmem:[#allocation6 + $0x3f4] sm:$0xf0] }
 0x301   :  { %v5451_v36 = vor.u32 %v6244_v38, %v5448_v32  ;;  %v5390_v27 = vld [vmem:[#allocation6 + $0x5e8] sm:$0xf]  ;;  %v6231_v57 = vld [vmem:[#allocation6 + $0x5f4] sm:$0xf0]  ;;  %v5264_v38 = vld [vmem:[#allocation6 + $0x4f8] sm:$0xf0]  ;;  %v4643_v32 = vor.u32 %v6041_v8, %v4640_v15 }
 0x302   :  { %3385 = vmatpush.bf16.msrb.mxu2 %v4891_v33  ;;  %v6053_v33 = vld [vmem:[#allocation6 + $0x6c] sm:$0xf]  ;;  %v5391_v41 = vor.u32 %v6231_v57, %v5390_v27  ;;  %v6151_v15 = vld [vmem:[#allocation6 + $0x374] sm:$0xf0] }
 0x303   :  { %3398 = vmatpush.bf16.msrb.mxu3 %v5019_v42  ;;  %v4815_v42 = vor.u32 %v6087_v35, %v4814_v3  ;;  %v4990_v3 = vld [vmem:[#allocation6 + $0x2c8] sm:$0xf]  ;;  %v6131_v35 = vld [vmem:[#allocation6 + $0x2d4] sm:$0xf0] }
 0x304   :  { %3424 = vmatpush.bf16.msra.mxu1 %v5275_v13  ;;  %3515 = vmatpush.bf16.msrb.mxu0 %v5151_v47  ;;  %v4691_v13 = vor.u32 %v6053_v33, %v4688_v49  ;;  %v5560_v47 = vld [vmem:[#allocation6 + $0x750] sm:$0xf0]  ;;  %v5118_v33 = vld [vmem:[#allocation6 + $0x3c8] sm:$0xf] }
 0x305   :  { %3386 = vmatmul.bf16.vlgmr.msrb.gmra.mxu2 %v7033_v50 }
 0x306   :  { %3430 = vmatpush.bf16.msra.mxu2 %v5515_v60  ;;  %3399 = vmatmul.bf16.vlgmr.msrb.gmra.mxu3 %v7038_v58  ;;  %v6240_v60 = vld [vmem:[#allocation6 + $0x644] sm:$0xf] }
 0x307   :  { %3443 = vmatpush.bf16.msra.mxu3 %v5643_v51  ;;  %3425 = vmatmul.bf16.vlgmr.msra.gmra.mxu1 %v7138_v56  ;;  %v4798_v51 = vld [vmem:[#allocation6 + $0x148] sm:$0xf]  ;;  %v5435_v52 = vor.u32 %v6240_v60, %v5432_v46  ;;  %v6193_v60 = vld [vmem:[#allocation6 + $0x4cc] sm:$0xf]  ;;  %v5248_v46 = vld [vmem:[#allocation6 + $0x4d8] sm:$0xf0] }
 0x308   :  { %3469 = vmatpush.bf16.msrb.mxu1 %v4879_v1  ;;  %3560 = vmatpush.bf16.msra.mxu0 %v4755_v62  ;;  %v6083_v1 = vld [vmem:[#allocation6 + $0x154] sm:$0xf0]  ;;  %v5563_v62 = vor.u32 %v6272_v44, %v5560_v47  ;;  %v4991_v44 = vor.u32 %v6131_v35, %v4990_v3  ;;  %v5251_v18 = vor.u32 %v6193_v60, %v5248_v46  ;;  %v5184_v3 = vld [vmem:[#allocation6 + $0x458] sm:$0xf0] }
 0x309   :  { %3516 = vmatmul.bf16.vlgmr.msrb.gmra.mxu0 %v7136_v53  ;;  %v4799_v24 = vor.u32 %v6083_v1, %v4798_v51  ;;  %v4974_v51 = vld [vmem:[#allocation6 + $0x2a8] sm:$0xf]  ;;  %v6127_v1 = vld [vmem:[#allocation6 + $0x2b4] sm:$0xf0] }
 0x30a   :  { %3431 = vmatpush.bf16.msra.mxu2 %v5499_v54  ;;  %v5544_v54 = vld [vmem:[#allocation6 + $0x730] sm:$0xf0]  ;;  %v6143_v46 = vld [vmem:[#allocation6 + $0x334] sm:$0xf0] }
 0x30b   :  { %3444 = vmatpush.bf16.msra.mxu3 %v5627_v16  ;;  %v4782_v16 = vld [vmem:[#allocation6 + $0x128] sm:$0xf]  ;;  %v5547_v34 = vor.u32 %v6268_v55, %v5544_v54  ;;  %v4975_v55 = vor.u32 %v6127_v1, %v4974_v51  ;;  %v5168_v51 = vld [vmem:[#allocation6 + $0x438] sm:$0xf0] }
 0x30c   :  { %3470 = vmatpush.bf16.msrb.mxu1 %v4863_v61  ;;  %3561 = vmatpush.bf16.msra.mxu0 %v4739_v21  ;;  %v6079_v61 = vld [vmem:[#allocation6 + $0x134] sm:$0xf0]  ;;  %v6232_v21 = vld [vmem:[#allocation6 + $0x604] sm:$0xf] }
 0x30d   :  { %v4783_v6 = vor.u32 %v6079_v61, %v4782_v16  ;;  %v5403_v31 = vor.u32 %v6232_v21, %v5400_v22  ;;  %v4958_v16 = vld [vmem:[#allocation6 + $0x288] sm:$0xf]  ;;  %v6123_v61 = vld [vmem:[#allocation6 + $0x294] sm:$0xf0] }
 0x30e   :  { %3432 = vmatpush.bf16.msra.mxu2 %v5483_v10  ;;  %v4766_v10 = vld [vmem:[#allocation6 + $0x108] sm:$0xf]  ;;  %v6219_v22 = vld [vmem:[#allocation6 + $0x594] sm:$0xf0] }
 0x30f   :  { %3445 = vmatpush.bf16.msra.mxu3 %v5611_v14  ;;  %v4659_v14 = vor.u32 %v6045_v39, %v4656_v7  ;;  %v5086_v39 = vld [vmem:[#allocation6 + $0x388] sm:$0xf]  ;;  %v5235_v7 = vor.u32 %v6189_v28, %v5232_v5  ;;  %v6139_v28 = vld [vmem:[#allocation6 + $0x314] sm:$0xf0] }
 0x310   :  { %3471 = vmatpush.bf16.msrb.mxu1 %v4847_v2  ;;  %3562 = vmatpush.bf16.msra.mxu0 %v4723_v25  ;;  %v6075_v2 = vld [vmem:[#allocation6 + $0x114] sm:$0xf0]  ;;  %v5342_v21 = vld [vmem:[#allocation6 + $0x588] sm:$0xf] }
 0x311   :  { %v6135_v25 = vld [vmem:[#allocation6 + $0x2f4] sm:$0xf0]  ;;  %v5278_v5 = vld [vmem:[#allocation6 + $0x508] sm:$0xf] }
 0x312   :  { %3433 = vmatpush.bf16.msra.mxu2 %v5467_v43  ;;  %v5531_v43 = vor.u32 %v6264_v19, %v5528_v23  ;;  %v5007_v17 = vor.u32 %v6135_v25, %v5006_v20  ;;  %v4959_v19 = vor.u32 %v6123_v61, %v4958_v16  ;;  %v5343_v23 = vor.u32 %v6219_v22, %v5342_v21  ;;  %v5326_v20 = vld [vmem:[#allocation6 + $0x568] sm:$0xf]  ;;  %v6215_v25 = vld [vmem:[#allocation6 + $0x574] sm:$0xf0]  ;;  %v5152_v16 = vld [vmem:[#allocation6 + $0x418] sm:$0xf0] }
 0x313   :  { %3446 = vmatpush.bf16.msra.mxu3 %v5595_v48  ;;  %v4767_v48 = vor.u32 %v6075_v2, %v4766_v10  ;;  %v4942_v10 = vld [vmem:[#allocation6 + $0x268] sm:$0xf]  ;;  %v5327_v57 = vor.u32 %v6215_v25, %v5326_v20  ;;  %v6295_v21 = vld [vmem:[#allocation6 + $0x7f4] sm:$0xf0]  ;;  %v6101_v22 = vld [vmem:[#allocation6 + $0x1ec] sm:$0xf] }
 0x314   :  { %3472 = vmatpush.bf16.msrb.mxu1 %v4831_v9  ;;  %3563 = vmatpush.bf16.msra.mxu0 %v4707_v59  ;;  %v6197_v9 = vld [vmem:[#allocation6 + $0x4ec] sm:$0xf]  ;;  %v5135_v59 = vor.u32 %v6167_v26, %v5134_v30  ;;  %v5070_v2 = vld [vmem:[#allocation6 + $0x368] sm:$0xf]  ;;  %v5710_v20 = vld [vmem:[#allocation8 + $0x70] sm:$0xf] }
 0x315   :  { %v5267_v49 = vor.u32 %v6197_v9, %v5264_v38  ;;  %v6181_v30 = vld [vmem:[#allocation6 + $0x46c] sm:$0xf]  ;;  %v5071_v27 = vor.u32 %v6151_v15, %v5070_v2  ;;  %v5054_v9 = vld [vmem:[#allocation6 + $0x348] sm:$0xf]  ;;  %v6311_v25 = vld [vmem:[#allocation8 + $0x74] sm:$0xf0] }
 0x316   :  { %3434 = vmatpush.bf16.msra.mxu2 %v5451_v36  ;;  %v6163_v36 = vld [vmem:[#allocation6 + $0x3d4] sm:$0xf0]  ;;  %v5518_v61 = vld [vmem:[#allocation6 + $0x6e8] sm:$0xf] }
 0x317   :  { %3447 = vmatpush.bf16.msra.mxu3 %v5579_v37  ;;  %v5374_v37 = vld [vmem:[#allocation6 + $0x5c8] sm:$0xf] }
 0x318   :  { %3473 = vmatpush.bf16.msrb.mxu1 %v4815_v42  ;;  %3564 = vmatpush.bf16.msra.mxu0 %v4691_v13  ;;  %v6227_v42 = vld [vmem:[#allocation6 + $0x5d4] sm:$0xf0]  ;;  %v5119_v13 = vor.u32 %v6163_v36, %v5118_v33  ;;  %v4910_v36 = vld [vmem:[#allocation6 + $0x228] sm:$0xf] }
 0x319   :  { %v5375_v47 = vor.u32 %v6227_v42, %v5374_v37  ;;  %v6111_v37 = vld [vmem:[#allocation6 + $0x234] sm:$0xf0]  ;;  %v5038_v42 = vld [vmem:[#allocation6 + $0x328] sm:$0xf] }
 0x31a   :  { %3435 = vmatpush.bf16.msra.mxu2 %v5435_v52  ;;  %v6159_v52 = vld [vmem:[#allocation6 + $0x3b4] sm:$0xf0]  ;;  %v4911_v1 = vor.u32 %v6111_v37, %v4910_v36  ;;  %v5630_v15 = vld [vmem:[#allocation6 + $0x7c8] sm:$0xf] }
 0x31b   :  { %3448 = vmatpush.bf16.msra.mxu3 %v5563_v62  ;;  %v5358_v62 = vld [vmem:[#allocation6 + $0x5a8] sm:$0xf]  ;;  %v6251_v36 = vld [vmem:[#allocation6 + $0x694] sm:$0xf0] }
 0x31c   :  { %3474 = vmatpush.bf16.msrb.mxu1 %v4799_v24  ;;  %3565 = vmatpush.bf16.msra.mxu0 %v4675_v0  ;;  %v6223_v24 = vld [vmem:[#allocation6 + $0x5b4] sm:$0xf0]  ;;  %v5103_v0 = vor.u32 %v6159_v52, %v5102_v4  ;;  %v4894_v4 = vld [vmem:[#allocation6 + $0x208] sm:$0xf]  ;;  %v5039_v52 = vor.u32 %v6143_v46, %v5038_v42 }
 0x31d   :  { %v5359_v54 = vor.u32 %v6223_v24, %v5358_v62  ;;  %v5022_v24 = vld [vmem:[#allocation6 + $0x308] sm:$0xf] }
 0x31e   :  { %3436 = vmatpush.bf16.msra.mxu2 %v5419_v63  ;;  %v6155_v63 = vld [vmem:[#allocation6 + $0x394] sm:$0xf0]  ;;  %v5598_v46 = vld [vmem:[#allocation6 + $0x788] sm:$0xf] }
 0x31f   :  { %3449 = vmatpush.bf16.msra.mxu3 %v5547_v34  ;;  %v6185_v34 = vld [vmem:[#allocation6 + $0x48c] sm:$0xf] }
 0x320   :  { %3475 = vmatpush.bf16.msrb.mxu1 %v4783_v6  ;;  %3566 = vmatpush.bf16.msra.mxu0 %v4659_v14  ;;  %v5216_v6 = vld [vmem:[#allocation6 + $0x498] sm:$0xf0]  ;;  %v6119_v14 = vld [vmem:[#allocation6 + $0x274] sm:$0xf0] }
 0x321   :  { %v5219_v8 = vor.u32 %v6185_v34, %v5216_v6  ;;  %v4943_v26 = vor.u32 %v6119_v14, %v4942_v10  ;;  %v4880_v34 = vld [vmem:[#allocation6 + $0x1f8] sm:$0xf0]  ;;  %v5023_v6 = vor.u32 %v6139_v28, %v5022_v24  ;;  %v5502_v10 = vld [vmem:[#allocation6 + $0x6c8] sm:$0xf]  ;;  %v6259_v14 = vld [vmem:[#allocation6 + $0x6d4] sm:$0xf0] }
 0x322   :  { %3437 = vmatpush.bf16.msra.mxu2 %v5403_v31  ;;  %v5200_v31 = vld [vmem:[#allocation6 + $0x478] sm:$0xf0]  ;;  %v5582_v28 = vld [vmem:[#allocation6 + $0x768] sm:$0xf] }
 0x323   :  { %3450 = vmatpush.bf16.msra.mxu3 %v5531_v43  ;;  %v4926_v43 = vld [vmem:[#allocation6 + $0x248] sm:$0xf]  ;;  %v5203_v38 = vor.u32 %v6181_v30, %v5200_v31  ;;  %v6291_v30 = vld [vmem:[#allocation6 + $0x7d4] sm:$0xf0]  ;;  %v6097_v31 = vld [vmem:[#allocation6 + $0x1cc] sm:$0xf] }
 0x324   :  { %3476 = vmatpush.bf16.msrb.mxu1 %v4767_v48  ;;  %3567 = vmatpush.bf16.msra.mxu0 %v4643_v32  ;;  %v6115_v48 = vld [vmem:[#allocation6 + $0x254] sm:$0xf0] }
 0x325   :  { %3438 = vmatmul.bf16.vlgmr.msra.gmra.mxu2 %v7140_v40  ;;  %v6147_v32 = vld [vmem:[#allocation6 + $0x354] sm:$0xf0]  ;;  %v4927_v35 = vor.u32 %v6115_v48, %v4926_v43  ;;  %v5711_v48 = vor.u32 %v6311_v25, %v5710_v20 }
 0x326   :  { %3482 = vmatpush.bf16.msrb.mxu2 %v5007_v17  ;;  %3451 = vmatmul.bf16.vlgmr.msra.gmra.mxu3 %v7148_v29  ;;  %v5310_v17 = vld [vmem:[#allocation6 + $0x548] sm:$0xf]  ;;  %v5055_v33 = vor.u32 %v6147_v32, %v5054_v9  ;;  %v6255_v43 = vld [vmem:[#allocation6 + $0x6b4] sm:$0xf0]  ;;  %v5631_v9 = vor.u32 %v6291_v30, %v5630_v15 }
 0x327   :  { %3495 = vmatpush.bf16.msrb.mxu3 %v5135_v59  ;;  %3477 = vmatmul.bf16.vlgmr.msrb.gmra.mxu1 %v7031_v45  ;;  %v6211_v59 = vld [vmem:[#allocation6 + $0x554] sm:$0xf0]  ;;  %v5614_v32 = vld [vmem:[#allocation6 + $0x7a8] sm:$0xf] }
 0x328   :  { %3521 = vmatpush.bf16.msra.mxu1 %v5391_v41  ;;  %3612 = vmatpush.bf16.msrb.mxu0 %v5267_v49  ;;  %v6177_v41 = vld [vmem:[#allocation6 + $0x44c] sm:$0xf]  ;;  %v5311_v49 = vor.u32 %v6211_v59, %v5310_v17  ;;  %v5702_v17 = vld [vmem:[#allocation8 + $0x60] sm:$0xf]  ;;  %v6309_v59 = vld [vmem:[#allocation8 + $0x64] sm:$0xf0] }
 0x329   :  { %3568 = vmatmul.bf16.vlgmr.msra.gmra.mxu0 %v7029_v12  ;;  %v5087_v12 = vor.u32 %v6155_v63, %v5086_v39  ;;  %v5187_v60 = vor.u32 %v6177_v41, %v5184_v3  ;;  %v6263_v39 = vld [vmem:[#allocation6 + $0x6f4] sm:$0xf0]  ;;  %v6093_v3 = vld [vmem:[#allocation6 + $0x1ac] sm:$0xf]  ;;  %v5703_v37 = vor.u32 %v6309_v59, %v5702_v17  ;;  %v5550_v30 = vld [vmem:[#allocation6 + $0x728] sm:$0xf] }
 0x32a   :  { %3483 = vmatpush.bf16.msrb.mxu2 %v4991_v44  ;;  %v5294_v44 = vld [vmem:[#allocation6 + $0x528] sm:$0xf]  ;;  %v6287_v41 = vld [vmem:[#allocation6 + $0x7b4] sm:$0xf0] }
 0x32b   :  { %3496 = vmatpush.bf16.msrb.mxu3 %v5119_v13  ;;  %v6207_v13 = vld [vmem:[#allocation6 + $0x534] sm:$0xf0]  ;;  %v5615_v42 = vor.u32 %v6287_v41, %v5614_v32  ;;  %v5534_v32 = vld [vmem:[#allocation6 + $0x708] sm:$0xf] }
 0x32c   :  { %3522 = vmatpush.bf16.msra.mxu1 %v5375_v47  ;;  %3613 = vmatpush.bf16.msrb.mxu0 %v5251_v18  ;;  %v6173_v47 = vld [vmem:[#allocation6 + $0x42c] sm:$0xf]  ;;  %v6107_v18 = vld [vmem:[#allocation6 + $0x214] sm:$0xf0]  ;;  %v5295_v62 = vor.u32 %v6207_v13, %v5294_v44  ;;  %v5694_v44 = vld [vmem:[#allocation8 + $0x50] sm:$0xf] }
 0x32d   :  { %v4895_v63 = vor.u32 %v6107_v18, %v4894_v4  ;;  %v6307_v13 = vld [vmem:[#allocation8 + $0x54] sm:$0xf0]  ;;  %v5454_v18 = vld [vmem:[#allocation6 + $0x668] sm:$0xf] }
 0x32e   :  { %3484 = vmatpush.bf16.msrb.mxu2 %v4975_v55  ;;  %v5171_v55 = vor.u32 %v6173_v47, %v5168_v51  ;;  %v6283_v47 = vld [vmem:[#allocation6 + $0x794] sm:$0xf0]  ;;  %v6089_v51 = vld [vmem:[#allocation6 + $0x18c] sm:$0xf] }
 0x32f   :  { %3497 = vmatpush.bf16.msrb.mxu3 %v5103_v0  ;;  %v6203_v0 = vld [vmem:[#allocation6 + $0x514] sm:$0xf0] }
 0x330   :  { %3523 = vmatpush.bf16.msra.mxu1 %v5359_v54  ;;  %3614 = vmatpush.bf16.msrb.mxu0 %v5235_v7  ;;  %v6169_v54 = vld [vmem:[#allocation6 + $0x40c] sm:$0xf]  ;;  %v5646_v7 = vld [vmem:[#allocation6 + $0x7e8] sm:$0xf] }
 0x331   :  { %v5647_v2 = vor.u32 %v6295_v21, %v5646_v7  ;;  %v6243_v7 = vld [vmem:[#allocation6 + $0x654] sm:$0xf0] }
 0x332   :  { %3485 = vmatpush.bf16.msrb.mxu2 %v4959_v19  ;;  %v5279_v19 = vor.u32 %v6203_v0, %v5278_v5  ;;  %v5686_v5 = vld [vmem:[#allocation8 + $0x40] sm:$0xf]  ;;  %v6279_v0 = vld [vmem:[#allocation6 + $0x774] sm:$0xf0] }
 0x333   :  { %3498 = vmatpush.bf16.msrb.mxu3 %v5087_v12  ;;  %v5155_v12 = vor.u32 %v6169_v54, %v5152_v16  ;;  %v6085_v54 = vld [vmem:[#allocation6 + $0x16c] sm:$0xf]  ;;  %v4816_v16 = vld [vmem:[#allocation6 + $0x178] sm:$0xf0]  ;;  %v5583_v21 = vor.u32 %v6279_v0, %v5582_v28  ;;  %v6297_v28 = vld [vmem:[#allocation8 + $0x4] sm:$0xf0] }
 0x334   :  { %3524 = vmatpush.bf16.msra.mxu1 %v5343_v23  ;;  %3615 = vmatpush.bf16.msrb.mxu0 %v5219_v8  ;;  %v5519_v23 = vor.u32 %v6263_v39, %v5518_v61  ;;  %v4883_v8 = vor.u32 %v6101_v22, %v4880_v34  ;;  %v5438_v39 = vld [vmem:[#allocation6 + $0x648] sm:$0xf]  ;;  %v4819_v22 = vor.u32 %v6085_v54, %v4816_v16  ;;  %v5120_v0 = vld [vmem:[#allocation6 + $0x3d8] sm:$0xf0]  ;;  %v6225_v54 = vld [vmem:[#allocation6 + $0x5cc] sm:$0xf] }
 0x335   :  { %v5566_v34 = vld [vmem:[#allocation6 + $0x748] sm:$0xf]  ;;  %v5376_v16 = vld [vmem:[#allocation6 + $0x5d8] sm:$0xf0] }
 0x336   :  { %3486 = vmatpush.bf16.msrb.mxu2 %v4943_v26  ;;  %v4864_v26 = vld [vmem:[#allocation6 + $0x1d8] sm:$0xf0] }
 0x337   :  { %3499 = vmatpush.bf16.msrb.mxu3 %v5071_v27  ;;  %v5503_v27 = vor.u32 %v6259_v14, %v5502_v10  ;;  %v4800_v10 = vld [vmem:[#allocation6 + $0x158] sm:$0xf0]  ;;  %v5439_v14 = vor.u32 %v6243_v7, %v5438_v39 }
 0x338   :  { %3525 = vmatpush.bf16.msra.mxu1 %v5327_v57  ;;  %3616 = vmatpush.bf16.msrb.mxu0 %v5203_v38  ;;  %v5486_v57 = vld [vmem:[#allocation6 + $0x6a8] sm:$0xf]  ;;  %v4867_v38 = vor.u32 %v6097_v31, %v4864_v26  ;;  %v5670_v31 = vld [vmem:[#allocation8 + $0x20] sm:$0xf]  ;;  %v5712_v39 = vld [vmem:[#allocation8 + $0x78] sm:$0xf0] }
 0x339   :  { %v6301_v26 = vld [vmem:[#allocation8 + $0x24] sm:$0xf0] }
 0x33a   :  { %3487 = vmatpush.bf16.msrb.mxu2 %v4927_v35  ;;  %v4848_v35 = vld [vmem:[#allocation6 + $0x1b8] sm:$0xf0]  ;;  %v5671_v17 = vor.u32 %v6301_v26, %v5670_v31 }
 0x33b   :  { %3500 = vmatpush.bf16.msrb.mxu3 %v5055_v33  ;;  %v5487_v33 = vor.u32 %v6255_v43, %v5486_v57  ;;  %v6077_v57 = vld [vmem:[#allocation6 + $0x12c] sm:$0xf]  ;;  %v4784_v43 = vld [vmem:[#allocation6 + $0x138] sm:$0xf0] }
 0x33c   :  { %3526 = vmatpush.bf16.msra.mxu1 %v5311_v49  ;;  %3617 = vmatpush.bf16.msrb.mxu0 %v5187_v60  ;;  %v5470_v49 = vld [vmem:[#allocation6 + $0x688] sm:$0xf]  ;;  %v4851_v60 = vor.u32 %v6093_v3, %v4848_v35  ;;  %v4787_v41 = vor.u32 %v6077_v57, %v4784_v43  ;;  %v6267_v3 = vld [vmem:[#allocation6 + $0x714] sm:$0xf0]  ;;  %v5662_v35 = vld [vmem:[#allocation8 + $0x10] sm:$0xf] }
 0x33d   :  { %v5471_v4 = vor.u32 %v6251_v36, %v5470_v49  ;;  %v6073_v49 = vld [vmem:[#allocation6 + $0x10c] sm:$0xf]  ;;  %v4768_v36 = vld [vmem:[#allocation6 + $0x118] sm:$0xf0] }
 0x33e   :  { %3488 = vmatpush.bf16.msrb.mxu2 %v4911_v1  ;;  %v4832_v1 = vld [vmem:[#allocation6 + $0x198] sm:$0xf0]  ;;  %v6217_v43 = vld [vmem:[#allocation6 + $0x58c] sm:$0xf] }
 0x33f   :  { %3501 = vmatpush.bf16.msrb.mxu3 %v5039_v52  ;;  %v5695_v52 = vor.u32 %v6307_v13, %v5694_v44  ;;  %v4835_v24 = vor.u32 %v6089_v51, %v4832_v1  ;;  %v6229_v13 = vld [vmem:[#allocation6 + $0x5ec] sm:$0xf]  ;;  %v5535_v1 = vor.u32 %v6267_v3, %v5534_v32  ;;  %v5088_v57 = vld [vmem:[#allocation6 + $0x398] sm:$0xf0] }
 0x340   :  { %3527 = vmatpush.bf16.msra.mxu1 %v5295_v62  ;;  %3618 = vmatpush.bf16.msrb.mxu0 %v5171_v55  ;;  %v5599_v62 = vor.u32 %v6283_v47, %v5598_v46  ;;  %v6305_v55 = vld [vmem:[#allocation8 + $0x44] sm:$0xf0]  ;;  %v5136_v46 = vld [vmem:[#allocation6 + $0x3f8] sm:$0xf0] }
 0x341   :  { %v5392_v47 = vld [vmem:[#allocation6 + $0x5f8] sm:$0xf0] }
 0x342   :  { %3489 = vmatpush.bf16.msrb.mxu2 %v4895_v63  ;;  %v5687_v63 = vor.u32 %v6305_v55, %v5686_v5  ;;  %v5395_v5 = vor.u32 %v6229_v13, %v5392_v47  ;;  %v6161_v55 = vld [vmem:[#allocation6 + $0x3cc] sm:$0xf]  ;;  %v5696_v32 = vld [vmem:[#allocation8 + $0x58] sm:$0xf0] }
 0x343   :  { %3502 = vmatpush.bf16.msrb.mxu3 %v5023_v6  ;;  %v5678_v6 = vld [vmem:[#allocation8 + $0x30] sm:$0xf]  ;;  %v4944_v3 = vld [vmem:[#allocation6 + $0x278] sm:$0xf0]  ;;  %v5688_v13 = vld [vmem:[#allocation8 + $0x48] sm:$0xf0] }
 0x344   :  { %3528 = vmatpush.bf16.msra.mxu1 %v5279_v19  ;;  %3619 = vmatpush.bf16.msrb.mxu0 %v5155_v12  ;;  %v6303_v19 = vld [vmem:[#allocation8 + $0x34] sm:$0xf0] }
 0x345   :  { %3490 = vmatmul.bf16.vlgmr.msrb.gmra.mxu2 %v7033_v50  ;;  %v6275_v12 = vld [vmem:[#allocation6 + $0x754] sm:$0xf0]  ;;  %v5679_v15 = vor.u32 %v6303_v19, %v5678_v6  ;;  %v5379_v6 = vor.u32 %v6225_v54, %v5376_v16  ;;  %v6157_v19 = vld [vmem:[#allocation6 + $0x3ac] sm:$0xf]  ;;  %v5680_v54 = vld [vmem:[#allocation8 + $0x38] sm:$0xf0] }
 0x346   :  { %3534 = vmatpush.bf16.msra.mxu2 %v5519_v23  ;;  %3503 = vmatmul.bf16.vlgmr.msrb.gmra.mxu3 %v7038_v58  ;;  %v6081_v23 = vld [vmem:[#allocation6 + $0x14c] sm:$0xf]  ;;  %v5567_v20 = vor.u32 %v6275_v12, %v5566_v34  ;;  %v4976_v34 = vld [vmem:[#allocation6 + $0x2b8] sm:$0xf0] }
 0x347   :  { %3547 = vmatpush.bf16.msra.mxu3 %v5647_v2  ;;  %3529 = vmatmul.bf16.vlgmr.msra.gmra.mxu1 %v7138_v56  ;;  %v5422_v2 = vld [vmem:[#allocation6 + $0x628] sm:$0xf]  ;;  %v4803_v25 = vor.u32 %v6081_v23, %v4800_v10  ;;  %v5104_v12 = vld [vmem:[#allocation6 + $0x3b8] sm:$0xf0]  ;;  %v6221_v23 = vld [vmem:[#allocation6 + $0x5ac] sm:$0xf] }
 0x348   :  { %3573 = vmatpush.bf16.msrb.mxu1 %v4883_v8  ;;  %3620 = vmatmul.bf16.vlgmr.msrb.gmra.mxu0 %v7136_v53  ;;  %v6247_v53 = vld [vmem:[#allocation6 + $0x674] sm:$0xf0] }
 0x349   :  { %4062 = vmatpush.bf16.msra.mxu0 %v5711_v48  ;;  %v5455_v61 = vor.u32 %v6247_v53, %v5454_v18  ;;  %v6239_v8 = vld [vmem:[#allocation6 + $0x634] sm:$0xf0]  ;;  %v6129_v18 = vld [vmem:[#allocation6 + $0x2cc] sm:$0xf] }
 0x34a   :  { %3535 = vmatpush.bf16.msra.mxu2 %v5503_v27  ;;  %v6271_v27 = vld [vmem:[#allocation6 + $0x734] sm:$0xf0]  ;;  %v5423_v48 = vor.u32 %v6239_v8, %v5422_v2  ;;  %v6308_v2 = vld [vmem:[#allocation8 + $0x64] sm:$0xf]  ;;  %v5704_v8 = vld [vmem:[#allocation8 + $0x68] sm:$0xf0] }
 0x34b   :  { %3548 = vmatpush.bf16.msra.mxu3 %v5631_v9  ;;  %v5406_v9 = vld [vmem:[#allocation6 + $0x608] sm:$0xf]  ;;  %v5551_v59 = vor.u32 %v6271_v27, %v5550_v30  ;;  %v4960_v30 = vld [vmem:[#allocation6 + $0x298] sm:$0xf0]  ;;  %v6153_v27 = vld [vmem:[#allocation6 + $0x38c] sm:$0xf] }
 0x34c   :  { %3574 = vmatpush.bf16.msrb.mxu1 %v4867_v38  ;;  %v6235_v38 = vld [vmem:[#allocation6 + $0x614] sm:$0xf0] }
 0x34d   :  { %4063 = vmatpush.bf16.msra.mxu0 %v5703_v37  ;;  %v6133_v37 = vld [vmem:[#allocation6 + $0x2ec] sm:$0xf]  ;;  %v5407_v44 = vor.u32 %v6235_v38, %v5406_v9  ;;  %v5344_v9 = vld [vmem:[#allocation6 + $0x598] sm:$0xf0]  ;;  %v6306_v38 = vld [vmem:[#allocation8 + $0x54] sm:$0xf] }
 0x34e   :  { %3536 = vmatpush.bf16.msra.mxu2 %v5487_v33  ;;  %v6299_v33 = vld [vmem:[#allocation8 + $0x14] sm:$0xf0] }
 0x34f   :  { %3549 = vmatpush.bf16.msra.mxu3 %v5615_v42  ;;  %v5008_v42 = vld [vmem:[#allocation6 + $0x2f8] sm:$0xf0]  ;;  %v5663_v51 = vor.u32 %v6299_v33, %v5662_v35  ;;  %v5347_v35 = vor.u32 %v6217_v43, %v5344_v9  ;;  %v6149_v33 = vld [vmem:[#allocation6 + $0x36c] sm:$0xf] }
 0x350   :  { %3575 = vmatpush.bf16.msrb.mxu1 %v4851_v60  ;;  %v6165_v60 = vld [vmem:[#allocation6 + $0x3ec] sm:$0xf]  ;;  %v5011_v53 = vor.u32 %v6133_v37, %v5008_v42  ;;  %v5699_v37 = vor.u32 %v6306_v38, %v5696_v32 }
 0x351   :  { %4064 = vmatpush.bf16.msra.mxu0 %v5695_v52  ;;  %v5139_v52 = vor.u32 %v6165_v60, %v5136_v46  ;;  %v5328_v46 = vld [vmem:[#allocation6 + $0x578] sm:$0xf0]  ;;  %v6201_v43 = vld [vmem:[#allocation6 + $0x50c] sm:$0xf] }
 0x352   :  { %3537 = vmatpush.bf16.msra.mxu2 %v5471_v4  ;;  %v4771_v4 = vor.u32 %v6073_v49, %v4768_v36  ;;  %v5072_v49 = vld [vmem:[#allocation6 + $0x378] sm:$0xf0]  ;;  %v6213_v36 = vld [vmem:[#allocation6 + $0x56c] sm:$0xf] }
 0x353   :  { %3550 = vmatpush.bf16.msra.mxu3 %v5599_v62  ;;  %v4992_v62 = vld [vmem:[#allocation6 + $0x2d8] sm:$0xf0]  ;;  %v6261_v32 = vld [vmem:[#allocation6 + $0x6ec] sm:$0xf] }
 0x354   :  { %3576 = vmatpush.bf16.msrb.mxu1 %v4835_v24  ;;  %v5654_v24 = vld [vmem:[#allocation8] sm:$0xf] }
 0x355   :  { %4065 = vmatpush.bf16.msra.mxu0 %v5687_v63  ;;  %v5655_v7 = vor.u32 %v6297_v28, %v5654_v24  ;;  %v4995_v63 = vor.u32 %v6129_v18, %v4992_v62  ;;  %v5331_v18 = vor.u32 %v6213_v36, %v5328_v46  ;;  %v5056_v62 = vld [vmem:[#allocation6 + $0x358] sm:$0xf0]  ;;  %v6209_v24 = vld [vmem:[#allocation6 + $0x54c] sm:$0xf] }
 0x356   :  { %3538 = vmatpush.bf16.msra.mxu2 %v5455_v61  ;;  %v6310_v61 = vld [vmem:[#allocation8 + $0x74] sm:$0xf]  ;;  %v5664_v46 = vld [vmem:[#allocation8 + $0x18] sm:$0xf0] }
 0x357   :  { %3551 = vmatpush.bf16.msra.mxu3 %v5583_v21  ;;  %v5123_v21 = vor.u32 %v6161_v55, %v5120_v0  ;;  %v5715_v10 = vor.u32 %v6310_v61, %v5712_v39  ;;  %v5312_v55 = vld [vmem:[#allocation6 + $0x558] sm:$0xf0]  ;;  %v6302_v0 = vld [vmem:[#allocation8 + $0x34] sm:$0xf]  ;;  %v6109_v39 = vld [vmem:[#allocation6 + $0x22c] sm:$0xf] }
 0x358   :  { %3577 = vmatpush.bf16.msrb.mxu1 %v4819_v22  ;;  %v6125_v22 = vld [vmem:[#allocation6 + $0x2ac] sm:$0xf] }
 0x359   :  { %4066 = vmatpush.bf16.msra.mxu0 %v5679_v15  ;;  %v4979_v15 = vor.u32 %v6125_v22, %v4976_v34  ;;  %v6141_v22 = vld [vmem:[#allocation6 + $0x32c] sm:$0xf]  ;;  %v5040_v34 = vld [vmem:[#allocation6 + $0x338] sm:$0xf0] }
 0x35a   :  { %3539 = vmatpush.bf16.msra.mxu2 %v5439_v14  ;;  %v5360_v14 = vld [vmem:[#allocation6 + $0x5b8] sm:$0xf0] }
 0x35b   :  { %3552 = vmatpush.bf16.msra.mxu3 %v5567_v20  ;;  %v5107_v20 = vor.u32 %v6157_v19, %v5104_v12  ;;  %v5363_v31 = vor.u32 %v6221_v23, %v5360_v14  ;;  %v5683_v19 = vor.u32 %v6302_v0, %v5680_v54  ;;  %v6300_v14 = vld [vmem:[#allocation8 + $0x24] sm:$0xf]  ;;  %v5656_v54 = vld [vmem:[#allocation8 + $0x8] sm:$0xf0] }
 0x35c   :  { %3578 = vmatpush.bf16.msrb.mxu1 %v4803_v25  ;;  %v6121_v25 = vld [vmem:[#allocation6 + $0x28c] sm:$0xf]  ;;  %v6296_v0 = vld [vmem:[#allocation8 + $0x4] sm:$0xf] }
 0x35d   :  { %4067 = vmatpush.bf16.msra.mxu0 %v5671_v17  ;;  %v4963_v17 = vor.u32 %v6121_v25, %v4960_v30  ;;  %v4896_v25 = vld [vmem:[#allocation6 + $0x218] sm:$0xf0]  ;;  %v6137_v30 = vld [vmem:[#allocation6 + $0x30c] sm:$0xf] }
 0x35e   :  { %3540 = vmatpush.bf16.msra.mxu2 %v5423_v48  ;;  %v5707_v48 = vor.u32 %v6308_v2, %v5704_v8  ;;  %v5672_v2 = vld [vmem:[#allocation8 + $0x28] sm:$0xf0] }
 0x35f   :  { %3553 = vmatpush.bf16.msra.mxu3 %v5551_v59  ;;  %v5091_v59 = vor.u32 %v6153_v27, %v5088_v57  ;;  %v5024_v57 = vld [vmem:[#allocation6 + $0x318] sm:$0xf0]  ;;  %v5675_v9 = vor.u32 %v6300_v14, %v5672_v2 }
 0x360   :  { %3579 = vmatpush.bf16.msrb.mxu1 %v4787_v41  ;;  %v6117_v41 = vld [vmem:[#allocation6 + $0x26c] sm:$0xf] }
 0x361   :  { %4068 = vmatpush.bf16.msra.mxu0 %v5663_v51  ;;  %v4947_v47 = vor.u32 %v6117_v41, %v4944_v3  ;;  %v5075_v51 = vor.u32 %v6149_v33, %v5072_v49  ;;  %v5648_v41 = vld [vmem:[#allocation6 + $0x7f8] sm:$0xf0]  ;;  %v5774_v3 = vld [vmem:[#allocation8 + $0xf0] sm:$0xf]  ;;  %v5027_v49 = vor.u32 %v6137_v30, %v5024_v57  ;;  %v6321_v30 = vld [vmem:[#allocation8 + $0xc4] sm:$0xf0] }
 0x362   :  { %3541 = vmatpush.bf16.msra.mxu2 %v5407_v44  ;;  %v6304_v44 = vld [vmem:[#allocation8 + $0x44] sm:$0xf]  ;;  %v6245_v57 = vld [vmem:[#allocation6 + $0x66c] sm:$0xf] }
 0x363   :  { %3554 = vmatpush.bf16.msra.mxu3 %v5535_v1  ;;  %v7169_v26 = vpop.f32.mrf.mxu1  ;;  %v6113_v1 = vld [vmem:[#allocation6 + $0x24c] sm:$0xf]  ;;  %v5691_v28 = vor.u32 %v6304_v44, %v5688_v13 }
 0x364   :  { %3580 = vmatpush.bf16.msrb.mxu1 %v4771_v4  ;;  %v4928_v4 = vld [vmem:[#allocation6 + $0x258] sm:$0xf0] }
 0x365   :  { %3542 = vmatmul.bf16.vlgmr.msra.gmra.mxu2 %v7140_v40  ;;  %4069 = vmatpush.bf16.msra.mxu0 %v5655_v7  ;;  %v4931_v16 = vor.u32 %v6113_v1, %v4928_v4  ;;  %v4912_v7 = vld [vmem:[#allocation6 + $0x238] sm:$0xf0]  ;;  %v6289_v4 = vld [vmem:[#allocation6 + $0x7cc] sm:$0xf] }
 0x366   :  { %3586 = vmatpush.bf16.msrb.mxu2 %v5011_v53  ;;  %3555 = vmatmul.bf16.vlgmr.msra.gmra.mxu3 %v7148_v29  ;;  %v4915_v8 = vor.u32 %v6109_v39, %v4912_v7  ;;  %v5504_v1 = vld [vmem:[#allocation6 + $0x6d8] sm:$0xf0]  ;;  %v6253_v39 = vld [vmem:[#allocation6 + $0x6ac] sm:$0xf] }
 0x367   :  { %3599 = vmatpush.bf16.msrb.mxu3 %v5139_v52  ;;  %3581 = vmatmul.bf16.vlgmr.msrb.gmra.mxu1 %v7031_v45  ;;  %v7171_v45 = vpop.f32.mrf.mxu0  ;;  %v6145_v52 = vld [vmem:[#allocation6 + $0x34c] sm:$0xf]  ;;  %v5488_v7 = vld [vmem:[#allocation6 + $0x6b8] sm:$0xf0] }
 0x368   :  { %3625 = vmatpush.bf16.msra.mxu1 %v5395_v5  ;;  %v3309_v42 = vpop.f32.mrf.mxu2  ;;  %v3322_v60 = vpop.f32.mrf.mxu3  ;;  %v5059_v61 = vor.u32 %v6145_v52, %v5056_v62  ;;  %v5632_v52 = vld [vmem:[#allocation6 + $0x7d8] sm:$0xf0]  ;;  %v5766_v62 = vld [vmem:[#allocation8 + $0xe0] sm:$0xf] }
 0x369   :  { %4114 = vmatpush.bf16.msrb.mxu0 %v5715_v10  ;;  %v5296_v10 = vld [vmem:[#allocation6 + $0x538] sm:$0xf0] }
 0x36a   :  { %3587 = vmatpush.bf16.msrb.mxu2 %v4995_v63  ;;  %v3310_v63 = vadd.f32 %v3309_v42, %v7146_v11 }
 0x36b   :  { %3600 = vmatpush.bf16.msrb.mxu3 %v5123_v21  ;;  %v3337_v53 = vpop.f32.mrf.mxu1  ;;  %v5315_v21 = vor.u32 %v6209_v24, %v5312_v55  ;;  %v6325_v24 = vld [vmem:[#allocation8 + $0xe4] sm:$0xf0] }
 0x36c   :  { %3626 = vmatpush.bf16.msra.mxu1 %v5379_v6  ;;  %v6205_v6 = vld [vmem:[#allocation6 + $0x52c] sm:$0xf]  ;;  %v3323_v11 = vadd.f32 %v3322_v60, %v3310_v63  ;;  %v6298_v60 = vld [vmem:[#allocation8 + $0x14] sm:$0xf] }
 0x36d   :  { %4115 = vmatpush.bf16.msrb.mxu0 %v5707_v48  ;;  %v5280_v48 = vld [vmem:[#allocation6 + $0x518] sm:$0xf0]  ;;  %v6285_v63 = vld [vmem:[#allocation6 + $0x7ac] sm:$0xf] }
 0x36e   :  { %3588 = vmatpush.bf16.msrb.mxu2 %v4979_v15  ;;  %v5043_v15 = vor.u32 %v6141_v22, %v5040_v34  ;;  %v5283_v36 = vor.u32 %v6201_v43, %v5280_v48  ;;  %v3336_v42 = vadd.f32 %v7169_v26, %v3323_v11  ;;  %v5616_v34 = vld [vmem:[#allocation6 + $0x7b8] sm:$0xf0]  ;;  %v6277_v48 = vld [vmem:[#allocation6 + $0x76c] sm:$0xf] }
 0x36f   :  { %3601 = vmatpush.bf16.msrb.mxu3 %v5107_v20  ;;  %v3415_v5 = vpop.f32.mrf.mxu0  ;;  %v6105_v20 = vld [vmem:[#allocation6 + $0x20c] sm:$0xf]  ;;  %v5456_v43 = vld [vmem:[#allocation6 + $0x678] sm:$0xf0] }
 0x370   :  { %3627 = vmatpush.bf16.msra.mxu1 %v5363_v31  ;;  %v3311_v12 = vpop.f32.mrf.mxu2  ;;  %v3324_v23 = vpop.f32.mrf.mxu3  ;;  %v5299_v31 = vor.u32 %v6205_v6, %v5296_v10  ;;  %v4899_v33 = vor.u32 %v6105_v20, %v4896_v25  ;;  %v5758_v6 = vld [vmem:[#allocation8 + $0xd0] sm:$0xf]  ;;  %v5619_v10 = vor.u32 %v6285_v63, %v5616_v34  ;;  %v5600_v20 = vld [vmem:[#allocation6 + $0x798] sm:$0xf0]  ;;  %v5750_v25 = vld [vmem:[#allocation8 + $0xc0] sm:$0xf] }
 0x371   :  { %4116 = vmatpush.bf16.msrb.mxu0 %v5699_v37  ;;  %v5659_v12 = vor.u32 %v6296_v0, %v5656_v54  ;;  %v5491_v23 = vor.u32 %v6253_v39, %v5488_v7  ;;  %v5408_v39 = vld [vmem:[#allocation6 + $0x618] sm:$0xf0]  ;;  %v6265_v7 = vld [vmem:[#allocation6 + $0x70c] sm:$0xf] }
 0x372   :  { %3589 = vmatpush.bf16.msrb.mxu2 %v4963_v17  ;;  %v5520_v17 = vld [vmem:[#allocation6 + $0x6f8] sm:$0xf0] }
 0x373   :  { %3602 = vmatpush.bf16.msrb.mxu3 %v5091_v59  ;;  %v7174_v27 = vpop.f32.mrf.mxu1  ;;  %v6293_v59 = vld [vmem:[#allocation6 + $0x7ec] sm:$0xf]  ;;  %v5523_v37 = vor.u32 %v6261_v32, %v5520_v17  ;;  %v5584_v17 = vld [vmem:[#allocation6 + $0x778] sm:$0xf0] }
 0x374   :  { %3628 = vmatpush.bf16.msra.mxu1 %v5347_v35  ;;  %v6327_v35 = vld [vmem:[#allocation8 + $0xf4] sm:$0xf0]  ;;  %v5651_v44 = vor.u32 %v6293_v59, %v5648_v41  ;;  %v5742_v59 = vld [vmem:[#allocation8 + $0xb0] sm:$0xf]  ;;  %v5536_v34 = vld [vmem:[#allocation6 + $0x718] sm:$0xf0] }
 0x375   :  { %4117 = vmatpush.bf16.msrb.mxu0 %v5691_v28  ;;  %v5667_v28 = vor.u32 %v6298_v60, %v5664_v46  ;;  %v6319_v41 = vld [vmem:[#allocation8 + $0xb4] sm:$0xf0]  ;;  %v5568_v60 = vld [vmem:[#allocation6 + $0x758] sm:$0xf0]  ;;  %v5734_v46 = vld [vmem:[#allocation8 + $0xa0] sm:$0xf] }
 0x376   :  { %3590 = vmatpush.bf16.msrb.mxu2 %v4947_v47 }
 0x377   :  { %3603 = vmatpush.bf16.msrb.mxu3 %v5075_v51  ;;  %v7176_v38 = vpop.f32.mrf.mxu0  ;;  %v6257_v51 = vld [vmem:[#allocation6 + $0x6cc] sm:$0xf] }
 0x378   :  { %3629 = vmatpush.bf16.msra.mxu1 %v5331_v18  ;;  %v3348_v13 = vpop.f32.mrf.mxu2  ;;  %v7179_v47 = vpop.f32.mrf.mxu3  ;;  %v5775_v18 = vor.u32 %v6327_v35, %v5774_v3  ;;  %v5507_v55 = vor.u32 %v6257_v51, %v5504_v1  ;;  %v5459_v3 = vor.u32 %v6245_v57, %v5456_v43  ;;  %v5587_v35 = vor.u32 %v6277_v48, %v5584_v17  ;;  %v6320_v57 = vld [vmem:[#allocation8 + $0xc4] sm:$0xf]  ;;  %v5752_v48 = vld [vmem:[#allocation8 + $0xc8] sm:$0xf0]  ;;  %v6343_v17 = vld [vmem:[#allocation8 + $0x174] sm:$0xf0] }
 0x379   :  { %4118 = vmatpush.bf16.msrb.mxu0 %v5683_v19  ;;  %v3349_v53 = vadd.f32 %v3348_v13, %v3336_v42  ;;  %v6323_v19 = vld [vmem:[#allocation8 + $0xd4] sm:$0xf0] }
 0x37a   :  { %3591 = vmatpush.bf16.msrb.mxu2 %v4931_v16 }
 0x37b   :  { %3604 = vmatpush.bf16.msrb.mxu3 %v5059_v61  ;;  %v3664_v26 = vmax.f32 %v3349_v53, 0.0  ;;  %v3376_v5 = vpop.f32.mrf.mxu1  ;;  %v5635_v61 = vor.u32 %v6289_v4, %v5632_v52  ;;  %v5424_v53 = vld [vmem:[#allocation6 + $0x638] sm:$0xf0]  ;;  %v6269_v52 = vld [vmem:[#allocation6 + $0x72c] sm:$0xf] }
 0x37c   :  { %3630 = vmatpush.bf16.msra.mxu1 %v5315_v21  ;;  %v5767_v21 = vor.u32 %v6325_v24, %v5766_v62  ;;  %v6315_v5 = vld [vmem:[#allocation8 + $0x94] sm:$0xf0] }
 0x37d   :  { %4119 = vmatpush.bf16.msrb.mxu0 %v5675_v9  ;;  %v7181_v22 = vpack.c.bf16 %v3664_v26, %v3664_v26  ;;  %v5751_v9 = vor.u32 %v6321_v30, %v5750_v25  ;;  %v5726_v26 = vld [vmem:[#allocation8 + $0x90] sm:$0xf] }
 0x37e   :  { %3592 = vmatpush.bf16.msrb.mxu2 %v4915_v8  ;;  %v6249_v8 = vld [vmem:[#allocation6 + $0x68c] sm:$0xf]  ;;  %v5727_v63 = vor.u32 %v6315_v5, %v5726_v26  ;;  %v6337_v26 = vld [vmem:[#allocation8 + $0x144] sm:$0xf0] }
 0x37f   :  { %3605 = vmatpush.bf16.msrb.mxu3 %v5043_v15  ;;  %v3467_v16 = vpop.f32.mrf.mxu0  ;;  %4070 = vmatmul.bf16.vlgmr.msra.gmra.mxu0 %v7181_v22  ;;  %v5472_v15 = vld [vmem:[#allocation6 + $0x698] sm:$0xf0] }
 0x380   :  { %3631 = vmatpush.bf16.msra.mxu1 %v5299_v31  ;;  %v3350_v14 = vpop.f32.mrf.mxu2  ;;  %v3363_v2 = vpop.f32.mrf.mxu3 }
 0x381   :  { %4120 = vmatpush.bf16.msrb.mxu0 %v5667_v28  ;;  %v5552_v28 = vld [vmem:[#allocation6 + $0x738] sm:$0xf0] }
 0x382   :  { %3593 = vmatpush.bf16.msrb.mxu2 %v4899_v33  ;;  %v6241_v33 = vld [vmem:[#allocation6 + $0x64c] sm:$0xf]  ;;  %v5555_v16 = vor.u32 %v6269_v52, %v5552_v28  ;;  %v5814_v28 = vld [vmem:[#allocation8 + $0x140] sm:$0xf] }
 0x383   :  { %3606 = vmatpush.bf16.msrb.mxu3 %v5027_v49  ;;  %v5440_v49 = vld [vmem:[#allocation6 + $0x658] sm:$0xf0] }
 0x384   :  { %3632 = vmatpush.bf16.msra.mxu1 %v5283_v36  ;;  %v7187_v11 = vpop.f32.mrf.mxu1  ;;  %v6273_v36 = vld [vmem:[#allocation6 + $0x74c] sm:$0xf]  ;;  %v5443_v51 = vor.u32 %v6241_v33, %v5440_v49  ;;  %v6318_v49 = vld [vmem:[#allocation8 + $0xb4] sm:$0xf] }
 0x385   :  { %3594 = vmatmul.bf16.vlgmr.msrb.gmra.mxu2 %v7033_v50  ;;  %v6281_v50 = vld [vmem:[#allocation6 + $0x78c] sm:$0xf]  ;;  %4121 = vmatpush.bf16.msrb.mxu0 %v5659_v12  ;;  %v5571_v4 = vor.u32 %v6273_v36, %v5568_v60 }
 0x386   :  { %3638 = vmatpush.bf16.msra.mxu2 %v5523_v37  ;;  %3607 = vmatmul.bf16.vlgmr.msrb.gmra.mxu3 %v7038_v58  ;;  %v5759_v58 = vor.u32 %v6323_v19, %v5758_v6  ;;  %v5603_v31 = vor.u32 %v6281_v50, %v5600_v20  ;;  %v5743_v37 = vor.u32 %v6319_v41, %v5742_v59  ;;  %v5718_v6 = vld [vmem:[#allocation8 + $0x80] sm:$0xf]  ;;  %v6313_v19 = vld [vmem:[#allocation8 + $0x84] sm:$0xf0]  ;;  %v6324_v50 = vld [vmem:[#allocation8 + $0xe4] sm:$0xf] }
 0x387   :  { %3651 = vmatpush.bf16.msra.mxu3 %v5651_v44  ;;  %3633 = vmatmul.bf16.vlgmr.msra.gmra.mxu1 %v7138_v56  ;;  %v5475_v56 = vor.u32 %v6249_v8, %v5472_v15  ;;  %v7189_v32 = vpop.f32.mrf.mxu0  ;;  %v6317_v44 = vld [vmem:[#allocation8 + $0xa4] sm:$0xf0]  ;;  %v5719_v8 = vor.u32 %v6313_v19, %v5718_v6 }
 0x388   :  { %4075 = vmatpush.bf16.msrb.mxu1 %v5775_v18  ;;  %v3387_v42 = vpop.f32.mrf.mxu2  ;;  %v6237_v18 = vld [vmem:[#allocation6 + $0x62c] sm:$0xf]  ;;  %v5735_v62 = vor.u32 %v6317_v44, %v5734_v46  ;;  %v6341_v41 = vld [vmem:[#allocation8 + $0x164] sm:$0xf0]  ;;  %v5822_v44 = vld [vmem:[#allocation8 + $0x150] sm:$0xf] }
 0x389   :  { %v3400_v13 = vpop.f32.mrf.mxu3  ;;  %v5427_v54 = vor.u32 %v6237_v18, %v5424_v53  ;;  %v5736_v46 = vld [vmem:[#allocation8 + $0xa8] sm:$0xf0]  ;;  %v6314_v53 = vld [vmem:[#allocation8 + $0x94] sm:$0xf]  ;;  %v6333_v6 = vld [vmem:[#allocation8 + $0x124] sm:$0xf0] }
 0x38a   :  { %3639 = vmatpush.bf16.msra.mxu2 %v5507_v55  ;;  %v7194_v55 = vld [vmem:[%s7282_s8] sm:$0xf] }
 0x38b   :  { %3652 = vmatpush.bf16.msra.mxu3 %v5635_v61  ;;  %v1961_v0 = vperm.slane %v7194_v55, 1  ;;  %v6233_v61 = vld [vmem:[#allocation6 + $0x60c] sm:$0xf] }
 0x38c   :  { %4076 = vmatpush.bf16.msrb.mxu1 %v5767_v21  ;;  %v3428_v1 = vpop.f32.mrf.mxu1  ;;  %v5411_v14 = vor.u32 %v6233_v61, %v5408_v39  ;;  %v5806_v61 = vld [vmem:[#allocation8 + $0x130] sm:$0xf]  ;;  %v6335_v39 = vld [vmem:[#allocation8 + $0x134] sm:$0xf0] }
 0x38d   :  { %v3362_v2 = vadd.f32 %v7179_v47, %v1961_v0  ;;  %v5815_v0 = vor.u32 %v6337_v26, %v5814_v28  ;;  %v5902_v26 = vld [vmem:[#allocation8 + $0x1f0] sm:$0xf] }
 0x38e   :  { %3640 = vmatpush.bf16.msra.mxu2 %v5491_v23  ;;  %v6326_v23 = vld [vmem:[#allocation8 + $0xf4] sm:$0xf] }
 0x38f   :  { %3653 = vmatpush.bf16.msra.mxu3 %v5619_v10  ;;  %v3519_v24 = vpop.f32.mrf.mxu0  ;;  %4122 = vmatmul.bf16.vlgmr.msrb.gmra.mxu0 %v7181_v22  ;;  %v5776_v10 = vld [vmem:[#allocation8 + $0xf8] sm:$0xf0]  ;;  %v5539_v22 = vor.u32 %v6265_v7, %v5536_v34  ;;  %v3375_v20 = vadd.f32 %v7174_v27, %v3362_v2  ;;  %v5830_v27 = vld [vmem:[#allocation8 + $0x160] sm:$0xf]  ;;  %v6331_v2 = vld [vmem:[#allocation8 + $0x114] sm:$0xf0] }
 0x390   :  { %4077 = vmatpush.bf16.msrb.mxu1 %v5759_v58  ;;  %v3389_v21 = vpop.f32.mrf.mxu2  ;;  %v5779_v15 = vor.u32 %v6326_v23, %v5776_v10  ;;  %v5768_v58 = vld [vmem:[#allocation8 + $0xe8] sm:$0xf0]  ;;  %v5728_v24 = vld [vmem:[#allocation8 + $0x98] sm:$0xf0]  ;;  %v5798_v34 = vld [vmem:[#allocation8 + $0x120] sm:$0xf] }
 0x391   :  { %v3402_v12 = vpop.f32.mrf.mxu3  ;;  %v5771_v25 = vor.u32 %v6324_v50, %v5768_v58  ;;  %v3388_v30 = vadd.f32 %v3387_v42, %v3375_v20  ;;  %v6316_v42 = vld [vmem:[#allocation8 + $0xa4] sm:$0xf]  ;;  %v5807_v21 = vor.u32 %v6335_v39, %v5806_v61  ;;  %v5799_v10 = vor.u32 %v6333_v6, %v5798_v34  ;;  %v6342_v58 = vld [vmem:[#allocation8 + $0x174] sm:$0xf]  ;;  %v5840_v20 = vld [vmem:[#allocation8 + $0x178] sm:$0xf0] }
 0x392   :  { %3641 = vmatpush.bf16.msra.mxu2 %v5475_v56  ;;  %v6322_v56 = vld [vmem:[#allocation8 + $0xd4] sm:$0xf]  ;;  %v5886_v61 = vld [vmem:[#allocation8 + $0x1d0] sm:$0xf]  ;;  %v6355_v39 = vld [vmem:[#allocation8 + $0x1d4] sm:$0xf0] }
 0x393   :  { %3654 = vmatpush.bf16.msra.mxu3 %v5603_v31  ;;  %v5760_v31 = vld [vmem:[#allocation8 + $0xd8] sm:$0xf0]  ;;  %v3401_v43 = vadd.f32 %v3400_v13, %v3388_v30  ;;  %v6339_v13 = vld [vmem:[#allocation8 + $0x154] sm:$0xf0]  ;;  %v1962_v30 = vperm.slane %v7194_v55, 2 }
 0x394   :  { %4078 = vmatpush.bf16.msrb.mxu1 %v5751_v9  ;;  %v5763_v47 = vor.u32 %v6322_v56, %v5760_v31  ;;  %v5838_v9 = vld [vmem:[#allocation8 + $0x170] sm:$0xf]  ;;  %v5823_v1 = vor.u32 %v6339_v13, %v5822_v44  ;;  %v6340_v56 = vld [vmem:[#allocation8 + $0x164] sm:$0xf]  ;;  %v5832_v31 = vld [vmem:[#allocation8 + $0x168] sm:$0xf0] }
 0x395   :  { %v5839_v59 = vor.u32 %v6343_v17, %v5838_v9  ;;  %v6338_v9 = vld [vmem:[#allocation8 + $0x154] sm:$0xf]  ;;  %v5824_v17 = vld [vmem:[#allocation8 + $0x158] sm:$0xf0]  ;;  %v6332_v13 = vld [vmem:[#allocation8 + $0x124] sm:$0xf] }
 0x396   :  { %3642 = vmatpush.bf16.msra.mxu2 %v5459_v3  ;;  %v5755_v3 = vor.u32 %v6320_v57, %v5752_v48  ;;  %v3466_v48 = vadd.f32 %v7176_v38, %v1962_v30  ;;  %v6334_v38 = vld [vmem:[#allocation8 + $0x134] sm:$0xf]  ;;  %v5808_v44 = vld [vmem:[#allocation8 + $0x138] sm:$0xf0] }
 0x397   :  { %3655 = vmatpush.bf16.msra.mxu3 %v5587_v35  ;;  %v5831_v35 = vor.u32 %v6341_v41, %v5830_v27  ;;  %v5827_v27 = vor.u32 %v6338_v9, %v5824_v17  ;;  %v6345_v9 = vld [vmem:[#allocation8 + $0x184] sm:$0xf0]  ;;  %v6358_v17 = vld [vmem:[#allocation8 + $0x1f4] sm:$0xf] }
 0x398   :  { %4079 = vmatpush.bf16.msrb.mxu1 %v5743_v37 }
 0x39a   :  { %3643 = vmatpush.bf16.msra.mxu2 %v5443_v51 }
 0x39b   :  { %3656 = vmatpush.bf16.msra.mxu3 %v5571_v4 }
 0x39c   :  { %4080 = vmatpush.bf16.msrb.mxu1 %v5735_v62 }
 0x39e   :  { %3644 = vmatpush.bf16.msra.mxu2 %v5427_v54 }
 0x39f   :  { %3657 = vmatpush.bf16.msra.mxu3 %v5555_v16  ;;  %v6312_v16 = vld [vmem:[#allocation8 + $0x84] sm:$0xf] }
 0x3a0   :  { %4081 = vmatpush.bf16.msrb.mxu1 %v5727_v63  ;;  %v5720_v63 = vld [vmem:[#allocation8 + $0x88] sm:$0xf0] }
 0x3a1   :  { %v5723_v23 = vor.u32 %v6312_v16, %v5720_v63  ;;  %v5887_v63 = vor.u32 %v6355_v39, %v5886_v61  ;;  %v6344_v39 = vld [vmem:[#allocation8 + $0x184] sm:$0xf] }
 0x3a2   :  { %3645 = vmatpush.bf16.msra.mxu2 %v5411_v14  ;;  %v5790_v14 = vld [vmem:[#allocation8 + $0x110] sm:$0xf] }
 0x3a3   :  { %3658 = vmatpush.bf16.msra.mxu3 %v5539_v22  ;;  %v5791_v22 = vor.u32 %v6331_v2, %v5790_v14 }
 0x3a4   :  { %4082 = vmatpush.bf16.msrb.mxu1 %v5719_v8  ;;  %v7203_v33 = vpop.f32.mrf.mxu1  ;;  %v5782_v8 = vld [vmem:[#allocation8 + $0x100] sm:$0xf] }
 0x3a5   :  { %3646 = vmatmul.bf16.vlgmr.msra.gmra.mxu2 %v7140_v40  ;;  %v3414_v40 = vadd.f32 %v7171_v45, %v3401_v43  ;;  %v5739_v45 = vor.u32 %v6316_v42, %v5736_v46 }
 0x3a6   :  { %3659 = vmatmul.bf16.vlgmr.msra.gmra.mxu3 %v7148_v29  ;;  %4088 = vmatpush.bf16.msrb.mxu2 %v5839_v59  ;;  %v5744_v29 = vld [vmem:[#allocation8 + $0xb8] sm:$0xf0]  ;;  %v7205_v36 = vpop.f32.mrf.mxu0  ;;  %v3479_v59 = vadd.f32 %v7203_v33, %v3466_v48  ;;  %v5846_v48 = vld [vmem:[#allocation8 + $0x180] sm:$0xf] }
 0x3a7   :  { %v5747_v37 = vor.u32 %v6318_v49, %v5744_v29  ;;  %v3427_v60 = vadd.f32 %v7187_v11, %v3414_v40  ;;  %v5731_v11 = vor.u32 %v6314_v53, %v5728_v24  ;;  %v6336_v40 = vld [vmem:[#allocation8 + $0x144] sm:$0xf]  ;;  %v5816_v49 = vld [vmem:[#allocation8 + $0x148] sm:$0xf0]  ;;  %v5792_v53 = vld [vmem:[#allocation8 + $0x118] sm:$0xf0] }
 0x3a8   :  { %4127 = vmatpush.bf16.msra.mxu1 %v5779_v15  ;;  %v3439_v51 = vpop.f32.mrf.mxu2  ;;  %v6329_v15 = vld [vmem:[#allocation8 + $0x104] sm:$0xf0]  ;;  %v5784_v24 = vld [vmem:[#allocation8 + $0x108] sm:$0xf0] }
 0x3a9   :  { %v3440_v4 = vadd.f32 %v3439_v51, %v3427_v60  ;;  %v3452_v18 = vpop.f32.mrf.mxu3  ;;  %v5783_v50 = vor.u32 %v6329_v15, %v5782_v8  ;;  %v5819_v60 = vor.u32 %v6336_v40, %v5816_v49  ;;  %v5811_v51 = vor.u32 %v6334_v38, %v5808_v44  ;;  %v6351_v8 = vld [vmem:[#allocation8 + $0x1b4] sm:$0xf0]  ;;  %v5862_v15 = vld [vmem:[#allocation8 + $0x1a0] sm:$0xf] }
 0x3aa   :  { %4089 = vmatpush.bf16.msrb.mxu2 %v5831_v35  ;;  %v1963_v49 = vperm.slane %v7194_v55, 3 }
 0x3ab   :  { %v3453_v52 = vadd.f32 %v3452_v18, %v3440_v4 }
 0x3ac   :  { %4128 = vmatpush.bf16.msra.mxu1 %v5771_v25  ;;  %v3480_v62 = vpop.f32.mrf.mxu1  ;;  %v5843_v25 = vor.u32 %v6342_v58, %v5840_v20  ;;  %v6349_v20 = vld [vmem:[#allocation8 + $0x1a4] sm:$0xf0] }
 0x3ad   :  { %v3665_v54 = vmax.f32 %v3453_v52, 0.0  ;;  %v6328_v62 = vld [vmem:[#allocation8 + $0x104] sm:$0xf] }
 0x3ae   :  { %4090 = vmatpush.bf16.msrb.mxu2 %v5823_v1  ;;  %v3571_v5 = vpop.f32.mrf.mxu0  ;;  %v5800_v1 = vld [vmem:[#allocation8 + $0x128] sm:$0xf0]  ;;  %v5787_v28 = vor.u32 %v6328_v62, %v5784_v24  ;;  %v6350_v62 = vld [vmem:[#allocation8 + $0x1b4] sm:$0xf]  ;;  %v5872_v24 = vld [vmem:[#allocation8 + $0x1b8] sm:$0xf0] }
 0x3af   :  { %v3669_v7 = vpack.c.bf16 %v3665_v54, %v3665_v54  ;;  %v5803_v18 = vor.u32 %v6332_v13, %v5800_v1  ;;  %v6357_v54 = vld [vmem:[#allocation8 + $0x1e4] sm:$0xf0] }
 0x3b0   :  { %4129 = vmatpush.bf16.msra.mxu1 %v5763_v47  ;;  %v3441_v19 = vpop.f32.mrf.mxu2  ;;  %v5835_v47 = vor.u32 %v6340_v56, %v5832_v31  ;;  %v5863_v56 = vor.u32 %v6349_v20, %v5862_v15  ;;  %v5854_v31 = vld [vmem:[#allocation8 + $0x190] sm:$0xf] }
 0x3b1   :  { %v3454_v12 = vpop.f32.mrf.mxu3  ;;  %4083 = vmatmul.bf16.vlgmr.msrb.gmra.mxu1 %v3669_v7  ;;  %v5878_v19 = vld [vmem:[#allocation8 + $0x1c0] sm:$0xf] }
 0x3b2   :  { %4091 = vmatpush.bf16.msrb.mxu2 %v5815_v0  ;;  %v5894_v0 = vld [vmem:[#allocation8 + $0x1e0] sm:$0xf]  ;;  %v6353_v12 = vld [vmem:[#allocation8 + $0x1c4] sm:$0xf0] }
 0x3b3   :  { %v5879_v14 = vor.u32 %v6353_v12, %v5878_v19 }
 0x3b4   :  { %4130 = vmatpush.bf16.msra.mxu1 %v5755_v3 }
 0x3b6   :  { %4092 = vmatpush.bf16.msrb.mxu2 %v5807_v21 }
 0x3b8   :  { %4131 = vmatpush.bf16.msra.mxu1 %v5747_v37 }
 0x3ba   :  { %4093 = vmatpush.bf16.msrb.mxu2 %v5799_v10 }
 0x3bc   :  { %4132 = vmatpush.bf16.msra.mxu1 %v5739_v45  ;;  %v6330_v45 = vld [vmem:[#allocation8 + $0x114] sm:$0xf] }
 0x3bd   :  { %v5795_v52 = vor.u32 %v6330_v45, %v5792_v53 }
 0x3be   :  { %4094 = vmatpush.bf16.msrb.mxu2 %v5791_v22  ;;  %v5870_v22 = vld [vmem:[#allocation8 + $0x1b0] sm:$0xf] }
 0x3bf   :  { %v5871_v58 = vor.u32 %v6351_v8, %v5870_v22 }
 0x3c0   :  { %4133 = vmatpush.bf16.msra.mxu1 %v5731_v11  ;;  %v5895_v11 = vor.u32 %v6357_v54, %v5894_v0 }
 0x3c2   :  { %4095 = vmatpush.bf16.msrb.mxu2 %v5783_v50 }
 0x3c4   :  { %4134 = vmatpush.bf16.msra.mxu1 %v5723_v23  ;;  %v3530_v57 = vpop.f32.mrf.mxu1 }
 0x3c5   :  { %v7209_v43 = vpop.f32.mrf.mxu0 }
 0x3c6   :  { %4140 = vmatpush.bf16.msra.mxu2 %v5843_v25 }
 0x3c7   :  { %4135 = vmatmul.bf16.vlgmr.msra.gmra.mxu1 %v3669_v7 }
 0x3c8   :  { %v3491_v41 = vpop.f32.mrf.mxu2 }
 0x3c9   :  { %v3504_v3 = vpop.f32.mrf.mxu3  ;;  %v3492_v35 = vadd.f32 %v3491_v41, %v3479_v59  ;;  %v5904_v59 = vld [vmem:[#allocation8 + $0x1f8] sm:$0xf0] }
 0x3ca   :  { %4141 = vmatpush.bf16.msra.mxu2 %v5835_v47  ;;  %v6347_v47 = vld [vmem:[#allocation8 + $0x194] sm:$0xf0]  ;;  %v5907_v41 = vor.u32 %v6358_v17, %v5904_v59  ;;  %v6374_v17 = vld [vmem:[%s7285_s11 + $0x70] sm:$0xff]  ;;  %v6365_v59 = vld [vmem:[%s7285_s11 + $0x28] sm:$0xff] }
 0x3cb   :  { %v3505_v29 = vadd.f32 %v3504_v3, %v3492_v35  ;;  %v6356_v3 = vld [vmem:[#allocation8 + $0x1e4] sm:$0xf]  ;;  %v5896_v35 = vld [vmem:[#allocation8 + $0x1e8] sm:$0xf0] }
 0x3cc   :  { %v3532_v37 = vpop.f32.mrf.mxu1  ;;  %v5899_v40 = vor.u32 %v6356_v3, %v5896_v35  ;;  %v6363_v3 = vld [vmem:[%s7285_s11 + $0x18] sm:$0xff] }
 0x3cd   :  { %v3623_v42 = vpop.f32.mrf.mxu0  ;;  %v3518_v46 = vadd.f32 %v7189_v32, %v3505_v29  ;;  %v6359_v32 = vld [vmem:[#allocation8 + $0x1f4] sm:$0xf0] }
 0x3ce   :  { %4142 = vmatpush.bf16.msra.mxu2 %v5827_v27  ;;  %v5903_v5 = vor.u32 %v6359_v32, %v5902_v26  ;;  %v5847_v27 = vor.u32 %v6345_v9, %v5846_v48  ;;  %v3570_v42 = vadd.f32 %v7205_v36, %v1963_v49  ;;  %v5875_v36 = vor.u32 %v6350_v62, %v5872_v24  ;;  %v5864_v26 = vld [vmem:[#allocation8 + $0x1a8] sm:$0xf0]  ;;  %v6375_v48 = vld [vmem:[%s7285_s11 + $0x78] sm:$0xff] }
 0x3cf   :  { %v3531_v7 = vadd.f32 %v3530_v57, %v3518_v46  ;;  %v5855_v57 = vor.u32 %v6347_v47, %v5854_v31  ;;  %v5888_v46 = vld [vmem:[#allocation8 + $0x1d8] sm:$0xf0]  ;;  %v6366_v9 = vld [vmem:[%s7285_s11 + $0x30] sm:$0xff]  ;;  %4315 = vmatpush.bf16.msrb.mxu1 %v6375_v48 }
 0x3d0   :  { %v3493_v33 = vpop.f32.mrf.mxu2  ;;  %4101 = vmatpush.bf16.msrb.mxu3 %v5903_v5 }
 0x3d1   :  { %v3506_v4 = vpop.f32.mrf.mxu3  ;;  %v6352_v33 = vld [vmem:[#allocation8 + $0x1c4] sm:$0xf] }
 0x3d2   :  { %4143 = vmatpush.bf16.msra.mxu2 %v5819_v60  ;;  %v6354_v60 = vld [vmem:[#allocation8 + $0x1d4] sm:$0xf]  ;;  %v5880_v4 = vld [vmem:[#allocation8 + $0x1c8] sm:$0xf0] }
 0x3d3   :  { %v5891_v38 = vor.u32 %v6354_v60, %v5888_v46  ;;  %4316 = vmatpush.bf16.msrb.mxu1 %v6374_v17  ;;  %v6360_v60 = vld [vmem:[%s7285_s11] sm:$0xff] }
 0x3d4   :  { %4102 = vmatpush.bf16.msrb.mxu3 %v5895_v11  ;;  %v6346_v11 = vld [vmem:[#allocation8 + $0x194] sm:$0xf]  ;;  %v6372_v46 = vld [vmem:[%s7285_s11 + $0x60] sm:$0xff] }
 0x3d6   :  { %4144 = vmatpush.bf16.msra.mxu2 %v5811_v51 }
 0x3d8   :  { %4103 = vmatpush.bf16.msrb.mxu3 %v5887_v63 }
 0x3da   :  { %4145 = vmatpush.bf16.msra.mxu2 %v5803_v18  ;;  %v5883_v18 = vor.u32 %v6352_v33, %v5880_v4 }
 0x3dc   :  { %4104 = vmatpush.bf16.msrb.mxu3 %v5879_v14  ;;  %v3736_v14 = vld [vmem:[%s7284_s10] sm:$0x3] }
 0x3dd   :  { %v3738_v8 = vperm.slane %v3736_v14, 0 }
 0x3de   :  { %4146 = vmatpush.bf16.msra.mxu2 %v5795_v52 }
 0x3e0   :  { %4105 = vmatpush.bf16.msrb.mxu3 %v5871_v58 }
 0x3e2   :  { %4147 = vmatpush.bf16.msra.mxu2 %v5787_v28  ;;  %v6348_v28 = vld [vmem:[#allocation8 + $0x1a4] sm:$0xf] }
 0x3e3   :  { %v5867_v0 = vor.u32 %v6348_v28, %v5864_v26 }
 0x3e4   :  { %v3582_v16 = vpop.f32.mrf.mxu1  ;;  %4106 = vmatpush.bf16.msrb.mxu3 %v5863_v56 }
 0x3e5   :  { %v3583_v44 = vadd.f32 %v3582_v16, %v3570_v42  ;;  %v5856_v16 = vld [vmem:[#allocation8 + $0x198] sm:$0xf0]  ;;  %v6373_v42 = vld [vmem:[%s7285_s11 + $0x68] sm:$0xff] }
 0x3e6   :  { %v5859_v61 = vor.u32 %v6346_v11, %v5856_v16  ;;  %4317 = vmatpush.bf16.msrb.mxu1 %v6373_v42 }
 0x3e8   :  { %v3543_v21 = vpop.f32.mrf.mxu2  ;;  %4107 = vmatpush.bf16.msrb.mxu3 %v5855_v57  ;;  %v6367_v57 = vld [vmem:[%s7285_s11 + $0x38] sm:$0xff] }
 0x3e9   :  { %v3544_v34 = vadd.f32 %v3543_v21, %v3531_v7  ;;  %v3556_v6 = vpop.f32.mrf.mxu3  ;;  %v5848_v7 = vld [vmem:[#allocation8 + $0x188] sm:$0xf0]  ;;  %4302 = vmatpush.bf16.msra.mxu0 %v6367_v57 }
 0x3ea   :  { %v5851_v63 = vor.u32 %v6344_v39, %v5848_v7  ;;  %4318 = vmatpush.bf16.msrb.mxu1 %v6372_v46 }
 0x3eb   :  { %v3557_v23 = vadd.f32 %v3556_v6, %v3544_v34 }
 0x3ec   :  { %v3584_v10 = vpop.f32.mrf.mxu1  ;;  %4108 = vmatpush.bf16.msrb.mxu3 %v5847_v27 }
 0x3ed   :  { %v3666_v2 = vmax.f32 %v3557_v23, 0.0  ;;  %4303 = vmatpush.bf16.msra.mxu0 %v6366_v9 }
 0x3ef   :  { %v3670_v50 = vpack.c.bf16 %v3666_v2, %v3666_v2 }
 0x3f0   :  { %v3545_v25 = vpop.f32.mrf.mxu2  ;;  %4153 = vmatpush.bf16.msra.mxu3 %v5907_v41  ;;  %v6364_v41 = vld [vmem:[%s7285_s11 + $0x20] sm:$0xff] }
 0x3f1   :  { %v3558_v30 = vpop.f32.mrf.mxu3  ;;  %4096 = vmatmul.bf16.vlgmr.msrb.gmra.mxu2 %v3670_v50  ;;  %v3739_v25 = vperm.slane %v3736_v14, 1  ;;  %4304 = vmatpush.bf16.msra.mxu0 %v6365_v59 }
 0x3f4   :  { %4154 = vmatpush.bf16.msra.mxu3 %v5899_v40  ;;  %v6362_v40 = vld [vmem:[%s7285_s11 + $0x10] sm:$0xff] }
 0x3f5   :  { %4305 = vmatpush.bf16.msra.mxu0 %v6364_v41 }
 0x3f8   :  { %4155 = vmatpush.bf16.msra.mxu3 %v5891_v38  ;;  %v6371_v38 = vld [vmem:[%s7285_s11 + $0x58] sm:$0xff] }
 0x3f9   :  { %4306 = vmatpush.bf16.msra.mxu0 %v6363_v3  ;;  %4319 = vmatpush.bf16.msrb.mxu1 %v6371_v38 }
 0x3fc   :  { %v4071_v37 = vpop.f32.mrf.mxu0  ;;  %4156 = vmatpush.bf16.msra.mxu3 %v5883_v18 }
 0x3fd   :  { %v4072_v15 = vadd.f32 %v4071_v37, %v3738_v8  ;;  %4307 = vmatpush.bf16.msra.mxu0 %v6362_v40  ;;  %v6361_v37 = vld [vmem:[%s7285_s11 + $0x8] sm:$0xff] }
 0x400   :  { %4157 = vmatpush.bf16.msra.mxu3 %v5875_v36 }
 0x401   :  { %4148 = vmatmul.bf16.vlgmr.msra.gmra.mxu2 %v3670_v50  ;;  %4308 = vmatpush.bf16.msra.mxu0 %v6361_v37 }
 0x404   :  { %v3634_v29 = vpop.f32.mrf.mxu1  ;;  %v4073_v55 = vpop.f32.mrf.mxu0  ;;  %4158 = vmatpush.bf16.msra.mxu3 %v5867_v0 }
 0x405   :  { %4309 = vmatpush.bf16.msra.mxu0 %v6360_v60 }
 0x408   :  { %v3595_v13 = vpop.f32.mrf.mxu2  ;;  %4159 = vmatpush.bf16.msra.mxu3 %v5859_v61 }
 0x409   :  { %v3608_v51 = vpop.f32.mrf.mxu3  ;;  %v3596_v1 = vadd.f32 %v3595_v13, %v3583_v44  ;;  %v6370_v44 = vld [vmem:[%s7285_s11 + $0x50] sm:$0xff]  ;;  %v6369_v13 = vld [vmem:[%s7285_s11 + $0x48] sm:$0xff] }
 0x40a   :  { %4320 = vmatpush.bf16.msrb.mxu1 %v6370_v44 }
 0x40b   :  { %v3609_v45 = vadd.f32 %v3608_v51, %v3596_v1  ;;  %v6368_v51 = vld [vmem:[%s7285_s11 + $0x40] sm:$0xff]  ;;  %s6546_s11 = smov [#allocation9]  }
 0x40c   :  { %v3636_v53 = vpop.f32.mrf.mxu1  ;;  %v4123_v54 = vpop.f32.mrf.mxu0  ;;  %4160 = vmatpush.bf16.msra.mxu3 %v5851_v63  ;;  %s4335_s21 = sshll.u32 %s6546_s11, 4  ;;  %s4336_s21 = int_to_ptr.vmem [resolvable:$true] %s4335_s21 }
 0x40d   :  { %v3622_v52 = vadd.f32 %v7209_v43, %v3609_v45  ;;  %v4124_v30 = vadd.f32 %v4123_v54, %v3739_v25 }
 0x40e   :  { %4321 = vmatpush.bf16.msrb.mxu1 %v6369_v13 }
 0x40f   :  { %v3635_v43 = vadd.f32 %v3634_v29, %v3622_v52 }
 0x410   :  { %v3597_v32 = vpop.f32.mrf.mxu2 }
 0x411   :  { %v3610_v5 = vpop.f32.mrf.mxu3 }
 0x412   :  { %4322 = vmatpush.bf16.msrb.mxu1 %v6368_v51  ;;  %v6430_v5 = vld [vmem:[%s7286_s12] ss:$0 sm:$0xff] }
 0x414   :  { %v4125_v21 = vpop.f32.mrf.mxu0 }
 0x428   :  { %v3647_v34 = vpop.f32.mrf.mxu2 }
 0x429   :  { %v3648_v6 = vadd.f32 %v3647_v34, %v3635_v43  ;;  %v3660_v19 = vpop.f32.mrf.mxu3 }
 0x42b   :  { %v3661_v12 = vadd.f32 %v3660_v19, %v3648_v6 }
 0x42d   :  { %v3667_v23 = vmax.f32 %v3661_v12, 0.0 }
 0x42e   :  { %v4084_v50 = vpop.f32.mrf.mxu1 }
 0x42f   :  { %v3671_v10 = vpack.c.bf16 %v3667_v23, %v3667_v23  ;;  %v4085_v58 = vadd.f32 %v4084_v50, %v4072_v15 }
 0x430   :  { %v3649_v2 = vpop.f32.mrf.mxu2 }
 0x431   :  { %v3662_v22 = vpop.f32.mrf.mxu3  ;;  %4109 = vmatmul.bf16.vlgmr.msrb.gmra.mxu3 %v3671_v10 }
 0x436   :  { %v4086_v20 = vpop.f32.mrf.mxu1 }
 0x441   :  { %4161 = vmatmul.bf16.vlgmr.msra.gmra.mxu3 %v3671_v10 }
 0x444   :  { %v4136_v56 = vpop.f32.mrf.mxu1 }
 0x445   :  { %v4137_v31 = vadd.f32 %v4136_v56, %v4124_v30 }
 0x44c   :  { %v4138_v47 = vpop.f32.mrf.mxu1 }
 0x474   :  { %v4097_v27 = vpop.f32.mrf.mxu2 }
 0x475   :  { %v4098_v1 = vadd.f32 %v4097_v27, %v4085_v58 }
 0x47c   :  { %v4099_v35 = vpop.f32.mrf.mxu2 }
 0x484   :  { %v4149_v49 = vpop.f32.mrf.mxu2 }
 0x485   :  { %v4150_v55 = vadd.f32 %v4149_v49, %v4137_v31 }
 0x48c   :  { %v4151_v29 = vpop.f32.mrf.mxu2 }
 0x4b4   :  { %v4110_v33 = vpop.f32.mrf.mxu3 }
 0x4b5   :  { %v4111_v4 = vadd.f32 %v4110_v33, %v4098_v1 }
 0x4b7   :  { %v4166_v18 = vmax.f32 %v4111_v4, 0.0 }
 0x4b9   :  { %v4168_v45 = vpack.c.bf16 %v4166_v18, %v4166_v18 }
 0x4bb   :  { %4310 = vmatmul.bf16.vlgmr.msra.gmra.mxu0 %v4168_v45 }
 0x4bc   :  { %v4112_v53 = vpop.f32.mrf.mxu3 }
 0x4c4   :  { %v4162_v52 = vpop.f32.mrf.mxu3 }
 0x4c5   :  { %v4163_v62 = vadd.f32 %v4162_v52, %v4150_v55 }
 0x4c7   :  { %v4167_v24 = vmax.f32 %v4163_v62, 0.0 }
 0x4c9   :  { %v4169_v36 = vpack.c.bf16 %v4167_v24, %v4167_v24 }
 0x4cb   :  { %4323 = vmatmul.bf16.vlgmr.msrb.gmra.mxu1 %v4169_v36 }
 0x4cc   :  { %v4164_v28 = vpop.f32.mrf.mxu3 }
 0x538   :  { %v4311_v26 = vpop.f32.mrf.mxu0 }
 0x539   :  { %v4312_v0 = vadd.f32 %v6430_v5, %v4311_v26 }
 0x540   :  { %v4313_v32 = vpop.f32.mrf.mxu0 }
 0x548   :  { %v4324_v54 = vpop.f32.mrf.mxu1 }
 0x549   :  { %v4325_v11 = vadd.f32 %v4324_v54, %v4312_v0 }
 0x54b   :  { %4329 = vst.msk [vmem:[#allocation9] sm:$0x3] %vm4328_vm8, %v4325_v11 }
 0x54c   :  { %4340 = dma.vmem_to_hbm [thread:$0]  %s4336_s21, 32, %s4338_s23, [#allocation5]  }
 0x550   :  { %v4326_v16 = vpop.f32.mrf.mxu1 }
 0x551   :  { %6532 = dma.done.wait [#allocation5], 32  }
 0x552   :  { %6533 = vsyncadd [#allocation5], 4294967264 }
 0x553   :  { %4345 = vsyncpa [#allocation4], 1 }
 0x554   :  { %4346 = vsyncpa [#allocation7], 1 }
 0x555   :  { %4347 = vsyncpa [#allocation5], 1 }

</bundles_post_ra>
